<compile_context>
chip_gen: v7x
topology: tpu7x:2x2x1
jax: 0.10.0
libtpu: 0.0.40
codegen_flags: <defaults>
</compile_context>

<pallas_src>
import functools

import jax
import jax.numpy as jnp
from jax.experimental import pallas as pl
from jax.experimental.pallas import tpu as pltpu

K = 5          # kernel size
PAD = 2        # padding
C_OUT = 8      # output channels
C_IN = 1       # input channels


def conv2d_kernel(w_ref, b_ref, x_ref, o_ref, xpad_ref, *, B, H, W):
    """One block of B images per grid step.

    w_ref:    (K*K*C_OUT,) f32 SMEM  flat weight table, idx t*C_OUT + c, t = kh*K + kw
    b_ref:    (C_OUT,)     f32 SMEM
    x_ref:    (B, 1, H, W)         f32 VMEM  raw images (no padding)
    o_ref:    (B, C_OUT, H, W)     f32 VMEM  true-width output block
    xpad_ref: (H+2*PAD, W+2*PAD)   f32 VMEM scratch (zero-padded image slab)
    """
    # Zero the padded slab once per grid step (a handful of vst).  The border
    # stays zero; the interior is overwritten for every image below.
    # Re-zeroing each step keeps this correct even when the grid axis is
    # sharded across cores (where "step 0" is not seen by every core).
    xpad_ref[...] = jnp.zeros_like(xpad_ref)

    @pl.loop(0, B)
    def _(b):
        # Copy image b into the interior of the zero-padded slab.
        xpad_ref[pl.ds(PAD, H), pl.ds(PAD, W)] = x_ref[b, 0, :, :]

        # Bias-initialized per-channel accumulators (8 x 4 vregs live at 28x28).
        accs = [jnp.full((H, W), b_ref[c], jnp.float32) for c in range(C_OUT)]

        # Outer loop over the 25 taps: load each shifted window exactly once
        # and broadcast-FMA it into every channel accumulator.
        for kh in range(K):
            for kw in range(K):
                tap = xpad_ref[pl.ds(kh, H), pl.ds(kw, W)]
                t = kh * K + kw
                for c in range(C_OUT):
                    accs[c] = accs[c] + tap * w_ref[t * C_OUT + c]

        # True-width stores (masked vst; ~25 KB per image, negligible here).
        for c in range(C_OUT):
            o_ref[b, c, :, :] = accs[c]


def _pick_block_batch(n, max_b=8):
    """Largest block batch B <= max_b that divides n while keeping >= 2 grid
    steps (so both v7x TensorCores get work).  Falls back to 1 for n == 1."""
    for cand in range(min(n, max_b), 0, -1):
        if n % cand == 0 and n // cand >= 2:
            return cand
    return 1


def conv2d_pallas(x, w, b, *, max_images_per_step=8):
    """x: (N, 1, H, W) f32, w: (C_OUT, 1, K, K) f32, b: (C_OUT,) f32."""
    N, cin, H, W = x.shape
    assert cin == C_IN

    B = _pick_block_batch(N, max_images_per_step)
    grid = (N // B,)

    # Flat 1D scalar tables for SMEM (avoids 2D SMEM padding blow-up).
    # w_tbl[t*C_OUT + c] == w[c, 0, kh, kw] with t = kh*K + kw.
    w_tbl = w.reshape(C_OUT, K * K).T.reshape(-1).astype(jnp.float32)  # (200,)
    b_tbl = b.reshape(C_OUT).astype(jnp.float32)                       # (8,)

    kernel = functools.partial(conv2d_kernel, B=B, H=H, W=W)
    return pl.pallas_call(
        kernel,
        out_shape=jax.ShapeDtypeStruct((N, C_OUT, H, W), jnp.float32),
        grid=grid,
        in_specs=[
            pl.BlockSpec(memory_space=pltpu.MemorySpace.SMEM),          # weights
            pl.BlockSpec(memory_space=pltpu.MemorySpace.SMEM),          # bias
            pl.BlockSpec((B, C_IN, H, W), lambda n: (n, 0, 0, 0)),      # raw images
        ],
        out_specs=pl.BlockSpec((B, C_OUT, H, W), lambda n: (n, 0, 0, 0)),
        scratch_shapes=[pltpu.VMEM((H + 2 * PAD, W + 2 * PAD), jnp.float32)],
        compiler_params=pltpu.CompilerParams(
            dimension_semantics=("parallel",)),
    )(w_tbl, b_tbl, x)


if __name__ == "__main__":
    key = jax.random.PRNGKey(0)
    kx, kw, kb = jax.random.split(key, 3)

    # Small shapes consistent with the module (NCHW, Cin must be 1).
    N, H, W = 4, 28, 28
    x = jax.random.normal(kx, (N, C_IN, H, W), jnp.float32)
    w = jax.random.normal(kw, (C_OUT, C_IN, K, K), jnp.float32) * 0.2
    b = jax.random.normal(kb, (C_OUT,), jnp.float32) * 0.1

    out = conv2d_pallas(x, w, b)
    out = jax.block_until_ready(out)

    # Reference check against XLA's conv.
    ref = jax.lax.conv_general_dilated(
        x, w, window_strides=(1, 1), padding=((PAD, PAD), (PAD, PAD)),
        dimension_numbers=("NCHW", "OIHW", "NCHW"),
    ) + b.reshape(1, C_OUT, 1, 1)

    assert out.shape == (N, C_OUT, H, W), out.shape
    assert jnp.allclose(out, ref, atol=1e-4, rtol=1e-4), \
        float(jnp.max(jnp.abs(out - ref)))
    print("KERNEL_OK")
</pallas_src>

<mosaic_0001>
module attributes {stable_mosaic.version = 11 : i64} {
  func.func @conv2d_kernel(%arg0: i32, %arg1: memref<200xf32, #tpu.memory_space<smem>>, %arg2: memref<8xf32, #tpu.memory_space<smem>>, %arg3: memref<2x1x28x28xf32, #tpu.memory_space<vmem>>, %arg4: memref<2x8x28x28xf32, #tpu.memory_space<vmem>>, %arg5: memref<32x32xf32, #tpu.memory_space<vmem>>) attributes {dimension_semantics = [#tpu.dimension_semantics<parallel>], iteration_bounds = array<i64: 2>, scalar_prefetch = 0 : i64, scratch_operands = 1 : i64, tpu.core_type = #tpu.core_type<tc>, window_params = [{transform_indices = @transform_0, window_bounds = array<i64: 200>}, {transform_indices = @transform_1, window_bounds = array<i64: 8>}, {transform_indices = @transform_2, window_bounds = array<i64: 2, 1, 28, 28>}, {transform_indices = @transform_3, window_bounds = array<i64: 2, 8, 28, 28>}]} {
    %cst = arith.constant 0.000000e+00 : f32
    %0 = vector.broadcast %cst : f32 to vector<32x32xf32>
    %c0 = arith.constant 0 : index
    %c0_0 = arith.constant 0 : index
    %1 = vector.load %arg5[%c0, %c0_0] : memref<32x32xf32, #tpu.memory_space<vmem>>, vector<32x32xf32>
    tpu.vector_store %arg5[%c0, %c0_0], %0 {strides = array<i32>} : memref<32x32xf32, #tpu.memory_space<vmem>>, vector<32x32xf32>,
    %c0_i32 = arith.constant 0 : i32
    %c2_i32 = arith.constant 2 : i32
    %2 = arith.addi %c0_i32, %c2_i32 : i32
    %c1_i32 = arith.constant 1 : i32
    scf.for %arg6 = %c0_i32 to %2 step %c1_i32  : i32 {
      %c1_i32_2 = arith.constant 1 : i32
      %3 = arith.muli %arg6, %c1_i32_2 : i32
      %c0_i32_3 = arith.constant 0 : i32
      %4 = arith.addi %c0_i32_3, %3 : i32
      %5 = arith.index_cast %4 : i32 to index
      %c0_4 = arith.constant 0 : index
      %c0_5 = arith.constant 0 : index
      %c0_6 = arith.constant 0 : index
      %6 = vector.load %arg3[%5, %c0_4, %c0_5, %c0_6] : memref<2x1x28x28xf32, #tpu.memory_space<vmem>>, vector<1x1x28x28xf32>
      %7 = vector.shape_cast %6 : vector<1x1x28x28xf32> to vector<28x28xf32>
      %c2 = arith.constant 2 : index
      %c2_7 = arith.constant 2 : index
      %8 = vector.load %arg5[%c2, %c2_7] : memref<32x32xf32, #tpu.memory_space<vmem>>, vector<28x28xf32>
      tpu.vector_store %arg5[%c2, %c2_7], %7 {strides = array<i32>} : memref<32x32xf32, #tpu.memory_space<vmem>>, vector<28x28xf32>,
      %c0_8 = arith.constant 0 : index
      %9 = memref.load %arg2[%c0_8] : memref<8xf32, #tpu.memory_space<smem>>
      %10 = vector.broadcast %9 : f32 to vector<28x28xf32>
      %c1 = arith.constant 1 : index
      %11 = memref.load %arg2[%c1] : memref<8xf32, #tpu.memory_space<smem>>
      %12 = vector.broadcast %11 : f32 to vector<28x28xf32>
      %c2_9 = arith.constant 2 : index
      %13 = memref.load %arg2[%c2_9] : memref<8xf32, #tpu.memory_space<smem>>
      %14 = vector.broadcast %13 : f32 to vector<28x28xf32>
      %c3 = arith.constant 3 : index
      %15 = memref.load %arg2[%c3] : memref<8xf32, #tpu.memory_space<smem>>
      %16 = vector.broadcast %15 : f32 to vector<28x28xf32>
      %c4 = arith.constant 4 : index
      %17 = memref.load %arg2[%c4] : memref<8xf32, #tpu.memory_space<smem>>
      %18 = vector.broadcast %17 : f32 to vector<28x28xf32>
      %c5 = arith.constant 5 : index
      %19 = memref.load %arg2[%c5] : memref<8xf32, #tpu.memory_space<smem>>
      %20 = vector.broadcast %19 : f32 to vector<28x28xf32>
      %c6 = arith.constant 6 : index
      %21 = memref.load %arg2[%c6] : memref<8xf32, #tpu.memory_space<smem>>
      %22 = vector.broadcast %21 : f32 to vector<28x28xf32>
      %c7 = arith.constant 7 : index
      %23 = memref.load %arg2[%c7] : memref<8xf32, #tpu.memory_space<smem>>
      %24 = vector.broadcast %23 : f32 to vector<28x28xf32>
      %c0_10 = arith.constant 0 : index
      %c0_11 = arith.constant 0 : index
      %25 = vector.load %arg5[%c0_10, %c0_11] : memref<32x32xf32, #tpu.memory_space<vmem>>, vector<28x28xf32>
      %c0_12 = arith.constant 0 : index
      %26 = memref.load %arg1[%c0_12] : memref<200xf32, #tpu.memory_space<smem>>
      %27 = vector.broadcast %26 : f32 to vector<28x28xf32>
      %28 = arith.mulf %25, %27 : vector<28x28xf32>
      %29 = arith.addf %10, %28 : vector<28x28xf32>
      %c1_13 = arith.constant 1 : index
      %30 = memref.load %arg1[%c1_13] : memref<200xf32, #tpu.memory_space<smem>>
      %31 = vector.broadcast %30 : f32 to vector<28x28xf32>
      %32 = arith.mulf %25, %31 : vector<28x28xf32>
      %33 = arith.addf %12, %32 : vector<28x28xf32>
      %c2_14 = arith.constant 2 : index
      %34 = memref.load %arg1[%c2_14] : memref<200xf32, #tpu.memory_space<smem>>
      %35 = vector.broadcast %34 : f32 to vector<28x28xf32>
      %36 = arith.mulf %25, %35 : vector<28x28xf32>
      %37 = arith.addf %14, %36 : vector<28x28xf32>
      %c3_15 = arith.constant 3 : index
      %38 = memref.load %arg1[%c3_15] : memref<200xf32, #tpu.memory_space<smem>>
      %39 = vector.broadcast %38 : f32 to vector<28x28xf32>
      %40 = arith.mulf %25, %39 : vector<28x28xf32>
      %41 = arith.addf %16, %40 : vector<28x28xf32>
      %c4_16 = arith.constant 4 : index
      %42 = memref.load %arg1[%c4_16] : memref<200xf32, #tpu.memory_space<smem>>
      %43 = vector.broadcast %42 : f32 to vector<28x28xf32>
      %44 = arith.mulf %25, %43 : vector<28x28xf32>
      %45 = arith.addf %18, %44 : vector<28x28xf32>
      %c5_17 = arith.constant 5 : index
      %46 = memref.load %arg1[%c5_17] : memref<200xf32, #tpu.memory_space<smem>>
      %47 = vector.broadcast %46 : f32 to vector<28x28xf32>
      %48 = arith.mulf %25, %47 : vector<28x28xf32>
      %49 = arith.addf %20, %48 : vector<28x28xf32>
      %c6_18 = arith.constant 6 : index
      %50 = memref.load %arg1[%c6_18] : memref<200xf32, #tpu.memory_space<smem>>
      %51 = vector.broadcast %50 : f32 to vector<28x28xf32>
      %52 = arith.mulf %25, %51 : vector<28x28xf32>
      %53 = arith.addf %22, %52 : vector<28x28xf32>
      %c7_19 = arith.constant 7 : index
      %54 = memref.load %arg1[%c7_19] : memref<200xf32, #tpu.memory_space<smem>>
      %55 = vector.broadcast %54 : f32 to vector<28x28xf32>
      %56 = arith.mulf %25, %55 : vector<28x28xf32>
      %57 = arith.addf %24, %56 : vector<28x28xf32>
      %c0_20 = arith.constant 0 : index
      %c1_21 = arith.constant 1 : index
      %58 = vector.load %arg5[%c0_20, %c1_21] : memref<32x32xf32, #tpu.memory_space<vmem>>, vector<28x28xf32>
      %c8 = arith.constant 8 : index
      %59 = memref.load %arg1[%c8] : memref<200xf32, #tpu.memory_space<smem>>
      %60 = vector.broadcast %59 : f32 to vector<28x28xf32>
      %61 = arith.mulf %58, %60 : vector<28x28xf32>
      %62 = arith.addf %29, %61 : vector<28x28xf32>
      %c9 = arith.constant 9 : index
      %63 = memref.load %arg1[%c9] : memref<200xf32, #tpu.memory_space<smem>>
      %64 = vector.broadcast %63 : f32 to vector<28x28xf32>
      %65 = arith.mulf %58, %64 : vector<28x28xf32>
      %66 = arith.addf %33, %65 : vector<28x28xf32>
      %c10 = arith.constant 10 : index
      %67 = memref.load %arg1[%c10] : memref<200xf32, #tpu.memory_space<smem>>
      %68 = vector.broadcast %67 : f32 to vector<28x28xf32>
      %69 = arith.mulf %58, %68 : vector<28x28xf32>
      %70 = arith.addf %37, %69 : vector<28x28xf32>
      %c11 = arith.constant 11 : index
      %71 = memref.load %arg1[%c11] : memref<200xf32, #tpu.memory_space<smem>>
      %72 = vector.broadcast %71 : f32 to vector<28x28xf32>
      %73 = arith.mulf %58, %72 : vector<28x28xf32>
      %74 = arith.addf %41, %73 : vector<28x28xf32>
      %c12 = arith.constant 12 : index
      %75 = memref.load %arg1[%c12] : memref<200xf32, #tpu.memory_space<smem>>
      %76 = vector.broadcast %75 : f32 to vector<28x28xf32>
      %77 = arith.mulf %58, %76 : vector<28x28xf32>
      %78 = arith.addf %45, %77 : vector<28x28xf32>
      %c13 = arith.constant 13 : index
      %79 = memref.load %arg1[%c13] : memref<200xf32, #tpu.memory_space<smem>>
      %80 = vector.broadcast %79 : f32 to vector<28x28xf32>
      %81 = arith.mulf %58, %80 : vector<28x28xf32>
      %82 = arith.addf %49, %81 : vector<28x28xf32>
      %c14 = arith.constant 14 : index
      %83 = memref.load %arg1[%c14] : memref<200xf32, #tpu.memory_space<smem>>
      %84 = vector.broadcast %83 : f32 to vector<28x28xf32>
      %85 = arith.mulf %58, %84 : vector<28x28xf32>
      %86 = arith.addf %53, %85 : vector<28x28xf32>
      %c15 = arith.constant 15 : index
      %87 = memref.load %arg1[%c15] : memref<200xf32, #tpu.memory_space<smem>>
      %88 = vector.broadcast %87 : f32 to vector<28x28xf32>
      %89 = arith.mulf %58, %88 : vector<28x28xf32>
      %90 = arith.addf %57, %89 : vector<28x28xf32>
      %c0_22 = arith.constant 0 : index
      %c2_23 = arith.constant 2 : index
      %91 = vector.load %arg5[%c0_22, %c2_23] : memref<32x32xf32, #tpu.memory_space<vmem>>, vector<28x28xf32>
      %c16 = arith.constant 16 : index
      %92 = memref.load %arg1[%c16] : memref<200xf32, #tpu.memory_space<smem>>
      %93 = vector.broadcast %92 : f32 to vector<28x28xf32>
      %94 = arith.mulf %91, %93 : vector<28x28xf32>
      %95 = arith.addf %62, %94 : vector<28x28xf32>
      %c17 = arith.constant 17 : index
      %96 = memref.load %arg1[%c17] : memref<200xf32, #tpu.memory_space<smem>>
      %97 = vector.broadcast %96 : f32 to vector<28x28xf32>
      %98 = arith.mulf %91, %97 : vector<28x28xf32>
      %99 = arith.addf %66, %98 : vector<28x28xf32>
      %c18 = arith.constant 18 : index
      %100 = memref.load %arg1[%c18] : memref<200xf32, #tpu.memory_space<smem>>
      %101 = vector.broadcast %100 : f32 to vector<28x28xf32>
      %102 = arith.mulf %91, %101 : vector<28x28xf32>
      %103 = arith.addf %70, %102 : vector<28x28xf32>
      %c19 = arith.constant 19 : index
      %104 = memref.load %arg1[%c19] : memref<200xf32, #tpu.memory_space<smem>>
      %105 = vector.broadcast %104 : f32 to vector<28x28xf32>
      %106 = arith.mulf %91, %105 : vector<28x28xf32>
      %107 = arith.addf %74, %106 : vector<28x28xf32>
      %c20 = arith.constant 20 : index
      %108 = memref.load %arg1[%c20] : memref<200xf32, #tpu.memory_space<smem>>
      %109 = vector.broadcast %108 : f32 to vector<28x28xf32>
      %110 = arith.mulf %91, %109 : vector<28x28xf32>
      %111 = arith.addf %78, %110 : vector<28x28xf32>
      %c21 = arith.constant 21 : index
      %112 = memref.load %arg1[%c21] : memref<200xf32, #tpu.memory_space<smem>>
      %113 = vector.broadcast %112 : f32 to vector<28x28xf32>
      %114 = arith.mulf %91, %113 : vector<28x28xf32>
      %115 = arith.addf %82, %114 : vector<28x28xf32>
      %c22 = arith.constant 22 : index
      %116 = memref.load %arg1[%c22] : memref<200xf32, #tpu.memory_space<smem>>
      %117 = vector.broadcast %116 : f32 to vector<28x28xf32>
      %118 = arith.mulf %91, %117 : vector<28x28xf32>
      %119 = arith.addf %86, %118 : vector<28x28xf32>
      %c23 = arith.constant 23 : index
      %120 = memref.load %arg1[%c23] : memref<200xf32, #tpu.memory_space<smem>>
      %121 = vector.broadcast %120 : f32 to vector<28x28xf32>
      %122 = arith.mulf %91, %121 : vector<28x28xf32>
      %123 = arith.addf %90, %122 : vector<28x28xf32>
      %c0_24 = arith.constant 0 : index
      %c3_25 = arith.constant 3 : index
      %124 = vector.load %arg5[%c0_24, %c3_25] : memref<32x32xf32, #tpu.memory_space<vmem>>, vector<28x28xf32>
      %c24 = arith.constant 24 : index
      %125 = memref.load %arg1[%c24] : memref<200xf32, #tpu.memory_space<smem>>
      %126 = vector.broadcast %125 : f32 to vector<28x28xf32>
      %127 = arith.mulf %124, %126 : vector<28x28xf32>
      %128 = arith.addf %95, %127 : vector<28x28xf32>
      %c25 = arith.constant 25 : index
      %129 = memref.load %arg1[%c25] : memref<200xf32, #tpu.memory_space<smem>>
      %130 = vector.broadcast %129 : f32 to vector<28x28xf32>
      %131 = arith.mulf %124, %130 : vector<28x28xf32>
      %132 = arith.addf %99, %131 : vector<28x28xf32>
      %c26 = arith.constant 26 : index
      %133 = memref.load %arg1[%c26] : memref<200xf32, #tpu.memory_space<smem>>
      %134 = vector.broadcast %133 : f32 to vector<28x28xf32>
      %135 = arith.mulf %124, %134 : vector<28x28xf32>
      %136 = arith.addf %103, %135 : vector<28x28xf32>
      %c27 = arith.constant 27 : index
      %137 = memref.load %arg1[%c27] : memref<200xf32, #tpu.memory_space<smem>>
      %138 = vector.broadcast %137 : f32 to vector<28x28xf32>
      %139 = arith.mulf %124, %138 : vector<28x28xf32>
      %140 = arith.addf %107, %139 : vector<28x28xf32>
      %c28 = arith.constant 28 : index
      %141 = memref.load %arg1[%c28] : memref<200xf32, #tpu.memory_space<smem>>
      %142 = vector.broadcast %141 : f32 to vector<28x28xf32>
      %143 = arith.mulf %124, %142 : vector<28x28xf32>
      %144 = arith.addf %111, %143 : vector<28x28xf32>
      %c29 = arith.constant 29 : index
      %145 = memref.load %arg1[%c29] : memref<200xf32, #tpu.memory_space<smem>>
      %146 = vector.broadcast %145 : f32 to vector<28x28xf32>
      %147 = arith.mulf %124, %146 : vector<28x28xf32>
      %148 = arith.addf %115, %147 : vector<28x28xf32>
      %c30 = arith.constant 30 : index
      %149 = memref.load %arg1[%c30] : memref<200xf32, #tpu.memory_space<smem>>
      %150 = vector.broadcast %149 : f32 to vector<28x28xf32>
      %151 = arith.mulf %124, %150 : vector<28x28xf32>
      %152 = arith.addf %119, %151 : vector<28x28xf32>
      %c31 = arith.constant 31 : index
      %153 = memref.load %arg1[%c31] : memref<200xf32, #tpu.memory_space<smem>>
      %154 = vector.broadcast %153 : f32 to vector<28x28xf32>
      %155 = arith.mulf %124, %154 : vector<28x28xf32>
      %156 = arith.addf %123, %155 : vector<28x28xf32>
      %c0_26 = arith.constant 0 : index
      %c4_27 = arith.constant 4 : index
      %157 = vector.load %arg5[%c0_26, %c4_27] : memref<32x32xf32, #tpu.memory_space<vmem>>, vector<28x28xf32>
      %c32 = arith.constant 32 : index
      %158 = memref.load %arg1[%c32] : memref<200xf32, #tpu.memory_space<smem>>
      %159 = vector.broadcast %158 : f32 to vector<28x28xf32>
      %160 = arith.mulf %157, %159 : vector<28x28xf32>
      %161 = arith.addf %128, %160 : vector<28x28xf32>
      %c33 = arith.constant 33 : index
      %162 = memref.load %arg1[%c33] : memref<200xf32, #tpu.memory_space<smem>>
      %163 = vector.broadcast %162 : f32 to vector<28x28xf32>
      %164 = arith.mulf %157, %163 : vector<28x28xf32>
      %165 = arith.addf %132, %164 : vector<28x28xf32>
      %c34 = arith.constant 34 : index
      %166 = memref.load %arg1[%c34] : memref<200xf32, #tpu.memory_space<smem>>
      %167 = vector.broadcast %166 : f32 to vector<28x28xf32>
      %168 = arith.mulf %157, %167 : vector<28x28xf32>
      %169 = arith.addf %136, %168 : vector<28x28xf32>
      %c35 = arith.constant 35 : index
      %170 = memref.load %arg1[%c35] : memref<200xf32, #tpu.memory_space<smem>>
      %171 = vector.broadcast %170 : f32 to vector<28x28xf32>
      %172 = arith.mulf %157, %171 : vector<28x28xf32>
      %173 = arith.addf %140, %172 : vector<28x28xf32>
      %c36 = arith.constant 36 : index
      %174 = memref.load %arg1[%c36] : memref<200xf32, #tpu.memory_space<smem>>
      %175 = vector.broadcast %174 : f32 to vector<28x28xf32>
      %176 = arith.mulf %157, %175 : vector<28x28xf32>
      %177 = arith.addf %144, %176 : vector<28x28xf32>
      %c37 = arith.constant 37 : index
      %178 = memref.load %arg1[%c37] : memref<200xf32, #tpu.memory_space<smem>>
      %179 = vector.broadcast %178 : f32 to vector<28x28xf32>
      %180 = arith.mulf %157, %179 : vector<28x28xf32>
      %181 = arith.addf %148, %180 : vector<28x28xf32>
      %c38 = arith.constant 38 : index
      %182 = memref.load %arg1[%c38] : memref<200xf32, #tpu.memory_space<smem>>
      %183 = vector.broadcast %182 : f32 to vector<28x28xf32>
      %184 = arith.mulf %157, %183 : vector<28x28xf32>
      %185 = arith.addf %152, %184 : vector<28x28xf32>
      %c39 = arith.constant 39 : index
      %186 = memref.load %arg1[%c39] : memref<200xf32, #tpu.memory_space<smem>>
      %187 = vector.broadcast %186 : f32 to vector<28x28xf32>
      %188 = arith.mulf %157, %187 : vector<28x28xf32>
      %189 = arith.addf %156, %188 : vector<28x28xf32>
      %c1_28 = arith.constant 1 : index
      %c0_29 = arith.constant 0 : index
      %190 = vector.load %arg5[%c1_28, %c0_29] : memref<32x32xf32, #tpu.memory_space<vmem>>, vector<28x28xf32>
      %c40 = arith.constant 40 : index
      %191 = memref.load %arg1[%c40] : memref<200xf32, #tpu.memory_space<smem>>
      %192 = vector.broadcast %191 : f32 to vector<28x28xf32>
      %193 = arith.mulf %190, %192 : vector<28x28xf32>
      %194 = arith.addf %161, %193 : vector<28x28xf32>
      %c41 = arith.constant 41 : index
      %195 = memref.load %arg1[%c41] : memref<200xf32, #tpu.memory_space<smem>>
      %196 = vector.broadcast %195 : f32 to vector<28x28xf32>
      %197 = arith.mulf %190, %196 : vector<28x28xf32>
      %198 = arith.addf %165, %197 : vector<28x28xf32>
      %c42 = arith.constant 42 : index
      %199 = memref.load %arg1[%c42] : memref<200xf32, #tpu.memory_space<smem>>
      %200 = vector.broadcast %199 : f32 to vector<28x28xf32>
      %201 = arith.mulf %190, %200 : vector<28x28xf32>
      %202 = arith.addf %169, %201 : vector<28x28xf32>
      %c43 = arith.constant 43 : index
      %203 = memref.load %arg1[%c43] : memref<200xf32, #tpu.memory_space<smem>>
      %204 = vector.broadcast %203 : f32 to vector<28x28xf32>
      %205 = arith.mulf %190, %204 : vector<28x28xf32>
      %206 = arith.addf %173, %205 : vector<28x28xf32>
      %c44 = arith.constant 44 : index
      %207 = memref.load %arg1[%c44] : memref<200xf32, #tpu.memory_space<smem>>
      %208 = vector.broadcast %207 : f32 to vector<28x28xf32>
      %209 = arith.mulf %190, %208 : vector<28x28xf32>
      %210 = arith.addf %177, %209 : vector<28x28xf32>
      %c45 = arith.constant 45 : index
      %211 = memref.load %arg1[%c45] : memref<200xf32, #tpu.memory_space<smem>>
      %212 = vector.broadcast %211 : f32 to vector<28x28xf32>
      %213 = arith.mulf %190, %212 : vector<28x28xf32>
      %214 = arith.addf %181, %213 : vector<28x28xf32>
      %c46 = arith.constant 46 : index
      %215 = memref.load %arg1[%c46] : memref<200xf32, #tpu.memory_space<smem>>
      %216 = vector.broadcast %215 : f32 to vector<28x28xf32>
      %217 = arith.mulf %190, %216 : vector<28x28xf32>
      %218 = arith.addf %185, %217 : vector<28x28xf32>
      %c47 = arith.constant 47 : index
      %219 = memref.load %arg1[%c47] : memref<200xf32, #tpu.memory_space<smem>>
      %220 = vector.broadcast %219 : f32 to vector<28x28xf32>
      %221 = arith.mulf %190, %220 : vector<28x28xf32>
      %222 = arith.addf %189, %221 : vector<28x28xf32>
      %c1_30 = arith.constant 1 : index
      %c1_31 = arith.constant 1 : index
      %223 = vector.load %arg5[%c1_30, %c1_31] : memref<32x32xf32, #tpu.memory_space<vmem>>, vector<28x28xf32>
      %c48 = arith.constant 48 : index
      %224 = memref.load %arg1[%c48] : memref<200xf32, #tpu.memory_space<smem>>
      %225 = vector.broadcast %224 : f32 to vector<28x28xf32>
      %226 = arith.mulf %223, %225 : vector<28x28xf32>
      %227 = arith.addf %194, %226 : vector<28x28xf32>
      %c49 = arith.constant 49 : index
      %228 = memref.load %arg1[%c49] : memref<200xf32, #tpu.memory_space<smem>>
      %229 = vector.broadcast %228 : f32 to vector<28x28xf32>
      %230 = arith.mulf %223, %229 : vector<28x28xf32>
      %231 = arith.addf %198, %230 : vector<28x28xf32>
      %c50 = arith.constant 50 : index
      %232 = memref.load %arg1[%c50] : memref<200xf32, #tpu.memory_space<smem>>
      %233 = vector.broadcast %232 : f32 to vector<28x28xf32>
      %234 = arith.mulf %223, %233 : vector<28x28xf32>
      %235 = arith.addf %202, %234 : vector<28x28xf32>
      %c51 = arith.constant 51 : index
      %236 = memref.load %arg1[%c51] : memref<200xf32, #tpu.memory_space<smem>>
      %237 = vector.broadcast %236 : f32 to vector<28x28xf32>
      %238 = arith.mulf %223, %237 : vector<28x28xf32>
      %239 = arith.addf %206, %238 : vector<28x28xf32>
      %c52 = arith.constant 52 : index
      %240 = memref.load %arg1[%c52] : memref<200xf32, #tpu.memory_space<smem>>
      %241 = vector.broadcast %240 : f32 to vector<28x28xf32>
      %242 = arith.mulf %223, %241 : vector<28x28xf32>
      %243 = arith.addf %210, %242 : vector<28x28xf32>
      %c53 = arith.constant 53 : index
      %244 = memref.load %arg1[%c53] : memref<200xf32, #tpu.memory_space<smem>>
      %245 = vector.broadcast %244 : f32 to vector<28x28xf32>
      %246 = arith.mulf %223, %245 : vector<28x28xf32>
      %247 = arith.addf %214, %246 : vector<28x28xf32>
      %c54 = arith.constant 54 : index
      %248 = memref.load %arg1[%c54] : memref<200xf32, #tpu.memory_space<smem>>
      %249 = vector.broadcast %248 : f32 to vector<28x28xf32>
      %250 = arith.mulf %223, %249 : vector<28x28xf32>
      %251 = arith.addf %218, %250 : vector<28x28xf32>
      %c55 = arith.constant 55 : index
      %252 = memref.load %arg1[%c55] : memref<200xf32, #tpu.memory_space<smem>>
      %253 = vector.broadcast %252 : f32 to vector<28x28xf32>
      %254 = arith.mulf %223, %253 : vector<28x28xf32>
      %255 = arith.addf %222, %254 : vector<28x28xf32>
      %c1_32 = arith.constant 1 : index
      %c2_33 = arith.constant 2 : index
      %256 = vector.load %arg5[%c1_32, %c2_33] : memref<32x32xf32, #tpu.memory_space<vmem>>, vector<28x28xf32>
      %c56 = arith.constant 56 : index
      %257 = memref.load %arg1[%c56] : memref<200xf32, #tpu.memory_space<smem>>
      %258 = vector.broadcast %257 : f32 to vector<28x28xf32>
      %259 = arith.mulf %256, %258 : vector<28x28xf32>
      %260 = arith.addf %227, %259 : vector<28x28xf32>
      %c57 = arith.constant 57 : index
      %261 = memref.load %arg1[%c57] : memref<200xf32, #tpu.memory_space<smem>>
      %262 = vector.broadcast %261 : f32 to vector<28x28xf32>
      %263 = arith.mulf %256, %262 : vector<28x28xf32>
      %264 = arith.addf %231, %263 : vector<28x28xf32>
      %c58 = arith.constant 58 : index
      %265 = memref.load %arg1[%c58] : memref<200xf32, #tpu.memory_space<smem>>
      %266 = vector.broadcast %265 : f32 to vector<28x28xf32>
      %267 = arith.mulf %256, %266 : vector<28x28xf32>
      %268 = arith.addf %235, %267 : vector<28x28xf32>
      %c59 = arith.constant 59 : index
      %269 = memref.load %arg1[%c59] : memref<200xf32, #tpu.memory_space<smem>>
      %270 = vector.broadcast %269 : f32 to vector<28x28xf32>
      %271 = arith.mulf %256, %270 : vector<28x28xf32>
      %272 = arith.addf %239, %271 : vector<28x28xf32>
      %c60 = arith.constant 60 : index
      %273 = memref.load %arg1[%c60] : memref<200xf32, #tpu.memory_space<smem>>
      %274 = vector.broadcast %273 : f32 to vector<28x28xf32>
      %275 = arith.mulf %256, %274 : vector<28x28xf32>
      %276 = arith.addf %243, %275 : vector<28x28xf32>
      %c61 = arith.constant 61 : index
      %277 = memref.load %arg1[%c61] : memref<200xf32, #tpu.memory_space<smem>>
      %278 = vector.broadcast %277 : f32 to vector<28x28xf32>
      %279 = arith.mulf %256, %278 : vector<28x28xf32>
      %280 = arith.addf %247, %279 : vector<28x28xf32>
      %c62 = arith.constant 62 : index
      %281 = memref.load %arg1[%c62] : memref<200xf32, #tpu.memory_space<smem>>
      %282 = vector.broadcast %281 : f32 to vector<28x28xf32>
      %283 = arith.mulf %256, %282 : vector<28x28xf32>
      %284 = arith.addf %251, %283 : vector<28x28xf32>
      %c63 = arith.constant 63 : index
      %285 = memref.load %arg1[%c63] : memref<200xf32, #tpu.memory_space<smem>>
      %286 = vector.broadcast %285 : f32 to vector<28x28xf32>
      %287 = arith.mulf %256, %286 : vector<28x28xf32>
      %288 = arith.addf %255, %287 : vector<28x28xf32>
      %c1_34 = arith.constant 1 : index
      %c3_35 = arith.constant 3 : index
      %289 = vector.load %arg5[%c1_34, %c3_35] : memref<32x32xf32, #tpu.memory_space<vmem>>, vector<28x28xf32>
      %c64 = arith.constant 64 : index
      %290 = memref.load %arg1[%c64] : memref<200xf32, #tpu.memory_space<smem>>
      %291 = vector.broadcast %290 : f32 to vector<28x28xf32>
      %292 = arith.mulf %289, %291 : vector<28x28xf32>
      %293 = arith.addf %260, %292 : vector<28x28xf32>
      %c65 = arith.constant 65 : index
      %294 = memref.load %arg1[%c65] : memref<200xf32, #tpu.memory_space<smem>>
      %295 = vector.broadcast %294 : f32 to vector<28x28xf32>
      %296 = arith.mulf %289, %295 : vector<28x28xf32>
      %297 = arith.addf %264, %296 : vector<28x28xf32>
      %c66 = arith.constant 66 : index
      %298 = memref.load %arg1[%c66] : memref<200xf32, #tpu.memory_space<smem>>
      %299 = vector.broadcast %298 : f32 to vector<28x28xf32>
      %300 = arith.mulf %289, %299 : vector<28x28xf32>
      %301 = arith.addf %268, %300 : vector<28x28xf32>
      %c67 = arith.constant 67 : index
      %302 = memref.load %arg1[%c67] : memref<200xf32, #tpu.memory_space<smem>>
      %303 = vector.broadcast %302 : f32 to vector<28x28xf32>
      %304 = arith.mulf %289, %303 : vector<28x28xf32>
      %305 = arith.addf %272, %304 : vector<28x28xf32>
      %c68 = arith.constant 68 : index
      %306 = memref.load %arg1[%c68] : memref<200xf32, #tpu.memory_space<smem>>
      %307 = vector.broadcast %306 : f32 to vector<28x28xf32>
      %308 = arith.mulf %289, %307 : vector<28x28xf32>
      %309 = arith.addf %276, %308 : vector<28x28xf32>
      %c69 = arith.constant 69 : index
      %310 = memref.load %arg1[%c69] : memref<200xf32, #tpu.memory_space<smem>>
      %311 = vector.broadcast %310 : f32 to vector<28x28xf32>
      %312 = arith.mulf %289, %311 : vector<28x28xf32>
      %313 = arith.addf %280, %312 : vector<28x28xf32>
      %c70 = arith.constant 70 : index
      %314 = memref.load %arg1[%c70] : memref<200xf32, #tpu.memory_space<smem>>
      %315 = vector.broadcast %314 : f32 to vector<28x28xf32>
      %316 = arith.mulf %289, %315 : vector<28x28xf32>
      %317 = arith.addf %284, %316 : vector<28x28xf32>
      %c71 = arith.constant 71 : index
      %318 = memref.load %arg1[%c71] : memref<200xf32, #tpu.memory_space<smem>>
      %319 = vector.broadcast %318 : f32 to vector<28x28xf32>
      %320 = arith.mulf %289, %319 : vector<28x28xf32>
      %321 = arith.addf %288, %320 : vector<28x28xf32>
      %c1_36 = arith.constant 1 : index
      %c4_37 = arith.constant 4 : index
      %322 = vector.load %arg5[%c1_36, %c4_37] : memref<32x32xf32, #tpu.memory_space<vmem>>, vector<28x28xf32>
      %c72 = arith.constant 72 : index
      %323 = memref.load %arg1[%c72] : memref<200xf32, #tpu.memory_space<smem>>
      %324 = vector.broadcast %323 : f32 to vector<28x28xf32>
      %325 = arith.mulf %322, %324 : vector<28x28xf32>
      %326 = arith.addf %293, %325 : vector<28x28xf32>
      %c73 = arith.constant 73 : index
      %327 = memref.load %arg1[%c73] : memref<200xf32, #tpu.memory_space<smem>>
      %328 = vector.broadcast %327 : f32 to vector<28x28xf32>
      %329 = arith.mulf %322, %328 : vector<28x28xf32>
      %330 = arith.addf %297, %329 : vector<28x28xf32>
      %c74 = arith.constant 74 : index
      %331 = memref.load %arg1[%c74] : memref<200xf32, #tpu.memory_space<smem>>
      %332 = vector.broadcast %331 : f32 to vector<28x28xf32>
      %333 = arith.mulf %322, %332 : vector<28x28xf32>
      %334 = arith.addf %301, %333 : vector<28x28xf32>
      %c75 = arith.constant 75 : index
      %335 = memref.load %arg1[%c75] : memref<200xf32, #tpu.memory_space<smem>>
      %336 = vector.broadcast %335 : f32 to vector<28x28xf32>
      %337 = arith.mulf %322, %336 : vector<28x28xf32>
      %338 = arith.addf %305, %337 : vector<28x28xf32>
      %c76 = arith.constant 76 : index
      %339 = memref.load %arg1[%c76] : memref<200xf32, #tpu.memory_space<smem>>
      %340 = vector.broadcast %339 : f32 to vector<28x28xf32>
      %341 = arith.mulf %322, %340 : vector<28x28xf32>
      %342 = arith.addf %309, %341 : vector<28x28xf32>
      %c77 = arith.constant 77 : index
      %343 = memref.load %arg1[%c77] : memref<200xf32, #tpu.memory_space<smem>>
      %344 = vector.broadcast %343 : f32 to vector<28x28xf32>
      %345 = arith.mulf %322, %344 : vector<28x28xf32>
      %346 = arith.addf %313, %345 : vector<28x28xf32>
      %c78 = arith.constant 78 : index
      %347 = memref.load %arg1[%c78] : memref<200xf32, #tpu.memory_space<smem>>
      %348 = vector.broadcast %347 : f32 to vector<28x28xf32>
      %349 = arith.mulf %322, %348 : vector<28x28xf32>
      %350 = arith.addf %317, %349 : vector<28x28xf32>
      %c79 = arith.constant 79 : index
      %351 = memref.load %arg1[%c79] : memref<200xf32, #tpu.memory_space<smem>>
      %352 = vector.broadcast %351 : f32 to vector<28x28xf32>
      %353 = arith.mulf %322, %352 : vector<28x28xf32>
      %354 = arith.addf %321, %353 : vector<28x28xf32>
      %c2_38 = arith.constant 2 : index
      %c0_39 = arith.constant 0 : index
      %355 = vector.load %arg5[%c2_38, %c0_39] : memref<32x32xf32, #tpu.memory_space<vmem>>, vector<28x28xf32>
      %c80 = arith.constant 80 : index
      %356 = memref.load %arg1[%c80] : memref<200xf32, #tpu.memory_space<smem>>
      %357 = vector.broadcast %356 : f32 to vector<28x28xf32>
      %358 = arith.mulf %355, %357 : vector<28x28xf32>
      %359 = arith.addf %326, %358 : vector<28x28xf32>
      %c81 = arith.constant 81 : index
      %360 = memref.load %arg1[%c81] : memref<200xf32, #tpu.memory_space<smem>>
      %361 = vector.broadcast %360 : f32 to vector<28x28xf32>
      %362 = arith.mulf %355, %361 : vector<28x28xf32>
      %363 = arith.addf %330, %362 : vector<28x28xf32>
      %c82 = arith.constant 82 : index
      %364 = memref.load %arg1[%c82] : memref<200xf32, #tpu.memory_space<smem>>
      %365 = vector.broadcast %364 : f32 to vector<28x28xf32>
      %366 = arith.mulf %355, %365 : vector<28x28xf32>
      %367 = arith.addf %334, %366 : vector<28x28xf32>
      %c83 = arith.constant 83 : index
      %368 = memref.load %arg1[%c83] : memref<200xf32, #tpu.memory_space<smem>>
      %369 = vector.broadcast %368 : f32 to vector<28x28xf32>
      %370 = arith.mulf %355, %369 : vector<28x28xf32>
      %371 = arith.addf %338, %370 : vector<28x28xf32>
      %c84 = arith.constant 84 : index
      %372 = memref.load %arg1[%c84] : memref<200xf32, #tpu.memory_space<smem>>
      %373 = vector.broadcast %372 : f32 to vector<28x28xf32>
      %374 = arith.mulf %355, %373 : vector<28x28xf32>
      %375 = arith.addf %342, %374 : vector<28x28xf32>
      %c85 = arith.constant 85 : index
      %376 = memref.load %arg1[%c85] : memref<200xf32, #tpu.memory_space<smem>>
      %377 = vector.broadcast %376 : f32 to vector<28x28xf32>
      %378 = arith.mulf %355, %377 : vector<28x28xf32>
      %379 = arith.addf %346, %378 : vector<28x28xf32>
      %c86 = arith.constant 86 : index
      %380 = memref.load %arg1[%c86] : memref<200xf32, #tpu.memory_space<smem>>
      %381 = vector.broadcast %380 : f32 to vector<28x28xf32>
      %382 = arith.mulf %355, %381 : vector<28x28xf32>
      %383 = arith.addf %350, %382 : vector<28x28xf32>
      %c87 = arith.constant 87 : index
      %384 = memref.load %arg1[%c87] : memref<200xf32, #tpu.memory_space<smem>>
      %385 = vector.broadcast %384 : f32 to vector<28x28xf32>
      %386 = arith.mulf %355, %385 : vector<28x28xf32>
      %387 = arith.addf %354, %386 : vector<28x28xf32>
      %c2_40 = arith.constant 2 : index
      %c1_41 = arith.constant 1 : index
      %388 = vector.load %arg5[%c2_40, %c1_41] : memref<32x32xf32, #tpu.memory_space<vmem>>, vector<28x28xf32>
      %c88 = arith.constant 88 : index
      %389 = memref.load %arg1[%c88] : memref<200xf32, #tpu.memory_space<smem>>
      %390 = vector.broadcast %389 : f32 to vector<28x28xf32>
      %391 = arith.mulf %388, %390 : vector<28x28xf32>
      %392 = arith.addf %359, %391 : vector<28x28xf32>
      %c89 = arith.constant 89 : index
      %393 = memref.load %arg1[%c89] : memref<200xf32, #tpu.memory_space<smem>>
      %394 = vector.broadcast %393 : f32 to vector<28x28xf32>
      %395 = arith.mulf %388, %394 : vector<28x28xf32>
      %396 = arith.addf %363, %395 : vector<28x28xf32>
      %c90 = arith.constant 90 : index
      %397 = memref.load %arg1[%c90] : memref<200xf32, #tpu.memory_space<smem>>
      %398 = vector.broadcast %397 : f32 to vector<28x28xf32>
      %399 = arith.mulf %388, %398 : vector<28x28xf32>
      %400 = arith.addf %367, %399 : vector<28x28xf32>
      %c91 = arith.constant 91 : index
      %401 = memref.load %arg1[%c91] : memref<200xf32, #tpu.memory_space<smem>>
      %402 = vector.broadcast %401 : f32 to vector<28x28xf32>
      %403 = arith.mulf %388, %402 : vector<28x28xf32>
      %404 = arith.addf %371, %403 : vector<28x28xf32>
      %c92 = arith.constant 92 : index
      %405 = memref.load %arg1[%c92] : memref<200xf32, #tpu.memory_space<smem>>
      %406 = vector.broadcast %405 : f32 to vector<28x28xf32>
      %407 = arith.mulf %388, %406 : vector<28x28xf32>
      %408 = arith.addf %375, %407 : vector<28x28xf32>
      %c93 = arith.constant 93 : index
      %409 = memref.load %arg1[%c93] : memref<200xf32, #tpu.memory_space<smem>>
      %410 = vector.broadcast %409 : f32 to vector<28x28xf32>
      %411 = arith.mulf %388, %410 : vector<28x28xf32>
      %412 = arith.addf %379, %411 : vector<28x28xf32>
      %c94 = arith.constant 94 : index
      %413 = memref.load %arg1[%c94] : memref<200xf32, #tpu.memory_space<smem>>
      %414 = vector.broadcast %413 : f32 to vector<28x28xf32>
      %415 = arith.mulf %388, %414 : vector<28x28xf32>
      %416 = arith.addf %383, %415 : vector<28x28xf32>
      %c95 = arith.constant 95 : index
      %417 = memref.load %arg1[%c95] : memref<200xf32, #tpu.memory_space<smem>>
      %418 = vector.broadcast %417 : f32 to vector<28x28xf32>
      %419 = arith.mulf %388, %418 : vector<28x28xf32>
      %420 = arith.addf %387, %419 : vector<28x28xf32>
      %c2_42 = arith.constant 2 : index
      %c2_43 = arith.constant 2 : index
      %421 = vector.load %arg5[%c2_42, %c2_43] : memref<32x32xf32, #tpu.memory_space<vmem>>, vector<28x28xf32>
      %c96 = arith.constant 96 : index
      %422 = memref.load %arg1[%c96] : memref<200xf32, #tpu.memory_space<smem>>
      %423 = vector.broadcast %422 : f32 to vector<28x28xf32>
      %424 = arith.mulf %421, %423 : vector<28x28xf32>
      %425 = arith.addf %392, %424 : vector<28x28xf32>
      %c97 = arith.constant 97 : index
      %426 = memref.load %arg1[%c97] : memref<200xf32, #tpu.memory_space<smem>>
      %427 = vector.broadcast %426 : f32 to vector<28x28xf32>
      %428 = arith.mulf %421, %427 : vector<28x28xf32>
      %429 = arith.addf %396, %428 : vector<28x28xf32>
      %c98 = arith.constant 98 : index
      %430 = memref.load %arg1[%c98] : memref<200xf32, #tpu.memory_space<smem>>
      %431 = vector.broadcast %430 : f32 to vector<28x28xf32>
      %432 = arith.mulf %421, %431 : vector<28x28xf32>
      %433 = arith.addf %400, %432 : vector<28x28xf32>
      %c99 = arith.constant 99 : index
      %434 = memref.load %arg1[%c99] : memref<200xf32, #tpu.memory_space<smem>>
      %435 = vector.broadcast %434 : f32 to vector<28x28xf32>
      %436 = arith.mulf %421, %435 : vector<28x28xf32>
      %437 = arith.addf %404, %436 : vector<28x28xf32>
      %c100 = arith.constant 100 : index
      %438 = memref.load %arg1[%c100] : memref<200xf32, #tpu.memory_space<smem>>
      %439 = vector.broadcast %438 : f32 to vector<28x28xf32>
      %440 = arith.mulf %421, %439 : vector<28x28xf32>
      %441 = arith.addf %408, %440 : vector<28x28xf32>
      %c101 = arith.constant 101 : index
      %442 = memref.load %arg1[%c101] : memref<200xf32, #tpu.memory_space<smem>>
      %443 = vector.broadcast %442 : f32 to vector<28x28xf32>
      %444 = arith.mulf %421, %443 : vector<28x28xf32>
      %445 = arith.addf %412, %444 : vector<28x28xf32>
      %c102 = arith.constant 102 : index
      %446 = memref.load %arg1[%c102] : memref<200xf32, #tpu.memory_space<smem>>
      %447 = vector.broadcast %446 : f32 to vector<28x28xf32>
      %448 = arith.mulf %421, %447 : vector<28x28xf32>
      %449 = arith.addf %416, %448 : vector<28x28xf32>
      %c103 = arith.constant 103 : index
      %450 = memref.load %arg1[%c103] : memref<200xf32, #tpu.memory_space<smem>>
      %451 = vector.broadcast %450 : f32 to vector<28x28xf32>
      %452 = arith.mulf %421, %451 : vector<28x28xf32>
      %453 = arith.addf %420, %452 : vector<28x28xf32>
      %c2_44 = arith.constant 2 : index
      %c3_45 = arith.constant 3 : index
      %454 = vector.load %arg5[%c2_44, %c3_45] : memref<32x32xf32, #tpu.memory_space<vmem>>, vector<28x28xf32>
      %c104 = arith.constant 104 : index
      %455 = memref.load %arg1[%c104] : memref<200xf32, #tpu.memory_space<smem>>
      %456 = vector.broadcast %455 : f32 to vector<28x28xf32>
      %457 = arith.mulf %454, %456 : vector<28x28xf32>
      %458 = arith.addf %425, %457 : vector<28x28xf32>
      %c105 = arith.constant 105 : index
      %459 = memref.load %arg1[%c105] : memref<200xf32, #tpu.memory_space<smem>>
      %460 = vector.broadcast %459 : f32 to vector<28x28xf32>
      %461 = arith.mulf %454, %460 : vector<28x28xf32>
      %462 = arith.addf %429, %461 : vector<28x28xf32>
      %c106 = arith.constant 106 : index
      %463 = memref.load %arg1[%c106] : memref<200xf32, #tpu.memory_space<smem>>
      %464 = vector.broadcast %463 : f32 to vector<28x28xf32>
      %465 = arith.mulf %454, %464 : vector<28x28xf32>
      %466 = arith.addf %433, %465 : vector<28x28xf32>
      %c107 = arith.constant 107 : index
      %467 = memref.load %arg1[%c107] : memref<200xf32, #tpu.memory_space<smem>>
      %468 = vector.broadcast %467 : f32 to vector<28x28xf32>
      %469 = arith.mulf %454, %468 : vector<28x28xf32>
      %470 = arith.addf %437, %469 : vector<28x28xf32>
      %c108 = arith.constant 108 : index
      %471 = memref.load %arg1[%c108] : memref<200xf32, #tpu.memory_space<smem>>
      %472 = vector.broadcast %471 : f32 to vector<28x28xf32>
      %473 = arith.mulf %454, %472 : vector<28x28xf32>
      %474 = arith.addf %441, %473 : vector<28x28xf32>
      %c109 = arith.constant 109 : index
      %475 = memref.load %arg1[%c109] : memref<200xf32, #tpu.memory_space<smem>>
      %476 = vector.broadcast %475 : f32 to vector<28x28xf32>
      %477 = arith.mulf %454, %476 : vector<28x28xf32>
      %478 = arith.addf %445, %477 : vector<28x28xf32>
      %c110 = arith.constant 110 : index
      %479 = memref.load %arg1[%c110] : memref<200xf32, #tpu.memory_space<smem>>
      %480 = vector.broadcast %479 : f32 to vector<28x28xf32>
      %481 = arith.mulf %454, %480 : vector<28x28xf32>
      %482 = arith.addf %449, %481 : vector<28x28xf32>
      %c111 = arith.constant 111 : index
      %483 = memref.load %arg1[%c111] : memref<200xf32, #tpu.memory_space<smem>>
      %484 = vector.broadcast %483 : f32 to vector<28x28xf32>
      %485 = arith.mulf %454, %484 : vector<28x28xf32>
      %486 = arith.addf %453, %485 : vector<28x28xf32>
      %c2_46 = arith.constant 2 : index
      %c4_47 = arith.constant 4 : index
      %487 = vector.load %arg5[%c2_46, %c4_47] : memref<32x32xf32, #tpu.memory_space<vmem>>, vector<28x28xf32>
      %c112 = arith.constant 112 : index
      %488 = memref.load %arg1[%c112] : memref<200xf32, #tpu.memory_space<smem>>
      %489 = vector.broadcast %488 : f32 to vector<28x28xf32>
      %490 = arith.mulf %487, %489 : vector<28x28xf32>
      %491 = arith.addf %458, %490 : vector<28x28xf32>
      %c113 = arith.constant 113 : index
      %492 = memref.load %arg1[%c113] : memref<200xf32, #tpu.memory_space<smem>>
      %493 = vector.broadcast %492 : f32 to vector<28x28xf32>
      %494 = arith.mulf %487, %493 : vector<28x28xf32>
      %495 = arith.addf %462, %494 : vector<28x28xf32>
      %c114 = arith.constant 114 : index
      %496 = memref.load %arg1[%c114] : memref<200xf32, #tpu.memory_space<smem>>
      %497 = vector.broadcast %496 : f32 to vector<28x28xf32>
      %498 = arith.mulf %487, %497 : vector<28x28xf32>
      %499 = arith.addf %466, %498 : vector<28x28xf32>
      %c115 = arith.constant 115 : index
      %500 = memref.load %arg1[%c115] : memref<200xf32, #tpu.memory_space<smem>>
      %501 = vector.broadcast %500 : f32 to vector<28x28xf32>
      %502 = arith.mulf %487, %501 : vector<28x28xf32>
      %503 = arith.addf %470, %502 : vector<28x28xf32>
      %c116 = arith.constant 116 : index
      %504 = memref.load %arg1[%c116] : memref<200xf32, #tpu.memory_space<smem>>
      %505 = vector.broadcast %504 : f32 to vector<28x28xf32>
      %506 = arith.mulf %487, %505 : vector<28x28xf32>
      %507 = arith.addf %474, %506 : vector<28x28xf32>
      %c117 = arith.constant 117 : index
      %508 = memref.load %arg1[%c117] : memref<200xf32, #tpu.memory_space<smem>>
      %509 = vector.broadcast %508 : f32 to vector<28x28xf32>
      %510 = arith.mulf %487, %509 : vector<28x28xf32>
      %511 = arith.addf %478, %510 : vector<28x28xf32>
      %c118 = arith.constant 118 : index
      %512 = memref.load %arg1[%c118] : memref<200xf32, #tpu.memory_space<smem>>
      %513 = vector.broadcast %512 : f32 to vector<28x28xf32>
      %514 = arith.mulf %487, %513 : vector<28x28xf32>
      %515 = arith.addf %482, %514 : vector<28x28xf32>
      %c119 = arith.constant 119 : index
      %516 = memref.load %arg1[%c119] : memref<200xf32, #tpu.memory_space<smem>>
      %517 = vector.broadcast %516 : f32 to vector<28x28xf32>
      %518 = arith.mulf %487, %517 : vector<28x28xf32>
      %519 = arith.addf %486, %518 : vector<28x28xf32>
      %c3_48 = arith.constant 3 : index
      %c0_49 = arith.constant 0 : index
      %520 = vector.load %arg5[%c3_48, %c0_49] : memref<32x32xf32, #tpu.memory_space<vmem>>, vector<28x28xf32>
      %c120 = arith.constant 120 : index
      %521 = memref.load %arg1[%c120] : memref<200xf32, #tpu.memory_space<smem>>
      %522 = vector.broadcast %521 : f32 to vector<28x28xf32>
      %523 = arith.mulf %520, %522 : vector<28x28xf32>
      %524 = arith.addf %491, %523 : vector<28x28xf32>
      %c121 = arith.constant 121 : index
      %525 = memref.load %arg1[%c121] : memref<200xf32, #tpu.memory_space<smem>>
      %526 = vector.broadcast %525 : f32 to vector<28x28xf32>
      %527 = arith.mulf %520, %526 : vector<28x28xf32>
      %528 = arith.addf %495, %527 : vector<28x28xf32>
      %c122 = arith.constant 122 : index
      %529 = memref.load %arg1[%c122] : memref<200xf32, #tpu.memory_space<smem>>
      %530 = vector.broadcast %529 : f32 to vector<28x28xf32>
      %531 = arith.mulf %520, %530 : vector<28x28xf32>
      %532 = arith.addf %499, %531 : vector<28x28xf32>
      %c123 = arith.constant 123 : index
      %533 = memref.load %arg1[%c123] : memref<200xf32, #tpu.memory_space<smem>>
      %534 = vector.broadcast %533 : f32 to vector<28x28xf32>
      %535 = arith.mulf %520, %534 : vector<28x28xf32>
      %536 = arith.addf %503, %535 : vector<28x28xf32>
      %c124 = arith.constant 124 : index
      %537 = memref.load %arg1[%c124] : memref<200xf32, #tpu.memory_space<smem>>
      %538 = vector.broadcast %537 : f32 to vector<28x28xf32>
      %539 = arith.mulf %520, %538 : vector<28x28xf32>
      %540 = arith.addf %507, %539 : vector<28x28xf32>
      %c125 = arith.constant 125 : index
      %541 = memref.load %arg1[%c125] : memref<200xf32, #tpu.memory_space<smem>>
      %542 = vector.broadcast %541 : f32 to vector<28x28xf32>
      %543 = arith.mulf %520, %542 : vector<28x28xf32>
      %544 = arith.addf %511, %543 : vector<28x28xf32>
      %c126 = arith.constant 126 : index
      %545 = memref.load %arg1[%c126] : memref<200xf32, #tpu.memory_space<smem>>
      %546 = vector.broadcast %545 : f32 to vector<28x28xf32>
      %547 = arith.mulf %520, %546 : vector<28x28xf32>
      %548 = arith.addf %515, %547 : vector<28x28xf32>
      %c127 = arith.constant 127 : index
      %549 = memref.load %arg1[%c127] : memref<200xf32, #tpu.memory_space<smem>>
      %550 = vector.broadcast %549 : f32 to vector<28x28xf32>
      %551 = arith.mulf %520, %550 : vector<28x28xf32>
      %552 = arith.addf %519, %551 : vector<28x28xf32>
      %c3_50 = arith.constant 3 : index
      %c1_51 = arith.constant 1 : index
      %553 = vector.load %arg5[%c3_50, %c1_51] : memref<32x32xf32, #tpu.memory_space<vmem>>, vector<28x28xf32>
      %c128 = arith.constant 128 : index
      %554 = memref.load %arg1[%c128] : memref<200xf32, #tpu.memory_space<smem>>
      %555 = vector.broadcast %554 : f32 to vector<28x28xf32>
      %556 = arith.mulf %553, %555 : vector<28x28xf32>
      %557 = arith.addf %524, %556 : vector<28x28xf32>
      %c129 = arith.constant 129 : index
      %558 = memref.load %arg1[%c129] : memref<200xf32, #tpu.memory_space<smem>>
      %559 = vector.broadcast %558 : f32 to vector<28x28xf32>
      %560 = arith.mulf %553, %559 : vector<28x28xf32>
      %561 = arith.addf %528, %560 : vector<28x28xf32>
      %c130 = arith.constant 130 : index
      %562 = memref.load %arg1[%c130] : memref<200xf32, #tpu.memory_space<smem>>
      %563 = vector.broadcast %562 : f32 to vector<28x28xf32>
      %564 = arith.mulf %553, %563 : vector<28x28xf32>
      %565 = arith.addf %532, %564 : vector<28x28xf32>
      %c131 = arith.constant 131 : index
      %566 = memref.load %arg1[%c131] : memref<200xf32, #tpu.memory_space<smem>>
      %567 = vector.broadcast %566 : f32 to vector<28x28xf32>
      %568 = arith.mulf %553, %567 : vector<28x28xf32>
      %569 = arith.addf %536, %568 : vector<28x28xf32>
      %c132 = arith.constant 132 : index
      %570 = memref.load %arg1[%c132] : memref<200xf32, #tpu.memory_space<smem>>
      %571 = vector.broadcast %570 : f32 to vector<28x28xf32>
      %572 = arith.mulf %553, %571 : vector<28x28xf32>
      %573 = arith.addf %540, %572 : vector<28x28xf32>
      %c133 = arith.constant 133 : index
      %574 = memref.load %arg1[%c133] : memref<200xf32, #tpu.memory_space<smem>>
      %575 = vector.broadcast %574 : f32 to vector<28x28xf32>
      %576 = arith.mulf %553, %575 : vector<28x28xf32>
      %577 = arith.addf %544, %576 : vector<28x28xf32>
      %c134 = arith.constant 134 : index
      %578 = memref.load %arg1[%c134] : memref<200xf32, #tpu.memory_space<smem>>
      %579 = vector.broadcast %578 : f32 to vector<28x28xf32>
      %580 = arith.mulf %553, %579 : vector<28x28xf32>
      %581 = arith.addf %548, %580 : vector<28x28xf32>
      %c135 = arith.constant 135 : index
      %582 = memref.load %arg1[%c135] : memref<200xf32, #tpu.memory_space<smem>>
      %583 = vector.broadcast %582 : f32 to vector<28x28xf32>
      %584 = arith.mulf %553, %583 : vector<28x28xf32>
      %585 = arith.addf %552, %584 : vector<28x28xf32>
      %c3_52 = arith.constant 3 : index
      %c2_53 = arith.constant 2 : index
      %586 = vector.load %arg5[%c3_52, %c2_53] : memref<32x32xf32, #tpu.memory_space<vmem>>, vector<28x28xf32>
      %c136 = arith.constant 136 : index
      %587 = memref.load %arg1[%c136] : memref<200xf32, #tpu.memory_space<smem>>
      %588 = vector.broadcast %587 : f32 to vector<28x28xf32>
      %589 = arith.mulf %586, %588 : vector<28x28xf32>
      %590 = arith.addf %557, %589 : vector<28x28xf32>
      %c137 = arith.constant 137 : index
      %591 = memref.load %arg1[%c137] : memref<200xf32, #tpu.memory_space<smem>>
      %592 = vector.broadcast %591 : f32 to vector<28x28xf32>
      %593 = arith.mulf %586, %592 : vector<28x28xf32>
      %594 = arith.addf %561, %593 : vector<28x28xf32>
      %c138 = arith.constant 138 : index
      %595 = memref.load %arg1[%c138] : memref<200xf32, #tpu.memory_space<smem>>
      %596 = vector.broadcast %595 : f32 to vector<28x28xf32>
      %597 = arith.mulf %586, %596 : vector<28x28xf32>
      %598 = arith.addf %565, %597 : vector<28x28xf32>
      %c139 = arith.constant 139 : index
      %599 = memref.load %arg1[%c139] : memref<200xf32, #tpu.memory_space<smem>>
      %600 = vector.broadcast %599 : f32 to vector<28x28xf32>
      %601 = arith.mulf %586, %600 : vector<28x28xf32>
      %602 = arith.addf %569, %601 : vector<28x28xf32>
      %c140 = arith.constant 140 : index
      %603 = memref.load %arg1[%c140] : memref<200xf32, #tpu.memory_space<smem>>
      %604 = vector.broadcast %603 : f32 to vector<28x28xf32>
      %605 = arith.mulf %586, %604 : vector<28x28xf32>
      %606 = arith.addf %573, %605 : vector<28x28xf32>
      %c141 = arith.constant 141 : index
      %607 = memref.load %arg1[%c141] : memref<200xf32, #tpu.memory_space<smem>>
      %608 = vector.broadcast %607 : f32 to vector<28x28xf32>
      %609 = arith.mulf %586, %608 : vector<28x28xf32>
      %610 = arith.addf %577, %609 : vector<28x28xf32>
      %c142 = arith.constant 142 : index
      %611 = memref.load %arg1[%c142] : memref<200xf32, #tpu.memory_space<smem>>
      %612 = vector.broadcast %611 : f32 to vector<28x28xf32>
      %613 = arith.mulf %586, %612 : vector<28x28xf32>
      %614 = arith.addf %581, %613 : vector<28x28xf32>
      %c143 = arith.constant 143 : index
      %615 = memref.load %arg1[%c143] : memref<200xf32, #tpu.memory_space<smem>>
      %616 = vector.broadcast %615 : f32 to vector<28x28xf32>
      %617 = arith.mulf %586, %616 : vector<28x28xf32>
      %618 = arith.addf %585, %617 : vector<28x28xf32>
      %c3_54 = arith.constant 3 : index
      %c3_55 = arith.constant 3 : index
      %619 = vector.load %arg5[%c3_54, %c3_55] : memref<32x32xf32, #tpu.memory_space<vmem>>, vector<28x28xf32>
      %c144 = arith.constant 144 : index
      %620 = memref.load %arg1[%c144] : memref<200xf32, #tpu.memory_space<smem>>
      %621 = vector.broadcast %620 : f32 to vector<28x28xf32>
      %622 = arith.mulf %619, %621 : vector<28x28xf32>
      %623 = arith.addf %590, %622 : vector<28x28xf32>
      %c145 = arith.constant 145 : index
      %624 = memref.load %arg1[%c145] : memref<200xf32, #tpu.memory_space<smem>>
      %625 = vector.broadcast %624 : f32 to vector<28x28xf32>
      %626 = arith.mulf %619, %625 : vector<28x28xf32>
      %627 = arith.addf %594, %626 : vector<28x28xf32>
      %c146 = arith.constant 146 : index
      %628 = memref.load %arg1[%c146] : memref<200xf32, #tpu.memory_space<smem>>
      %629 = vector.broadcast %628 : f32 to vector<28x28xf32>
      %630 = arith.mulf %619, %629 : vector<28x28xf32>
      %631 = arith.addf %598, %630 : vector<28x28xf32>
      %c147 = arith.constant 147 : index
      %632 = memref.load %arg1[%c147] : memref<200xf32, #tpu.memory_space<smem>>
      %633 = vector.broadcast %632 : f32 to vector<28x28xf32>
      %634 = arith.mulf %619, %633 : vector<28x28xf32>
      %635 = arith.addf %602, %634 : vector<28x28xf32>
      %c148 = arith.constant 148 : index
      %636 = memref.load %arg1[%c148] : memref<200xf32, #tpu.memory_space<smem>>
      %637 = vector.broadcast %636 : f32 to vector<28x28xf32>
      %638 = arith.mulf %619, %637 : vector<28x28xf32>
      %639 = arith.addf %606, %638 : vector<28x28xf32>
      %c149 = arith.constant 149 : index
      %640 = memref.load %arg1[%c149] : memref<200xf32, #tpu.memory_space<smem>>
      %641 = vector.broadcast %640 : f32 to vector<28x28xf32>
      %642 = arith.mulf %619, %641 : vector<28x28xf32>
      %643 = arith.addf %610, %642 : vector<28x28xf32>
      %c150 = arith.constant 150 : index
      %644 = memref.load %arg1[%c150] : memref<200xf32, #tpu.memory_space<smem>>
      %645 = vector.broadcast %644 : f32 to vector<28x28xf32>
      %646 = arith.mulf %619, %645 : vector<28x28xf32>
      %647 = arith.addf %614, %646 : vector<28x28xf32>
      %c151 = arith.constant 151 : index
      %648 = memref.load %arg1[%c151] : memref<200xf32, #tpu.memory_space<smem>>
      %649 = vector.broadcast %648 : f32 to vector<28x28xf32>
      %650 = arith.mulf %619, %649 : vector<28x28xf32>
      %651 = arith.addf %618, %650 : vector<28x28xf32>
      %c3_56 = arith.constant 3 : index
      %c4_57 = arith.constant 4 : index
      %652 = vector.load %arg5[%c3_56, %c4_57] : memref<32x32xf32, #tpu.memory_space<vmem>>, vector<28x28xf32>
      %c152 = arith.constant 152 : index
      %653 = memref.load %arg1[%c152] : memref<200xf32, #tpu.memory_space<smem>>
      %654 = vector.broadcast %653 : f32 to vector<28x28xf32>
      %655 = arith.mulf %652, %654 : vector<28x28xf32>
      %656 = arith.addf %623, %655 : vector<28x28xf32>
      %c153 = arith.constant 153 : index
      %657 = memref.load %arg1[%c153] : memref<200xf32, #tpu.memory_space<smem>>
      %658 = vector.broadcast %657 : f32 to vector<28x28xf32>
      %659 = arith.mulf %652, %658 : vector<28x28xf32>
      %660 = arith.addf %627, %659 : vector<28x28xf32>
      %c154 = arith.constant 154 : index
      %661 = memref.load %arg1[%c154] : memref<200xf32, #tpu.memory_space<smem>>
      %662 = vector.broadcast %661 : f32 to vector<28x28xf32>
      %663 = arith.mulf %652, %662 : vector<28x28xf32>
      %664 = arith.addf %631, %663 : vector<28x28xf32>
      %c155 = arith.constant 155 : index
      %665 = memref.load %arg1[%c155] : memref<200xf32, #tpu.memory_space<smem>>
      %666 = vector.broadcast %665 : f32 to vector<28x28xf32>
      %667 = arith.mulf %652, %666 : vector<28x28xf32>
      %668 = arith.addf %635, %667 : vector<28x28xf32>
      %c156 = arith.constant 156 : index
      %669 = memref.load %arg1[%c156] : memref<200xf32, #tpu.memory_space<smem>>
      %670 = vector.broadcast %669 : f32 to vector<28x28xf32>
      %671 = arith.mulf %652, %670 : vector<28x28xf32>
      %672 = arith.addf %639, %671 : vector<28x28xf32>
      %c157 = arith.constant 157 : index
      %673 = memref.load %arg1[%c157] : memref<200xf32, #tpu.memory_space<smem>>
      %674 = vector.broadcast %673 : f32 to vector<28x28xf32>
      %675 = arith.mulf %652, %674 : vector<28x28xf32>
      %676 = arith.addf %643, %675 : vector<28x28xf32>
      %c158 = arith.constant 158 : index
      %677 = memref.load %arg1[%c158] : memref<200xf32, #tpu.memory_space<smem>>
      %678 = vector.broadcast %677 : f32 to vector<28x28xf32>
      %679 = arith.mulf %652, %678 : vector<28x28xf32>
      %680 = arith.addf %647, %679 : vector<28x28xf32>
      %c159 = arith.constant 159 : index
      %681 = memref.load %arg1[%c159] : memref<200xf32, #tpu.memory_space<smem>>
      %682 = vector.broadcast %681 : f32 to vector<28x28xf32>
      %683 = arith.mulf %652, %682 : vector<28x28xf32>
      %684 = arith.addf %651, %683 : vector<28x28xf32>
      %c4_58 = arith.constant 4 : index
      %c0_59 = arith.constant 0 : index
      %685 = vector.load %arg5[%c4_58, %c0_59] : memref<32x32xf32, #tpu.memory_space<vmem>>, vector<28x28xf32>
      %c160 = arith.constant 160 : index
      %686 = memref.load %arg1[%c160] : memref<200xf32, #tpu.memory_space<smem>>
      %687 = vector.broadcast %686 : f32 to vector<28x28xf32>
      %688 = arith.mulf %685, %687 : vector<28x28xf32>
      %689 = arith.addf %656, %688 : vector<28x28xf32>
      %c161 = arith.constant 161 : index
      %690 = memref.load %arg1[%c161] : memref<200xf32, #tpu.memory_space<smem>>
      %691 = vector.broadcast %690 : f32 to vector<28x28xf32>
      %692 = arith.mulf %685, %691 : vector<28x28xf32>
      %693 = arith.addf %660, %692 : vector<28x28xf32>
      %c162 = arith.constant 162 : index
      %694 = memref.load %arg1[%c162] : memref<200xf32, #tpu.memory_space<smem>>
      %695 = vector.broadcast %694 : f32 to vector<28x28xf32>
      %696 = arith.mulf %685, %695 : vector<28x28xf32>
      %697 = arith.addf %664, %696 : vector<28x28xf32>
      %c163 = arith.constant 163 : index
      %698 = memref.load %arg1[%c163] : memref<200xf32, #tpu.memory_space<smem>>
      %699 = vector.broadcast %698 : f32 to vector<28x28xf32>
      %700 = arith.mulf %685, %699 : vector<28x28xf32>
      %701 = arith.addf %668, %700 : vector<28x28xf32>
      %c164 = arith.constant 164 : index
      %702 = memref.load %arg1[%c164] : memref<200xf32, #tpu.memory_space<smem>>
      %703 = vector.broadcast %702 : f32 to vector<28x28xf32>
      %704 = arith.mulf %685, %703 : vector<28x28xf32>
      %705 = arith.addf %672, %704 : vector<28x28xf32>
      %c165 = arith.constant 165 : index
      %706 = memref.load %arg1[%c165] : memref<200xf32, #tpu.memory_space<smem>>
      %707 = vector.broadcast %706 : f32 to vector<28x28xf32>
      %708 = arith.mulf %685, %707 : vector<28x28xf32>
      %709 = arith.addf %676, %708 : vector<28x28xf32>
      %c166 = arith.constant 166 : index
      %710 = memref.load %arg1[%c166] : memref<200xf32, #tpu.memory_space<smem>>
      %711 = vector.broadcast %710 : f32 to vector<28x28xf32>
      %712 = arith.mulf %685, %711 : vector<28x28xf32>
      %713 = arith.addf %680, %712 : vector<28x28xf32>
      %c167 = arith.constant 167 : index
      %714 = memref.load %arg1[%c167] : memref<200xf32, #tpu.memory_space<smem>>
      %715 = vector.broadcast %714 : f32 to vector<28x28xf32>
      %716 = arith.mulf %685, %715 : vector<28x28xf32>
      %717 = arith.addf %684, %716 : vector<28x28xf32>
      %c4_60 = arith.constant 4 : index
      %c1_61 = arith.constant 1 : index
      %718 = vector.load %arg5[%c4_60, %c1_61] : memref<32x32xf32, #tpu.memory_space<vmem>>, vector<28x28xf32>
      %c168 = arith.constant 168 : index
      %719 = memref.load %arg1[%c168] : memref<200xf32, #tpu.memory_space<smem>>
      %720 = vector.broadcast %719 : f32 to vector<28x28xf32>
      %721 = arith.mulf %718, %720 : vector<28x28xf32>
      %722 = arith.addf %689, %721 : vector<28x28xf32>
      %c169 = arith.constant 169 : index
      %723 = memref.load %arg1[%c169] : memref<200xf32, #tpu.memory_space<smem>>
      %724 = vector.broadcast %723 : f32 to vector<28x28xf32>
      %725 = arith.mulf %718, %724 : vector<28x28xf32>
      %726 = arith.addf %693, %725 : vector<28x28xf32>
      %c170 = arith.constant 170 : index
      %727 = memref.load %arg1[%c170] : memref<200xf32, #tpu.memory_space<smem>>
      %728 = vector.broadcast %727 : f32 to vector<28x28xf32>
      %729 = arith.mulf %718, %728 : vector<28x28xf32>
      %730 = arith.addf %697, %729 : vector<28x28xf32>
      %c171 = arith.constant 171 : index
      %731 = memref.load %arg1[%c171] : memref<200xf32, #tpu.memory_space<smem>>
      %732 = vector.broadcast %731 : f32 to vector<28x28xf32>
      %733 = arith.mulf %718, %732 : vector<28x28xf32>
      %734 = arith.addf %701, %733 : vector<28x28xf32>
      %c172 = arith.constant 172 : index
      %735 = memref.load %arg1[%c172] : memref<200xf32, #tpu.memory_space<smem>>
      %736 = vector.broadcast %735 : f32 to vector<28x28xf32>
      %737 = arith.mulf %718, %736 : vector<28x28xf32>
      %738 = arith.addf %705, %737 : vector<28x28xf32>
      %c173 = arith.constant 173 : index
      %739 = memref.load %arg1[%c173] : memref<200xf32, #tpu.memory_space<smem>>
      %740 = vector.broadcast %739 : f32 to vector<28x28xf32>
      %741 = arith.mulf %718, %740 : vector<28x28xf32>
      %742 = arith.addf %709, %741 : vector<28x28xf32>
      %c174 = arith.constant 174 : index
      %743 = memref.load %arg1[%c174] : memref<200xf32, #tpu.memory_space<smem>>
      %744 = vector.broadcast %743 : f32 to vector<28x28xf32>
      %745 = arith.mulf %718, %744 : vector<28x28xf32>
      %746 = arith.addf %713, %745 : vector<28x28xf32>
      %c175 = arith.constant 175 : index
      %747 = memref.load %arg1[%c175] : memref<200xf32, #tpu.memory_space<smem>>
      %748 = vector.broadcast %747 : f32 to vector<28x28xf32>
      %749 = arith.mulf %718, %748 : vector<28x28xf32>
      %750 = arith.addf %717, %749 : vector<28x28xf32>
      %c4_62 = arith.constant 4 : index
      %c2_63 = arith.constant 2 : index
      %751 = vector.load %arg5[%c4_62, %c2_63] : memref<32x32xf32, #tpu.memory_space<vmem>>, vector<28x28xf32>
      %c176 = arith.constant 176 : index
      %752 = memref.load %arg1[%c176] : memref<200xf32, #tpu.memory_space<smem>>
      %753 = vector.broadcast %752 : f32 to vector<28x28xf32>
      %754 = arith.mulf %751, %753 : vector<28x28xf32>
      %755 = arith.addf %722, %754 : vector<28x28xf32>
      %c177 = arith.constant 177 : index
      %756 = memref.load %arg1[%c177] : memref<200xf32, #tpu.memory_space<smem>>
      %757 = vector.broadcast %756 : f32 to vector<28x28xf32>
      %758 = arith.mulf %751, %757 : vector<28x28xf32>
      %759 = arith.addf %726, %758 : vector<28x28xf32>
      %c178 = arith.constant 178 : index
      %760 = memref.load %arg1[%c178] : memref<200xf32, #tpu.memory_space<smem>>
      %761 = vector.broadcast %760 : f32 to vector<28x28xf32>
      %762 = arith.mulf %751, %761 : vector<28x28xf32>
      %763 = arith.addf %730, %762 : vector<28x28xf32>
      %c179 = arith.constant 179 : index
      %764 = memref.load %arg1[%c179] : memref<200xf32, #tpu.memory_space<smem>>
      %765 = vector.broadcast %764 : f32 to vector<28x28xf32>
      %766 = arith.mulf %751, %765 : vector<28x28xf32>
      %767 = arith.addf %734, %766 : vector<28x28xf32>
      %c180 = arith.constant 180 : index
      %768 = memref.load %arg1[%c180] : memref<200xf32, #tpu.memory_space<smem>>
      %769 = vector.broadcast %768 : f32 to vector<28x28xf32>
      %770 = arith.mulf %751, %769 : vector<28x28xf32>
      %771 = arith.addf %738, %770 : vector<28x28xf32>
      %c181 = arith.constant 181 : index
      %772 = memref.load %arg1[%c181] : memref<200xf32, #tpu.memory_space<smem>>
      %773 = vector.broadcast %772 : f32 to vector<28x28xf32>
      %774 = arith.mulf %751, %773 : vector<28x28xf32>
      %775 = arith.addf %742, %774 : vector<28x28xf32>
      %c182 = arith.constant 182 : index
      %776 = memref.load %arg1[%c182] : memref<200xf32, #tpu.memory_space<smem>>
      %777 = vector.broadcast %776 : f32 to vector<28x28xf32>
      %778 = arith.mulf %751, %777 : vector<28x28xf32>
      %779 = arith.addf %746, %778 : vector<28x28xf32>
      %c183 = arith.constant 183 : index
      %780 = memref.load %arg1[%c183] : memref<200xf32, #tpu.memory_space<smem>>
      %781 = vector.broadcast %780 : f32 to vector<28x28xf32>
      %782 = arith.mulf %751, %781 : vector<28x28xf32>
      %783 = arith.addf %750, %782 : vector<28x28xf32>
      %c4_64 = arith.constant 4 : index
      %c3_65 = arith.constant 3 : index
      %784 = vector.load %arg5[%c4_64, %c3_65] : memref<32x32xf32, #tpu.memory_space<vmem>>, vector<28x28xf32>
      %c184 = arith.constant 184 : index
      %785 = memref.load %arg1[%c184] : memref<200xf32, #tpu.memory_space<smem>>
      %786 = vector.broadcast %785 : f32 to vector<28x28xf32>
      %787 = arith.mulf %784, %786 : vector<28x28xf32>
      %788 = arith.addf %755, %787 : vector<28x28xf32>
      %c185 = arith.constant 185 : index
      %789 = memref.load %arg1[%c185] : memref<200xf32, #tpu.memory_space<smem>>
      %790 = vector.broadcast %789 : f32 to vector<28x28xf32>
      %791 = arith.mulf %784, %790 : vector<28x28xf32>
      %792 = arith.addf %759, %791 : vector<28x28xf32>
      %c186 = arith.constant 186 : index
      %793 = memref.load %arg1[%c186] : memref<200xf32, #tpu.memory_space<smem>>
      %794 = vector.broadcast %793 : f32 to vector<28x28xf32>
      %795 = arith.mulf %784, %794 : vector<28x28xf32>
      %796 = arith.addf %763, %795 : vector<28x28xf32>
      %c187 = arith.constant 187 : index
      %797 = memref.load %arg1[%c187] : memref<200xf32, #tpu.memory_space<smem>>
      %798 = vector.broadcast %797 : f32 to vector<28x28xf32>
      %799 = arith.mulf %784, %798 : vector<28x28xf32>
      %800 = arith.addf %767, %799 : vector<28x28xf32>
      %c188 = arith.constant 188 : index
      %801 = memref.load %arg1[%c188] : memref<200xf32, #tpu.memory_space<smem>>
      %802 = vector.broadcast %801 : f32 to vector<28x28xf32>
      %803 = arith.mulf %784, %802 : vector<28x28xf32>
      %804 = arith.addf %771, %803 : vector<28x28xf32>
      %c189 = arith.constant 189 : index
      %805 = memref.load %arg1[%c189] : memref<200xf32, #tpu.memory_space<smem>>
      %806 = vector.broadcast %805 : f32 to vector<28x28xf32>
      %807 = arith.mulf %784, %806 : vector<28x28xf32>
      %808 = arith.addf %775, %807 : vector<28x28xf32>
      %c190 = arith.constant 190 : index
      %809 = memref.load %arg1[%c190] : memref<200xf32, #tpu.memory_space<smem>>
      %810 = vector.broadcast %809 : f32 to vector<28x28xf32>
      %811 = arith.mulf %784, %810 : vector<28x28xf32>
      %812 = arith.addf %779, %811 : vector<28x28xf32>
      %c191 = arith.constant 191 : index
      %813 = memref.load %arg1[%c191] : memref<200xf32, #tpu.memory_space<smem>>
      %814 = vector.broadcast %813 : f32 to vector<28x28xf32>
      %815 = arith.mulf %784, %814 : vector<28x28xf32>
      %816 = arith.addf %783, %815 : vector<28x28xf32>
      %c4_66 = arith.constant 4 : index
      %c4_67 = arith.constant 4 : index
      %817 = vector.load %arg5[%c4_66, %c4_67] : memref<32x32xf32, #tpu.memory_space<vmem>>, vector<28x28xf32>
      %c192 = arith.constant 192 : index
      %818 = memref.load %arg1[%c192] : memref<200xf32, #tpu.memory_space<smem>>
      %819 = vector.broadcast %818 : f32 to vector<28x28xf32>
      %820 = arith.mulf %817, %819 : vector<28x28xf32>
      %821 = arith.addf %788, %820 : vector<28x28xf32>
      %c193 = arith.constant 193 : index
      %822 = memref.load %arg1[%c193] : memref<200xf32, #tpu.memory_space<smem>>
      %823 = vector.broadcast %822 : f32 to vector<28x28xf32>
      %824 = arith.mulf %817, %823 : vector<28x28xf32>
      %825 = arith.addf %792, %824 : vector<28x28xf32>
      %c194 = arith.constant 194 : index
      %826 = memref.load %arg1[%c194] : memref<200xf32, #tpu.memory_space<smem>>
      %827 = vector.broadcast %826 : f32 to vector<28x28xf32>
      %828 = arith.mulf %817, %827 : vector<28x28xf32>
      %829 = arith.addf %796, %828 : vector<28x28xf32>
      %c195 = arith.constant 195 : index
      %830 = memref.load %arg1[%c195] : memref<200xf32, #tpu.memory_space<smem>>
      %831 = vector.broadcast %830 : f32 to vector<28x28xf32>
      %832 = arith.mulf %817, %831 : vector<28x28xf32>
      %833 = arith.addf %800, %832 : vector<28x28xf32>
      %c196 = arith.constant 196 : index
      %834 = memref.load %arg1[%c196] : memref<200xf32, #tpu.memory_space<smem>>
      %835 = vector.broadcast %834 : f32 to vector<28x28xf32>
      %836 = arith.mulf %817, %835 : vector<28x28xf32>
      %837 = arith.addf %804, %836 : vector<28x28xf32>
      %c197 = arith.constant 197 : index
      %838 = memref.load %arg1[%c197] : memref<200xf32, #tpu.memory_space<smem>>
      %839 = vector.broadcast %838 : f32 to vector<28x28xf32>
      %840 = arith.mulf %817, %839 : vector<28x28xf32>
      %841 = arith.addf %808, %840 : vector<28x28xf32>
      %c198 = arith.constant 198 : index
      %842 = memref.load %arg1[%c198] : memref<200xf32, #tpu.memory_space<smem>>
      %843 = vector.broadcast %842 : f32 to vector<28x28xf32>
      %844 = arith.mulf %817, %843 : vector<28x28xf32>
      %845 = arith.addf %812, %844 : vector<28x28xf32>
      %c199 = arith.constant 199 : index
      %846 = memref.load %arg1[%c199] : memref<200xf32, #tpu.memory_space<smem>>
      %847 = vector.broadcast %846 : f32 to vector<28x28xf32>
      %848 = arith.mulf %817, %847 : vector<28x28xf32>
      %849 = arith.addf %816, %848 : vector<28x28xf32>
      %850 = arith.index_cast %4 : i32 to index
      %c0_68 = arith.constant 0 : index
      %c0_69 = arith.constant 0 : index
      %c0_70 = arith.constant 0 : index
      %851 = vector.load %arg4[%850, %c0_68, %c0_69, %c0_70] : memref<2x8x28x28xf32, #tpu.memory_space<vmem>>, vector<1x1x28x28xf32>
      %852 = vector.shape_cast %851 : vector<1x1x28x28xf32> to vector<28x28xf32>
      %853 = vector.shape_cast %821 : vector<28x28xf32> to vector<1x1x28x28xf32>
      tpu.vector_store %arg4[%850, %c0_68, %c0_69, %c0_70], %853 {strides = array<i32>} : memref<2x8x28x28xf32, #tpu.memory_space<vmem>>, vector<1x1x28x28xf32>,
      %854 = arith.index_cast %4 : i32 to index
      %c1_71 = arith.constant 1 : index
      %c0_72 = arith.constant 0 : index
      %c0_73 = arith.constant 0 : index
      %855 = vector.load %arg4[%854, %c1_71, %c0_72, %c0_73] : memref<2x8x28x28xf32, #tpu.memory_space<vmem>>, vector<1x1x28x28xf32>
      %856 = vector.shape_cast %855 : vector<1x1x28x28xf32> to vector<28x28xf32>
      %857 = vector.shape_cast %825 : vector<28x28xf32> to vector<1x1x28x28xf32>
      tpu.vector_store %arg4[%854, %c1_71, %c0_72, %c0_73], %857 {strides = array<i32>} : memref<2x8x28x28xf32, #tpu.memory_space<vmem>>, vector<1x1x28x28xf32>,
      %858 = arith.index_cast %4 : i32 to index
      %c2_74 = arith.constant 2 : index
      %c0_75 = arith.constant 0 : index
      %c0_76 = arith.constant 0 : index
      %859 = vector.load %arg4[%858, %c2_74, %c0_75, %c0_76] : memref<2x8x28x28xf32, #tpu.memory_space<vmem>>, vector<1x1x28x28xf32>
      %860 = vector.shape_cast %859 : vector<1x1x28x28xf32> to vector<28x28xf32>
      %861 = vector.shape_cast %829 : vector<28x28xf32> to vector<1x1x28x28xf32>
      tpu.vector_store %arg4[%858, %c2_74, %c0_75, %c0_76], %861 {strides = array<i32>} : memref<2x8x28x28xf32, #tpu.memory_space<vmem>>, vector<1x1x28x28xf32>,
      %862 = arith.index_cast %4 : i32 to index
      %c3_77 = arith.constant 3 : index
      %c0_78 = arith.constant 0 : index
      %c0_79 = arith.constant 0 : index
      %863 = vector.load %arg4[%862, %c3_77, %c0_78, %c0_79] : memref<2x8x28x28xf32, #tpu.memory_space<vmem>>, vector<1x1x28x28xf32>
      %864 = vector.shape_cast %863 : vector<1x1x28x28xf32> to vector<28x28xf32>
      %865 = vector.shape_cast %833 : vector<28x28xf32> to vector<1x1x28x28xf32>
      tpu.vector_store %arg4[%862, %c3_77, %c0_78, %c0_79], %865 {strides = array<i32>} : memref<2x8x28x28xf32, #tpu.memory_space<vmem>>, vector<1x1x28x28xf32>,
      %866 = arith.index_cast %4 : i32 to index
      %c4_80 = arith.constant 4 : index
      %c0_81 = arith.constant 0 : index
      %c0_82 = arith.constant 0 : index
      %867 = vector.load %arg4[%866, %c4_80, %c0_81, %c0_82] : memref<2x8x28x28xf32, #tpu.memory_space<vmem>>, vector<1x1x28x28xf32>
      %868 = vector.shape_cast %867 : vector<1x1x28x28xf32> to vector<28x28xf32>
      %869 = vector.shape_cast %837 : vector<28x28xf32> to vector<1x1x28x28xf32>
      tpu.vector_store %arg4[%866, %c4_80, %c0_81, %c0_82], %869 {strides = array<i32>} : memref<2x8x28x28xf32, #tpu.memory_space<vmem>>, vector<1x1x28x28xf32>,
      %870 = arith.index_cast %4 : i32 to index
      %c5_83 = arith.constant 5 : index
      %c0_84 = arith.constant 0 : index
      %c0_85 = arith.constant 0 : index
      %871 = vector.load %arg4[%870, %c5_83, %c0_84, %c0_85] : memref<2x8x28x28xf32, #tpu.memory_space<vmem>>, vector<1x1x28x28xf32>
      %872 = vector.shape_cast %871 : vector<1x1x28x28xf32> to vector<28x28xf32>
      %873 = vector.shape_cast %841 : vector<28x28xf32> to vector<1x1x28x28xf32>
      tpu.vector_store %arg4[%870, %c5_83, %c0_84, %c0_85], %873 {strides = array<i32>} : memref<2x8x28x28xf32, #tpu.memory_space<vmem>>, vector<1x1x28x28xf32>,
      %874 = arith.index_cast %4 : i32 to index
      %c6_86 = arith.constant 6 : index
      %c0_87 = arith.constant 0 : index
      %c0_88 = arith.constant 0 : index
      %875 = vector.load %arg4[%874, %c6_86, %c0_87, %c0_88] : memref<2x8x28x28xf32, #tpu.memory_space<vmem>>, vector<1x1x28x28xf32>
      %876 = vector.shape_cast %875 : vector<1x1x28x28xf32> to vector<28x28xf32>
      %877 = vector.shape_cast %845 : vector<28x28xf32> to vector<1x1x28x28xf32>
      tpu.vector_store %arg4[%874, %c6_86, %c0_87, %c0_88], %877 {strides = array<i32>} : memref<2x8x28x28xf32, #tpu.memory_space<vmem>>, vector<1x1x28x28xf32>,
      %878 = arith.index_cast %4 : i32 to index
      %c7_89 = arith.constant 7 : index
      %c0_90 = arith.constant 0 : index
      %c0_91 = arith.constant 0 : index
      %879 = vector.load %arg4[%878, %c7_89, %c0_90, %c0_91] : memref<2x8x28x28xf32, #tpu.memory_space<vmem>>, vector<1x1x28x28xf32>
      %880 = vector.shape_cast %879 : vector<1x1x28x28xf32> to vector<28x28xf32>
      %881 = vector.shape_cast %849 : vector<28x28xf32> to vector<1x1x28x28xf32>
      tpu.vector_store %arg4[%878, %c7_89, %c0_90, %c0_91], %881 {strides = array<i32>} : memref<2x8x28x28xf32, #tpu.memory_space<vmem>>, vector<1x1x28x28xf32>,
    }
    %c2_i32_1 = arith.constant 2 : i32
    return
  }
  func.func @transform_0(%arg0: i32) -> i32 {
    %c0_i32 = arith.constant 0 : i32
    %c0_i32_0 = arith.constant 0 : i32
    return %c0_i32 : i32
  }
  func.func @transform_1(%arg0: i32) -> i32 {
    %c0_i32 = arith.constant 0 : i32
    %c0_i32_0 = arith.constant 0 : i32
    return %c0_i32 : i32
  }
  func.func @transform_2(%arg0: i32) -> (i32, i32, i32, i32) {
    %c0_i32 = arith.constant 0 : i32
    %c0_i32_0 = arith.constant 0 : i32
    %c0_i32_1 = arith.constant 0 : i32
    %c0_i32_2 = arith.constant 0 : i32
    return %arg0, %c0_i32, %c0_i32_0, %c0_i32_1 : i32, i32, i32, i32
  }
  func.func @transform_3(%arg0: i32) -> (i32, i32, i32, i32) {
    %c0_i32 = arith.constant 0 : i32
    %c0_i32_0 = arith.constant 0 : i32
    %c0_i32_1 = arith.constant 0 : i32
    %c0_i32_2 = arith.constant 0 : i32
    return %arg0, %c0_i32, %c0_i32_0, %c0_i32_1 : i32, i32, i32, i32
  }
}

</mosaic_0001>

<bundles_post_ra>
// kernel: tpu_custom_call.1
= control target key start
LH: loop header
LB: loop body
LE: loop exit
PB: predicated region body
PF: predicated region fallthrough
CT: control target
= control target key end

     0   :  { %8 = vsyncpa [#allocation4], 0  ;;  %s9484_s0 = inlined_call_operand.vmem [shape: f32[200], index: 0, kind: input, shape index: {}]   ;;  %s9485_s1 = inlined_call_operand.vmem [shape: f32[8], index: 1, kind: input, shape index: {}]   ;;  %s9486_s2 = inlined_call_operand.vmem [shape: f32[4,1,28,28], index: 2, kind: input, shape index: {}]   ;;  %s9487_s3 = inlined_call_operand.vmem [shape: f32[4,8,28,28], index: 3, kind: output, shape index: {}]  }
   0x1   :  { %9 = vsyncpa [#allocation6], 0  ;;  %s5408_s12 = smov 0  }
   0x2 LB: > { %s5001_s13 = sadd.s32 4294967295, %s5374_s12   ;;  %p5003_p0 = scmp.ge.s32.totalorder %s5374_s12, 1  ;;  %s5374_s12 = sphi %s5408_s12, %s15_s12  }
   0x3   : > { %p114_p1 = scmp.lt.s32.totalorder %s5374_s12, 3  ;;  %s127_s16 = sshll.u32 %s9484_s0, 4  ;;  %s128_s16 = int_to_ptr.vmem [resolvable:$true] %s127_s16 }
   0x4   : > { %p5425_p3 = scmp.eq.s32.totalorder %s5001_s13, 0  ;;  %s138_s21 = sshll.u32 %s9485_s1, 4  ;;  %s139_s21 = int_to_ptr.vmem [resolvable:$true] %s138_s21 }
   0x5   : > { %p5419_p2 = pnand %p5003_p0, %p114_p1  ;;  %s5326_s23 = scalar_lea.vmem %s128_s16, 32 }
   0x6   : > { %s9494_s18 = scalar_select %p5425_p3, 1, 0 }
   0x7   : > { %s9493_s17 = scalar_select %p5419_p2, 1, 0 }
   0x8   : > { %p5271_p4 = pneg %p5419_p2  ;;  %p5327_p6 = scmp.ne.s32.totalorder %s128_s16, %s5326_s23 }
   0x9   : > { %p5334_p10 = scmp.lt.s32.totalorder %s128_s16, %s128_s16  ;;  %p5335_p11 = scmp.lt.s32.totalorder %s5326_s23, %s5326_s23 }
   0xa   : > { %p5436_p5 = pnand %p5425_p3, %p5271_p4 }
   0xb   : > { %p5336_p12 = por %p5335_p11, %p5334_p10 }
   0xc   : > { %p5328_p7 = pneg %p5436_p5 }
   0xe   : > { %p5329_p8 = pnand %p5328_p7, %p5327_p6 }
  0x10   : > { %p5330_p9 = pneg %p5329_p8 }
  0x12   : > { %p5337_p13 = pnand %p5336_p12, %p5330_p9 }
  0x14   : > { %5340 = shalt.err (!%p5337_p13)
}
  0x15   : > { %s5380_s24 = smov [#allocation3]   ;;  %s5341_s25 = scalar_lea.vmem %s139_s21, 16 }
  0x16   : > { %5274 = dma.vmem_to_smem (!%p5436_p5), %s128_s16, 32, %s5380_s24, [#allocation4]  }
  0x17   : > { %p5342_p0 = scmp.ne.s32.totalorder %s139_s21, %s5341_s25  ;;  %p5349_p3 = scmp.lt.s32.totalorder %s139_s21, %s139_s21 }
  0x18   : > { %p5350_p2 = scmp.lt.s32.totalorder %s5341_s25, %s5341_s25 }
  0x19   : > { %p5344_p1 = pnand %p5342_p0, %p5328_p7 }
  0x1a   : > { %p5351_p6 = por %p5350_p2, %p5349_p3 }
  0x1b   : > { %p5345_p4 = pneg %p5344_p1 }
  0x1d   : > { %p5352_p8 = pnand %p5351_p6, %p5345_p4 }
  0x1f   : > { %5355 = shalt.err (!%p5352_p8)
}
  0x20   : > { %s5381_s26 = smov [#allocation5]   ;;  %p9496_p9 = scmp.ne.s32.totalorder %s9493_s17, 0 }
  0x21   : > { %5277 = dma.vmem_to_smem (!%p5436_p5), %s139_s21, 16, %s5381_s26, [#allocation6]  }
  0x22   : > { %161 = sbr.rel (%p9496_p9) target bundleno = 1579 (0x62b), region = 32  ;;  %p9497_p10 = scmp.ne.s32.totalorder (!%p9496_p9), %s9494_s18, 0 }
  0x29   : > { %5365 = dma.done.wait (%p9497_p10), [#allocation4], 32  }
  0x2a   : > { %5367 = vsyncadd (%p9497_p10), [#allocation4], 4294967264 }
  0x2b   : > { %5369 = dma.done.wait (%p9497_p10), [#allocation6], 16  }
  0x2c   : > { %5371 = vsyncadd (%p9497_p10), [#allocation6], 4294967280 }
  0x2d   : > { %171 = sfence }
  0x2e   : > { %s5010_s27 = sshll.u32 %s5001_s13, 1  ;;  %vm206_vm0 = vcmask 261120   ;;  %v5382_v0 = vmov 0.0   ;;  %s5468_s9 = smov 0  }
  0x2f   : > { %p193_p2 = scmp.lt.s32.totalorder %s5010_s27, 3  ;;  %207 = vst.msk [vmem:[#allocation2] sm:$0xff] %vm206_vm0, %v5382_v0  ;;  %208 = vst.msk [vmem:[#allocation2 + $0x8] sm:$0xff] %vm206_vm0, %v5382_v0 }
  0x30   : > { %209 = vst.msk [vmem:[#allocation2 + $0x10] sm:$0xff] %vm206_vm0, %v5382_v0  ;;  %210 = vst.msk [vmem:[#allocation2 + $0x18] sm:$0xff] %vm206_vm0, %v5382_v0 }
  0x31   : > { %s10167_s27 = smov (!%p193_p2, %s5010_s27), 3 }
  0x32   : > { %s5261_s28 = sshll.u32 %s10167_s27, 5  ;;  %s5262_s29 = sshll.u32 %s10167_s27, 8 }
  0x33   : > { %s5461_s5 = scalar_lea.vmem %s9486_s2, %s5261_s28  ;;  %s5466_s8 = scalar_lea.vmem %s9487_s3, %s5262_s29 }
  0x34 LB: >> { %s5016_s10 = sshll.u32 %s5378_s9, 5  ;;  %s5383_s13 = smov 2   ;;  %vm239_vm1 = vcmask 244752   ;;  %vm243_vm2 = vcmask 240656   ;;  %vm4843_vm3 = vcmask 228352   ;;  %vm4847_vm4 = vcmask 224256   ;;  %s5378_s9 = sphi %s5468_s9, %s216_s9  }
  0x35   : >> { %s218_s11 = scalar_lea.vmem %s5461_s5, %s5016_s10  ;;  %s5031_s14 = sld [smem:[#allocation3 + $0x8]] }
  0x36   : >> { %v221_v1 = vld [vmem:[%s218_s11 + $0x10] sm:$0xff]  ;;  %v219_v2 = vld [vmem:[%s218_s11] sm:$0xff]  ;;  %v222_v3 = vld [vmem:[%s218_s11 + $0x18] sm:$0xf]  ;;  %s5032_s15 = sld [smem:[#allocation3 + $0x9]]  ;;  %s5384_s16 = smov 127  }
  0x37   : >> { %231 = vrot.lane.b32.xlu1 %v221_v1, %s5383_s13  ;;  %227 = vrot.lane.b32.xlu0 %v219_v2, %s5383_s13  ;;  %v220_v4 = vld [vmem:[%s218_s11 + $0x8] sm:$0xff]  ;;  %s5033_s17 = sld [smem:[#allocation3 + $0xa]]  ;;  %s5034_s18 = sld [smem:[#allocation3 + $0xb]] }
  0x38   : >> { %s5035_s19 = sld [smem:[#allocation3 + $0xc]]  ;;  %s5036_s20 = sld [smem:[#allocation3 + $0xd]] }
  0x39   : >> { %s5037_s21 = sld [smem:[#allocation3 + $0xe]]  ;;  %s5038_s22 = sld [smem:[#allocation3 + $0xf]] }
  0x3a   : >> { %s5039_s23 = sld [smem:[#allocation3 + $0x10]]  ;;  %s5040_s24 = sld [smem:[#allocation3 + $0x11]] }
  0x3b   : >> { %233 = vrot.lane.b32.xlu1 %v222_v3, %s5383_s13  ;;  %229 = vrot.lane.b32.xlu0 %v220_v4, %s5383_s13  ;;  %v346_v9 = vstv %s5031_s14  ;;  %s5385_s25 = smov 126   ;;  %s5041_s26 = sld [smem:[#allocation3 + $0x12]] }
  0x3c   : >> { %v372_v17 = vstv %s5032_s15  ;;  %s5042_s27 = sld [smem:[#allocation3 + $0x13]]  ;;  %s5043_s28 = sld [smem:[#allocation3 + $0x14]] }
  0x3d   : >> { %v398_v22 = vstv %s5033_s17  ;;  %v424_v27 = vstv %s5034_s18  ;;  %s5044_s29 = sld [smem:[#allocation3 + $0x15]]  ;;  %s5045_s30 = sld [smem:[#allocation3 + $0x16]] }
  0x3e   : >> { %v450_v32 = vstv %s5035_s19  ;;  %v476_v37 = vstv %s5036_s20  ;;  %s5046_s4 = sld [smem:[#allocation3 + $0x17]]  ;;  %s5047_s6 = sld [smem:[#allocation3 + $0x18]] }
  0x3f   : >> { %v502_v42 = vstv %s5037_s21  ;;  %v528_v47 = vstv %s5038_s22  ;;  %s5048_s7 = sld [smem:[#allocation3 + $0x19]]  ;;  %s5386_s10 = smov 125  }
  0x40   : >> { %v554_v52 = vstv %s5039_s23  ;;  %v580_v57 = vstv %s5040_s24  ;;  %s5049_s11 = sld [smem:[#allocation3 + $0x1a]]  ;;  %s5050_s13 = sld [smem:[#allocation3 + $0x1b]] }
  0x41   : >> { %v606_v62 = vstv %s5041_s26  ;;  %s5051_s14 = sld [smem:[#allocation3 + $0x1c]]  ;;  %s5052_s15 = sld [smem:[#allocation3 + $0x1d]] }
  0x42   : >> { %v632_v3 = vstv %s5042_s27  ;;  %s5053_s17 = sld [smem:[#allocation3 + $0x1e]]  ;;  %s5054_s18 = sld [smem:[#allocation3 + $0x1f]] }
  0x43   : >> { %s5055_s19 = sld [smem:[#allocation3 + $0x20]]  ;;  %s5056_s20 = sld [smem:[#allocation3 + $0x21]] }
  0x44   : >> { %s5387_s21 = smov 124   ;;  %s5057_s22 = sld [smem:[#allocation3 + $0x22]] }
  0x45   : >> { %s5058_s23 = sld [smem:[#allocation3 + $0x23]]  ;;  %s5059_s24 = sld [smem:[#allocation3 + $0x24]] }
  0x46   : >> { %s5060_s26 = sld [smem:[#allocation3 + $0x25]]  ;;  %s5061_s27 = sld [smem:[#allocation3 + $0x26]] }
  0xa9   : >> { %v232_v5 = vpop.permute.xlu1 %231  ;;  %v228_v6 = vpop.permute.xlu0 %227 }
  0xaa   : >> { %242 = vst.msk [vmem:[#allocation2 + $0x12] sm:$0xff] %vm239_vm1, %v232_v5  ;;  %240 = vst.msk [vmem:[#allocation2 + $0x2] sm:$0xff] %vm239_vm1, %v228_v6 }
  0xad   : >> { %v234_v7 = vpop.permute.xlu1 %233  ;;  %v230_v8 = vpop.permute.xlu0 %229 }
  0xae   : >> { %244 = vst.msk [vmem:[#allocation2 + $0x1a] sm:$0xf] %vm243_vm2, %v234_v7 }
  0xaf   : >> { %241 = vst.msk [vmem:[#allocation2 + $0xa] sm:$0xff] %vm239_vm1, %v230_v8  ;;  %v658_v8 = vstv %s5043_s28  ;;  %s5062_s28 = sld [smem:[#allocation3 + $0x27]] }
  0xb1   : >> { %v5475_v10 = vld [vmem:[#allocation2] sm:$0xff] }
  0xb2   : >> { %v347_v11 = vmul.f32 %v346_v9, %v5475_v10  ;;  %v373_v18 = vmul.f32 %v372_v17, %v5475_v10  ;;  %v399_v23 = vmul.f32 %v398_v22, %v5475_v10  ;;  %v425_v28 = vmul.f32 %v424_v27, %v5475_v10 }
  0xb3   : >> { %v451_v33 = vmul.f32 %v450_v32, %v5475_v10  ;;  %v477_v38 = vmul.f32 %v476_v37, %v5475_v10  ;;  %v503_v43 = vmul.f32 %v502_v42, %v5475_v10  ;;  %v529_v48 = vmul.f32 %v528_v47, %v5475_v10 }
  0xb4   : >> { %355 = vrot.lane.b32.xlu0 %v347_v11, %s5384_s16  ;;  %v555_v53 = vmul.f32 %v554_v52, %v5475_v10  ;;  %v581_v58 = vmul.f32 %v580_v57, %v5475_v10  ;;  %v607_v63 = vmul.f32 %v606_v62, %v5475_v10  ;;  %v633_v4 = vmul.f32 %v632_v3, %v5475_v10 }
  0xb5   : >> { %v5485_v16 = vld [vmem:[#allocation2 + $0x18] sm:$0xf] }
  0xb6   : >> { %v5479_v12 = vld [vmem:[#allocation2 + $0x8] sm:$0xff]  ;;  %v5481_v13 = vld [vmem:[#allocation2 + $0x10] sm:$0xff]  ;;  %v350_v19 = vmul.f32 %v346_v9, %v5485_v16  ;;  %v376_v24 = vmul.f32 %v372_v17, %v5485_v16  ;;  %v402_v29 = vmul.f32 %v398_v22, %v5485_v16  ;;  %v428_v34 = vmul.f32 %v424_v27, %v5485_v16 }
  0xb7   : >> { %v349_v14 = vmul.f32 %v346_v9, %v5481_v13  ;;  %v348_v15 = vmul.f32 %v346_v9, %v5479_v12  ;;  %v375_v20 = vmul.f32 %v372_v17, %v5481_v13  ;;  %v374_v21 = vmul.f32 %v372_v17, %v5479_v12 }
  0xb8   : >> { %v401_v25 = vmul.f32 %v398_v22, %v5481_v13  ;;  %v400_v26 = vmul.f32 %v398_v22, %v5479_v12  ;;  %v427_v30 = vmul.f32 %v424_v27, %v5481_v13  ;;  %v426_v31 = vmul.f32 %v424_v27, %v5479_v12 }
  0xb9   : >> { %359 = vrot.lane.b32.xlu0 %v349_v14, %s5384_s16  ;;  %357 = vrot.lane.b32.xlu1 %v348_v15, %s5384_s16  ;;  %v453_v35 = vmul.f32 %v450_v32, %v5481_v13  ;;  %v452_v36 = vmul.f32 %v450_v32, %v5479_v12  ;;  %v454_v39 = vmul.f32 %v450_v32, %v5485_v16  ;;  %v684_v17 = vstv %s5044_s29  ;;  %s5071_s29 = sld [smem:[#allocation3 + $0x30]] }
  0xba   : >> { %v479_v40 = vmul.f32 %v476_v37, %v5481_v13  ;;  %v478_v41 = vmul.f32 %v476_v37, %v5479_v12  ;;  %v480_v44 = vmul.f32 %v476_v37, %v5485_v16  ;;  %v505_v45 = vmul.f32 %v502_v42, %v5481_v13 }
  0xbb   : >> { %v504_v46 = vmul.f32 %v502_v42, %v5479_v12  ;;  %v506_v49 = vmul.f32 %v502_v42, %v5485_v16  ;;  %v531_v50 = vmul.f32 %v528_v47, %v5481_v13  ;;  %v530_v51 = vmul.f32 %v528_v47, %v5479_v12 }
  0xbc   : >> { %v532_v54 = vmul.f32 %v528_v47, %v5485_v16  ;;  %v557_v55 = vmul.f32 %v554_v52, %v5481_v13  ;;  %v556_v56 = vmul.f32 %v554_v52, %v5479_v12  ;;  %v558_v59 = vmul.f32 %v554_v52, %v5485_v16 }
  0xbd   : >> { %381 = vrot.lane.b32.xlu0 %v373_v18, %s5384_s16  ;;  %361 = vrot.lane.b32.xlu1 %v350_v19, %s5384_s16  ;;  %v583_v60 = vmul.f32 %v580_v57, %v5481_v13  ;;  %v582_v61 = vmul.f32 %v580_v57, %v5479_v12  ;;  %v584_v0 = vmul.f32 %v580_v57, %v5485_v16  ;;  %v710_v22 = vstv %s5045_s30  ;;  %s5072_s30 = sld [smem:[#allocation3 + $0x31]] }
  0xbe   : >> { %v609_v1 = vmul.f32 %v606_v62, %v5481_v13  ;;  %v608_v2 = vmul.f32 %v606_v62, %v5479_v12  ;;  %v610_v5 = vmul.f32 %v606_v62, %v5485_v16  ;;  %v635_v6 = vmul.f32 %v632_v3, %v5481_v13 }
  0xbf   : >> { %v634_v7 = vmul.f32 %v632_v3, %v5479_v12  ;;  %v659_v9 = vmul.f32 %v658_v8, %v5475_v10  ;;  %v636_v11 = vmul.f32 %v632_v3, %v5485_v16  ;;  %v661_v14 = vmul.f32 %v658_v8, %v5481_v13 }
  0xc0   : >> { %v660_v15 = vmul.f32 %v658_v8, %v5479_v12  ;;  %v685_v18 = vmul.f32 %v684_v17, %v5475_v10  ;;  %v662_v19 = vmul.f32 %v658_v8, %v5485_v16  ;;  %v712_v27 = vmul.f32 %v710_v22, %v5479_v12 }
  0xc1   : >> { %385 = vrot.lane.b32.xlu0 %v375_v20, %s5384_s16  ;;  %383 = vrot.lane.b32.xlu1 %v374_v21, %s5384_s16  ;;  %v687_v20 = vmul.f32 %v684_v17, %v5481_v13  ;;  %v686_v21 = vmul.f32 %v684_v17, %v5479_v12  ;;  %v714_v32 = vmul.f32 %v710_v22, %v5485_v16  ;;  %v762_v37 = vstv %s5047_s6  ;;  %s5074_s6 = sld [smem:[#allocation3 + $0x33]] }
  0xc5   : >> { %407 = vrot.lane.b32.xlu0 %v399_v23, %s5384_s16  ;;  %387 = vrot.lane.b32.xlu1 %v376_v24, %s5384_s16  ;;  %v711_v23 = vmul.f32 %v710_v22, %v5475_v10  ;;  %v688_v24 = vmul.f32 %v684_v17, %v5485_v16 }
  0xc9   : >> { %411 = vrot.lane.b32.xlu0 %v401_v25, %s5384_s16  ;;  %409 = vrot.lane.b32.xlu1 %v400_v26, %s5384_s16  ;;  %v713_v26 = vmul.f32 %v710_v22, %v5481_v13  ;;  %v892_v22 = vstv %s5052_s15  ;;  %s5935_s15 = sld [smem:[#allocation3 + $0x1]] }
  0xcd   : >> { %433 = vrot.lane.b32.xlu0 %v425_v28, %s5384_s16  ;;  %413 = vrot.lane.b32.xlu1 %v402_v29, %s5384_s16  ;;  %v736_v28 = vstv %s5046_s4  ;;  %s5073_s4 = sld [smem:[#allocation3 + $0x32]] }
  0xd1   : >> { %437 = vrot.lane.b32.xlu0 %v427_v30, %s5384_s16  ;;  %435 = vrot.lane.b32.xlu1 %v426_v31, %s5384_s16  ;;  %v737_v31 = vmul.f32 %v736_v28, %v5475_v10 }
  0xd5   : >> { %459 = vrot.lane.b32.xlu0 %v451_v33, %s5384_s16  ;;  %439 = vrot.lane.b32.xlu1 %v428_v34, %s5384_s16 }
  0xd9   : >> { %463 = vrot.lane.b32.xlu0 %v453_v35, %s5384_s16  ;;  %461 = vrot.lane.b32.xlu1 %v452_v36, %s5384_s16  ;;  %v739_v35 = vmul.f32 %v736_v28, %v5481_v13  ;;  %v738_v36 = vmul.f32 %v736_v28, %v5479_v12 }
  0xdd   : >> { %485 = vrot.lane.b32.xlu0 %v477_v38, %s5384_s16  ;;  %465 = vrot.lane.b32.xlu1 %v454_v39, %s5384_s16 }
  0xe1   : >> { %489 = vrot.lane.b32.xlu0 %v479_v40, %s5384_s16  ;;  %487 = vrot.lane.b32.xlu1 %v478_v41, %s5384_s16  ;;  %v763_v40 = vmul.f32 %v762_v37, %v5475_v10  ;;  %v740_v41 = vmul.f32 %v736_v28, %v5485_v16 }
  0xe5   : >> { %511 = vrot.lane.b32.xlu0 %v503_v43, %s5384_s16  ;;  %491 = vrot.lane.b32.xlu1 %v480_v44, %s5384_s16  ;;  %v765_v44 = vmul.f32 %v762_v37, %v5481_v13 }
  0xe9   : >> { %515 = vrot.lane.b32.xlu0 %v505_v45, %s5384_s16  ;;  %513 = vrot.lane.b32.xlu1 %v504_v46, %s5384_s16  ;;  %v764_v45 = vmul.f32 %v762_v37, %v5479_v12  ;;  %v788_v46 = vstv %s5048_s7  ;;  %s5923_s7 = sld [smem:[#allocation5]] }
  0xed   : >> { %537 = vrot.lane.b32.xlu0 %v529_v48, %s5384_s16  ;;  %517 = vrot.lane.b32.xlu1 %v506_v49, %s5384_s16  ;;  %v789_v49 = vmul.f32 %v788_v46, %v5475_v10 }
  0xf1   : >> { %541 = vrot.lane.b32.xlu0 %v531_v50, %s5384_s16  ;;  %539 = vrot.lane.b32.xlu1 %v530_v51, %s5384_s16  ;;  %v766_v50 = vmul.f32 %v762_v37, %v5485_v16 }
  0xf5   : >> { %563 = vrot.lane.b32.xlu0 %v555_v53, %s5385_s25  ;;  %543 = vrot.lane.b32.xlu1 %v532_v54, %s5384_s16  ;;  %v791_v53 = vmul.f32 %v788_v46, %v5481_v13  ;;  %v790_v54 = vmul.f32 %v788_v46, %v5479_v12 }
  0xf9   : >> { %567 = vrot.lane.b32.xlu0 %v557_v55, %s5385_s25  ;;  %565 = vrot.lane.b32.xlu1 %v556_v56, %s5385_s25  ;;  %v814_v55 = vstv %s5049_s11  ;;  %s5931_s11 = sld [smem:[#allocation3]] }
  0xfa   : >> { %v817_v62 = vmul.f32 %v814_v55, %v5481_v13 }
  0xfd   : >> { %589 = vrot.lane.b32.xlu0 %v581_v58, %s5385_s25  ;;  %569 = vrot.lane.b32.xlu1 %v558_v59, %s5385_s25  ;;  %v815_v58 = vmul.f32 %v814_v55, %v5475_v10  ;;  %v792_v59 = vmul.f32 %v788_v46, %v5485_v16 }
 0x101   : >> { %593 = vrot.lane.b32.xlu0 %v583_v60, %s5385_s25  ;;  %591 = vrot.lane.b32.xlu1 %v582_v61, %s5385_s25 }
 0x105   : >> { %615 = vrot.lane.b32.xlu0 %v607_v63, %s5385_s25  ;;  %595 = vrot.lane.b32.xlu1 %v584_v0, %s5385_s25  ;;  %v816_v63 = vmul.f32 %v814_v55, %v5479_v12  ;;  %v840_v0 = vstv %s5050_s13  ;;  %s5075_s13 = sld [smem:[#allocation3 + $0x34]] }
 0x106   : >> { %v841_v3 = vmul.f32 %v840_v0, %v5475_v10  ;;  %v842_v8 = vmul.f32 %v840_v0, %v5479_v12  ;;  %v844_v17 = vmul.f32 %v840_v0, %v5485_v16 }
 0x109   : >> { %619 = vrot.lane.b32.xlu0 %v609_v1, %s5385_s25  ;;  %617 = vrot.lane.b32.xlu1 %v608_v2, %s5385_s25 }
 0x10d   : >> { %641 = vrot.lane.b32.xlu0 %v633_v4, %s5385_s25  ;;  %621 = vrot.lane.b32.xlu1 %v610_v5, %s5385_s25  ;;  %v818_v4 = vmul.f32 %v814_v55, %v5485_v16 }
 0x111   : >> { %645 = vrot.lane.b32.xlu0 %v635_v6, %s5385_s25  ;;  %643 = vrot.lane.b32.xlu1 %v634_v7, %s5385_s25  ;;  %v843_v7 = vmul.f32 %v840_v0, %v5481_v13 }
 0x115   : >> { %667 = vrot.lane.b32.xlu0 %v659_v9, %s5385_s25  ;;  %647 = vrot.lane.b32.xlu1 %v636_v11, %s5385_s25  ;;  %v866_v9 = vstv %s5051_s14  ;;  %s5933_s14 = sld [smem:[#allocation5 + $0x1]] }
 0x119   : >> { %671 = vrot.lane.b32.xlu0 %v661_v14, %s5385_s25  ;;  %669 = vrot.lane.b32.xlu1 %v660_v15, %s5385_s25  ;;  %v867_v15 = vmul.f32 %v866_v9, %v5475_v10 }
 0x11d   : >> { %693 = vrot.lane.b32.xlu0 %v685_v18, %s5385_s25  ;;  %673 = vrot.lane.b32.xlu1 %v662_v19, %s5385_s25 }
 0x121   : >> { %697 = vrot.lane.b32.xlu0 %v687_v20, %s5385_s25  ;;  %695 = vrot.lane.b32.xlu1 %v686_v21, %s5385_s25  ;;  %v869_v20 = vmul.f32 %v866_v9, %v5481_v13  ;;  %v868_v21 = vmul.f32 %v866_v9, %v5479_v12 }
 0x125   : >> { %719 = vrot.lane.b32.xlu0 %v711_v23, %s5385_s25  ;;  %699 = vrot.lane.b32.xlu1 %v688_v24, %s5385_s25 }
 0x126   : >> { %v5597_v25 = vpop.permute.xlu0 %355 }
 0x129   : >> { %723 = vrot.lane.b32.xlu0 %v713_v26, %s5385_s25  ;;  %721 = vrot.lane.b32.xlu1 %v712_v27, %s5385_s25  ;;  %v893_v26 = vmul.f32 %v892_v22, %v5475_v10  ;;  %v870_v27 = vmul.f32 %v866_v9, %v5485_v16 }
 0x12b   : >> { %v5603_v29 = vpop.permute.xlu1 %357  ;;  %v5605_v30 = vpop.permute.xlu0 %359 }
 0x12d   : >> { %745 = vrot.lane.b32.xlu0 %v737_v31, %s5385_s25  ;;  %725 = vrot.lane.b32.xlu1 %v714_v32, %s5385_s25  ;;  %v895_v32 = vmul.f32 %v892_v22, %v5481_v13 }
 0x12f   : >> { %v5611_v33 = vpop.permute.xlu1 %361  ;;  %v5613_v34 = vpop.permute.xlu0 %381 }
 0x131   : >> { %749 = vrot.lane.b32.xlu0 %v739_v35, %s5385_s25  ;;  %747 = vrot.lane.b32.xlu1 %v738_v36, %s5385_s25  ;;  %v894_v35 = vmul.f32 %v892_v22, %v5479_v12  ;;  %v918_v36 = vstv %s5053_s17  ;;  %s5939_s17 = sld [smem:[#allocation5 + $0x2]] }
 0x133   : >> { %v5619_v38 = vpop.permute.xlu1 %383  ;;  %v5621_v39 = vpop.permute.xlu0 %385 }
 0x135   : >> { %771 = vrot.lane.b32.xlu0 %v763_v40, %s5386_s10  ;;  %751 = vrot.lane.b32.xlu1 %v740_v41, %s5385_s25  ;;  %v919_v41 = vmul.f32 %v918_v36, %v5475_v10 }
 0x137   : >> { %v5627_v42 = vpop.permute.xlu1 %387  ;;  %v5629_v43 = vpop.permute.xlu0 %407 }
 0x139   : >> { %775 = vrot.lane.b32.xlu0 %v765_v44, %s5386_s10  ;;  %773 = vrot.lane.b32.xlu1 %v764_v45, %s5386_s10  ;;  %v896_v44 = vmul.f32 %v892_v22, %v5485_v16 }
 0x13b   : >> { %v5635_v47 = vpop.permute.xlu1 %409  ;;  %v5637_v48 = vpop.permute.xlu0 %411 }
 0x13c   : >> { %9498 = vst [vmem:[#allocation9_spill] sm:$0xff] %v5635_v47  ;;  %9499 = vst [vmem:[#allocation10_spill] sm:$0xff] %v5637_v48 }
 0x13d   : >> { %797 = vrot.lane.b32.xlu0 %v789_v49, %s5386_s10  ;;  %777 = vrot.lane.b32.xlu1 %v766_v50, %s5386_s10  ;;  %v921_v49 = vmul.f32 %v918_v36, %v5481_v13  ;;  %v920_v50 = vmul.f32 %v918_v36, %v5479_v12 }
 0x13f   : >> { %v5643_v51 = vpop.permute.xlu1 %413  ;;  %v5645_v52 = vpop.permute.xlu0 %433 }
 0x140   : >> { %9500 = vst [vmem:[#allocation11_spill] sm:$0xff] %v5643_v51  ;;  %9501 = vst [vmem:[#allocation12_spill] sm:$0xff] %v5645_v52 }
 0x141   : >> { %801 = vrot.lane.b32.xlu0 %v791_v53, %s5386_s10  ;;  %799 = vrot.lane.b32.xlu1 %v790_v54, %s5386_s10  ;;  %v944_v53 = vstv %s5054_s18  ;;  %s5941_s18 = sld [smem:[#allocation3 + $0x2]] }
 0x142   : >> { %v947_v0 = vmul.f32 %v944_v53, %v5481_v13 }
 0x143   : >> { %v5651_v56 = vpop.permute.xlu1 %435  ;;  %v5653_v57 = vpop.permute.xlu0 %437 }
 0x144   : >> { %9502 = vst [vmem:[#allocation13_spill] sm:$0xff] %v5651_v56  ;;  %9503 = vst [vmem:[#allocation14_spill] sm:$0xff] %v5653_v57 }
 0x145   : >> { %823 = vrot.lane.b32.xlu0 %v815_v58, %s5386_s10  ;;  %803 = vrot.lane.b32.xlu1 %v792_v59, %s5386_s10  ;;  %v945_v58 = vmul.f32 %v944_v53, %v5475_v10  ;;  %v922_v59 = vmul.f32 %v918_v36, %v5485_v16 }
 0x147   : >> { %v5659_v60 = vpop.permute.xlu1 %439  ;;  %v5661_v61 = vpop.permute.xlu0 %459 }
 0x148   : >> { %9504 = vst [vmem:[#allocation15_spill] sm:$0xff] %v5659_v60  ;;  %9505 = vst [vmem:[#allocation16_spill] sm:$0xff] %v5661_v61 }
 0x149   : >> { %827 = vrot.lane.b32.xlu0 %v817_v62, %s5386_s10  ;;  %825 = vrot.lane.b32.xlu1 %v816_v63, %s5386_s10 }
 0x14b   : >> { %v5667_v1 = vpop.permute.xlu1 %461  ;;  %v5669_v2 = vpop.permute.xlu0 %463 }
 0x14c   : >> { %9506 = vst [vmem:[#allocation17_spill] sm:$0xff] %v5667_v1  ;;  %9507 = vst [vmem:[#allocation18_spill] sm:$0xff] %v5669_v2 }
 0x14d   : >> { %849 = vrot.lane.b32.xlu0 %v841_v3, %s5386_s10  ;;  %829 = vrot.lane.b32.xlu1 %v818_v4, %s5386_s10  ;;  %v946_v3 = vmul.f32 %v944_v53, %v5479_v12  ;;  %v970_v4 = vstv %s5055_s19  ;;  %s5943_s19 = sld [smem:[#allocation5 + $0x3]] }
 0x14e   : >> { %v971_v9 = vmul.f32 %v970_v4, %v5475_v10  ;;  %v973_v22 = vmul.f32 %v970_v4, %v5481_v13 }
 0x14f   : >> { %v5675_v5 = vpop.permute.xlu1 %465  ;;  %v5677_v6 = vpop.permute.xlu0 %485 }
 0x150   : >> { %9508 = vst [vmem:[#allocation19_spill] sm:$0xff] %v5675_v5  ;;  %9509 = vst [vmem:[#allocation20_spill] sm:$0xff] %v5677_v6 }
 0x151   : >> { %853 = vrot.lane.b32.xlu0 %v843_v7, %s5386_s10  ;;  %851 = vrot.lane.b32.xlu1 %v842_v8, %s5386_s10 }
 0x153   : >> { %v5683_v11 = vpop.permute.xlu1 %487  ;;  %v5685_v14 = vpop.permute.xlu0 %489 }
 0x154   : >> { %9510 = vst [vmem:[#allocation21_spill] sm:$0xff] %v5683_v11  ;;  %9511 = vst [vmem:[#allocation22_spill] sm:$0xff] %v5685_v14 }
 0x155   : >> { %875 = vrot.lane.b32.xlu0 %v867_v15, %s5386_s10  ;;  %855 = vrot.lane.b32.xlu1 %v844_v17, %s5386_s10  ;;  %v948_v15 = vmul.f32 %v944_v53, %v5485_v16  ;;  %v1022_v53 = vstv %s5057_s22  ;;  %s5953_s22 = sld [smem:[#allocation5 + $0x4]] }
 0x157   : >> { %v5691_v18 = vpop.permute.xlu1 %491  ;;  %v5693_v19 = vpop.permute.xlu0 %511 }
 0x158   : >> { %9512 = vst [vmem:[#allocation23_spill] sm:$0xff] %v5691_v18  ;;  %9513 = vst [vmem:[#allocation24_spill] sm:$0xff] %v5693_v19  ;;  %v1262_v19 = vstv %s5071_s29  ;;  %s5973_s29 = sld [smem:[#allocation3 + $0x35]] }
 0x159   : >> { %879 = vrot.lane.b32.xlu0 %v869_v20, %s5386_s10  ;;  %877 = vrot.lane.b32.xlu1 %v868_v21, %s5386_s10  ;;  %v972_v21 = vmul.f32 %v970_v4, %v5479_v12 }
 0x15b   : >> { %v5699_v23 = vpop.permute.xlu1 %513  ;;  %v5701_v24 = vpop.permute.xlu0 %515 }
 0x15c   : >> { %9514 = vst [vmem:[#allocation25_spill] sm:$0xff] %v5699_v23  ;;  %9515 = vst [vmem:[#allocation26_spill] sm:$0xff] %v5701_v24 }
 0x15d   : >> { %901 = vrot.lane.b32.xlu0 %v893_v26, %s5386_s10  ;;  %881 = vrot.lane.b32.xlu1 %v870_v27, %s5386_s10  ;;  %v996_v26 = vstv %s5056_s20  ;;  %s5945_s20 = sld [smem:[#allocation3 + $0x3]] }
 0x15e   : >> { %v997_v36 = vmul.f32 %v996_v26, %v5475_v10 }
 0x15f   : >> { %v5707_v28 = vpop.permute.xlu1 %517  ;;  %v5709_v31 = vpop.permute.xlu0 %537 }
 0x160   : >> { %9516 = vst [vmem:[#allocation27_spill] sm:$0xff] %v5707_v28  ;;  %9517 = vst [vmem:[#allocation28_spill] sm:$0xff] %v5709_v31  ;;  %v1100_v31 = vstv %s5060_s26  ;;  %s5959_s26 = sld [smem:[#allocation3 + $0x5]] }
 0x161   : >> { %905 = vrot.lane.b32.xlu0 %v895_v32, %s5386_s10  ;;  %903 = vrot.lane.b32.xlu1 %v894_v35, %s5386_s10  ;;  %v974_v35 = vmul.f32 %v970_v4, %v5485_v16 }
 0x163   : >> { %v5715_v37 = vpop.permute.xlu1 %539  ;;  %v5717_v40 = vpop.permute.xlu0 %541 }
 0x164   : >> { %9518 = vst [vmem:[#allocation29_spill] sm:$0xff] %v5715_v37  ;;  %9519 = vst [vmem:[#allocation30_spill] sm:$0xff] %v5717_v40 }
 0x165   : >> { %927 = vrot.lane.b32.xlu0 %v919_v41, %s5386_s10  ;;  %907 = vrot.lane.b32.xlu1 %v896_v44, %s5386_s10 }
 0x166   : >> { %v6009_v57 = vstv %s5959_s26  ;;  %s6452_s26 = sld [smem:[#allocation3 + $0x2e]] }
 0x167   : >> { %v5723_v45 = vpop.permute.xlu1 %543  ;;  %v5725_v46 = vpop.permute.xlu0 %563 }
 0x168   : >> { %9520 = vst [vmem:[#allocation31_spill] sm:$0xff] %v5723_v45 }
 0x169   : >> { %931 = vrot.lane.b32.xlu0 %v921_v49, %s5386_s10  ;;  %929 = vrot.lane.b32.xlu1 %v920_v50, %s5386_s10  ;;  %v998_v49 = vmul.f32 %v996_v26, %v5479_v12  ;;  %v999_v50 = vmul.f32 %v996_v26, %v5481_v13 }
 0x16b   : >> { %v5731_v54 = vpop.permute.xlu1 %565  ;;  %v5733_v55 = vpop.permute.xlu0 %567 }
 0x16d   : >> { %953 = vrot.lane.b32.xlu0 %v945_v58, %s5386_s10  ;;  %933 = vrot.lane.b32.xlu1 %v922_v59, %s5386_s10 }
 0x16f   : >> { %v5739_v62 = vpop.permute.xlu1 %569  ;;  %v5741_v63 = vpop.permute.xlu0 %589 }
 0x171   : >> { %957 = vrot.lane.b32.xlu0 %v947_v0, %s5386_s10  ;;  %955 = vrot.lane.b32.xlu1 %v946_v3, %s5386_s10  ;;  %v1000_v0 = vmul.f32 %v996_v26, %v5485_v16  ;;  %v1023_v3 = vmul.f32 %v1022_v53, %v5475_v10 }
 0x173   : >> { %v5747_v7 = vpop.permute.xlu1 %591  ;;  %v5749_v8 = vpop.permute.xlu0 %593 }
 0x175   : >> { %979 = vrot.lane.b32.xlu0 %v971_v9, %s5387_s21  ;;  %959 = vrot.lane.b32.xlu1 %v948_v15, %s5386_s10  ;;  %v1024_v15 = vmul.f32 %v1022_v53, %v5479_v12 }
 0x177   : >> { %v5755_v17 = vpop.permute.xlu1 %595  ;;  %v5757_v20 = vpop.permute.xlu0 %615 }
 0x178   : >> { %9521 = vst [vmem:[#allocation32_spill] sm:$0xff] %v5755_v17  ;;  %9522 = vst [vmem:[#allocation33_spill] sm:$0xff] %v5757_v20 }
 0x179   : >> { %981 = vrot.lane.b32.xlu1 %v972_v21, %s5387_s21  ;;  %983 = vrot.lane.b32.xlu0 %v973_v22, %s5387_s21  ;;  %v1025_v21 = vmul.f32 %v1022_v53, %v5481_v13  ;;  %v1048_v22 = vstv %s5058_s23  ;;  %s5955_s23 = sld [smem:[#allocation3 + $0x4]] }
 0x17b   : >> { %v5763_v27 = vpop.permute.xlu1 %617  ;;  %v5765_v32 = vpop.permute.xlu0 %619 }
 0x17c   : >> { %9523 = vst [vmem:[#allocation34_spill] sm:$0xff] %v5763_v27  ;;  %9524 = vst [vmem:[#allocation35_spill] sm:$0xff] %v5765_v32  ;;  %v1392_v27 = vstv %s5973_s29  ;;  %s6539_s29 = sld [smem:[#allocation3 + $0x3e]] }
 0x17d   : >> { %985 = vrot.lane.b32.xlu1 %v974_v35, %s5387_s21  ;;  %1005 = vrot.lane.b32.xlu0 %v997_v36, %s5387_s21  ;;  %v1026_v36 = vmul.f32 %v1022_v53, %v5485_v16 }
 0x17f   : >> { %v5771_v41 = vpop.permute.xlu1 %621  ;;  %v5773_v44 = vpop.permute.xlu0 %641 }
 0x180   : >> { %9525 = vst [vmem:[#allocation36_spill] sm:$0xff] %v5771_v41  ;;  %9526 = vst [vmem:[#allocation37_spill] sm:$0xff] %v5773_v44 }
 0x181   : >> { %1007 = vrot.lane.b32.xlu1 %v998_v49, %s5387_s21  ;;  %1009 = vrot.lane.b32.xlu0 %v999_v50, %s5387_s21  ;;  %v1049_v49 = vmul.f32 %v1048_v22, %v5475_v10 }
 0x183   : >> { %v5779_v58 = vpop.permute.xlu1 %643  ;;  %v5781_v59 = vpop.permute.xlu0 %645 }
 0x184   : >> { %9527 = vst [vmem:[#allocation38_spill] sm:$0xff] %v5779_v58  ;;  %9528 = vst [vmem:[#allocation39_spill] sm:$0xff] %v5781_v59  ;;  %v5996_v59 = vstv %s5943_s19  ;;  %v6000_v58 = vstv %s5953_s22  ;;  %s6297_s19 = sld [smem:[#allocation3 + $0x3a]]  ;;  %s6359_s22 = sld [smem:[#allocation3 + $0x3b]] }
 0x185   : >> { %1011 = vrot.lane.b32.xlu1 %v1000_v0, %s5387_s21  ;;  %1031 = vrot.lane.b32.xlu0 %v1023_v3, %s5387_s21  ;;  %v1050_v3 = vmul.f32 %v1048_v22, %v5479_v12 }
 0x187   : >> { %v5787_v4 = vpop.permute.xlu1 %647  ;;  %v5789_v9 = vpop.permute.xlu0 %667 }
 0x188   : >> { %9529 = vst [vmem:[#allocation40_spill] sm:$0xff] %v5787_v4  ;;  %9530 = vst [vmem:[#allocation41_spill] sm:$0xff] %v5789_v9  ;;  %v1340_v4 = vstv %s5074_s6  ;;  %s6013_s6 = sld [smem:[#allocation3 + $0x36]] }
 0x189   : >> { %1033 = vrot.lane.b32.xlu1 %v1024_v15, %s5387_s21  ;;  %1035 = vrot.lane.b32.xlu0 %v1025_v21, %s5387_s21  ;;  %v1051_v15 = vmul.f32 %v1048_v22, %v5481_v13  ;;  %v1074_v21 = vstv %s5059_s24  ;;  %s5957_s24 = sld [smem:[#allocation5 + $0x5]] }
 0x18b   : >> { %v5795_v26 = vpop.permute.xlu1 %669  ;;  %v5797_v35 = vpop.permute.xlu0 %671 }
 0x18c   : >> { %9531 = vst [vmem:[#allocation42_spill] sm:$0xff] %v5795_v26  ;;  %9532 = vst [vmem:[#allocation43_spill] sm:$0xff] %v5797_v35  ;;  %v1314_v26 = vstv %s5073_s4  ;;  %s5977_s4 = sld [smem:[#allocation3 + $0x7]] }
 0x18d   : >> { %1037 = vrot.lane.b32.xlu1 %v1026_v36, %s5387_s21  ;;  %1057 = vrot.lane.b32.xlu0 %v1049_v49, %s5387_s21  ;;  %v1052_v36 = vmul.f32 %v1048_v22, %v5485_v16  ;;  %v1075_v49 = vmul.f32 %v1074_v21, %v5475_v10 }
 0x18f   : >> { %v5803_v50 = vpop.permute.xlu1 %673  ;;  %v5805_v0 = vpop.permute.xlu0 %693 }
 0x190   : >> { %9533 = vst [vmem:[#allocation44_spill] sm:$0xff] %v5803_v50  ;;  %9534 = vst [vmem:[#allocation45_spill] sm:$0xff] %v5805_v0  ;;  %v5895_v0 = vld [vmem:[#allocation2 + $0x19] sm:$0xf] }
 0x191   : >> { %1059 = vrot.lane.b32.xlu1 %v1050_v3, %s5387_s21  ;;  %1061 = vrot.lane.b32.xlu0 %v1051_v15, %s5387_s21  ;;  %v1076_v3 = vmul.f32 %v1074_v21, %v5479_v12  ;;  %v1077_v15 = vmul.f32 %v1074_v21, %v5481_v13  ;;  %v1344_v60 = vmul.f32 %v1340_v4, %v5895_v0 }
 0x193   : >> { %v5811_v53 = vpop.permute.xlu1 %695  ;;  %v5813_v45 = vpop.permute.xlu0 %697 }
 0x194   : >> { %9535 = vst [vmem:[#allocation46_spill] sm:$0xff] %v5811_v53  ;;  %9536 = vst [vmem:[#allocation47_spill] sm:$0xff] %v5813_v45  ;;  %v5883_v45 = vld [vmem:[#allocation2 + $0x9] sm:$0xff]  ;;  %v5885_v53 = vld [vmem:[#allocation2 + $0x11] sm:$0xff] }
 0x195   : >> { %1063 = vrot.lane.b32.xlu1 %v1052_v36, %s5387_s21  ;;  %1083 = vrot.lane.b32.xlu0 %v1075_v49, %s5387_s21  ;;  %v1078_v36 = vmul.f32 %v1074_v21, %v5485_v16  ;;  %v1101_v49 = vmul.f32 %v1100_v31, %v5475_v10  ;;  %v1265_v11 = vmul.f32 %v1262_v19, %v5885_v53 }
 0x197   : >> { %v5819_v40 = vpop.permute.xlu1 %699  ;;  %v5821_v37 = vpop.permute.xlu0 %719 }
 0x198   : >> { %9537 = vst [vmem:[#allocation48_spill] sm:$0xff] %v5819_v40  ;;  %9538 = vst [vmem:[#allocation49_spill] sm:$0xff] %v5821_v37  ;;  %v1126_v37 = vstv %s5061_s27  ;;  %v5873_v40 = vld [vmem:[#allocation2 + $0x1] sm:$0xff]  ;;  %s5963_s27 = sld [smem:[#allocation5 + $0x6]] }
 0x199   : >> { %1085 = vrot.lane.b32.xlu1 %v1076_v3, %s5387_s21  ;;  %1087 = vrot.lane.b32.xlu0 %v1077_v15, %s5387_s21  ;;  %v1102_v3 = vmul.f32 %v1100_v31, %v5479_v12  ;;  %v1103_v15 = vmul.f32 %v1100_v31, %v5481_v13  ;;  %v1263_v18 = vmul.f32 %v1262_v19, %v5873_v40 }
 0x19b   : >> { %v5827_v22 = vpop.permute.xlu1 %721  ;;  %v5829_v28 = vpop.permute.xlu0 %723 }
 0x19c   : >> { %9539 = vst [vmem:[#allocation50_spill] sm:$0xff] %v5827_v22  ;;  %9540 = vst [vmem:[#allocation51_spill] sm:$0xff] %v5829_v28  ;;  %v1152_v22 = vstv %s5062_s28  ;;  %s5965_s28 = sld [smem:[#allocation3 + $0x6]] }
 0x19d   : >> { %1089 = vrot.lane.b32.xlu1 %v1078_v36, %s5387_s21  ;;  %1109 = vrot.lane.b32.xlu0 %v1101_v49, %s5387_s21  ;;  %v1104_v36 = vmul.f32 %v1100_v31, %v5485_v16  ;;  %v1127_v49 = vmul.f32 %v1126_v37, %v5475_v10 }
 0x19f   : >> { %v5835_v24 = vpop.permute.xlu1 %725  ;;  %v5837_v23 = vpop.permute.xlu0 %745 }
 0x1a0   : >> { %9541 = vst [vmem:[#allocation52_spill] sm:$0xff] %v5835_v24  ;;  %9542 = vst [vmem:[#allocation53_spill] sm:$0xff] %v5837_v23 }
 0x1a1   : >> { %1111 = vrot.lane.b32.xlu1 %v1102_v3, %s5387_s21  ;;  %1113 = vrot.lane.b32.xlu0 %v1103_v15, %s5387_s21  ;;  %v1128_v3 = vmul.f32 %v1126_v37, %v5479_v12  ;;  %v1129_v15 = vmul.f32 %v1126_v37, %v5481_v13 }
 0x1a2   : >> { %v6021_v56 = vstv %s5965_s28  ;;  %s6510_s28 = sld [smem:[#allocation3 + $0x2f]] }
 0x1a3   : >> { %v5843_v21 = vpop.permute.xlu1 %747  ;;  %v5845_v28 = vpop.permute.xlu0 %749 }
 0x1a4   : >> { %9543 = vst [vmem:[#allocation54_spill] sm:$0xff] %v5843_v21  ;;  %9544 = vst [vmem:[#allocation55_spill] sm:$0xff] %v5845_v28 }
 0x1a5   : >> { %1115 = vrot.lane.b32.xlu1 %v1104_v36, %s5387_s21  ;;  %1135 = vrot.lane.b32.xlu0 %v1127_v49, %s5387_s21  ;;  %v1130_v36 = vmul.f32 %v1126_v37, %v5485_v16  ;;  %v1153_v49 = vmul.f32 %v1152_v22, %v5475_v10 }
 0x1a7   : >> { %v5851_v23 = vpop.permute.xlu1 %751  ;;  %v5853_v24 = vpop.permute.xlu0 %771 }
 0x1a8   : >> { %9545 = vst [vmem:[#allocation56_spill] sm:$0xff] %v5851_v23 }
 0x1a9   : >> { %1137 = vrot.lane.b32.xlu1 %v1128_v3, %s5387_s21  ;;  %1139 = vrot.lane.b32.xlu0 %v1129_v15, %s5387_s21  ;;  %v1154_v3 = vmul.f32 %v1152_v22, %v5479_v12  ;;  %v1155_v15 = vmul.f32 %v1152_v22, %v5481_v13 }
 0x1ab   : >> { %v5859_v31 = vpop.permute.xlu1 %773  ;;  %v5861_v28 = vpop.permute.xlu0 %775 }
 0x1ad   : >> { %1141 = vrot.lane.b32.xlu1 %v1130_v36, %s5387_s21  ;;  %1161 = vrot.lane.b32.xlu0 %v1153_v49, %s5387_s21  ;;  %v1156_v49 = vmul.f32 %v1152_v22, %v5485_v16  ;;  %v1288_v22 = vstv %s5072_s30  ;;  %s5975_s30 = sld [smem:[#allocation5 + $0x7]] }
 0x1ae   : >> { %v1289_v6 = vmul.f32 %v1288_v22, %v5873_v40 }
 0x1af   : >> { %v5867_v23 = vpop.permute.xlu1 %777  ;;  %v5869_v21 = vpop.permute.xlu0 %797 }
 0x1b1   : >> { %1163 = vrot.lane.b32.xlu1 %v1154_v3, %s5387_s21  ;;  %1165 = vrot.lane.b32.xlu0 %v1155_v15, %s5387_s21  ;;  %v1264_v15 = vmul.f32 %v1262_v19, %v5883_v45 }
 0x1b3   : >> { %v5877_v37 = vpop.permute.xlu1 %799  ;;  %v5879_v36 = vpop.permute.xlu0 %801 }
 0x1b4   : >> { %9546 = vst [vmem:[#allocation57_spill] sm:$0xff] %v5877_v37  ;;  %9547 = vst [vmem:[#allocation58_spill] sm:$0xff] %v5879_v36 }
 0x1b5   : >> { %1167 = vrot.lane.b32.xlu1 %v1156_v49, %s5387_s21  ;;  %1271 = vrot.lane.b32.xlu0 %v1263_v18, %s5384_s16  ;;  %v1266_v18 = vmul.f32 %v1262_v19, %v5895_v0 }
 0x1b7   : >> { %v5889_v14 = vpop.permute.xlu1 %803  ;;  %v5891_v3 = vpop.permute.xlu0 %823 }
 0x1b8   : >> { %9548 = vst [vmem:[#allocation59_spill] sm:$0xff] %v5889_v14  ;;  %9549 = vst [vmem:[#allocation60_spill] sm:$0xff] %v5891_v3 }
 0x1b9   : >> { %1273 = vrot.lane.b32.xlu1 %v1264_v15, %s5384_s16  ;;  %1275 = vrot.lane.b32.xlu0 %v1265_v11, %s5384_s16  ;;  %v1290_v15 = vmul.f32 %v1288_v22, %v5883_v45  ;;  %v1291_v11 = vmul.f32 %v1288_v22, %v5885_v53 }
 0x1bb   : >> { %v5899_v50 = vpop.permute.xlu1 %825  ;;  %v5901_v49 = vpop.permute.xlu0 %827 }
 0x1bc   : >> { %9550 = vst [vmem:[#allocation61_spill] sm:$0xff] %v5899_v50  ;;  %9551 = vst [vmem:[#allocation62_spill] sm:$0xff] %v5901_v49 }
 0x1bd   : >> { %1277 = vrot.lane.b32.xlu1 %v1266_v18, %s5384_s16  ;;  %1297 = vrot.lane.b32.xlu0 %v1289_v6, %s5384_s16  ;;  %v1292_v6 = vmul.f32 %v1288_v22, %v5895_v0  ;;  %v1315_v18 = vmul.f32 %v1314_v26, %v5873_v40 }
 0x1bf   : >> { %v5907_v5 = vpop.permute.xlu1 %829  ;;  %v5909_v35 = vpop.permute.xlu0 %849 }
 0x1c0   : >> { %9552 = vst [vmem:[#allocation63_spill] sm:$0xff] %v5907_v5  ;;  %9553 = vst [vmem:[#allocation64_spill] sm:$0xff] %v5909_v35  ;;  %v6003_v35 = vstv %s5955_s23  ;;  %v6006_v5 = vstv %s5957_s24  ;;  %s6390_s23 = sld [smem:[#allocation3 + $0x2d]]  ;;  %s6421_s24 = sld [smem:[#allocation3 + $0x3c]] }
 0x1c1   : >> { %1299 = vrot.lane.b32.xlu1 %v1290_v15, %s5384_s16  ;;  %1301 = vrot.lane.b32.xlu0 %v1291_v11, %s5384_s16  ;;  %v1316_v15 = vmul.f32 %v1314_v26, %v5883_v45  ;;  %v1317_v11 = vmul.f32 %v1314_v26, %v5885_v53 }
 0x1c3   : >> { %v5915_v19 = vpop.permute.xlu1 %851  ;;  %v5917_v2 = vpop.permute.xlu0 %853 }
 0x1c4   : >> { %9554 = vst [vmem:[#allocation65_spill] sm:$0xff] %v5915_v19  ;;  %9555 = vst [vmem:[#allocation66_spill] sm:$0xff] %v5917_v2  ;;  %v286_v2 = vstv %s5941_s18  ;;  %s6266_s18 = sld [smem:[#allocation3 + $0x2b]] }
 0x1c5   : >> { %1303 = vrot.lane.b32.xlu1 %v1292_v6, %s5384_s16  ;;  %1323 = vrot.lane.b32.xlu0 %v1315_v18, %s5384_s16  ;;  %v1318_v18 = vmul.f32 %v1314_v26, %v5895_v0  ;;  %v287_v14 = vmul.f32 %v286_v2, %v5475_v10  ;;  %v288_v47 = vmul.f32 %v286_v2, %v5479_v12 }
 0x1c6   : >> { %v289_v20 = vmul.f32 %v286_v2, %v5481_v13 }
 0x1c7   : >> { %v5925_v1 = vpop.permute.xlu1 %855  ;;  %v5927_v9 = vpop.permute.xlu0 %875 }
 0x1c8   : >> { %9556 = vst [vmem:[#allocation67_spill] sm:$0xff] %v5925_v1  ;;  %9557 = vst [vmem:[#allocation68_spill] sm:$0xff] %v5927_v9  ;;  %v1341_v9 = vmul.f32 %v1340_v4, %v5873_v40  ;;  %v5986_v1 = vstv %s5939_s17  ;;  %s6237_s17 = sld [smem:[#allocation3 + $0x39]] }
 0x1c9   : >> { %1325 = vrot.lane.b32.xlu1 %v1316_v15, %s5384_s16  ;;  %1327 = vrot.lane.b32.xlu0 %v1317_v11, %s5384_s16  ;;  %v1342_v11 = vmul.f32 %v1340_v4, %v5883_v45 }
 0x1cb   : >> { %v5947_v22 = vpop.permute.xlu1 %877  ;;  %v5949_v6 = vpop.permute.xlu0 %879 }
 0x1cc   : >> { %9558 = vst [vmem:[#allocation69_spill] sm:$0xff] %v5947_v22  ;;  %9559 = vst [vmem:[#allocation70_spill] sm:$0xff] %v5949_v6  ;;  %v1343_v6 = vmul.f32 %v1340_v4, %v5885_v53  ;;  %v1366_v22 = vstv %s5075_s13  ;;  %s6127_s13 = sld [smem:[#allocation3 + $0x29]] }
 0x1cd   : >> { %1329 = vrot.lane.b32.xlu1 %v1318_v18, %s5384_s16  ;;  %1349 = vrot.lane.b32.xlu0 %v1341_v9, %s5384_s16  ;;  %v246_v9 = vstv %s5923_s7  ;;  %v266_v18 = vstv %s5931_s11  ;;  %v1369_v50 = vmul.f32 %v1366_v22, %v5885_v53  ;;  %s6045_s7 = sld [smem:[#allocation3 + $0x37]]  ;;  %s6083_s11 = sld [smem:[#allocation3 + $0x28]] }
 0x1ce   : >> { %v267_v4 = vmul.f32 %v266_v18, %v5475_v10  ;;  %v269_v44 = vmul.f32 %v266_v18, %v5481_v13  ;;  %v270_v41 = vmul.f32 %v266_v18, %v5485_v16 }
 0x1cf   : >> { %v5967_v26 = vpop.permute.xlu1 %881  ;;  %v5969_v15 = vpop.permute.xlu0 %901 }
 0x1d0   : >> { %9560 = vst [vmem:[#allocation71_spill] sm:$0xff] %v5967_v26  ;;  %9561 = vst [vmem:[#allocation72_spill] sm:$0xff] %v5969_v15  ;;  %v248_v15 = vstv %s5933_s14  ;;  %v276_v26 = vstv %s5935_s15  ;;  %s6171_s14 = sld [smem:[#allocation3 + $0x38]]  ;;  %s6209_s15 = sld [smem:[#allocation3 + $0x2a]] }
 0x1d1   : >> { %1351 = vrot.lane.b32.xlu1 %v1342_v11, %s5384_s16  ;;  %1353 = vrot.lane.b32.xlu0 %v1343_v6, %s5384_s16  ;;  %v1367_v11 = vmul.f32 %v1366_v22, %v5873_v40  ;;  %v296_v6 = vstv %s5945_s20  ;;  %v277_v52 = vmul.f32 %v276_v26, %v5475_v10  ;;  %v278_v51 = vmul.f32 %v276_v26, %v5479_v12  ;;  %s6328_s20 = sld [smem:[#allocation3 + $0x2c]] }
 0x1d2   : >> { %v279_v32 = vmul.f32 %v276_v26, %v5481_v13  ;;  %v280_v3 = vmul.f32 %v276_v26, %v5485_v16  ;;  %v6051_v16 = vadd.f32 %v269_v44, %v246_v9  ;;  %v6053_v10 = vadd.f32 %v270_v41, %v246_v9  ;;  %v6067_v13 = vld [vmem:[#allocation2 + $0x18] sm:$0xf] }
 0x1d3   : >> { %v5989_v19 = vpop.permute.xlu1 %903  ;;  %v5991_v61 = vpop.permute.xlu0 %905  ;;  %v290_v41 = vmul.f32 %v6067_v13, %v286_v2  ;;  %v6089_v2 = vadd.f32 %v289_v20, %v5986_v1  ;;  %v1394_v20 = vmul.f32 %v1392_v27, %v5883_v45  ;;  %v310_v17 = vmul.f32 %v6067_v13, %v6003_v35 }
 0x1d4   : >> { %9562 = vst [vmem:[#allocation73_spill] sm:$0xff] %v5989_v19  ;;  %9563 = vst [vmem:[#allocation74_spill] sm:$0xff] %v5991_v61  ;;  %v268_v61 = vmul.f32 %v266_v18, %v5479_v12  ;;  %v6018_v19 = vstv %s5963_s27  ;;  %v6038_v18 = vstv %s5975_s30  ;;  %v6065_v12 = vadd.f32 %v279_v32, %v248_v15  ;;  %s6481_s27 = sld [smem:[#allocation3 + $0x3d]]  ;;  %s5086_s30 = sld [smem:[#allocation3 + $0x3f]] }
 0x1d5   : >> { %1355 = vrot.lane.b32.xlu1 %v1344_v60, %s5384_s16  ;;  %1375 = vrot.lane.b32.xlu0 %v1367_v11, %s5384_s16  ;;  %v1368_v11 = vmul.f32 %v1366_v22, %v5883_v45  ;;  %9566 = vst [vmem:[#allocation77_spill] sm:$0xff] %v6038_v18  ;;  %v6070_v44 = vadd.f32 %v280_v3, %v248_v15  ;;  %9571 = vst [vmem:[#allocation82_spill] sm:$0xff] %v6089_v2  ;;  %v6094_v3 = vld [vmem:[#allocation2 + $0x10] sm:$0xff] }
 0x1d6   : >> { %v6047_v48 = vadd.f32 %v268_v61, %v246_v9  ;;  %v6063_v61 = vadd.f32 %v278_v51, %v248_v15  ;;  %v6081_v51 = vstv %s6013_s6  ;;  %v6107_v2 = vadd.f32 %v290_v41, %v5986_v1  ;;  %s5088_s6 = sld [smem:[#allocation3 + $0x41]] }
 0x1d7   : >> { %v6025_v60 = vpop.permute.xlu1 %907  ;;  %v6027_v49 = vpop.permute.xlu0 %927 }
 0x1d8   : >> { %9564 = vst [vmem:[#allocation75_spill] sm:$0xff] %v6025_v60  ;;  %9565 = vst [vmem:[#allocation76_spill] sm:$0xff] %v6027_v49  ;;  %v6041_v60 = vstv %s5977_s4  ;;  %v271_v49 = vadd.f32 %v267_v4, %v246_v9  ;;  %v6061_v4 = vadd.f32 %v277_v52, %v248_v15  ;;  %v6073_v9 = vadd.f32 %v287_v14, %v5986_v1  ;;  %v6091_v14 = vld [vmem:[#allocation2 + $0x8] sm:$0xff]  ;;  %s5087_s4 = sld [smem:[#allocation3 + $0x40]] }
 0x1d9   : >> { %9567 = vst [vmem:[#allocation78_spill] sm:$0xff] %v6041_v60  ;;  %1377 = vrot.lane.b32.xlu1 %v1368_v11, %s5384_s16  ;;  %1379 = vrot.lane.b32.xlu0 %v1369_v50, %s5384_s16  ;;  %v1370_v50 = vmul.f32 %v1366_v22, %v5895_v0  ;;  %v1393_v11 = vmul.f32 %v1392_v27, %v5873_v40  ;;  %9574 = vst [vmem:[#allocation85_spill] sm:$0xff] %v6107_v2 }
 0x1da   : >> { %v6086_v52 = vadd.f32 %v288_v47, %v5986_v1  ;;  %v298_v32 = vmul.f32 %v6091_v14, %v296_v6  ;;  %v299_v15 = vmul.f32 %v6094_v3, %v296_v6  ;;  %v1395_v60 = vmul.f32 %v1392_v27, %v5885_v53 }
 0x1db   : >> { %v6055_v26 = vpop.permute.xlu1 %929  ;;  %v6057_v18 = vpop.permute.xlu0 %931  ;;  %v318_v36 = vmul.f32 %v6091_v14, %v6009_v57  ;;  %v6125_v1 = vstv %s6045_s7  ;;  %v367_v41 = vadd.f32 %v5597_v25, %v271_v49  ;;  %v1396_v25 = vmul.f32 %v1392_v27, %v5895_v0  ;;  %s5089_s7 = sld [smem:[#allocation3 + $0x42]] }
 0x1dc   : >> { %9568 = vst [vmem:[#allocation79_spill] sm:$0xff] %v6055_v26  ;;  %9569 = vst [vmem:[#allocation80_spill] sm:$0xff] %v6057_v18  ;;  %v6075_v18 = vld [vmem:[#allocation2] sm:$0xff]  ;;  %v1419_v49 = vmul.f32 %v6081_v51, %v5873_v40  ;;  %v320_v27 = vmul.f32 %v6067_v13, %v6009_v57 }
 0x1dd   : >> { %v297_v22 = vmul.f32 %v6075_v18, %v296_v6  ;;  %1381 = vrot.lane.b32.xlu1 %v1370_v50, %s5384_s16  ;;  %1401 = vrot.lane.b32.xlu0 %v1393_v11, %s5384_s16  ;;  %9570 = vst [vmem:[#allocation81_spill] sm:$0xff] %v6086_v52  ;;  %v300_v50 = vmul.f32 %v6067_v13, %v296_v6 }
 0x1de   : >> { %v307_v11 = vmul.f32 %v6075_v18, %v6003_v35  ;;  %v308_v52 = vmul.f32 %v6091_v14, %v6003_v35  ;;  %v309_v6 = vmul.f32 %v6094_v3, %v6003_v35  ;;  %v6131_v35 = vadd.f32 %v298_v32, %v5996_v59 }
 0x1df   : >> { %v6100_v26 = vpop.permute.xlu1 %933  ;;  %v6102_v47 = vpop.permute.xlu0 %953  ;;  %v6139_v2 = vadd.f32 %v300_v50, %v5996_v59  ;;  %v575_v50 = vadd.f32 %v5725_v46, %v367_v41  ;;  %v369_v46 = vadd.f32 %v5605_v30, %v6051_v16  ;;  %v1421_v30 = vmul.f32 %v6081_v51, %v5885_v53 }
 0x1e0   : >> { %9572 = vst [vmem:[#allocation83_spill] sm:$0xff] %v6100_v26  ;;  %9573 = vst [vmem:[#allocation84_spill] sm:$0xff] %v6102_v47  ;;  %v6116_v26 = vadd.f32 %v297_v22, %v5996_v59  ;;  %v317_v47 = vmul.f32 %v6075_v18, %v6009_v57  ;;  %v6134_v22 = vadd.f32 %v299_v15, %v5996_v59 }
 0x1e1   : >> { %1403 = vrot.lane.b32.xlu1 %v1394_v20, %s5384_s16  ;;  %1405 = vrot.lane.b32.xlu0 %v1395_v60, %s5384_s16  ;;  %v6142_v60 = vadd.f32 %v307_v11, %v6000_v58  ;;  %v6152_v32 = vadd.f32 %v308_v52, %v6000_v58  ;;  %v6155_v15 = vadd.f32 %v309_v6, %v6000_v58  ;;  %v1182_v52 = vstv %s6083_s11  ;;  %s5090_s11 = sld [smem:[#allocation3 + $0x43]] }
 0x1e2   : >> { %9575 = vst [vmem:[#allocation86_spill] sm:$0xff] %v6116_v26  ;;  %v319_v26 = vmul.f32 %v6094_v3, %v6009_v57  ;;  %v6158_v59 = vadd.f32 %v310_v17, %v6000_v58  ;;  %v6162_v11 = vadd.f32 %v317_v47, %v6006_v5  ;;  %v368_v17 = vadd.f32 %v5603_v29, %v6047_v48 }
 0x1e3   : >> { %v6144_v20 = vpop.permute.xlu1 %955  ;;  %v6146_v37 = vpop.permute.xlu0 %957  ;;  %v327_v57 = vmul.f32 %v6075_v18, %v6021_v56  ;;  %v328_v47 = vmul.f32 %v6091_v14, %v6021_v56  ;;  %v1420_v29 = vmul.f32 %v6081_v51, %v5883_v45 }
 0x1e4   : >> { %9576 = vst [vmem:[#allocation87_spill] sm:$0xff] %v6146_v37  ;;  %v6165_v37 = vadd.f32 %v318_v36, %v6006_v5  ;;  %v6179_v58 = vadd.f32 %v319_v26, %v6006_v5  ;;  %v783_v36 = vadd.f32 %v5853_v24, %v575_v50  ;;  %v576_v48 = vadd.f32 %v5731_v54, %v368_v17 }
 0x1e5   : >> { %1407 = vrot.lane.b32.xlu1 %v1396_v25, %s5384_s16  ;;  %1427 = vrot.lane.b32.xlu0 %v1419_v49, %s5384_s16  ;;  %v577_v24 = vadd.f32 %v5733_v55, %v369_v46  ;;  %v1183_v26 = vmul.f32 %v1182_v52, %v5873_v40  ;;  %v370_v25 = vadd.f32 %v5611_v33, %v6053_v10  ;;  %v6207_v54 = vstv %s6127_s13  ;;  %s5091_s13 = sld [smem:[#allocation3 + $0x44]] }
 0x1e6   : >> { %v6198_v49 = vadd.f32 %v320_v27, %v6006_v5  ;;  %v6202_v50 = vmul.f32 %v6094_v3, %v6021_v56  ;;  %v393_v55 = vadd.f32 %v5613_v34, %v6061_v4  ;;  %v784_v33 = vadd.f32 %v5859_v31, %v576_v48 }
 0x1e7   : >> { %v6186_v6 = vpop.permute.xlu1 %959  ;;  %v980_v41 = vpop.permute.xlu0 %979  ;;  %v785_v5 = vadd.f32 %v5861_v28, %v577_v24  ;;  %v1422_v46 = vmul.f32 %v6081_v51, %v5895_v0  ;;  %v578_v34 = vadd.f32 %v5739_v62, %v370_v25  ;;  %v395_v48 = vadd.f32 %v5621_v39, %v6065_v12 }
 0x1e8   : >> { %v991_v16 = vadd.f32 %v980_v41, %v783_v36  ;;  %v1445_v36 = vmul.f32 %v6125_v1, %v5873_v40  ;;  %v1184_v41 = vmul.f32 %v1182_v52, %v5883_v45  ;;  %v601_v31 = vadd.f32 %v5741_v63, %v393_v55 }
 0x1e9   : >> { %1429 = vrot.lane.b32.xlu1 %v1420_v29, %s5384_s16  ;;  %1431 = vrot.lane.b32.xlu0 %v1421_v30, %s5384_s16  ;;  %v1185_v29 = vmul.f32 %v1182_v52, %v5885_v53  ;;  %v394_v30 = vadd.f32 %v5619_v38, %v6063_v61  ;;  %v6230_v51 = vadd.f32 %v327_v57, %v6018_v19  ;;  %v6235_v24 = vstv %s6171_s14  ;;  %s5092_s14 = sld [smem:[#allocation3 + $0x45]] }
 0x1ea   : >> { %v6215_v10 = vadd.f32 %v1183_v26, %v991_v16  ;;  %v786_v62 = vadd.f32 %v5867_v23, %v578_v34  ;;  %v809_v63 = vadd.f32 %v5869_v21, %v601_v31  ;;  %v1446_v12 = vmul.f32 %v6125_v1, %v5883_v45  ;;  %v9579_v31 = vld [vmem:[#allocation32_spill] sm:$0xff] }
 0x1eb   : >> { %v982_v27 = vpop.permute.xlu1 %981  ;;  %v984_v17 = vpop.permute.xlu0 %983  ;;  %v1447_v57 = vmul.f32 %v6125_v1, %v5885_v53  ;;  %v1186_v26 = vmul.f32 %v1182_v52, %v5895_v0  ;;  %v1193_v23 = vmul.f32 %v6207_v54, %v5873_v40  ;;  %v602_v21 = vadd.f32 %v5747_v7, %v394_v30  ;;  %v9577_v7 = vld [vmem:[#allocation57_spill] sm:$0xff] }
 0x1ec   : >> { %v992_v28 = vadd.f32 %v982_v27, %v784_v33  ;;  %v993_v4 = vadd.f32 %v984_v17, %v785_v5  ;;  %v603_v25 = vadd.f32 %v5749_v8, %v395_v48  ;;  %v396_v5 = vadd.f32 %v5627_v42, %v6070_v44 }
 0x1ed   : >> { %1433 = vrot.lane.b32.xlu1 %v1422_v46, %s5384_s16  ;;  %1453 = vrot.lane.b32.xlu0 %v1445_v36, %s5384_s16  ;;  %v419_v27 = vadd.f32 %v5629_v43, %v6073_v9  ;;  %v6259_v17 = vadd.f32 %v328_v47, %v6018_v19  ;;  %v6264_v52 = vstv %s6209_s15  ;;  %v810_v8 = vadd.f32 %v9577_v7, %v602_v21  ;;  %v9578_v46 = vld [vmem:[#allocation58_spill] sm:$0xff]  ;;  %v9585_v21 = vld [vmem:[#allocation59_spill] sm:$0xff]  ;;  %s5093_s15 = sld [smem:[#allocation3 + $0x46]] }
 0x1ee   : >> { %v6241_v16 = vadd.f32 %v1184_v41, %v992_v28  ;;  %v6243_v38 = vadd.f32 %v1185_v29, %v993_v4  ;;  %v811_v36 = vadd.f32 %v9578_v46, %v603_v25  ;;  %v1448_v9 = vmul.f32 %v6125_v1, %v5895_v0  ;;  %v9580_v4 = vld [vmem:[#allocation33_spill] sm:$0xff]  ;;  %v9584_v1 = vld [vmem:[#allocation10_spill] sm:$0xff] }
 0x1ef   : >> { %v986_v39 = vpop.permute.xlu1 %985  ;;  %v1006_v61 = vpop.permute.xlu0 %1005  ;;  %v1471_v47 = vmul.f32 %v6235_v24, %v5873_v40  ;;  %v1194_v29 = vmul.f32 %v6207_v54, %v5883_v45  ;;  %v1195_v34 = vmul.f32 %v6207_v54, %v5885_v53  ;;  %v604_v28 = vadd.f32 %v9579_v31, %v396_v5 }
 0x1f0   : >> { %v994_v55 = vadd.f32 %v986_v39, %v786_v62  ;;  %v1017_v33 = vadd.f32 %v1006_v61, %v809_v63  ;;  %v627_v30 = vadd.f32 %v9580_v4, %v419_v27  ;;  %v9581_v63 = vld [vmem:[#allocation81_spill] sm:$0xff]  ;;  %v1473_v46 = vmul.f32 %v6235_v24, %v5885_v53  ;;  %v9590_v4 = vld [vmem:[#allocation11_spill] sm:$0xff] }
 0x1f1   : >> { %1455 = vrot.lane.b32.xlu1 %v1446_v12, %s5384_s16  ;;  %1457 = vrot.lane.b32.xlu0 %v1447_v57, %s5384_s16  ;;  %v9582_v39 = vld [vmem:[#allocation9_spill] sm:$0xff]  ;;  %v9583_v12 = vld [vmem:[#allocation82_spill] sm:$0xff]  ;;  %v812_v25 = vadd.f32 %v9585_v21, %v604_v28 }
 0x1f2   : >> { %v6270_v41 = vadd.f32 %v1186_v26, %v994_v55  ;;  %v6272_v42 = vadd.f32 %v1193_v23, %v1017_v33  ;;  %v420_v61 = vadd.f32 %v9582_v39, %v9581_v63  ;;  %v421_v57 = vadd.f32 %v9584_v1, %v9583_v12  ;;  %v9586_v55 = vld [vmem:[#allocation60_spill] sm:$0xff]  ;;  %v9589_v28 = vld [vmem:[#allocation85_spill] sm:$0xff]  ;;  %v9594_v1 = vld [vmem:[#allocation62_spill] sm:$0xff] }
 0x1f3   : >> { %v1008_v43 = vpop.permute.xlu1 %1007  ;;  %v1010_v44 = vpop.permute.xlu0 %1009  ;;  %v6290_v26 = vadd.f32 %v6202_v50, %v6018_v19  ;;  %v6295_v23 = vstv %s6237_s17  ;;  %v835_v33 = vadd.f32 %v9586_v55, %v627_v30  ;;  %v422_v30 = vadd.f32 %v9590_v4, %v9589_v28  ;;  %v9599_v28 = vld [vmem:[#allocation78_spill] sm:$0xff]  ;;  %s5094_s17 = sld [smem:[#allocation3 + $0x47]] }
 0x1f4   : >> { %v1018_v48 = vadd.f32 %v1008_v43, %v810_v8  ;;  %v1019_v62 = vadd.f32 %v1010_v44, %v811_v36  ;;  %v1472_v8 = vmul.f32 %v6235_v24, %v5883_v45  ;;  %v1196_v36 = vmul.f32 %v6207_v54, %v5895_v0  ;;  %v9587_v44 = vld [vmem:[#allocation34_spill] sm:$0xff] }
 0x1f5   : >> { %1459 = vrot.lane.b32.xlu1 %v1448_v9, %s5384_s16  ;;  %1479 = vrot.lane.b32.xlu0 %v1471_v47, %s5385_s25  ;;  %v1203_v43 = vmul.f32 %v6264_v52, %v5873_v40  ;;  %v628_v9 = vadd.f32 %v9587_v44, %v420_v61  ;;  %v9588_v47 = vld [vmem:[#allocation35_spill] sm:$0xff]  ;;  %v6321_v39 = vmul.f32 %v6067_v13, %v6021_v56  ;;  %v6326_v54 = vstv %s6266_s18  ;;  %v9593_v61 = vld [vmem:[#allocation61_spill] sm:$0xff]  ;;  %s5095_s18 = sld [smem:[#allocation3 + $0x48]] }
 0x1f6   : >> { %v6301_v5 = vadd.f32 %v1194_v29, %v1018_v48  ;;  %v6303_v27 = vadd.f32 %v1195_v34, %v1019_v62  ;;  %v629_v29 = vadd.f32 %v9588_v47, %v421_v57  ;;  %v9591_v48 = vld [vmem:[#allocation86_spill] sm:$0xff]  ;;  %v9592_v62 = vld [vmem:[#allocation12_spill] sm:$0xff]  ;;  %v9596_v44 = vld [vmem:[#allocation37_spill] sm:$0xff]  ;;  %v6352_v4 = vmul.f32 %v6075_v18, %v9599_v28 }
 0x1f7   : >> { %v1012_v7 = vpop.permute.xlu1 %1011  ;;  %v1032_v50 = vpop.permute.xlu0 %1031  ;;  %v445_v63 = vadd.f32 %v9592_v62, %v9591_v48  ;;  %v836_v12 = vadd.f32 %v9593_v61, %v628_v9  ;;  %v6357_v48 = vstv %s6297_s19  ;;  %s5096_s19 = sld [smem:[#allocation3 + $0x49]] }
 0x1f8   : >> { %v1020_v34 = vadd.f32 %v1012_v7, %v812_v25  ;;  %v1043_v31 = vadd.f32 %v1032_v50, %v835_v33  ;;  %v837_v57 = vadd.f32 %v9594_v1, %v629_v29  ;;  %v1474_v33 = vmul.f32 %v6235_v24, %v5895_v0  ;;  %v9597_v29 = vld [vmem:[#allocation13_spill] sm:$0xff]  ;;  %v9598_v24 = vld [vmem:[#allocation14_spill] sm:$0xff] }
 0x1f9   : >> { %1481 = vrot.lane.b32.xlu1 %v1472_v8, %s5385_s25  ;;  %1483 = vrot.lane.b32.xlu0 %v1473_v46, %s5385_s25  ;;  %v1497_v7 = vmul.f32 %v6295_v23, %v5873_v40  ;;  %v1204_v50 = vmul.f32 %v6264_v52, %v5883_v45  ;;  %v1205_v8 = vmul.f32 %v6264_v52, %v5885_v53  ;;  %v9595_v46 = vld [vmem:[#allocation36_spill] sm:$0xff] }
 0x1fa   : >> { %v6332_v21 = vadd.f32 %v1196_v36, %v1020_v34  ;;  %v6334_v25 = vadd.f32 %v1203_v43, %v1043_v31  ;;  %v630_v36 = vadd.f32 %v9595_v46, %v422_v30  ;;  %v653_v43 = vadd.f32 %v9596_v44, %v445_v63  ;;  %v9600_v30 = vld [vmem:[#allocation63_spill] sm:$0xff]  ;;  %v9601_v63 = vld [vmem:[#allocation64_spill] sm:$0xff] }
 0x1fb   : >> { %v1034_v55 = vpop.permute.xlu1 %1033  ;;  %v1036_v56 = vpop.permute.xlu0 %1035  ;;  %v446_v34 = vadd.f32 %v9597_v29, %v6131_v35  ;;  %v447_v31 = vadd.f32 %v9598_v24, %v6134_v22  ;;  %v1498_v1 = vmul.f32 %v6295_v23, %v5883_v45  ;;  %v9604_v44 = vld [vmem:[#allocation15_spill] sm:$0xff]  ;;  %v6383_v29 = vmul.f32 %v6091_v14, %v9599_v28 }
 0x1fc   : >> { %v1044_v9 = vadd.f32 %v1034_v55, %v836_v12  ;;  %v1045_v47 = vadd.f32 %v1036_v56, %v837_v57  ;;  %v838_v62 = vadd.f32 %v9600_v30, %v630_v36  ;;  %v861_v61 = vadd.f32 %v9601_v63, %v653_v43 }
 0x1fd   : >> { %1485 = vrot.lane.b32.xlu1 %v1474_v33, %s5385_s25  ;;  %1505 = vrot.lane.b32.xlu0 %v1497_v7, %s5385_s25  ;;  %v1499_v57 = vmul.f32 %v6295_v23, %v5885_v53  ;;  %v1206_v55 = vmul.f32 %v6264_v52, %v5895_v0  ;;  %v1213_v56 = vmul.f32 %v6326_v54, %v5873_v40  ;;  %v9602_v33 = vld [vmem:[#allocation38_spill] sm:$0xff]  ;;  %v6388_v52 = vstv %s6328_s20  ;;  %s5097_s20 = sld [smem:[#allocation3 + $0x4a]] }
 0x1fe   : >> { %v6363_v35 = vadd.f32 %v1204_v50, %v1044_v9  ;;  %v6365_v12 = vadd.f32 %v1205_v8, %v1045_v47  ;;  %v654_v7 = vadd.f32 %v9602_v33, %v446_v34  ;;  %v9603_v50 = vld [vmem:[#allocation39_spill] sm:$0xff]  ;;  %v448_v43 = vadd.f32 %v9604_v44, %v6139_v2  ;;  %v9605_v9 = vld [vmem:[#allocation16_spill] sm:$0xff]  ;;  %v9606_v34 = vld [vmem:[#allocation65_spill] sm:$0xff] }
 0x1ff   : >> { %v1038_v22 = vpop.permute.xlu1 %1037  ;;  %v1058_v18 = vpop.permute.xlu0 %1057  ;;  %v655_v8 = vadd.f32 %v9603_v50, %v447_v31  ;;  %v471_v47 = vadd.f32 %v9605_v9, %v6142_v60  ;;  %v9607_v31 = vld [vmem:[#allocation66_spill] sm:$0xff]  ;;  %v1500_v63 = vmul.f32 %v6295_v23, %v5895_v0  ;;  %v9610_v50 = vld [vmem:[#allocation17_spill] sm:$0xff]  ;;  %v6419_v44 = vstv %s6359_s22  ;;  %s5098_s22 = sld [smem:[#allocation3 + $0x4b]] }
 0x200   : >> { %v1046_v46 = vadd.f32 %v1038_v22, %v838_v62  ;;  %v1069_v36 = vadd.f32 %v1058_v18, %v861_v61  ;;  %v862_v24 = vadd.f32 %v9606_v34, %v654_v7  ;;  %v1523_v61 = vmul.f32 %v6357_v48, %v5873_v40  ;;  %v9611_v23 = vld [vmem:[#allocation18_spill] sm:$0xff] }
 0x201   : >> { %1507 = vrot.lane.b32.xlu1 %v1498_v1, %s5385_s25  ;;  %1509 = vrot.lane.b32.xlu0 %v1499_v57, %s5385_s25  ;;  %v863_v30 = vadd.f32 %v9607_v31, %v655_v8  ;;  %v1214_v22 = vmul.f32 %v6326_v54, %v5883_v45  ;;  %v1215_v18 = vmul.f32 %v6326_v54, %v5885_v53  ;;  %v9608_v1 = vld [vmem:[#allocation40_spill] sm:$0xff] }
 0x202   : >> { %v6394_v2 = vadd.f32 %v1206_v55, %v1046_v46  ;;  %v6396_v62 = vadd.f32 %v1213_v56, %v1069_v36  ;;  %v656_v57 = vadd.f32 %v9608_v1, %v448_v43  ;;  %v9609_v55 = vld [vmem:[#allocation41_spill] sm:$0xff]  ;;  %v472_v8 = vadd.f32 %v9610_v50, %v6152_v32  ;;  %v9612_v43 = vld [vmem:[#allocation67_spill] sm:$0xff] }
 0x203   : >> { %v1060_v60 = vpop.permute.xlu1 %1059  ;;  %v1062_v14 = vpop.permute.xlu0 %1061  ;;  %v679_v56 = vadd.f32 %v9609_v55, %v471_v47  ;;  %v473_v46 = vadd.f32 %v9611_v23, %v6155_v15  ;;  %v6414_v36 = vadd.f32 %v6321_v39, %v6018_v19  ;;  %v9613_v47 = vld [vmem:[#allocation68_spill] sm:$0xff]  ;;  %v1524_v39 = vmul.f32 %v6357_v48, %v5883_v45  ;;  %v9620_v50 = vld [vmem:[#allocation69_spill] sm:$0xff]  ;;  %v9621_v23 = vld [vmem:[#allocation70_spill] sm:$0xff] }
 0x204   : >> { %v1070_v33 = vadd.f32 %v1060_v60, %v862_v24  ;;  %v1071_v7 = vadd.f32 %v1062_v14, %v863_v30  ;;  %v864_v9 = vadd.f32 %v9612_v43, %v656_v57  ;;  %v1525_v31 = vmul.f32 %v6357_v48, %v5885_v53  ;;  %v9616_v14 = vld [vmem:[#allocation42_spill] sm:$0xff]  ;;  %v9618_v57 = vld [vmem:[#allocation19_spill] sm:$0xff] }
 0x205   : >> { %1511 = vrot.lane.b32.xlu1 %v1500_v63, %s5385_s25  ;;  %1531 = vrot.lane.b32.xlu0 %v1523_v61, %s5385_s25  ;;  %v887_v34 = vadd.f32 %v9613_v47, %v679_v56  ;;  %v1216_v30 = vmul.f32 %v6326_v54, %v5895_v0  ;;  %v1223_v60 = vmul.f32 %v6388_v52, %v5873_v40  ;;  %v9617_v61 = vld [vmem:[#allocation43_spill] sm:$0xff]  ;;  %v9619_v56 = vld [vmem:[#allocation20_spill] sm:$0xff]  ;;  %v6450_v54 = vstv %s6390_s23  ;;  %s5099_s23 = sld [smem:[#allocation3 + $0x4c]] }
 0x206   : >> { %v6425_v32 = vadd.f32 %v1214_v22, %v1070_v33  ;;  %v6427_v24 = vadd.f32 %v1215_v18, %v1071_v7  ;;  %v680_v63 = vadd.f32 %v9616_v14, %v472_v8  ;;  %v681_v22 = vadd.f32 %v9617_v61, %v473_v46 }
 0x207   : >> { %v1064_v15 = vpop.permute.xlu1 %1063  ;;  %v1084_v19 = vpop.permute.xlu0 %1083  ;;  %v474_v55 = vadd.f32 %v9618_v57, %v6158_v59  ;;  %v497_v33 = vadd.f32 %v9619_v56, %v6162_v11  ;;  %v6445_v7 = vmul.f32 %v6094_v3, %v9599_v28  ;;  %v1549_v47 = vmul.f32 %v6419_v44, %v5873_v40 }
 0x208   : >> { %9614 = vst [vmem:[#allocation57_spill] sm:$0xff] %v6425_v32  ;;  %9615 = vst [vmem:[#allocation58_spill] sm:$0xff] %v6427_v24  ;;  %v1072_v18 = vadd.f32 %v1064_v15, %v864_v9  ;;  %v1095_v1 = vadd.f32 %v1084_v19, %v887_v34  ;;  %v888_v8 = vadd.f32 %v9620_v50, %v680_v63  ;;  %v9624_v19 = vld [vmem:[#allocation44_spill] sm:$0xff]  ;;  %v9626_v63 = vld [vmem:[#allocation21_spill] sm:$0xff]  ;;  %v6479_v57 = vstv %s6421_s24  ;;  %s5100_s24 = sld [smem:[#allocation3 + $0x4d]] }
 0x209   : >> { %1533 = vrot.lane.b32.xlu1 %v1524_v39, %s5385_s25  ;;  %1535 = vrot.lane.b32.xlu0 %v1525_v31, %s5385_s25  ;;  %v889_v46 = vadd.f32 %v9621_v23, %v681_v22  ;;  %v1526_v9 = vmul.f32 %v6357_v48, %v5895_v0  ;;  %v1224_v34 = vmul.f32 %v6388_v52, %v5883_v45  ;;  %v9625_v31 = vld [vmem:[#allocation45_spill] sm:$0xff]  ;;  %v9627_v48 = vld [vmem:[#allocation22_spill] sm:$0xff] }
 0x20a   : >> { %v6456_v59 = vadd.f32 %v1216_v30, %v1072_v18  ;;  %v6458_v43 = vadd.f32 %v1223_v60, %v1095_v1  ;;  %v1225_v15 = vmul.f32 %v6388_v52, %v5885_v53  ;;  %v682_v39 = vadd.f32 %v9624_v19, %v474_v55  ;;  %v9628_v18 = vld [vmem:[#allocation77_spill] sm:$0xff]  ;;  %v9629_v55 = vld [vmem:[#allocation71_spill] sm:$0xff] }
 0x20b   : >> { %v1086_v11 = vpop.permute.xlu1 %1085  ;;  %v1088_v3 = vpop.permute.xlu0 %1087  ;;  %v705_v30 = vadd.f32 %v9625_v31, %v497_v33  ;;  %v498_v61 = vadd.f32 %v9626_v63, %v6165_v37  ;;  %v499_v22 = vadd.f32 %v9627_v48, %v6179_v58  ;;  %v341_v1 = vadd.f32 %v6352_v4, %v9628_v18  ;;  %v9630_v33 = vld [vmem:[#allocation72_spill] sm:$0xff]  ;;  %v9635_v31 = vld [vmem:[#allocation23_spill] sm:$0xff] }
 0x20c   : >> { %9622 = vst [vmem:[#allocation32_spill] sm:$0xff] %v6456_v59  ;;  %9623 = vst [vmem:[#allocation33_spill] sm:$0xff] %v6458_v43  ;;  %v1096_v60 = vadd.f32 %v1086_v11, %v888_v8  ;;  %v1097_v14 = vadd.f32 %v1088_v3, %v889_v46  ;;  %v890_v56 = vadd.f32 %v9629_v55, %v682_v39 }
 0x20d   : >> { %1537 = vrot.lane.b32.xlu1 %v1526_v9, %s5385_s25  ;;  %1557 = vrot.lane.b32.xlu0 %v1549_v47, %s5385_s25  ;;  %v913_v50 = vadd.f32 %v9630_v33, %v705_v30  ;;  %v1550_v4 = vmul.f32 %v6419_v44, %v5883_v45  ;;  %v1551_v46 = vmul.f32 %v6419_v44, %v5885_v53  ;;  %v9633_v9 = vld [vmem:[#allocation46_spill] sm:$0xff] }
 0x20e   : >> { %v6485_v8 = vadd.f32 %v1224_v34, %v1096_v60  ;;  %v6487_v37 = vadd.f32 %v1225_v15, %v1097_v14  ;;  %v1226_v11 = vmul.f32 %v6388_v52, %v5895_v0  ;;  %v1233_v3 = vmul.f32 %v6450_v54, %v5873_v40  ;;  %v9634_v34 = vld [vmem:[#allocation47_spill] sm:$0xff]  ;;  %v9636_v60 = vld [vmem:[#allocation24_spill] sm:$0xff] }
 0x20f   : >> { %v1090_v58 = vpop.permute.xlu1 %1089  ;;  %v1110_v23 = vpop.permute.xlu0 %1109  ;;  %v706_v47 = vadd.f32 %v9633_v9, %v498_v61  ;;  %v707_v15 = vadd.f32 %v9634_v34, %v499_v22  ;;  %v500_v30 = vadd.f32 %v9635_v31, %v6198_v49  ;;  %v523_v14 = vadd.f32 %v9636_v60, %v6230_v51  ;;  %v9637_v61 = vld [vmem:[#allocation73_spill] sm:$0xff]  ;;  %v9638_v22 = vld [vmem:[#allocation74_spill] sm:$0xff] }
 0x210   : >> { %9631 = vst [vmem:[#allocation81_spill] sm:$0xff] %v6485_v8  ;;  %9632 = vst [vmem:[#allocation9_spill] sm:$0xff] %v6487_v37  ;;  %v1098_v19 = vadd.f32 %v1090_v58, %v890_v56  ;;  %v1121_v39 = vadd.f32 %v1110_v23, %v913_v50  ;;  %v342_v63 = vadd.f32 %v6383_v29, %v9628_v18  ;;  %v6508_v52 = vstv %s6452_s26  ;;  %v9643_v34 = vld [vmem:[#allocation25_spill] sm:$0xff]  ;;  %s5101_s26 = sld [smem:[#allocation3 + $0x4e]] }
 0x211   : >> { %1559 = vrot.lane.b32.xlu1 %v1550_v4, %s5385_s25  ;;  %1561 = vrot.lane.b32.xlu0 %v1551_v46, %s5385_s25  ;;  %v914_v48 = vadd.f32 %v9637_v61, %v706_v47  ;;  %v915_v55 = vadd.f32 %v9638_v22, %v707_v15  ;;  %v1552_v29 = vmul.f32 %v6419_v44, %v5895_v0  ;;  %v9641_v4 = vld [vmem:[#allocation48_spill] sm:$0xff]  ;;  %v9644_v44 = vld [vmem:[#allocation26_spill] sm:$0xff]  ;;  %v6537_v31 = vstv %s6481_s27  ;;  %s5102_s27 = sld [smem:[#allocation3 + $0x4f]] }
 0x212   : >> { %v6514_v56 = vadd.f32 %v1226_v11, %v1098_v19  ;;  %v6516_v49 = vadd.f32 %v1233_v3, %v1121_v39  ;;  %v1575_v50 = vmul.f32 %v6479_v57, %v5873_v40  ;;  %v1234_v58 = vmul.f32 %v6450_v54, %v5883_v45  ;;  %v9642_v11 = vld [vmem:[#allocation49_spill] sm:$0xff] }
 0x213   : >> { %v1112_v51 = vpop.permute.xlu1 %1111  ;;  %v1114_v33 = vpop.permute.xlu0 %1113  ;;  %v1235_v23 = vmul.f32 %v6450_v54, %v5885_v53  ;;  %v708_v46 = vadd.f32 %v9641_v4, %v500_v30  ;;  %v731_v3 = vadd.f32 %v9642_v11, %v523_v14  ;;  %v524_v15 = vadd.f32 %v9643_v34, %v6259_v17  ;;  %v9645_v30 = vld [vmem:[#allocation75_spill] sm:$0xff]  ;;  %v9646_v14 = vld [vmem:[#allocation76_spill] sm:$0xff] }
 0x214   : >> { %9639 = vst [vmem:[#allocation82_spill] sm:$0xff] %v6514_v56  ;;  %9640 = vst [vmem:[#allocation10_spill] sm:$0xff] %v6516_v49  ;;  %v1122_v9 = vadd.f32 %v1112_v51, %v914_v48  ;;  %v1123_v47 = vadd.f32 %v1114_v33, %v915_v55  ;;  %v525_v19 = vadd.f32 %v9644_v44, %v6290_v26  ;;  %v9649_v33 = vld [vmem:[#allocation50_spill] sm:$0xff]  ;;  %v9653_v34 = vld [vmem:[#allocation79_spill] sm:$0xff]  ;;  %v1938_v49 = vstv %s5097_s20  ;;  %s7101_s20 = sld [smem:[#allocation3 + $0x53]] }
 0x215   : >> { %v340_v39 = vmul.f32 %v6067_v13, %v9599_v28  ;;  %1563 = vrot.lane.b32.xlu1 %v1552_v29, %s5385_s25  ;;  %1583 = vrot.lane.b32.xlu0 %v1575_v50, %s5385_s25  ;;  %v916_v60 = vadd.f32 %v9645_v30, %v708_v46  ;;  %v939_v61 = vadd.f32 %v9646_v14, %v731_v3  ;;  %v9650_v50 = vld [vmem:[#allocation51_spill] sm:$0xff]  ;;  %v9652_v3 = vld [vmem:[#allocation28_spill] sm:$0xff]  ;;  %v1964_v37 = vstv %s5098_s22  ;;  %s7127_s22 = sld [smem:[#allocation3 + $0x62]] }
 0x216   : >> { %v6543_v48 = vadd.f32 %v1234_v58, %v1122_v9  ;;  %v6545_v17 = vadd.f32 %v1235_v23, %v1123_v47  ;;  %v1576_v13 = vmul.f32 %v6479_v57, %v5883_v45  ;;  %v1577_v28 = vmul.f32 %v6479_v57, %v5885_v53  ;;  %v9651_v46 = vld [vmem:[#allocation27_spill] sm:$0xff]  ;;  %v9654_v44 = vld [vmem:[#allocation80_spill] sm:$0xff] }
 0x217   : >> { %v1116_v26 = vpop.permute.xlu1 %1115  ;;  %v1136_v22 = vpop.permute.xlu0 %1135  ;;  %v1236_v55 = vmul.f32 %v6450_v54, %v5895_v0  ;;  %v1243_v51 = vmul.f32 %v6508_v52, %v5873_v40  ;;  %v732_v29 = vadd.f32 %v9649_v33, %v524_v15  ;;  %v733_v58 = vadd.f32 %v9650_v50, %v525_v19 }
 0x218   : >> { %9647 = vst [vmem:[#allocation59_spill] sm:$0xff] %v6543_v48  ;;  %9648 = vst [vmem:[#allocation60_spill] sm:$0xff] %v6545_v17  ;;  %v1124_v23 = vadd.f32 %v1116_v26, %v916_v60  ;;  %v1147_v4 = vadd.f32 %v1136_v22, %v939_v61  ;;  %v526_v11 = vadd.f32 %v9651_v46, %v6414_v36  ;;  %v6565_v54 = vstv %s6510_s28  ;;  %v9657_v22 = vld [vmem:[#allocation52_spill] sm:$0xff]  ;;  %v9661_v46 = vld [vmem:[#allocation83_spill] sm:$0xff]  ;;  %s5111_s28 = sld [smem:[#allocation3 + $0x58]] }
 0x219   : >> { %v549_v9 = vadd.f32 %v9652_v3, %v341_v1  ;;  %v343_v47 = vadd.f32 %v6445_v7, %v9628_v18  ;;  %1585 = vrot.lane.b32.xlu1 %v1576_v13, %s5385_s25  ;;  %1587 = vrot.lane.b32.xlu0 %v1577_v28, %s5385_s25  ;;  %v940_v15 = vadd.f32 %v9653_v34, %v732_v29  ;;  %v9658_v28 = vld [vmem:[#allocation53_spill] sm:$0xff]  ;;  %v9662_v34 = vld [vmem:[#allocation84_spill] sm:$0xff]  ;;  %v1912_v17 = vstv %s5096_s19  ;;  %s7077_s19 = sld [smem:[#allocation3 + $0x61]] }
 0x21a   : >> { %v941_v19 = vadd.f32 %v9654_v44, %v733_v58  ;;  %v6569_v30 = vadd.f32 %v1236_v55, %v1124_v23  ;;  %v6571_v60 = vadd.f32 %v1243_v51, %v1147_v4  ;;  %v1578_v7 = vmul.f32 %v6479_v57, %v5895_v0  ;;  %v9659_v29 = vld [vmem:[#allocation29_spill] sm:$0xff]  ;;  %v9660_v58 = vld [vmem:[#allocation30_spill] sm:$0xff] }
 0x21b   : >> { %v1138_v36 = vpop.permute.xlu1 %1137  ;;  %v1140_v1 = vpop.permute.xlu0 %1139  ;;  %v1601_v14 = vmul.f32 %v6537_v31, %v5873_v40  ;;  %v1244_v61 = vmul.f32 %v6508_v52, %v5883_v45  ;;  %v1245_v26 = vmul.f32 %v6508_v52, %v5885_v53  ;;  %v734_v13 = vadd.f32 %v9657_v22, %v526_v11  ;;  %v9667_v22 = vld [vmem:[#allocation31_spill] sm:$0xff] }
 0x21c   : >> { %9655 = vst [vmem:[#allocation34_spill] sm:$0xff] %v6569_v30  ;;  %9656 = vst [vmem:[#allocation35_spill] sm:$0xff] %v6571_v60  ;;  %v757_v55 = vadd.f32 %v9658_v28, %v549_v9  ;;  %v1148_v51 = vadd.f32 %v1138_v36, %v940_v15  ;;  %v1149_v33 = vadd.f32 %v1140_v1, %v941_v19  ;;  %v1626_v4 = vstv %s6539_s29  ;;  %v9665_v36 = vld [vmem:[#allocation54_spill] sm:$0xff]  ;;  %s5112_s29 = sld [smem:[#allocation3 + $0x59]] }
 0x21d   : >> { %v550_v50 = vadd.f32 %v9659_v29, %v342_v63  ;;  %v551_v23 = vadd.f32 %v9660_v58, %v343_v47  ;;  %v344_v57 = vadd.f32 %v340_v39, %v9628_v18  ;;  %1589 = vrot.lane.b32.xlu1 %v1578_v7, %s5385_s25  ;;  %1609 = vrot.lane.b32.xlu0 %v1601_v14, %s5385_s25  ;;  %v9666_v7 = vld [vmem:[#allocation55_spill] sm:$0xff]  ;;  %v1886_v60 = vstv %s5095_s18  ;;  %s7054_s18 = sld [smem:[#allocation3 + $0x52]] }
 0x21e   : >> { %v942_v3 = vadd.f32 %v9661_v46, %v734_v13  ;;  %v965_v44 = vadd.f32 %v9662_v34, %v757_v55  ;;  %v6591_v11 = vadd.f32 %v1244_v61, %v1148_v51  ;;  %v6593_v9 = vadd.f32 %v1245_v26, %v1149_v33  ;;  %v9668_v55 = vld [vmem:[#allocation87_spill] sm:$0xff]  ;;  %v9671_v46 = vld [vmem:[#allocation56_spill] sm:$0xff] }
 0x21f   : >> { %v1142_v15 = vpop.permute.xlu1 %1141  ;;  %v1162_v19 = vpop.permute.xlu0 %1161  ;;  %v1602_v63 = vmul.f32 %v6537_v31, %v5883_v45  ;;  %v1603_v18 = vmul.f32 %v6537_v31, %v5885_v53  ;;  %v1246_v39 = vmul.f32 %v6508_v52, %v5895_v0  ;;  %v1253_v47 = vmul.f32 %v6565_v54, %v5873_v40 }
 0x220   : >> { %9663 = vst [vmem:[#allocation85_spill] sm:$0xff] %v6591_v11  ;;  %9664 = vst [vmem:[#allocation11_spill] sm:$0xff] %v6593_v9  ;;  %v758_v1 = vadd.f32 %v9665_v36, %v550_v50  ;;  %v759_v14 = vadd.f32 %v9666_v7, %v551_v23  ;;  %v1150_v61 = vadd.f32 %v1142_v15, %v942_v3  ;;  %v1652_v36 = vstv %s5086_s30  ;;  %s5113_s30 = sld [smem:[#allocation3 + $0x5a]] }
 0x221   : >> { %v1173_v26 = vadd.f32 %v1162_v19, %v965_v44  ;;  %v552_v13 = vadd.f32 %v9667_v22, %v344_v57  ;;  %1611 = vrot.lane.b32.xlu1 %v1602_v63, %s5385_s25  ;;  %1613 = vrot.lane.b32.xlu0 %v1603_v18, %s5385_s25  ;;  %v1604_v58 = vmul.f32 %v6537_v31, %v5895_v0  ;;  %v6653_v22 = vld [vmem:[#allocation2 + $0x9] sm:$0xff]  ;;  %v2178_v43 = vstv %s5111_s28  ;;  %s7262_s28 = sld [smem:[#allocation3 + $0x56]] }
 0x222   : >> { %v966_v28 = vadd.f32 %v6144_v20, %v758_v1  ;;  %v967_v52 = vadd.f32 %v9668_v55, %v759_v14  ;;  %v6610_v51 = vadd.f32 %v1246_v39, %v1150_v61  ;;  %v1627_v23 = vmul.f32 %v1626_v4, %v5873_v40  ;;  %v6644_v61 = vld [vmem:[#allocation2 + $0x1] sm:$0xff] }
 0x223   : >> { %v6612_v33 = vadd.f32 %v1253_v47, %v1173_v26  ;;  %v1164_v29 = vpop.permute.xlu1 %1163  ;;  %v1166_v50 = vpop.permute.xlu0 %1165  ;;  %v1254_v57 = vmul.f32 %v6565_v54, %v5883_v45  ;;  %v760_v3 = vadd.f32 %v9671_v46, %v552_v13  ;;  %v1255_v44 = vmul.f32 %v6565_v54, %v5885_v53 }
 0x224   : >> { %9669 = vst [vmem:[#allocation86_spill] sm:$0xff] %v6610_v51  ;;  %v1174_v34 = vadd.f32 %v1164_v29, %v966_v28  ;;  %v1175_v20 = vadd.f32 %v1166_v50, %v967_v52  ;;  %v1628_v18 = vmul.f32 %v1626_v4, %v5883_v45  ;;  %v1629_v39 = vmul.f32 %v1626_v4, %v5885_v53  ;;  %v6656_v28 = vld [vmem:[#allocation2 + $0x11] sm:$0xff]  ;;  %v6665_v29 = vld [vmem:[#allocation2 + $0x19] sm:$0xf] }
 0x225   : >> { %9670 = vst [vmem:[#allocation12_spill] sm:$0xff] %v6612_v33  ;;  %1615 = vrot.lane.b32.xlu1 %v1604_v58, %s5385_s25  ;;  %1635 = vrot.lane.b32.xlu0 %v1627_v23, %s5385_s25  ;;  %v968_v15 = vadd.f32 %v6186_v6, %v760_v3  ;;  %v1256_v1 = vmul.f32 %v6565_v54, %v5895_v0  ;;  %v1808_v33 = vstv %s5092_s14  ;;  %s5118_s14 = sld [smem:[#allocation3 + $0x5f]] }
 0x226   : >> { %v6625_v19 = vadd.f32 %v1254_v57, %v1174_v34  ;;  %v6627_v31 = vadd.f32 %v1255_v44, %v1175_v20  ;;  %v1630_v45 = vmul.f32 %v1626_v4, %v5895_v0  ;;  %v1653_v53 = vmul.f32 %v6644_v61, %v1652_v36 }
 0x227   : >> { %v1168_v40 = vpop.permute.xlu1 %1167  ;;  %v6629_v63 = vpop.permute.xlu0 %1271  ;;  %v1654_v13 = vmul.f32 %v6653_v22, %v1652_v36  ;;  %v1655_v0 = vmul.f32 %v6656_v28, %v1652_v36  ;;  %v1678_v4 = vstv %s5087_s4  ;;  %v1656_v50 = vmul.f32 %v6665_v29, %v1652_v36  ;;  %s5114_s4 = sld [smem:[#allocation3 + $0x5b]] }
 0x228   : >> { %9672 = vst [vmem:[#allocation61_spill] sm:$0xff] %v6625_v19  ;;  %9673 = vst [vmem:[#allocation62_spill] sm:$0xff] %v6627_v31  ;;  %v1176_v47 = vadd.f32 %v1168_v40, %v968_v15  ;;  %v1679_v58 = vmul.f32 %v6644_v61, %v1678_v4  ;;  %v1680_v46 = vmul.f32 %v6653_v22, %v1678_v4  ;;  %v1704_v34 = vstv %s5088_s6  ;;  %s5115_s6 = sld [smem:[#allocation3 + $0x5c]] }
 0x229   : >> { %1637 = vrot.lane.b32.xlu1 %v1628_v18, %s5385_s25  ;;  %1639 = vrot.lane.b32.xlu0 %v1629_v39, %s5385_s25  ;;  %v1681_v3 = vmul.f32 %v6656_v28, %v1678_v4  ;;  %v1682_v15 = vmul.f32 %v6665_v29, %v1678_v4  ;;  %v1705_v40 = vmul.f32 %v6644_v61, %v1704_v34 }
 0x22a   : >> { %v6637_v6 = vadd.f32 %v1256_v1, %v1176_v47  ;;  %v1706_v47 = vmul.f32 %v6653_v22, %v1704_v34  ;;  %v1707_v36 = vmul.f32 %v6656_v28, %v1704_v34  ;;  %v1730_v1 = vstv %s5089_s7  ;;  %s5116_s7 = sld [smem:[#allocation3 + $0x5d]] }
 0x22b   : >> { %v6639_v7 = vpop.permute.xlu1 %1273  ;;  %v6641_v14 = vpop.permute.xlu0 %1275 }
 0x22c   : >> { %9674 = vst [vmem:[#allocation36_spill] sm:$0xff] %v6637_v6 }
 0x22d   : >> { %1641 = vrot.lane.b32.xlu1 %v1630_v45, %s5385_s25  ;;  %1661 = vrot.lane.b32.xlu0 %v1653_v53, %s5385_s25 }
 0x22f   : >> { %v6649_v54 = vpop.permute.xlu1 %1277  ;;  %v6651_v26 = vpop.permute.xlu0 %1297 }
 0x231   : >> { %1663 = vrot.lane.b32.xlu1 %v1654_v13, %s5385_s25  ;;  %1665 = vrot.lane.b32.xlu0 %v1655_v0, %s5385_s25  ;;  %v1708_v13 = vmul.f32 %v6665_v29, %v1704_v34  ;;  %v1731_v0 = vmul.f32 %v6644_v61, %v1730_v1 }
 0x233   : >> { %v6661_v55 = vpop.permute.xlu1 %1299  ;;  %v6663_v52 = vpop.permute.xlu0 %1301 }
 0x235   : >> { %1667 = vrot.lane.b32.xlu1 %v1656_v50, %s5385_s25  ;;  %1687 = vrot.lane.b32.xlu0 %v1679_v58, %s5386_s10  ;;  %v1732_v58 = vmul.f32 %v6653_v22, %v1730_v1 }
 0x237   : >> { %v6671_v23 = vpop.permute.xlu1 %1303  ;;  %v6673_v57 = vpop.permute.xlu0 %1323 }
 0x239   : >> { %1689 = vrot.lane.b32.xlu1 %v1680_v46, %s5386_s10  ;;  %1691 = vrot.lane.b32.xlu0 %v1681_v3, %s5386_s10  ;;  %v1733_v46 = vmul.f32 %v6656_v28, %v1730_v1  ;;  %v1756_v3 = vstv %s5090_s11  ;;  %s5117_s11 = sld [smem:[#allocation3 + $0x5e]] }
 0x23b   : >> { %v6679_v20 = vpop.permute.xlu1 %1325  ;;  %v6681_v44 = vpop.permute.xlu0 %1327 }
 0x23d   : >> { %1693 = vrot.lane.b32.xlu1 %v1682_v15, %s5386_s10  ;;  %1713 = vrot.lane.b32.xlu0 %v1705_v40, %s5386_s10  ;;  %v1734_v40 = vmul.f32 %v6665_v29, %v1730_v1 }
 0x23f   : >> { %v6687_v18 = vpop.permute.xlu1 %1329  ;;  %v6689_v39 = vpop.permute.xlu0 %1349 }
 0x241   : >> { %1715 = vrot.lane.b32.xlu1 %v1706_v47, %s5386_s10  ;;  %1717 = vrot.lane.b32.xlu0 %v1707_v36, %s5386_s10  ;;  %v1757_v47 = vmul.f32 %v6644_v61, %v1756_v3 }
 0x243   : >> { %v6695_v45 = vpop.permute.xlu1 %1351  ;;  %v6697_v53 = vpop.permute.xlu0 %1353 }
 0x244   : >> { %9675 = vst [vmem:[#allocation37_spill] sm:$0xff] %v6695_v45  ;;  %9676 = vst [vmem:[#allocation13_spill] sm:$0xff] %v6697_v53  ;;  %v2230_v45 = vstv %s5113_s30  ;;  %s7316_s30 = sld [smem:[#allocation3 + $0x57]] }
 0x245   : >> { %1719 = vrot.lane.b32.xlu1 %v1708_v13, %s5386_s10  ;;  %1739 = vrot.lane.b32.xlu0 %v1731_v0, %s5386_s10  ;;  %v1758_v0 = vmul.f32 %v6653_v22, %v1756_v3 }
 0x247   : >> { %v6703_v4 = vpop.permute.xlu1 %1355  ;;  %v6705_v50 = vpop.permute.xlu0 %1375 }
 0x248   : >> { %9677 = vst [vmem:[#allocation14_spill] sm:$0xff] %v6703_v4  ;;  %9678 = vst [vmem:[#allocation78_spill] sm:$0xff] %v6705_v50  ;;  %v6917_v50 = vld [vmem:[#allocation2 + $0x2] sm:$0xff]  ;;  %v6927_v4 = vld [vmem:[#allocation2 + $0x12] sm:$0xff] }
 0x249   : >> { %1741 = vrot.lane.b32.xlu1 %v1732_v58, %s5386_s10  ;;  %1743 = vrot.lane.b32.xlu0 %v1733_v46, %s5386_s10  ;;  %v1759_v58 = vmul.f32 %v6656_v28, %v1756_v3  ;;  %v1782_v46 = vstv %s5091_s13  ;;  %v2181_v59 = vmul.f32 %v2178_v43, %v6927_v4  ;;  %s5103_s13 = sld [smem:[#allocation3 + $0x50]] }
 0x24b   : >> { %v6711_v34 = vpop.permute.xlu1 %1377  ;;  %v6713_v15 = vpop.permute.xlu0 %1379 }
 0x24c   : >> { %9679 = vst [vmem:[#allocation63_spill] sm:$0xff] %v6711_v34  ;;  %9680 = vst [vmem:[#allocation64_spill] sm:$0xff] %v6713_v15 }
 0x24d   : >> { %1745 = vrot.lane.b32.xlu1 %v1734_v40, %s5386_s10  ;;  %1765 = vrot.lane.b32.xlu0 %v1757_v47, %s5386_s10  ;;  %v1760_v40 = vmul.f32 %v6665_v29, %v1756_v3  ;;  %v1783_v47 = vmul.f32 %v6644_v61, %v1782_v46 }
 0x24f   : >> { %v6719_v36 = vpop.permute.xlu1 %1381  ;;  %v6721_v13 = vpop.permute.xlu0 %1401 }
 0x250   : >> { %9681 = vst [vmem:[#allocation38_spill] sm:$0xff] %v6719_v36  ;;  %9682 = vst [vmem:[#allocation39_spill] sm:$0xff] %v6721_v13 }
 0x251   : >> { %1767 = vrot.lane.b32.xlu1 %v1758_v0, %s5386_s10  ;;  %1769 = vrot.lane.b32.xlu0 %v1759_v58, %s5386_s10  ;;  %v1784_v0 = vmul.f32 %v6653_v22, %v1782_v46  ;;  %v1785_v58 = vmul.f32 %v6656_v28, %v1782_v46 }
 0x253   : >> { %v6727_v1 = vpop.permute.xlu1 %1403  ;;  %v6729_v6 = vpop.permute.xlu0 %1405 }
 0x254   : >> { %9683 = vst [vmem:[#allocation15_spill] sm:$0xff] %v6727_v1  ;;  %9684 = vst [vmem:[#allocation16_spill] sm:$0xff] %v6729_v6 }
 0x255   : >> { %1771 = vrot.lane.b32.xlu1 %v1760_v40, %s5386_s10  ;;  %1791 = vrot.lane.b32.xlu0 %v1783_v47, %s5386_s10  ;;  %v1786_v40 = vmul.f32 %v6665_v29, %v1782_v46  ;;  %v1809_v47 = vmul.f32 %v6644_v61, %v1808_v33 }
 0x257   : >> { %v6735_v31 = vpop.permute.xlu1 %1407  ;;  %v6737_v19 = vpop.permute.xlu0 %1427 }
 0x258   : >> { %9685 = vst [vmem:[#allocation65_spill] sm:$0xff] %v6735_v31  ;;  %9686 = vst [vmem:[#allocation66_spill] sm:$0xff] %v6737_v19  ;;  %v1834_v19 = vstv %s5093_s15  ;;  %s5104_s15 = sld [smem:[#allocation3 + $0x51]] }
 0x259   : >> { %1793 = vrot.lane.b32.xlu1 %v1784_v0, %s5386_s10  ;;  %1795 = vrot.lane.b32.xlu0 %v1785_v58, %s5386_s10  ;;  %v1810_v0 = vmul.f32 %v6653_v22, %v1808_v33  ;;  %v1811_v58 = vmul.f32 %v6656_v28, %v1808_v33 }
 0x25b   : >> { %v6743_v3 = vpop.permute.xlu1 %1429  ;;  %v6745_v51 = vpop.permute.xlu0 %1431 }
 0x25c   : >> { %9687 = vst [vmem:[#allocation40_spill] sm:$0xff] %v6743_v3  ;;  %9688 = vst [vmem:[#allocation41_spill] sm:$0xff] %v6745_v51  ;;  %v1860_v3 = vstv %s5094_s17  ;;  %s7034_s17 = sld [smem:[#allocation3 + $0x60]] }
 0x25d   : >> { %1797 = vrot.lane.b32.xlu1 %v1786_v40, %s5386_s10  ;;  %1817 = vrot.lane.b32.xlu0 %v1809_v47, %s5386_s10  ;;  %v1812_v40 = vmul.f32 %v6665_v29, %v1808_v33  ;;  %v1835_v47 = vmul.f32 %v6644_v61, %v1834_v19 }
 0x25f   : >> { %v6751_v9 = vpop.permute.xlu1 %1433  ;;  %v6753_v11 = vpop.permute.xlu0 %1453 }
 0x260   : >> { %9689 = vst [vmem:[#allocation17_spill] sm:$0xff] %v6751_v9  ;;  %9690 = vst [vmem:[#allocation18_spill] sm:$0xff] %v6753_v11 }
 0x261   : >> { %1819 = vrot.lane.b32.xlu1 %v1810_v0, %s5386_s10  ;;  %1821 = vrot.lane.b32.xlu0 %v1811_v58, %s5386_s10  ;;  %v1836_v0 = vmul.f32 %v6653_v22, %v1834_v19  ;;  %v1837_v58 = vmul.f32 %v6656_v28, %v1834_v19 }
 0x263   : >> { %v6759_v46 = vpop.permute.xlu1 %1455  ;;  %v6761_v51 = vpop.permute.xlu0 %1457 }
 0x264   : >> { %9691 = vst [vmem:[#allocation67_spill] sm:$0xff] %v6759_v46  ;;  %9692 = vst [vmem:[#allocation68_spill] sm:$0xff] %v6761_v51 }
 0x265   : >> { %1823 = vrot.lane.b32.xlu1 %v1812_v40, %s5386_s10  ;;  %1843 = vrot.lane.b32.xlu0 %v1835_v47, %s5386_s10  ;;  %v1838_v40 = vmul.f32 %v6665_v29, %v1834_v19  ;;  %v1861_v47 = vmul.f32 %v6644_v61, %v1860_v3 }
 0x267   : >> { %v6767_v11 = vpop.permute.xlu1 %1459  ;;  %v6769_v9 = vpop.permute.xlu0 %1479 }
 0x268   : >> { %9693 = vst [vmem:[#allocation42_spill] sm:$0xff] %v6767_v11 }
 0x269   : >> { %1845 = vrot.lane.b32.xlu1 %v1836_v0, %s5386_s10  ;;  %1847 = vrot.lane.b32.xlu0 %v1837_v58, %s5386_s10  ;;  %v1862_v0 = vmul.f32 %v6653_v22, %v1860_v3  ;;  %v1863_v58 = vmul.f32 %v6656_v28, %v1860_v3 }
 0x26b   : >> { %v6775_v33 = vpop.permute.xlu1 %1481  ;;  %v6777_v51 = vpop.permute.xlu0 %1483 }
 0x26d   : >> { %1849 = vrot.lane.b32.xlu1 %v1838_v40, %s5386_s10  ;;  %1869 = vrot.lane.b32.xlu0 %v1861_v47, %s5386_s10  ;;  %v1864_v40 = vmul.f32 %v6665_v29, %v1860_v3  ;;  %v1887_v47 = vmul.f32 %v6644_v61, %v1886_v60 }
 0x26f   : >> { %v6783_v11 = vpop.permute.xlu1 %1485  ;;  %v6785_v46 = vpop.permute.xlu0 %1505 }
 0x271   : >> { %1871 = vrot.lane.b32.xlu1 %v1862_v0, %s5386_s10  ;;  %1873 = vrot.lane.b32.xlu0 %v1863_v58, %s5386_s10  ;;  %v1888_v0 = vmul.f32 %v6653_v22, %v1886_v60  ;;  %v1889_v58 = vmul.f32 %v6656_v28, %v1886_v60 }
 0x273   : >> { %v6791_v19 = vpop.permute.xlu1 %1507  ;;  %v6793_v31 = vpop.permute.xlu0 %1509 }
 0x275   : >> { %1875 = vrot.lane.b32.xlu1 %v1864_v40, %s5386_s10  ;;  %1895 = vrot.lane.b32.xlu0 %v1887_v47, %s5387_s21  ;;  %v1890_v40 = vmul.f32 %v6665_v29, %v1886_v60  ;;  %v1913_v47 = vmul.f32 %v6644_v61, %v1912_v17 }
 0x277   : >> { %v6799_v30 = vpop.permute.xlu1 %1511  ;;  %v6801_v6 = vpop.permute.xlu0 %1531 }
 0x279   : >> { %1897 = vrot.lane.b32.xlu1 %v1888_v0, %s5387_s21  ;;  %1899 = vrot.lane.b32.xlu0 %v1889_v58, %s5387_s21  ;;  %v1914_v0 = vmul.f32 %v6653_v22, %v1912_v17  ;;  %v1915_v58 = vmul.f32 %v6656_v28, %v1912_v17 }
 0x27b   : >> { %v6807_v3 = vpop.permute.xlu1 %1533  ;;  %v6809_v1 = vpop.permute.xlu0 %1535 }
 0x27d   : >> { %1901 = vrot.lane.b32.xlu1 %v1890_v40, %s5387_s21  ;;  %1921 = vrot.lane.b32.xlu0 %v1913_v47, %s5387_s21  ;;  %v1916_v40 = vmul.f32 %v6665_v29, %v1912_v17  ;;  %v1939_v47 = vmul.f32 %v6644_v61, %v1938_v49 }
 0x27f   : >> { %v6815_v48 = vpop.permute.xlu1 %1537  ;;  %v6817_v13 = vpop.permute.xlu0 %1557 }
 0x280   : >> { %9694 = vst [vmem:[#allocation43_spill] sm:$0xff] %v6817_v13  ;;  %v2256_v13 = vstv %s5114_s4  ;;  %s7343_s4 = sld [smem:[#allocation3 + $0x66]] }
 0x281   : >> { %1923 = vrot.lane.b32.xlu1 %v1914_v0, %s5387_s21  ;;  %1925 = vrot.lane.b32.xlu0 %v1915_v58, %s5387_s21  ;;  %v1940_v0 = vmul.f32 %v6653_v22, %v1938_v49  ;;  %v1941_v58 = vmul.f32 %v6656_v28, %v1938_v49 }
 0x283   : >> { %v6823_v60 = vpop.permute.xlu1 %1559  ;;  %v6825_v36 = vpop.permute.xlu0 %1561 }
 0x284   : >> { %9695 = vst [vmem:[#allocation19_spill] sm:$0xff] %v6823_v60  ;;  %9696 = vst [vmem:[#allocation20_spill] sm:$0xff] %v6825_v36  ;;  %v6939_v36 = vld [vmem:[#allocation2 + $0x1a] sm:$0xf] }
 0x285   : >> { %1927 = vrot.lane.b32.xlu1 %v1916_v40, %s5387_s21  ;;  %1947 = vrot.lane.b32.xlu0 %v1939_v47, %s5387_s21  ;;  %v1942_v40 = vmul.f32 %v6665_v29, %v1938_v49  ;;  %v1965_v47 = vmul.f32 %v6644_v61, %v1964_v37 }
 0x287   : >> { %v6831_v56 = vpop.permute.xlu1 %1563  ;;  %v6833_v15 = vpop.permute.xlu0 %1583 }
 0x288   : >> { %9697 = vst [vmem:[#allocation69_spill] sm:$0xff] %v6831_v56  ;;  %9698 = vst [vmem:[#allocation70_spill] sm:$0xff] %v6833_v15  ;;  %v1990_v56 = vstv %s5099_s23  ;;  %s7154_s23 = sld [smem:[#allocation3 + $0x54]] }
 0x289   : >> { %1949 = vrot.lane.b32.xlu1 %v1940_v0, %s5387_s21  ;;  %1951 = vrot.lane.b32.xlu0 %v1941_v58, %s5387_s21  ;;  %v1966_v0 = vmul.f32 %v6653_v22, %v1964_v37  ;;  %v1967_v58 = vmul.f32 %v6656_v28, %v1964_v37 }
 0x28b   : >> { %v6839_v17 = vpop.permute.xlu1 %1585  ;;  %v6841_v34 = vpop.permute.xlu0 %1587 }
 0x28c   : >> { %9699 = vst [vmem:[#allocation44_spill] sm:$0xff] %v6839_v17  ;;  %9700 = vst [vmem:[#allocation45_spill] sm:$0xff] %v6841_v34  ;;  %v2016_v17 = vstv %s5100_s24  ;;  %s7181_s24 = sld [smem:[#allocation3 + $0x63]] }
 0x28d   : >> { %1953 = vrot.lane.b32.xlu1 %v1942_v40, %s5387_s21  ;;  %1973 = vrot.lane.b32.xlu0 %v1965_v47, %s5387_s21  ;;  %v1968_v40 = vmul.f32 %v6665_v29, %v1964_v37  ;;  %v1991_v47 = vmul.f32 %v6644_v61, %v1990_v56 }
 0x28f   : >> { %v6847_v8 = vpop.permute.xlu1 %1589  ;;  %v6849_v15 = vpop.permute.xlu0 %1609 }
 0x290   : >> { %9701 = vst [vmem:[#allocation21_spill] sm:$0xff] %v6847_v8  ;;  %9702 = vst [vmem:[#allocation22_spill] sm:$0xff] %v6849_v15 }
 0x291   : >> { %1975 = vrot.lane.b32.xlu1 %v1966_v0, %s5387_s21  ;;  %1977 = vrot.lane.b32.xlu0 %v1967_v58, %s5387_s21  ;;  %v1992_v0 = vmul.f32 %v6653_v22, %v1990_v56  ;;  %v1993_v58 = vmul.f32 %v6656_v28, %v1990_v56 }
 0x293   : >> { %v6855_v49 = vpop.permute.xlu1 %1611  ;;  %v6857_v34 = vpop.permute.xlu0 %1613 }
 0x294   : >> { %9703 = vst [vmem:[#allocation77_spill] sm:$0xff] %v6855_v49  ;;  %9704 = vst [vmem:[#allocation71_spill] sm:$0xff] %v6857_v34  ;;  %v2042_v49 = vstv %s5101_s26  ;;  %s7208_s26 = sld [smem:[#allocation3 + $0x55]] }
 0x295   : >> { %1979 = vrot.lane.b32.xlu1 %v1968_v40, %s5387_s21  ;;  %1999 = vrot.lane.b32.xlu0 %v1991_v47, %s5387_s21  ;;  %v1994_v40 = vmul.f32 %v6665_v29, %v1990_v56  ;;  %v2017_v47 = vmul.f32 %v6644_v61, %v2016_v17 }
 0x297   : >> { %v6863_v15 = vpop.permute.xlu1 %1615  ;;  %v6865_v8 = vpop.permute.xlu0 %1635 }
 0x298   : >> { %9705 = vst [vmem:[#allocation72_spill] sm:$0xff] %v6863_v15  ;;  %9706 = vst [vmem:[#allocation46_spill] sm:$0xff] %v6865_v8 }
 0x299   : >> { %2001 = vrot.lane.b32.xlu1 %v1992_v0, %s5387_s21  ;;  %2003 = vrot.lane.b32.xlu0 %v1993_v58, %s5387_s21  ;;  %v2018_v0 = vmul.f32 %v6653_v22, %v2016_v17  ;;  %v2019_v58 = vmul.f32 %v6656_v28, %v2016_v17 }
 0x29b   : >> { %v6871_v37 = vpop.permute.xlu1 %1637  ;;  %v6873_v34 = vpop.permute.xlu0 %1639 }
 0x29c   : >> { %9707 = vst [vmem:[#allocation47_spill] sm:$0xff] %v6871_v37  ;;  %9708 = vst [vmem:[#allocation23_spill] sm:$0xff] %v6873_v34  ;;  %v2068_v37 = vstv %s5102_s27  ;;  %s7235_s27 = sld [smem:[#allocation3 + $0x64]] }
 0x29d   : >> { %2005 = vrot.lane.b32.xlu1 %v1994_v40, %s5387_s21  ;;  %2025 = vrot.lane.b32.xlu0 %v2017_v47, %s5387_s21  ;;  %v2020_v40 = vmul.f32 %v6665_v29, %v2016_v17  ;;  %v2043_v47 = vmul.f32 %v6644_v61, %v2042_v49 }
 0x29f   : >> { %v6879_v8 = vpop.permute.xlu1 %1641  ;;  %v6881_v15 = vpop.permute.xlu0 %1661 }
 0x2a0   : >> { %9709 = vst [vmem:[#allocation24_spill] sm:$0xff] %v6879_v8  ;;  %9710 = vst [vmem:[#allocation73_spill] sm:$0xff] %v6881_v15 }
 0x2a1   : >> { %2027 = vrot.lane.b32.xlu1 %v2018_v0, %s5387_s21  ;;  %2029 = vrot.lane.b32.xlu0 %v2019_v58, %s5387_s21  ;;  %v2044_v0 = vmul.f32 %v6653_v22, %v2042_v49  ;;  %v2045_v58 = vmul.f32 %v6656_v28, %v2042_v49 }
 0x2a3   : >> { %v6887_v56 = vpop.permute.xlu1 %1663  ;;  %v6889_v34 = vpop.permute.xlu0 %1665 }
 0x2a4   : >> { %9711 = vst [vmem:[#allocation74_spill] sm:$0xff] %v6887_v56  ;;  %9712 = vst [vmem:[#allocation48_spill] sm:$0xff] %v6889_v34 }
 0x2a5   : >> { %2031 = vrot.lane.b32.xlu1 %v2020_v40, %s5387_s21  ;;  %2051 = vrot.lane.b32.xlu0 %v2043_v47, %s5387_s21  ;;  %v2046_v40 = vmul.f32 %v6665_v29, %v2042_v49  ;;  %v2069_v47 = vmul.f32 %v6644_v61, %v2068_v37 }
 0x2a7   : >> { %v6895_v15 = vpop.permute.xlu1 %1667  ;;  %v6897_v8 = vpop.permute.xlu0 %1687 }
 0x2a8   : >> { %9713 = vst [vmem:[#allocation49_spill] sm:$0xff] %v6895_v15 }
 0x2a9   : >> { %2053 = vrot.lane.b32.xlu1 %v2044_v0, %s5387_s21  ;;  %2055 = vrot.lane.b32.xlu0 %v2045_v58, %s5387_s21  ;;  %v2070_v0 = vmul.f32 %v6653_v22, %v2068_v37  ;;  %v2071_v58 = vmul.f32 %v6656_v28, %v2068_v37  ;;  %v6929_v22 = vld [vmem:[#allocation2 + $0xa] sm:$0xff] }
 0x2ab   : >> { %v6903_v17 = vpop.permute.xlu1 %1689  ;;  %v6905_v34 = vpop.permute.xlu0 %1691 }
 0x2ad   : >> { %2057 = vrot.lane.b32.xlu1 %v2046_v40, %s5387_s21  ;;  %2077 = vrot.lane.b32.xlu0 %v2069_v47, %s5387_s21  ;;  %v2072_v40 = vmul.f32 %v6665_v29, %v2068_v37  ;;  %v2179_v47 = vmul.f32 %v2178_v43, %v6917_v50  ;;  %v2204_v29 = vstv %s5112_s29  ;;  %s7289_s29 = sld [smem:[#allocation3 + $0x65]] }
 0x2ae   : >> { %v2205_v60 = vmul.f32 %v2204_v29, %v6917_v50 }
 0x2af   : >> { %v6911_v15 = vpop.permute.xlu1 %1693  ;;  %v6913_v56 = vpop.permute.xlu0 %1713 }
 0x2b1   : >> { %2079 = vrot.lane.b32.xlu1 %v2070_v0, %s5387_s21  ;;  %2081 = vrot.lane.b32.xlu0 %v2071_v58, %s5387_s21  ;;  %v2180_v58 = vmul.f32 %v2178_v43, %v6929_v22 }
 0x2b3   : >> { %v6921_v61 = vpop.permute.xlu1 %1715  ;;  %v6923_v49 = vpop.permute.xlu0 %1717 }
 0x2b5   : >> { %2083 = vrot.lane.b32.xlu1 %v2072_v40, %s5387_s21  ;;  %2187 = vrot.lane.b32.xlu0 %v2179_v47, %s5384_s16  ;;  %v2182_v47 = vmul.f32 %v2178_v43, %v6939_v36 }
 0x2b7   : >> { %v6933_v28 = vpop.permute.xlu1 %1719  ;;  %v6935_v0 = vpop.permute.xlu0 %1739 }
 0x2b9   : >> { %2189 = vrot.lane.b32.xlu1 %v2180_v58, %s5384_s16  ;;  %2191 = vrot.lane.b32.xlu0 %v2181_v59, %s5384_s16  ;;  %v2206_v58 = vmul.f32 %v2204_v29, %v6929_v22  ;;  %v2207_v59 = vmul.f32 %v2204_v29, %v6927_v4 }
 0x2bb   : >> { %v6943_v37 = vpop.permute.xlu1 %1741  ;;  %v6945_v40 = vpop.permute.xlu0 %1743 }
 0x2bd   : >> { %2193 = vrot.lane.b32.xlu1 %v2182_v47, %s5384_s16  ;;  %2213 = vrot.lane.b32.xlu0 %v2205_v60, %s5384_s16  ;;  %v2208_v60 = vmul.f32 %v2204_v29, %v6939_v36  ;;  %v2231_v47 = vmul.f32 %v2230_v45, %v6917_v50 }
 0x2bf   : >> { %v6951_v53 = vpop.permute.xlu1 %1745  ;;  %v6953_v24 = vpop.permute.xlu0 %1765 }
 0x2c0   : >> { %9714 = vst [vmem:[#allocation25_spill] sm:$0xff] %v6951_v53  ;;  %9715 = vst [vmem:[#allocation26_spill] sm:$0xff] %v6953_v24 }
 0x2c1   : >> { %2215 = vrot.lane.b32.xlu1 %v2206_v58, %s5384_s16  ;;  %2217 = vrot.lane.b32.xlu0 %v2207_v59, %s5384_s16  ;;  %v2232_v58 = vmul.f32 %v2230_v45, %v6929_v22  ;;  %v2233_v59 = vmul.f32 %v2230_v45, %v6927_v4 }
 0x2c3   : >> { %v6959_v43 = vpop.permute.xlu1 %1767  ;;  %v6961_v32 = vpop.permute.xlu0 %1769 }
 0x2c4   : >> { %9716 = vst [vmem:[#allocation75_spill] sm:$0xff] %v6959_v43  ;;  %9717 = vst [vmem:[#allocation76_spill] sm:$0xff] %v6961_v32  ;;  %v2282_v43 = vstv %s5115_s6  ;;  %s5126_s6 = sld [smem:[#allocation3 + $0x67]] }
 0x2c5   : >> { %2219 = vrot.lane.b32.xlu1 %v2208_v60, %s5384_s16  ;;  %2239 = vrot.lane.b32.xlu0 %v2231_v47, %s5384_s16  ;;  %v2234_v60 = vmul.f32 %v2230_v45, %v6939_v36  ;;  %v2257_v47 = vmul.f32 %v2256_v13, %v6917_v50 }
 0x2c7   : >> { %v6967_v24 = vpop.permute.xlu1 %1771  ;;  %v6969_v53 = vpop.permute.xlu0 %1791 }
 0x2c8   : >> { %9718 = vst [vmem:[#allocation50_spill] sm:$0xff] %v6967_v24  ;;  %9719 = vst [vmem:[#allocation51_spill] sm:$0xff] %v6969_v53 }
 0x2c9   : >> { %2241 = vrot.lane.b32.xlu1 %v2232_v58, %s5384_s16  ;;  %2243 = vrot.lane.b32.xlu0 %v2233_v59, %s5384_s16  ;;  %v2258_v58 = vmul.f32 %v2256_v13, %v6929_v22  ;;  %v2259_v59 = vmul.f32 %v2256_v13, %v6927_v4 }
 0x2cb   : >> { %v6975_v29 = vpop.permute.xlu1 %1793  ;;  %v6977_v32 = vpop.permute.xlu0 %1795 }
 0x2cc   : >> { %9720 = vst [vmem:[#allocation27_spill] sm:$0xff] %v6975_v29  ;;  %9721 = vst [vmem:[#allocation28_spill] sm:$0xff] %v6977_v32  ;;  %v2308_v29 = vstv %s5116_s7  ;;  %s5127_s7 = sld [smem:[#allocation3 + $0x68]] }
 0x2cd   : >> { %2245 = vrot.lane.b32.xlu1 %v2234_v60, %s5384_s16  ;;  %2265 = vrot.lane.b32.xlu0 %v2257_v47, %s5384_s16  ;;  %v2260_v60 = vmul.f32 %v2256_v13, %v6939_v36  ;;  %v2283_v47 = vmul.f32 %v2282_v43, %v6917_v50 }
 0x2cf   : >> { %v6983_v53 = vpop.permute.xlu1 %1797  ;;  %v6985_v24 = vpop.permute.xlu0 %1817 }
 0x2d0   : >> { %9722 = vst [vmem:[#allocation79_spill] sm:$0xff] %v6983_v53  ;;  %9723 = vst [vmem:[#allocation80_spill] sm:$0xff] %v6985_v24 }
 0x2d1   : >> { %2267 = vrot.lane.b32.xlu1 %v2258_v58, %s5384_s16  ;;  %2269 = vrot.lane.b32.xlu0 %v2259_v59, %s5384_s16  ;;  %v2284_v58 = vmul.f32 %v2282_v43, %v6929_v22  ;;  %v2285_v59 = vmul.f32 %v2282_v43, %v6927_v4 }
 0x2d3   : >> { %v6991_v45 = vpop.permute.xlu1 %1819  ;;  %v6993_v32 = vpop.permute.xlu0 %1821 }
 0x2d4   : >> { %9724 = vst [vmem:[#allocation52_spill] sm:$0xff] %v6991_v45  ;;  %9725 = vst [vmem:[#allocation53_spill] sm:$0xff] %v6993_v32 }
 0x2d5   : >> { %2271 = vrot.lane.b32.xlu1 %v2260_v60, %s5384_s16  ;;  %2291 = vrot.lane.b32.xlu0 %v2283_v47, %s5384_s16  ;;  %v2286_v60 = vmul.f32 %v2282_v43, %v6939_v36  ;;  %v2309_v47 = vmul.f32 %v2308_v29, %v6917_v50  ;;  %v1283_v43 = vadd.f32 %v6629_v63, %v6215_v10 }
 0x2d6   : >> { %v1284_v10 = vadd.f32 %v6639_v7, %v6241_v16  ;;  %v1285_v63 = vadd.f32 %v6641_v14, %v6243_v38  ;;  %v1286_v38 = vadd.f32 %v6649_v54, %v6270_v41 }
 0x2d7   : >> { %v6999_v24 = vpop.permute.xlu1 %1823  ;;  %v7001_v53 = vpop.permute.xlu0 %1843 }
 0x2d8   : >> { %9726 = vst [vmem:[#allocation29_spill] sm:$0xff] %v6999_v24  ;;  %9727 = vst [vmem:[#allocation30_spill] sm:$0xff] %v7001_v53 }
 0x2d9   : >> { %2293 = vrot.lane.b32.xlu1 %v2284_v58, %s5384_s16  ;;  %2295 = vrot.lane.b32.xlu0 %v2285_v59, %s5384_s16  ;;  %v2310_v58 = vmul.f32 %v2308_v29, %v6929_v22  ;;  %v2311_v59 = vmul.f32 %v2308_v29, %v6927_v4 }
 0x2db   : >> { %v7007_v13 = vpop.permute.xlu1 %1845  ;;  %v7009_v32 = vpop.permute.xlu0 %1847 }
 0x2dc   : >> { %9728 = vst [vmem:[#allocation83_spill] sm:$0xff] %v7007_v13  ;;  %9729 = vst [vmem:[#allocation84_spill] sm:$0xff] %v7009_v32  ;;  %v2334_v13 = vstv %s5117_s11  ;;  %v1491_v32 = vadd.f32 %v6769_v9, %v1283_v43  ;;  %v2360_v43 = vstv %s5118_s14  ;;  %s5128_s11 = sld [smem:[#allocation3 + $0x69]]  ;;  %s5130_s14 = sld [smem:[#allocation3 + $0x6b]] }
 0x2dd   : >> { %2297 = vrot.lane.b32.xlu1 %v2286_v60, %s5384_s16  ;;  %2317 = vrot.lane.b32.xlu0 %v2309_v47, %s5384_s16  ;;  %v2336_v9 = vmul.f32 %v2334_v13, %v6929_v22  ;;  %v2338_v54 = vmul.f32 %v2334_v13, %v6939_v36 }
 0x2df   : >> { %v7015_v53 = vpop.permute.xlu1 %1849  ;;  %v7017_v24 = vpop.permute.xlu0 %1869 }
 0x2e0   : >> { %9730 = vst [vmem:[#allocation54_spill] sm:$0xff] %v7015_v53  ;;  %9731 = vst [vmem:[#allocation55_spill] sm:$0xff] %v7017_v24  ;;  %v2312_v24 = vmul.f32 %v2308_v29, %v6939_v36  ;;  %v2335_v53 = vmul.f32 %v2334_v13, %v6917_v50 }
 0x2e1   : >> { %2319 = vrot.lane.b32.xlu1 %v2310_v58, %s5384_s16  ;;  %2321 = vrot.lane.b32.xlu0 %v2311_v59, %s5384_s16  ;;  %v2098_v58 = vstv %s5103_s13  ;;  %v1699_v59 = vadd.f32 %v6897_v8, %v1491_v32  ;;  %v7052_v32 = vstv %s5104_s15  ;;  %v1309_v8 = vadd.f32 %v6651_v26, %v6272_v42  ;;  %s5129_s13 = sld [smem:[#allocation3 + $0x6a]]  ;;  %s5131_s15 = sld [smem:[#allocation3 + $0x6c]] }
 0x2e2   : >> { %v2099_v16 = vmul.f32 %v2098_v58, %v6917_v50 }
 0x2e3   : >> { %v7025_v60 = vpop.permute.xlu1 %1871  ;;  %v7027_v47 = vpop.permute.xlu0 %1873  ;;  %v1517_v42 = vadd.f32 %v6785_v46, %v1309_v8  ;;  %v1312_v8 = vadd.f32 %v6671_v23, %v6332_v21 }
 0x2e4   : >> { %9732 = vst [vmem:[#allocation31_spill] sm:$0xff] %v7025_v60  ;;  %9733 = vst [vmem:[#allocation87_spill] sm:$0xff] %v7027_v47  ;;  %v1493_v60 = vadd.f32 %v6777_v51, %v1285_v63  ;;  %v2101_v63 = vmul.f32 %v2098_v58, %v6927_v4 }
 0x2e5   : >> { %2323 = vrot.lane.b32.xlu1 %v2312_v24, %s5384_s16  ;;  %2343 = vrot.lane.b32.xlu0 %v2335_v53, %s5384_s16  ;;  %v2337_v24 = vmul.f32 %v2334_v13, %v6927_v4  ;;  %v1492_v53 = vadd.f32 %v6775_v33, %v1284_v10  ;;  %v2100_v10 = vmul.f32 %v2098_v58, %v6929_v22  ;;  %v7075_v13 = vstv %s7034_s17  ;;  %s5132_s17 = sld [smem:[#allocation3 + $0x6d]] }
 0x2e6   : >> { %v1701_v51 = vadd.f32 %v6905_v34, %v1493_v60  ;;  %v1310_v34 = vadd.f32 %v6661_v55, %v6301_v5  ;;  %v1725_v46 = vadd.f32 %v6913_v56, %v1517_v42 }
 0x2e7   : >> { %v7041_v29 = vpop.permute.xlu1 %1875  ;;  %v1896_v47 = vpop.permute.xlu0 %1895  ;;  %v1700_v7 = vadd.f32 %v6903_v17, %v1492_v53  ;;  %v2109_v53 = vmul.f32 %v7052_v32, %v6917_v50 }
 0x2e8   : >> { %v1907_v45 = vadd.f32 %v1896_v47, %v1699_v59  ;;  %v2361_v47 = vmul.f32 %v2360_v43, %v6917_v50  ;;  %v1494_v59 = vadd.f32 %v6783_v11, %v1286_v38 }
 0x2e9   : >> { %2345 = vrot.lane.b32.xlu1 %v2336_v9, %s5384_s16  ;;  %2347 = vrot.lane.b32.xlu0 %v2337_v24, %s5384_s16  ;;  %v2102_v24 = vmul.f32 %v2098_v58, %v6939_v36  ;;  %v7099_v58 = vstv %s7054_s18  ;;  %s5133_s18 = sld [smem:[#allocation3 + $0x6e]] }
 0x2ea   : >> { %v7060_v14 = vadd.f32 %v2099_v16, %v1907_v45  ;;  %v1311_v45 = vadd.f32 %v6663_v52, %v6303_v27  ;;  %v1702_v11 = vadd.f32 %v6911_v15, %v1494_v59  ;;  %v2362_v27 = vmul.f32 %v2360_v43, %v6929_v22 }
 0x2eb   : >> { %v1898_v33 = vpop.permute.xlu1 %1897  ;;  %v1900_v41 = vpop.permute.xlu0 %1899  ;;  %v2363_v52 = vmul.f32 %v2360_v43, %v6927_v4  ;;  %v1518_v15 = vadd.f32 %v6791_v19, %v1310_v34  ;;  %v7125_v59 = vstv %s7077_s19  ;;  %s5134_s19 = sld [smem:[#allocation3 + $0x6f]] }
 0x2ec   : >> { %v1908_v26 = vadd.f32 %v1898_v33, %v1700_v7  ;;  %v1909_v17 = vadd.f32 %v1900_v41, %v1701_v51  ;;  %v1519_v56 = vadd.f32 %v6793_v31, %v1311_v45  ;;  %v1335_v7 = vadd.f32 %v6673_v57, %v6334_v25 }
 0x2ed   : >> { %2349 = vrot.lane.b32.xlu1 %v2338_v54, %s5384_s16  ;;  %2369 = vrot.lane.b32.xlu0 %v2361_v47, %s5384_s16  ;;  %v1726_v19 = vadd.f32 %v6921_v61, %v1518_v15  ;;  %v2364_v25 = vmul.f32 %v2360_v43, %v6939_v36  ;;  %v2387_v57 = vmul.f32 %v7075_v13, %v6917_v50 }
 0x2ee   : >> { %v7081_v60 = vadd.f32 %v2100_v10, %v1908_v26  ;;  %v7083_v9 = vadd.f32 %v2101_v63, %v1909_v17  ;;  %v1727_v31 = vadd.f32 %v6923_v49, %v1519_v56  ;;  %v2110_v41 = vmul.f32 %v7052_v32, %v6929_v22 }
 0x2ef   : >> { %v1902_v5 = vpop.permute.xlu1 %1901  ;;  %v1922_v55 = vpop.permute.xlu0 %1921  ;;  %v2111_v61 = vmul.f32 %v7052_v32, %v6927_v4  ;;  %v1520_v49 = vadd.f32 %v6799_v30, %v1312_v8  ;;  %v1543_v54 = vadd.f32 %v6801_v6, %v1335_v7  ;;  %v1336_v63 = vadd.f32 %v6679_v20, %v6363_v35  ;;  %v9737_v7 = vld [vmem:[#allocation58_spill] sm:$0xff] }
 0x2f0   : >> { %v1910_v16 = vadd.f32 %v1902_v5, %v1702_v11  ;;  %v1933_v38 = vadd.f32 %v1922_v55, %v1725_v46  ;;  %v1337_v43 = vadd.f32 %v6681_v44, %v6365_v12  ;;  %v2388_v12 = vmul.f32 %v7075_v13, %v6929_v22 }
 0x2f1   : >> { %2371 = vrot.lane.b32.xlu1 %v2362_v27, %s5384_s16  ;;  %2373 = vrot.lane.b32.xlu0 %v2363_v52, %s5384_s16  ;;  %v1728_v30 = vadd.f32 %v6933_v28, %v1520_v49  ;;  %v1751_v6 = vadd.f32 %v6935_v0, %v1543_v54  ;;  %v2389_v44 = vmul.f32 %v7075_v13, %v6927_v4 }
 0x2f2   : >> { %v7105_v51 = vadd.f32 %v2102_v24, %v1910_v16  ;;  %v7107_v33 = vadd.f32 %v2109_v53, %v1933_v38  ;;  %v2112_v17 = vmul.f32 %v7052_v32, %v6939_v36  ;;  %v2119_v28 = vmul.f32 %v7099_v58, %v6917_v50  ;;  %v9734_v24 = vld [vmem:[#allocation43_spill] sm:$0xff]  ;;  %v9735_v16 = vld [vmem:[#allocation57_spill] sm:$0xff] }
 0x2f3   : >> { %v1924_v21 = vpop.permute.xlu1 %1923  ;;  %v1926_v23 = vpop.permute.xlu0 %1925  ;;  %v1544_v0 = vadd.f32 %v6807_v3, %v1336_v63  ;;  %v1545_v34 = vadd.f32 %v6809_v1, %v1337_v43  ;;  %v1338_v46 = vadd.f32 %v6687_v18, %v6394_v2  ;;  %v1361_v5 = vadd.f32 %v6689_v39, %v6396_v62  ;;  %v9736_v38 = vld [vmem:[#allocation37_spill] sm:$0xff]  ;;  %v9741_v43 = vld [vmem:[#allocation19_spill] sm:$0xff] }
 0x2f4   : >> { %v1934_v47 = vadd.f32 %v1924_v21, %v1726_v19  ;;  %v1935_v10 = vadd.f32 %v1926_v23, %v1727_v31  ;;  %v7152_v32 = vstv %s7101_s20  ;;  %v2390_v62 = vmul.f32 %v7075_v13, %v6939_v36  ;;  %v9738_v13 = vld [vmem:[#allocation13_spill] sm:$0xff]  ;;  %v9740_v23 = vld [vmem:[#allocation26_spill] sm:$0xff]  ;;  %s5135_s20 = sld [smem:[#allocation3 + $0x70]] }
 0x2f5   : >> { %2375 = vrot.lane.b32.xlu1 %v2364_v25, %s5384_s16  ;;  %2395 = vrot.lane.b32.xlu0 %v2387_v57, %s5385_s25  ;;  %v1752_v3 = vadd.f32 %v6943_v37, %v1544_v0  ;;  %v1753_v1 = vadd.f32 %v6945_v40, %v1545_v34  ;;  %v2413_v39 = vmul.f32 %v7125_v59, %v6917_v50  ;;  %v7179_v31 = vstv %s7127_s22  ;;  %v9739_v21 = vld [vmem:[#allocation25_spill] sm:$0xff]  ;;  %v9746_v34 = vld [vmem:[#allocation78_spill] sm:$0xff]  ;;  %s5136_s22 = sld [smem:[#allocation3 + $0x71]] }
 0x2f6   : >> { %v7131_v42 = vadd.f32 %v2110_v41, %v1934_v47  ;;  %v7133_v26 = vadd.f32 %v2111_v61, %v1935_v10  ;;  %v2120_v52 = vmul.f32 %v7099_v58, %v6929_v22  ;;  %v2121_v37 = vmul.f32 %v7099_v58, %v6927_v4  ;;  %v9745_v0 = vld [vmem:[#allocation33_spill] sm:$0xff] }
 0x2f7   : >> { %v1928_v35 = vpop.permute.xlu1 %1927  ;;  %v1948_v20 = vpop.permute.xlu0 %1947  ;;  %v1546_v40 = vadd.f32 %v6815_v48, %v1338_v46  ;;  %v1569_v53 = vadd.f32 %v9734_v24, %v1361_v5  ;;  %v1362_v8 = vadd.f32 %v9736_v38, %v9735_v16  ;;  %v1363_v19 = vadd.f32 %v9738_v13, %v9737_v7  ;;  %v9748_v5 = vld [vmem:[#allocation76_spill] sm:$0xff]  ;;  %v9749_v24 = vld [vmem:[#allocation69_spill] sm:$0xff]  ;;  %v9752_v7 = vld [vmem:[#allocation63_spill] sm:$0xff] }
 0x2f8   : >> { %v1936_v45 = vadd.f32 %v1928_v35, %v1728_v30  ;;  %v1959_v11 = vadd.f32 %v1948_v20, %v1751_v6  ;;  %v2414_v54 = vmul.f32 %v7125_v59, %v6929_v22  ;;  %v2415_v47 = vmul.f32 %v7125_v59, %v6927_v4  ;;  %v9742_v6 = vld [vmem:[#allocation20_spill] sm:$0xff] }
 0x2f9   : >> { %2397 = vrot.lane.b32.xlu1 %v2388_v12, %s5385_s25  ;;  %2399 = vrot.lane.b32.xlu0 %v2389_v44, %s5385_s25  ;;  %v1754_v48 = vadd.f32 %v9739_v21, %v1546_v40  ;;  %v1777_v25 = vadd.f32 %v9740_v23, %v1569_v53  ;;  %v2122_v10 = vmul.f32 %v7099_v58, %v6939_v36  ;;  %v9743_v44 = vld [vmem:[#allocation32_spill] sm:$0xff]  ;;  %v7206_v58 = vstv %s7154_s23  ;;  %v9755_v23 = vld [vmem:[#allocation50_spill] sm:$0xff]  ;;  %s5137_s23 = sld [smem:[#allocation3 + $0x72]] }
 0x2fa   : >> { %v7158_v55 = vadd.f32 %v2112_v17, %v1936_v45  ;;  %v7160_v27 = vadd.f32 %v2119_v28, %v1959_v11  ;;  %v2129_v63 = vmul.f32 %v7152_v32, %v6917_v50  ;;  %v1570_v30 = vadd.f32 %v9741_v43, %v1362_v8  ;;  %v9744_v17 = vld [vmem:[#allocation14_spill] sm:$0xff]  ;;  %v9747_v11 = vld [vmem:[#allocation75_spill] sm:$0xff]  ;;  %v9751_v8 = vld [vmem:[#allocation81_spill] sm:$0xff] }
 0x2fb   : >> { %v1950_v2 = vpop.permute.xlu1 %1949  ;;  %v1952_v18 = vpop.permute.xlu0 %1951  ;;  %v1571_v35 = vadd.f32 %v9742_v6, %v1363_v19  ;;  %v1364_v28 = vadd.f32 %v9744_v17, %v9743_v44  ;;  %v1387_v45 = vadd.f32 %v9746_v34, %v9745_v0  ;;  %v2131_v40 = vmul.f32 %v7152_v32, %v6927_v4  ;;  %v9753_v19 = vld [vmem:[#allocation9_spill] sm:$0xff]  ;;  %v9761_v34 = vld [vmem:[#allocation82_spill] sm:$0xff] }
 0x2fc   : >> { %v1960_v15 = vadd.f32 %v1950_v2, %v1752_v3  ;;  %v1961_v56 = vadd.f32 %v1952_v18, %v1753_v1  ;;  %v1778_v46 = vadd.f32 %v9747_v11, %v1570_v30  ;;  %v1388_v13 = vadd.f32 %v9752_v7, %v9751_v8  ;;  %v9760_v44 = vld [vmem:[#allocation45_spill] sm:$0xff] }
 0x2fd   : >> { %2401 = vrot.lane.b32.xlu1 %v2390_v62, %s5385_s25  ;;  %2421 = vrot.lane.b32.xlu0 %v2413_v39, %s5385_s25  ;;  %v1779_v3 = vadd.f32 %v9748_v5, %v1571_v35  ;;  %v2416_v39 = vmul.f32 %v7125_v59, %v6939_v36  ;;  %v1572_v53 = vadd.f32 %v9749_v24, %v1364_v28  ;;  %v9754_v59 = vld [vmem:[#allocation64_spill] sm:$0xff]  ;;  %v9764_v5 = vld [vmem:[#allocation39_spill] sm:$0xff]  ;;  %v9769_v8 = vld [vmem:[#allocation21_spill] sm:$0xff] }
 0x2fe   : >> { %v7185_v57 = vadd.f32 %v2120_v52, %v1960_v15  ;;  %v7187_v41 = vadd.f32 %v2121_v37, %v1961_v56  ;;  %v2439_v52 = vmul.f32 %v7179_v31, %v6917_v50  ;;  %v2130_v37 = vmul.f32 %v7152_v32, %v6929_v22  ;;  %v9750_v15 = vld [vmem:[#allocation70_spill] sm:$0xff] }
 0x2ff   : >> { %v1954_v61 = vpop.permute.xlu1 %1953  ;;  %v1974_v49 = vpop.permute.xlu0 %1973  ;;  %v1595_v56 = vadd.f32 %v9750_v15, %v1387_v45  ;;  %v1389_v21 = vadd.f32 %v9754_v59, %v9753_v19  ;;  %v2440_v43 = vmul.f32 %v7179_v31, %v6929_v22  ;;  %v2441_v30 = vmul.f32 %v7179_v31, %v6927_v4  ;;  %v9762_v45 = vld [vmem:[#allocation38_spill] sm:$0xff] }
 0x300   : >> { %v1962_v20 = vadd.f32 %v1954_v61, %v1754_v48  ;;  %v1985_v12 = vadd.f32 %v1974_v49, %v1777_v25  ;;  %v7233_v48 = vstv %s7181_s24  ;;  %v1780_v25 = vadd.f32 %v9755_v23, %v1572_v53  ;;  %v9756_v61 = vld [vmem:[#allocation51_spill] sm:$0xff]  ;;  %s5138_s24 = sld [smem:[#allocation3 + $0x73]] }
 0x301   : >> { %2423 = vrot.lane.b32.xlu1 %v2414_v54, %s5385_s25  ;;  %2425 = vrot.lane.b32.xlu0 %v2415_v47, %s5385_s25  ;;  %v1803_v49 = vadd.f32 %v9756_v61, %v1595_v56  ;;  %v2132_v6 = vmul.f32 %v7152_v32, %v6939_v36  ;;  %v2139_v35 = vmul.f32 %v7206_v58, %v6917_v50  ;;  %v7260_v32 = vstv %s7208_s26  ;;  %v9771_v23 = vld [vmem:[#allocation59_spill] sm:$0xff]  ;;  %s5139_s26 = sld [smem:[#allocation3 + $0x74]] }
 0x302   : >> { %v7212_v1 = vadd.f32 %v2122_v10, %v1962_v20  ;;  %v7214_v2 = vadd.f32 %v2129_v63, %v1985_v12  ;;  %v9759_v20 = vld [vmem:[#allocation44_spill] sm:$0xff]  ;;  %v1597_v17 = vadd.f32 %v9760_v44, %v1389_v21  ;;  %v1390_v11 = vadd.f32 %v9762_v45, %v9761_v34 }
 0x303   : >> { %v1976_v18 = vpop.permute.xlu1 %1975  ;;  %v1978_v62 = vpop.permute.xlu0 %1977  ;;  %v1596_v12 = vadd.f32 %v9759_v20, %v1388_v13  ;;  %v2442_v15 = vmul.f32 %v7179_v31, %v6939_v36  ;;  %v2465_v56 = vmul.f32 %v7233_v48, %v6917_v50  ;;  %v9770_v13 = vld [vmem:[#allocation22_spill] sm:$0xff]  ;;  %v9774_v31 = vld [vmem:[#allocation16_spill] sm:$0xff]  ;;  %v2142_v34 = vmul.f32 %v7206_v58, %v6939_v36 }
 0x304   : >> { %v1986_v16 = vadd.f32 %v1976_v18, %v1778_v46  ;;  %v1987_v38 = vadd.f32 %v1978_v62, %v1779_v3  ;;  %v9763_v46 = vld [vmem:[#allocation10_spill] sm:$0xff]  ;;  %v9765_v18 = vld [vmem:[#allocation27_spill] sm:$0xff]  ;;  %v1598_v7 = vadd.f32 %v9769_v8, %v1390_v11  ;;  %v2149_v45 = vmul.f32 %v7260_v32, %v6917_v50  ;;  %v9779_v11 = vld [vmem:[#allocation77_spill] sm:$0xff] }
 0x305   : >> { %2427 = vrot.lane.b32.xlu1 %v2416_v39, %s5385_s25  ;;  %2447 = vrot.lane.b32.xlu0 %v2439_v52, %s5385_s25  ;;  %v1413_v3 = vadd.f32 %v9764_v5, %v9763_v46  ;;  %v1804_v62 = vadd.f32 %v9765_v18, %v1596_v12  ;;  %v9766_v39 = vld [vmem:[#allocation28_spill] sm:$0xff]  ;;  %v9780_v5 = vld [vmem:[#allocation71_spill] sm:$0xff]  ;;  %v9786_v8 = vld [vmem:[#allocation53_spill] sm:$0xff] }
 0x306   : >> { %v7239_v54 = vadd.f32 %v2130_v37, %v1986_v16  ;;  %v7241_v47 = vadd.f32 %v2131_v40, %v1987_v38  ;;  %v1805_v52 = vadd.f32 %v9766_v39, %v1597_v17  ;;  %v2140_v16 = vmul.f32 %v7206_v58, %v6929_v22  ;;  %v9781_v39 = vld [vmem:[#allocation34_spill] sm:$0xff] }
 0x307   : >> { %v1980_v10 = vpop.permute.xlu1 %1979  ;;  %v2000_v63 = vpop.permute.xlu0 %1999  ;;  %v2141_v38 = vmul.f32 %v7206_v58, %v6927_v4  ;;  %v1621_v19 = vadd.f32 %v9770_v13, %v1413_v3  ;;  %v7314_v58 = vstv %s7262_s28  ;;  %s5141_s28 = sld [smem:[#allocation3 + $0x76]] }
 0x308   : >> { %9757 = vst [vmem:[#allocation56_spill] sm:$0xff] %v7239_v54  ;;  %9758 = vst [vmem:[#allocation43_spill] sm:$0xff] %v7241_v47  ;;  %v1988_v28 = vadd.f32 %v1980_v10, %v1780_v25  ;;  %v2011_v0 = vadd.f32 %v2000_v63, %v1803_v49  ;;  %v9772_v25 = vld [vmem:[#allocation15_spill] sm:$0xff]  ;;  %v9773_v49 = vld [vmem:[#allocation60_spill] sm:$0xff]  ;;  %v7287_v63 = vstv %s7235_s27  ;;  %s5140_s27 = sld [smem:[#allocation3 + $0x75]] }
 0x309   : >> { %2449 = vrot.lane.b32.xlu1 %v2440_v43, %s5385_s25  ;;  %2451 = vrot.lane.b32.xlu0 %v2441_v30, %s5385_s25  ;;  %v1414_v61 = vadd.f32 %v9772_v25, %v9771_v23  ;;  %v1415_v10 = vadd.f32 %v9774_v31, %v9773_v49  ;;  %v9775_v43 = vld [vmem:[#allocation79_spill] sm:$0xff]  ;;  %v2468_v23 = vmul.f32 %v7233_v48, %v6939_v36  ;;  %v9789_v31 = vld [vmem:[#allocation72_spill] sm:$0xff] }
 0x30a   : >> { %v7266_v37 = vadd.f32 %v2132_v6, %v1988_v28  ;;  %v7268_v40 = vadd.f32 %v2139_v35, %v2011_v0  ;;  %v1806_v30 = vadd.f32 %v9775_v43, %v1598_v7  ;;  %v9776_v6 = vld [vmem:[#allocation80_spill] sm:$0xff]  ;;  %v2466_v28 = vmul.f32 %v7233_v48, %v6929_v22  ;;  %v9790_v43 = vld [vmem:[#allocation46_spill] sm:$0xff] }
 0x30b   : >> { %v2002_v24 = vpop.permute.xlu1 %2001  ;;  %v2004_v53 = vpop.permute.xlu0 %2003  ;;  %v1829_v35 = vadd.f32 %v9776_v6, %v1621_v19  ;;  %v2467_v0 = vmul.f32 %v7233_v48, %v6927_v4  ;;  %v1622_v46 = vadd.f32 %v9779_v11, %v1414_v61  ;;  %v1623_v3 = vadd.f32 %v9780_v5, %v1415_v10  ;;  %v9794_v48 = vld [vmem:[#allocation41_spill] sm:$0xff]  ;;  %v9796_v5 = vld [vmem:[#allocation30_spill] sm:$0xff] }
 0x30c   : >> { %9767 = vst [vmem:[#allocation57_spill] sm:$0xff] %v7266_v37  ;;  %9768 = vst [vmem:[#allocation37_spill] sm:$0xff] %v7268_v40  ;;  %v2012_v59 = vadd.f32 %v2002_v24, %v1804_v62  ;;  %v2013_v21 = vadd.f32 %v2004_v53, %v1805_v52  ;;  %v9782_v52 = vld [vmem:[#allocation65_spill] sm:$0xff]  ;;  %v9783_v53 = vld [vmem:[#allocation35_spill] sm:$0xff]  ;;  %v2491_v25 = vmul.f32 %v7287_v63, %v6917_v50 }
 0x30d   : >> { %2453 = vrot.lane.b32.xlu1 %v2442_v15, %s5385_s25  ;;  %2473 = vrot.lane.b32.xlu0 %v2465_v56, %s5385_s25  ;;  %v1416_v24 = vadd.f32 %v9782_v52, %v9781_v39  ;;  %v9784_v15 = vld [vmem:[#allocation66_spill] sm:$0xff]  ;;  %v1831_v7 = vadd.f32 %v9786_v8, %v1623_v3  ;;  %v2150_v61 = vmul.f32 %v7260_v32, %v6929_v22  ;;  %v9795_v11 = vld [vmem:[#allocation29_spill] sm:$0xff]  ;;  %v9800_v8 = vld [vmem:[#allocation23_spill] sm:$0xff] }
 0x30e   : >> { %v7293_v20 = vadd.f32 %v2140_v16, %v2012_v59  ;;  %v7295_v12 = vadd.f32 %v2141_v38, %v2013_v21  ;;  %v1439_v56 = vadd.f32 %v9784_v15, %v9783_v53  ;;  %v9785_v16 = vld [vmem:[#allocation52_spill] sm:$0xff]  ;;  %v2151_v49 = vmul.f32 %v7260_v32, %v6927_v4 }
 0x30f   : >> { %v2006_v44 = vpop.permute.xlu1 %2005  ;;  %v2026_v17 = vpop.permute.xlu0 %2025  ;;  %v1830_v38 = vadd.f32 %v9785_v16, %v1622_v46  ;;  %v1624_v10 = vadd.f32 %v9789_v31, %v1416_v24  ;;  %v2492_v24 = vmul.f32 %v7287_v63, %v6929_v22  ;;  %v2493_v53 = vmul.f32 %v7287_v63, %v6927_v4  ;;  %v9799_v16 = vld [vmem:[#allocation47_spill] sm:$0xff]  ;;  %v9804_v31 = vld [vmem:[#allocation18_spill] sm:$0xff] }
 0x310   : >> { %9777 = vst [vmem:[#allocation58_spill] sm:$0xff] %v7293_v20  ;;  %9778 = vst [vmem:[#allocation13_spill] sm:$0xff] %v7295_v12  ;;  %v2014_v18 = vadd.f32 %v2006_v44, %v1806_v30  ;;  %v2037_v62 = vadd.f32 %v2026_v17, %v1829_v35  ;;  %v1647_v30 = vadd.f32 %v9790_v43, %v1439_v56  ;;  %v9791_v44 = vld [vmem:[#allocation85_spill] sm:$0xff]  ;;  %v9792_v17 = vld [vmem:[#allocation40_spill] sm:$0xff]  ;;  %v2880_v12 = vstv %s5138_s24  ;;  %s7932_s24 = sld [smem:[#allocation3 + $0x8a]] }
 0x311   : >> { %2475 = vrot.lane.b32.xlu1 %v2466_v28, %s5385_s25  ;;  %2477 = vrot.lane.b32.xlu0 %v2467_v0, %s5385_s25  ;;  %v1440_v28 = vadd.f32 %v9792_v17, %v9791_v44  ;;  %v9793_v0 = vld [vmem:[#allocation11_spill] sm:$0xff]  ;;  %v1832_v46 = vadd.f32 %v9795_v11, %v1624_v10  ;;  %v2152_v15 = vmul.f32 %v7260_v32, %v6939_v36  ;;  %v7368_v32 = vstv %s7316_s30  ;;  %s5151_s30 = sld [smem:[#allocation3 + $0x80]] }
 0x312   : >> { %v7320_v13 = vadd.f32 %v2142_v34, %v2014_v18  ;;  %v7322_v19 = vadd.f32 %v2149_v45, %v2037_v62  ;;  %v1441_v34 = vadd.f32 %v9794_v48, %v9793_v0  ;;  %v7341_v45 = vstv %s7289_s29  ;;  %v9805_v43 = vld [vmem:[#allocation83_spill] sm:$0xff]  ;;  %s5142_s29 = sld [smem:[#allocation3 + $0x77]] }
 0x313   : >> { %v2028_v59 = vpop.permute.xlu1 %2027  ;;  %v2030_v21 = vpop.permute.xlu0 %2029  ;;  %v1855_v3 = vadd.f32 %v9796_v5, %v1647_v30  ;;  %v2159_v56 = vmul.f32 %v7314_v58, %v6917_v50  ;;  %v2494_v48 = vmul.f32 %v7287_v63, %v6939_v36  ;;  %v2160_v11 = vmul.f32 %v7314_v58, %v6929_v22  ;;  %v9809_v5 = vld [vmem:[#allocation24_spill] sm:$0xff] }
 0x314   : >> { %9787 = vst [vmem:[#allocation25_spill] sm:$0xff] %v7320_v13  ;;  %9788 = vst [vmem:[#allocation26_spill] sm:$0xff] %v7322_v19  ;;  %v2038_v6 = vadd.f32 %v2028_v59, %v1830_v38  ;;  %v2039_v35 = vadd.f32 %v2030_v21, %v1831_v7  ;;  %v1648_v38 = vadd.f32 %v9799_v16, %v1440_v28  ;;  %v9814_v63 = vld [vmem:[#allocation68_spill] sm:$0xff]  ;;  %v2854_v19 = vstv %s5137_s23  ;;  %s7906_s23 = sld [smem:[#allocation3 + $0x7b]] }
 0x315   : >> { %2479 = vrot.lane.b32.xlu1 %v2468_v23, %s5385_s25  ;;  %2499 = vrot.lane.b32.xlu0 %v2491_v25, %s5385_s25  ;;  %v1649_v7 = vadd.f32 %v9800_v8, %v1441_v34  ;;  %v9801_v23 = vld [vmem:[#allocation86_spill] sm:$0xff]  ;;  %v9802_v25 = vld [vmem:[#allocation17_spill] sm:$0xff]  ;;  %v2517_v34 = vmul.f32 %v7341_v45, %v6917_v50 }
 0x316   : >> { %v7347_v18 = vadd.f32 %v2150_v61, %v2038_v6  ;;  %v7349_v62 = vadd.f32 %v2151_v49, %v2039_v35  ;;  %v1442_v61 = vadd.f32 %v9802_v25, %v9801_v23  ;;  %v9803_v49 = vld [vmem:[#allocation12_spill] sm:$0xff]  ;;  %v1856_v30 = vadd.f32 %v9805_v43, %v1648_v38  ;;  %v9813_v38 = vld [vmem:[#allocation62_spill] sm:$0xff]  ;;  %v9816_v23 = vld [vmem:[#allocation55_spill] sm:$0xff] }
 0x317   : >> { %v2032_v39 = vpop.permute.xlu1 %2031  ;;  %v2052_v52 = vpop.permute.xlu0 %2051  ;;  %v1465_v10 = vadd.f32 %v9804_v31, %v9803_v49  ;;  %v9806_v6 = vld [vmem:[#allocation84_spill] sm:$0xff]  ;;  %v1467_v8 = vadd.f32 %v9814_v63, %v9813_v38  ;;  %v2518_v43 = vmul.f32 %v7341_v45, %v6929_v22  ;;  %v2520_v63 = vmul.f32 %v7341_v45, %v6939_v36 }
 0x318   : >> { %9797 = vst [vmem:[#allocation19_spill] sm:$0xff] %v7347_v18  ;;  %9798 = vst [vmem:[#allocation20_spill] sm:$0xff] %v7349_v62  ;;  %v2040_v59 = vadd.f32 %v2032_v39, %v1832_v46  ;;  %v2063_v21 = vadd.f32 %v2052_v52, %v1855_v3  ;;  %v1857_v35 = vadd.f32 %v9806_v6, %v1649_v7  ;;  %v9810_v39 = vld [vmem:[#allocation73_spill] sm:$0xff]  ;;  %v2542_v7 = vstv %s7343_s4  ;;  %s5152_s4 = sld [smem:[#allocation3 + $0x81]] }
 0x319   : >> { %2501 = vrot.lane.b32.xlu1 %v2492_v24, %s5385_s25  ;;  %2503 = vrot.lane.b32.xlu0 %v2493_v53, %s5385_s25  ;;  %v2161_v46 = vmul.f32 %v7314_v58, %v6927_v4  ;;  %v1650_v3 = vadd.f32 %v9809_v5, %v1442_v61  ;;  %v1673_v52 = vadd.f32 %v9810_v39, %v1465_v10  ;;  %v9821_v5 = vld [vmem:[#allocation36_spill] sm:$0xff]  ;;  %v2828_v62 = vstv %s5136_s22  ;;  %s7882_s22 = sld [smem:[#allocation3 + $0x89]] }
 0x31a   : >> { %v7372_v44 = vadd.f32 %v2152_v15, %v2040_v59  ;;  %v7374_v17 = vadd.f32 %v2159_v56, %v2063_v21  ;;  %v9811_v15 = vld [vmem:[#allocation61_spill] sm:$0xff]  ;;  %v9812_v56 = vld [vmem:[#allocation67_spill] sm:$0xff]  ;;  %v9815_v59 = vld [vmem:[#allocation54_spill] sm:$0xff]  ;;  %v2162_v6 = vmul.f32 %v7314_v58, %v6939_v36  ;;  %v3094_v40 = vstv %s5151_s30  ;;  %s8067_s30 = sld [smem:[#allocation3 + $0x7e]] }
 0x31b   : >> { %v2054_v28 = vpop.permute.xlu1 %2053  ;;  %v2056_v0 = vpop.permute.xlu0 %2055  ;;  %v1466_v16 = vadd.f32 %v9812_v56, %v9811_v15  ;;  %v1858_v21 = vadd.f32 %v9815_v59, %v1650_v3  ;;  %v1881_v25 = vadd.f32 %v9816_v23, %v1673_v52  ;;  %v9822_v3 = vld [vmem:[#allocation42_spill] sm:$0xff]  ;;  %v9823_v52 = vld [vmem:[#allocation31_spill] sm:$0xff]  ;;  %v2170_v59 = vmul.f32 %v7368_v32, %v6929_v22 }
 0x31c   : >> { %9807 = vst [vmem:[#allocation32_spill] sm:$0xff] %v7372_v44  ;;  %9808 = vst [vmem:[#allocation14_spill] sm:$0xff] %v7374_v17  ;;  %v2064_v24 = vadd.f32 %v2054_v28, %v1856_v30  ;;  %v2065_v53 = vadd.f32 %v2056_v0, %v1857_v35  ;;  %v2519_v30 = vmul.f32 %v7341_v45, %v6927_v4  ;;  %v9819_v28 = vld [vmem:[#allocation74_spill] sm:$0xff]  ;;  %v9824_v58 = vld [vmem:[#allocation87_spill] sm:$0xff]  ;;  %v2802_v17 = vstv %s5135_s20  ;;  %s7859_s20 = sld [smem:[#allocation3 + $0x7a]] }
 0x31d   : >> { %2505 = vrot.lane.b32.xlu1 %v2494_v48, %s5385_s25  ;;  %2525 = vrot.lane.b32.xlu0 %v2517_v34, %s5385_s25  ;;  %v2169_v35 = vmul.f32 %v7368_v32, %v6917_v50  ;;  %v1674_v0 = vadd.f32 %v9819_v28, %v1466_v16  ;;  %v9820_v48 = vld [vmem:[#allocation48_spill] sm:$0xff]  ;;  %v1468_v39 = vadd.f32 %v9822_v3, %v9821_v5 }
 0x31e   : >> { %v7395_v61 = vadd.f32 %v2160_v11, %v2064_v24  ;;  %v7397_v49 = vadd.f32 %v2161_v46, %v2065_v53  ;;  %v1675_v34 = vadd.f32 %v9820_v48, %v1467_v8  ;;  %v2543_v8 = vmul.f32 %v2542_v7, %v6917_v50 }
 0x31f   : >> { %v2058_v31 = vpop.permute.xlu1 %2057  ;;  %v2078_v10 = vpop.permute.xlu0 %2077  ;;  %v1882_v24 = vadd.f32 %v9823_v52, %v1674_v0  ;;  %v2544_v28 = vmul.f32 %v2542_v7, %v6929_v22  ;;  %v2545_v0 = vmul.f32 %v2542_v7, %v6927_v4  ;;  %v2546_v3 = vmul.f32 %v2542_v7, %v6939_v36 }
 0x320   : >> { %9817 = vst [vmem:[#allocation33_spill] sm:$0xff] %v7395_v61  ;;  %9818 = vst [vmem:[#allocation78_spill] sm:$0xff] %v7397_v49  ;;  %v2066_v11 = vadd.f32 %v2058_v31, %v1858_v21  ;;  %v2089_v46 = vadd.f32 %v2078_v10, %v1881_v25  ;;  %v1883_v53 = vadd.f32 %v9824_v58, %v1675_v34  ;;  %v9827_v21 = vld [vmem:[#allocation49_spill] sm:$0xff]  ;;  %v2568_v34 = vstv %s5126_s6  ;;  %s5153_s6 = sld [smem:[#allocation3 + $0x82]] }
 0x321   : >> { %2527 = vrot.lane.b32.xlu1 %v2518_v43, %s5385_s25  ;;  %2529 = vrot.lane.b32.xlu0 %v2519_v30, %s5385_s25  ;;  %v1676_v23 = vadd.f32 %v9827_v21, %v1468_v39  ;;  %v2171_v10 = vmul.f32 %v7368_v32, %v6927_v4  ;;  %v2569_v39 = vmul.f32 %v2568_v34, %v6917_v50 }
 0x322   : >> { %v7415_v15 = vadd.f32 %v2162_v6, %v2066_v11  ;;  %v7417_v56 = vadd.f32 %v2169_v35, %v2089_v46  ;;  %v2172_v11 = vmul.f32 %v7368_v32, %v6939_v36  ;;  %v2571_v58 = vmul.f32 %v2568_v34, %v6927_v4 }
 0x323   : >> { %v2080_v16 = vpop.permute.xlu1 %2079  ;;  %v2082_v38 = vpop.permute.xlu0 %2081  ;;  %v1884_v43 = vadd.f32 %v7041_v29, %v1676_v23 }
 0x324   : >> { %9825 = vst [vmem:[#allocation75_spill] sm:$0xff] %v7415_v15  ;;  %9826 = vst [vmem:[#allocation76_spill] sm:$0xff] %v7417_v56  ;;  %v2090_v25 = vadd.f32 %v2080_v16, %v1882_v24  ;;  %v2091_v31 = vadd.f32 %v2082_v38, %v1883_v53  ;;  %v2570_v24 = vmul.f32 %v2568_v34, %v6929_v22  ;;  %v2594_v53 = vstv %s5127_s7  ;;  %s5154_s7 = sld [smem:[#allocation3 + $0x83]] }
 0x325   : >> { %2531 = vrot.lane.b32.xlu1 %v2520_v63, %s5385_s25  ;;  %2551 = vrot.lane.b32.xlu0 %v2543_v8, %s5385_s25  ;;  %v2572_v38 = vmul.f32 %v2568_v34, %v6939_v36  ;;  %v2595_v63 = vmul.f32 %v2594_v53, %v6917_v50  ;;  %v2596_v21 = vmul.f32 %v2594_v53, %v6929_v22  ;;  %v2724_v56 = vstv %s5132_s17  ;;  %s5158_s17 = sld [smem:[#allocation3 + $0x87]] }
 0x326   : >> { %v7430_v30 = vadd.f32 %v2170_v59, %v2090_v25  ;;  %v7432_v45 = vadd.f32 %v2171_v10, %v2091_v31  ;;  %v2597_v23 = vmul.f32 %v2594_v53, %v6927_v4  ;;  %v2620_v25 = vstv %s5128_s11  ;;  %s5155_s11 = sld [smem:[#allocation3 + $0x84]] }
 0x327   : >> { %v2084_v6 = vpop.permute.xlu1 %2083  ;;  %v7434_v35 = vpop.permute.xlu0 %2187  ;;  %v2623_v34 = vmul.f32 %v2620_v25, %v6927_v4 }
 0x328   : >> { %9828 = vst [vmem:[#allocation69_spill] sm:$0xff] %v7430_v30  ;;  %9829 = vst [vmem:[#allocation70_spill] sm:$0xff] %v7432_v45  ;;  %v2092_v48 = vadd.f32 %v2084_v6, %v1884_v43  ;;  %v2598_v43 = vmul.f32 %v2594_v53, %v6939_v36  ;;  %v2621_v6 = vmul.f32 %v2620_v25, %v6917_v50 }
 0x329   : >> { %2553 = vrot.lane.b32.xlu1 %v2544_v28, %s5385_s25  ;;  %2555 = vrot.lane.b32.xlu0 %v2545_v0, %s5385_s25 }
 0x32a   : >> { %v7442_v29 = vadd.f32 %v2172_v11, %v2092_v48  ;;  %v2622_v48 = vmul.f32 %v2620_v25, %v6929_v22  ;;  %v2646_v11 = vstv %s5129_s13  ;;  %s5156_s13 = sld [smem:[#allocation3 + $0x85]] }
 0x32b   : >> { %v7444_v46 = vpop.permute.xlu1 %2189  ;;  %v7446_v5 = vpop.permute.xlu0 %2191 }
 0x32c   : >> { %9830 = vst [vmem:[#allocation81_spill] sm:$0xff] %v7442_v29 }
 0x32d   : >> { %2557 = vrot.lane.b32.xlu1 %v2546_v3, %s5385_s25  ;;  %2577 = vrot.lane.b32.xlu0 %v2569_v39, %s5385_s25 }
 0x32f   : >> { %v7452_v52 = vpop.permute.xlu1 %2193  ;;  %v7454_v32 = vpop.permute.xlu0 %2213 }
 0x331   : >> { %2579 = vrot.lane.b32.xlu1 %v2570_v24, %s5385_s25  ;;  %2581 = vrot.lane.b32.xlu0 %v2571_v58, %s5385_s25  ;;  %v2624_v24 = vmul.f32 %v2620_v25, %v6939_v36  ;;  %v2647_v58 = vmul.f32 %v2646_v11, %v6917_v50 }
 0x333   : >> { %v7460_v7 = vpop.permute.xlu1 %2215  ;;  %v7462_v16 = vpop.permute.xlu0 %2217 }
 0x335   : >> { %2583 = vrot.lane.b32.xlu1 %v2572_v38, %s5385_s25  ;;  %2603 = vrot.lane.b32.xlu0 %v2595_v63, %s5386_s10  ;;  %v2648_v63 = vmul.f32 %v2646_v11, %v6929_v22 }
 0x337   : >> { %v7468_v8 = vpop.permute.xlu1 %2219  ;;  %v7470_v59 = vpop.permute.xlu0 %2239 }
 0x339   : >> { %2605 = vrot.lane.b32.xlu1 %v2596_v21, %s5386_s10  ;;  %2607 = vrot.lane.b32.xlu0 %v2597_v23, %s5386_s10  ;;  %v2649_v21 = vmul.f32 %v2646_v11, %v6927_v4  ;;  %v2672_v23 = vstv %s5130_s14  ;;  %s5157_s14 = sld [smem:[#allocation3 + $0x86]] }
 0x33b   : >> { %v7476_v31 = vpop.permute.xlu1 %2241  ;;  %v7478_v10 = vpop.permute.xlu0 %2243 }
 0x33d   : >> { %2609 = vrot.lane.b32.xlu1 %v2598_v43, %s5386_s10  ;;  %2629 = vrot.lane.b32.xlu0 %v2621_v6, %s5386_s10  ;;  %v2650_v6 = vmul.f32 %v2646_v11, %v6939_v36 }
 0x33f   : >> { %v7484_v28 = vpop.permute.xlu1 %2245  ;;  %v7486_v0 = vpop.permute.xlu0 %2265 }
 0x341   : >> { %2631 = vrot.lane.b32.xlu1 %v2622_v48, %s5386_s10  ;;  %2633 = vrot.lane.b32.xlu0 %v2623_v34, %s5386_s10  ;;  %v2673_v48 = vmul.f32 %v2672_v23, %v6917_v50 }
 0x343   : >> { %v7492_v3 = vpop.permute.xlu1 %2267  ;;  %v7494_v39 = vpop.permute.xlu0 %2269 }
 0x344   : >> { %9831 = vst [vmem:[#allocation63_spill] sm:$0xff] %v7492_v3  ;;  %9832 = vst [vmem:[#allocation9_spill] sm:$0xff] %v7494_v39  ;;  %v3146_v3 = vstv %s5153_s6  ;;  %s8121_s6 = sld [smem:[#allocation3 + $0x7f]] }
 0x345   : >> { %2635 = vrot.lane.b32.xlu1 %v2624_v24, %s5386_s10  ;;  %2655 = vrot.lane.b32.xlu0 %v2647_v58, %s5386_s10  ;;  %v2674_v58 = vmul.f32 %v2672_v23, %v6929_v22 }
 0x347   : >> { %v7500_v53 = vpop.permute.xlu1 %2271  ;;  %v7502_v38 = vpop.permute.xlu0 %2291 }
 0x348   : >> { %9833 = vst [vmem:[#allocation64_spill] sm:$0xff] %v7500_v53  ;;  %9834 = vst [vmem:[#allocation50_spill] sm:$0xff] %v7502_v38  ;;  %v7722_v38 = vld [vmem:[#allocation2 + $0x3] sm:$0xff]  ;;  %v7732_v53 = vld [vmem:[#allocation2 + $0x13] sm:$0xff] }
 0x349   : >> { %2657 = vrot.lane.b32.xlu1 %v2648_v63, %s5386_s10  ;;  %2659 = vrot.lane.b32.xlu0 %v2649_v21, %s5386_s10  ;;  %v2675_v63 = vmul.f32 %v2672_v23, %v6927_v4  ;;  %v2698_v21 = vstv %s5131_s15  ;;  %v3097_v37 = vmul.f32 %v3094_v40, %v7732_v53  ;;  %s5143_s15 = sld [smem:[#allocation3 + $0x78]] }
 0x34b   : >> { %v7508_v25 = vpop.permute.xlu1 %2293  ;;  %v7510_v43 = vpop.permute.xlu0 %2295 }
 0x34c   : >> { %9835 = vst [vmem:[#allocation51_spill] sm:$0xff] %v7508_v25  ;;  %9836 = vst [vmem:[#allocation44_spill] sm:$0xff] %v7510_v43 }
 0x34d   : >> { %2661 = vrot.lane.b32.xlu1 %v2650_v6, %s5386_s10  ;;  %2681 = vrot.lane.b32.xlu0 %v2673_v48, %s5386_s10  ;;  %v2676_v6 = vmul.f32 %v2672_v23, %v6939_v36  ;;  %v2699_v48 = vmul.f32 %v2698_v21, %v6917_v50 }
 0x34f   : >> { %v7516_v34 = vpop.permute.xlu1 %2297  ;;  %v7518_v24 = vpop.permute.xlu0 %2317 }
 0x350   : >> { %9837 = vst [vmem:[#allocation45_spill] sm:$0xff] %v7516_v34  ;;  %9838 = vst [vmem:[#allocation82_spill] sm:$0xff] %v7518_v24 }
 0x351   : >> { %2683 = vrot.lane.b32.xlu1 %v2674_v58, %s5386_s10  ;;  %2685 = vrot.lane.b32.xlu0 %v2675_v63, %s5386_s10  ;;  %v2700_v58 = vmul.f32 %v2698_v21, %v6929_v22  ;;  %v2701_v63 = vmul.f32 %v2698_v21, %v6927_v4 }
 0x353   : >> { %v7524_v11 = vpop.permute.xlu1 %2319  ;;  %v7526_v29 = vpop.permute.xlu0 %2321 }
 0x354   : >> { %9839 = vst [vmem:[#allocation38_spill] sm:$0xff] %v7524_v11  ;;  %9840 = vst [vmem:[#allocation10_spill] sm:$0xff] %v7526_v29 }
 0x355   : >> { %2687 = vrot.lane.b32.xlu1 %v2676_v6, %s5386_s10  ;;  %2707 = vrot.lane.b32.xlu0 %v2699_v48, %s5386_s10  ;;  %v2702_v6 = vmul.f32 %v2698_v21, %v6939_v36  ;;  %v7545_v48 = vld [vmem:[#allocation2 + $0x2] sm:$0xff] }
 0x356   : >> { %v2725_v15 = vmul.f32 %v7545_v48, %v2724_v56 }
 0x357   : >> { %v7532_v45 = vpop.permute.xlu1 %2323  ;;  %v7534_v30 = vpop.permute.xlu0 %2343 }
 0x358   : >> { %9841 = vst [vmem:[#allocation39_spill] sm:$0xff] %v7532_v45  ;;  %9842 = vst [vmem:[#allocation27_spill] sm:$0xff] %v7534_v30 }
 0x359   : >> { %2709 = vrot.lane.b32.xlu1 %v2700_v58, %s5386_s10  ;;  %2711 = vrot.lane.b32.xlu0 %v2701_v63, %s5386_s10  ;;  %v2726_v58 = vmul.f32 %v2724_v56, %v6929_v22  ;;  %v2727_v63 = vmul.f32 %v2724_v56, %v6927_v4 }
 0x35b   : >> { %v7540_v23 = vpop.permute.xlu1 %2345  ;;  %v7542_v50 = vpop.permute.xlu0 %2347 }
 0x35c   : >> { %9843 = vst [vmem:[#allocation28_spill] sm:$0xff] %v7540_v23  ;;  %9844 = vst [vmem:[#allocation21_spill] sm:$0xff] %v7542_v50  ;;  %v2750_v23 = vstv %s5133_s18  ;;  %s5144_s18 = sld [smem:[#allocation3 + $0x79]] }
 0x35d   : >> { %2713 = vrot.lane.b32.xlu1 %v2702_v6, %s5386_s10  ;;  %2733 = vrot.lane.b32.xlu0 %v2725_v15, %s5386_s10  ;;  %v2728_v15 = vmul.f32 %v2724_v56, %v6939_v36  ;;  %v2751_v6 = vmul.f32 %v7545_v48, %v2750_v23 }
 0x35f   : >> { %v7550_v49 = vpop.permute.xlu1 %2349  ;;  %v7552_v61 = vpop.permute.xlu0 %2369 }
 0x360   : >> { %9845 = vst [vmem:[#allocation22_spill] sm:$0xff] %v7550_v49  ;;  %9846 = vst [vmem:[#allocation59_spill] sm:$0xff] %v7552_v61  ;;  %v7570_v61 = vld [vmem:[#allocation2 + $0xa] sm:$0xff] }
 0x361   : >> { %2735 = vrot.lane.b32.xlu1 %v2726_v58, %s5386_s10  ;;  %2737 = vrot.lane.b32.xlu0 %v2727_v63, %s5386_s10  ;;  %v2752_v58 = vmul.f32 %v7570_v61, %v2750_v23  ;;  %v7573_v63 = vld [vmem:[#allocation2 + $0x12] sm:$0xff] }
 0x363   : >> { %v7558_v21 = vpop.permute.xlu1 %2371  ;;  %v7560_v50 = vpop.permute.xlu0 %2373 }
 0x364   : >> { %9847 = vst [vmem:[#allocation15_spill] sm:$0xff] %v7558_v21  ;;  %9848 = vst [vmem:[#allocation60_spill] sm:$0xff] %v7560_v50  ;;  %v2753_v50 = vmul.f32 %v7573_v63, %v2750_v23  ;;  %v2776_v21 = vstv %s5134_s19  ;;  %s7839_s19 = sld [smem:[#allocation3 + $0x88]] }
 0x365   : >> { %2739 = vrot.lane.b32.xlu1 %v2728_v15, %s5386_s10  ;;  %2759 = vrot.lane.b32.xlu0 %v2751_v6, %s5386_s10  ;;  %v7582_v15 = vld [vmem:[#allocation2 + $0x1a] sm:$0xf] }
 0x366   : >> { %v2754_v6 = vmul.f32 %v7582_v15, %v2750_v23 }
 0x367   : >> { %v7566_v22 = vpop.permute.xlu1 %2375  ;;  %v7568_v4 = vpop.permute.xlu0 %2395 }
 0x368   : >> { %9849 = vst [vmem:[#allocation16_spill] sm:$0xff] %v7566_v22  ;;  %v2777_v22 = vmul.f32 %v7545_v48, %v2776_v21 }
 0x369   : >> { %2761 = vrot.lane.b32.xlu1 %v2752_v58, %s5386_s10  ;;  %2763 = vrot.lane.b32.xlu0 %v2753_v50, %s5386_s10  ;;  %v2778_v50 = vmul.f32 %v7570_v61, %v2776_v21  ;;  %v2779_v58 = vmul.f32 %v7573_v63, %v2776_v21 }
 0x36b   : >> { %v7578_v36 = vpop.permute.xlu1 %2397  ;;  %v7580_v56 = vpop.permute.xlu0 %2399 }
 0x36d   : >> { %2765 = vrot.lane.b32.xlu1 %v2754_v6, %s5386_s10  ;;  %2785 = vrot.lane.b32.xlu0 %v2777_v22, %s5386_s10  ;;  %v2780_v22 = vmul.f32 %v7582_v15, %v2776_v21  ;;  %v2803_v6 = vmul.f32 %v7545_v48, %v2802_v17 }
 0x36f   : >> { %v7588_v49 = vpop.permute.xlu1 %2401  ;;  %v7590_v30 = vpop.permute.xlu0 %2421 }
 0x371   : >> { %2787 = vrot.lane.b32.xlu1 %v2778_v50, %s5386_s10  ;;  %2789 = vrot.lane.b32.xlu0 %v2779_v58, %s5386_s10  ;;  %v2804_v50 = vmul.f32 %v7570_v61, %v2802_v17  ;;  %v2805_v58 = vmul.f32 %v7573_v63, %v2802_v17 }
 0x373   : >> { %v7596_v23 = vpop.permute.xlu1 %2423  ;;  %v7598_v45 = vpop.permute.xlu0 %2425 }
 0x375   : >> { %2791 = vrot.lane.b32.xlu1 %v2780_v22, %s5386_s10  ;;  %2811 = vrot.lane.b32.xlu0 %v2803_v6, %s5387_s21  ;;  %v2806_v22 = vmul.f32 %v7582_v15, %v2802_v17  ;;  %v2829_v6 = vmul.f32 %v7545_v48, %v2828_v62 }
 0x377   : >> { %v7604_v44 = vpop.permute.xlu1 %2427  ;;  %v7606_v29 = vpop.permute.xlu0 %2447 }
 0x379   : >> { %2813 = vrot.lane.b32.xlu1 %v2804_v50, %s5387_s21  ;;  %2815 = vrot.lane.b32.xlu0 %v2805_v58, %s5387_s21  ;;  %v2830_v50 = vmul.f32 %v7570_v61, %v2828_v62  ;;  %v2831_v58 = vmul.f32 %v7573_v63, %v2828_v62 }
 0x37b   : >> { %v7612_v21 = vpop.permute.xlu1 %2449  ;;  %v7614_v11 = vpop.permute.xlu0 %2451 }
 0x37d   : >> { %2817 = vrot.lane.b32.xlu1 %v2806_v22, %s5387_s21  ;;  %2837 = vrot.lane.b32.xlu0 %v2829_v6, %s5387_s21  ;;  %v2832_v22 = vmul.f32 %v7582_v15, %v2828_v62  ;;  %v2855_v6 = vmul.f32 %v7545_v48, %v2854_v19 }
 0x37f   : >> { %v7620_v18 = vpop.permute.xlu1 %2453  ;;  %v7622_v24 = vpop.permute.xlu0 %2473 }
 0x380   : >> { %9850 = vst [vmem:[#allocation79_spill] sm:$0xff] %v7622_v24  ;;  %v3172_v24 = vstv %s5154_s7  ;;  %s8148_s7 = sld [smem:[#allocation3 + $0x8e]] }
 0x381   : >> { %2839 = vrot.lane.b32.xlu1 %v2830_v50, %s5387_s21  ;;  %2841 = vrot.lane.b32.xlu0 %v2831_v58, %s5387_s21  ;;  %v2856_v50 = vmul.f32 %v7570_v61, %v2854_v19  ;;  %v2857_v58 = vmul.f32 %v7573_v63, %v2854_v19 }
 0x383   : >> { %v7628_v17 = vpop.permute.xlu1 %2475  ;;  %v7630_v34 = vpop.permute.xlu0 %2477 }
 0x384   : >> { %9851 = vst [vmem:[#allocation80_spill] sm:$0xff] %v7628_v17  ;;  %9852 = vst [vmem:[#allocation77_spill] sm:$0xff] %v7630_v34  ;;  %v7744_v34 = vld [vmem:[#allocation2 + $0x1b] sm:$0xf] }
 0x385   : >> { %2843 = vrot.lane.b32.xlu1 %v2832_v22, %s5387_s21  ;;  %2863 = vrot.lane.b32.xlu0 %v2855_v6, %s5387_s21  ;;  %v2858_v22 = vmul.f32 %v7582_v15, %v2854_v19  ;;  %v2881_v6 = vmul.f32 %v7545_v48, %v2880_v12 }
 0x387   : >> { %v7636_v13 = vpop.permute.xlu1 %2479  ;;  %v7638_v43 = vpop.permute.xlu0 %2499 }
 0x388   : >> { %9853 = vst [vmem:[#allocation71_spill] sm:$0xff] %v7636_v13  ;;  %9854 = vst [vmem:[#allocation34_spill] sm:$0xff] %v7638_v43  ;;  %v2906_v13 = vstv %s5139_s26  ;;  %s7959_s26 = sld [smem:[#allocation3 + $0x7c]] }
 0x389   : >> { %2865 = vrot.lane.b32.xlu1 %v2856_v50, %s5387_s21  ;;  %2867 = vrot.lane.b32.xlu0 %v2857_v58, %s5387_s21  ;;  %v2882_v50 = vmul.f32 %v7570_v61, %v2880_v12  ;;  %v2883_v58 = vmul.f32 %v7573_v63, %v2880_v12 }
 0x38b   : >> { %v7644_v62 = vpop.permute.xlu1 %2501  ;;  %v7646_v25 = vpop.permute.xlu0 %2503 }
 0x38c   : >> { %9855 = vst [vmem:[#allocation65_spill] sm:$0xff] %v7644_v62  ;;  %9856 = vst [vmem:[#allocation35_spill] sm:$0xff] %v7646_v25  ;;  %v2932_v62 = vstv %s5140_s27  ;;  %s7986_s27 = sld [smem:[#allocation3 + $0x8b]] }
 0x38d   : >> { %2869 = vrot.lane.b32.xlu1 %v2858_v22, %s5387_s21  ;;  %2889 = vrot.lane.b32.xlu0 %v2881_v6, %s5387_s21  ;;  %v2884_v22 = vmul.f32 %v7582_v15, %v2880_v12  ;;  %v2907_v6 = vmul.f32 %v7545_v48, %v2906_v13 }
 0x38f   : >> { %v7652_v20 = vpop.permute.xlu1 %2505  ;;  %v7654_v43 = vpop.permute.xlu0 %2525 }
 0x390   : >> { %9857 = vst [vmem:[#allocation66_spill] sm:$0xff] %v7652_v20  ;;  %9858 = vst [vmem:[#allocation52_spill] sm:$0xff] %v7654_v43 }
 0x391   : >> { %2891 = vrot.lane.b32.xlu1 %v2882_v50, %s5387_s21  ;;  %2893 = vrot.lane.b32.xlu0 %v2883_v58, %s5387_s21  ;;  %v2908_v50 = vmul.f32 %v7570_v61, %v2906_v13  ;;  %v2909_v58 = vmul.f32 %v7573_v63, %v2906_v13 }
 0x393   : >> { %v7660_v19 = vpop.permute.xlu1 %2527  ;;  %v7662_v25 = vpop.permute.xlu0 %2529 }
 0x394   : >> { %9859 = vst [vmem:[#allocation53_spill] sm:$0xff] %v7660_v19  ;;  %9860 = vst [vmem:[#allocation72_spill] sm:$0xff] %v7662_v25  ;;  %v2958_v19 = vstv %s5141_s28  ;;  %s8013_s28 = sld [smem:[#allocation3 + $0x7d]] }
 0x395   : >> { %2895 = vrot.lane.b32.xlu1 %v2884_v22, %s5387_s21  ;;  %2915 = vrot.lane.b32.xlu0 %v2907_v6, %s5387_s21  ;;  %v2910_v22 = vmul.f32 %v7582_v15, %v2906_v13  ;;  %v2933_v6 = vmul.f32 %v7545_v48, %v2932_v62 }
 0x397   : >> { %v7668_v43 = vpop.permute.xlu1 %2531  ;;  %v7670_v20 = vpop.permute.xlu0 %2551 }
 0x398   : >> { %9861 = vst [vmem:[#allocation46_spill] sm:$0xff] %v7668_v43  ;;  %9862 = vst [vmem:[#allocation85_spill] sm:$0xff] %v7670_v20 }
 0x399   : >> { %2917 = vrot.lane.b32.xlu1 %v2908_v50, %s5387_s21  ;;  %2919 = vrot.lane.b32.xlu0 %v2909_v58, %s5387_s21  ;;  %v2934_v50 = vmul.f32 %v7570_v61, %v2932_v62  ;;  %v2935_v58 = vmul.f32 %v7573_v63, %v2932_v62 }
 0x39b   : >> { %v7676_v12 = vpop.permute.xlu1 %2553  ;;  %v7678_v25 = vpop.permute.xlu0 %2555 }
 0x39c   : >> { %9863 = vst [vmem:[#allocation40_spill] sm:$0xff] %v7676_v12  ;;  %9864 = vst [vmem:[#allocation11_spill] sm:$0xff] %v7678_v25  ;;  %v2984_v12 = vstv %s5142_s29  ;;  %s8040_s29 = sld [smem:[#allocation3 + $0x8c]] }
 0x39d   : >> { %2921 = vrot.lane.b32.xlu1 %v2910_v22, %s5387_s21  ;;  %2941 = vrot.lane.b32.xlu0 %v2933_v6, %s5387_s21  ;;  %v2936_v22 = vmul.f32 %v7582_v15, %v2932_v62  ;;  %v2959_v6 = vmul.f32 %v7545_v48, %v2958_v19 }
 0x39f   : >> { %v7684_v20 = vpop.permute.xlu1 %2557  ;;  %v7686_v43 = vpop.permute.xlu0 %2577 }
 0x3a0   : >> { %9865 = vst [vmem:[#allocation41_spill] sm:$0xff] %v7684_v20  ;;  %9866 = vst [vmem:[#allocation29_spill] sm:$0xff] %v7686_v43 }
 0x3a1   : >> { %2943 = vrot.lane.b32.xlu1 %v2934_v50, %s5387_s21  ;;  %2945 = vrot.lane.b32.xlu0 %v2935_v58, %s5387_s21  ;;  %v2960_v50 = vmul.f32 %v7570_v61, %v2958_v19  ;;  %v2961_v58 = vmul.f32 %v7573_v63, %v2958_v19 }
 0x3a3   : >> { %v7692_v13 = vpop.permute.xlu1 %2579  ;;  %v7694_v25 = vpop.permute.xlu0 %2581 }
 0x3a4   : >> { %9867 = vst [vmem:[#allocation30_spill] sm:$0xff] %v7692_v13  ;;  %9868 = vst [vmem:[#allocation47_spill] sm:$0xff] %v7694_v25 }
 0x3a5   : >> { %2947 = vrot.lane.b32.xlu1 %v2936_v22, %s5387_s21  ;;  %2967 = vrot.lane.b32.xlu0 %v2959_v6, %s5387_s21  ;;  %v2962_v22 = vmul.f32 %v7582_v15, %v2958_v19  ;;  %v2985_v6 = vmul.f32 %v7545_v48, %v2984_v12 }
 0x3a7   : >> { %v7700_v43 = vpop.permute.xlu1 %2583  ;;  %v7702_v20 = vpop.permute.xlu0 %2603 }
 0x3a8   : >> { %9869 = vst [vmem:[#allocation23_spill] sm:$0xff] %v7700_v43 }
 0x3a9   : >> { %2969 = vrot.lane.b32.xlu1 %v2960_v50, %s5387_s21  ;;  %2971 = vrot.lane.b32.xlu0 %v2961_v58, %s5387_s21  ;;  %v2986_v50 = vmul.f32 %v7570_v61, %v2984_v12  ;;  %v2987_v58 = vmul.f32 %v7573_v63, %v2984_v12  ;;  %v7734_v61 = vld [vmem:[#allocation2 + $0xb] sm:$0xff] }
 0x3ab   : >> { %v7708_v62 = vpop.permute.xlu1 %2605  ;;  %v7710_v25 = vpop.permute.xlu0 %2607 }
 0x3ad   : >> { %2973 = vrot.lane.b32.xlu1 %v2962_v22, %s5387_s21  ;;  %2993 = vrot.lane.b32.xlu0 %v2985_v6, %s5387_s21  ;;  %v2988_v22 = vmul.f32 %v7582_v15, %v2984_v12  ;;  %v3095_v6 = vmul.f32 %v3094_v40, %v7722_v38  ;;  %v3120_v15 = vstv %s5152_s4  ;;  %s8094_s4 = sld [smem:[#allocation3 + $0x8d]] }
 0x3ae   : >> { %v3121_v17 = vmul.f32 %v3120_v15, %v7722_v38 }
 0x3af   : >> { %v7716_v43 = vpop.permute.xlu1 %2609  ;;  %v7718_v13 = vpop.permute.xlu0 %2629 }
 0x3b1   : >> { %2995 = vrot.lane.b32.xlu1 %v2986_v50, %s5387_s21  ;;  %2997 = vrot.lane.b32.xlu0 %v2987_v58, %s5387_s21  ;;  %v3096_v58 = vmul.f32 %v3094_v40, %v7734_v61 }
 0x3b3   : >> { %v7726_v48 = vpop.permute.xlu1 %2631  ;;  %v7728_v19 = vpop.permute.xlu0 %2633 }
 0x3b5   : >> { %2999 = vrot.lane.b32.xlu1 %v2988_v22, %s5387_s21  ;;  %3103 = vrot.lane.b32.xlu0 %v3095_v6, %s5384_s16  ;;  %v3098_v6 = vmul.f32 %v3094_v40, %v7744_v34 }
 0x3b7   : >> { %v7738_v63 = vpop.permute.xlu1 %2635  ;;  %v7740_v50 = vpop.permute.xlu0 %2655 }
 0x3b9   : >> { %3105 = vrot.lane.b32.xlu1 %v3096_v58, %s5384_s16  ;;  %3107 = vrot.lane.b32.xlu0 %v3097_v37, %s5384_s16  ;;  %v3122_v58 = vmul.f32 %v3120_v15, %v7734_v61  ;;  %v3123_v37 = vmul.f32 %v3120_v15, %v7732_v53 }
 0x3bb   : >> { %v7748_v12 = vpop.permute.xlu1 %2657  ;;  %v7750_v22 = vpop.permute.xlu0 %2659 }
 0x3bd   : >> { %3109 = vrot.lane.b32.xlu1 %v3098_v6, %s5384_s16  ;;  %3129 = vrot.lane.b32.xlu0 %v3121_v17, %s5384_s16  ;;  %v3124_v17 = vmul.f32 %v3120_v15, %v7744_v34  ;;  %v3147_v6 = vmul.f32 %v3146_v3, %v7722_v38 }
 0x3bf   : >> { %v7756_v39 = vpop.permute.xlu1 %2661  ;;  %v7758_v47 = vpop.permute.xlu0 %2681 }
 0x3c0   : >> { %9870 = vst [vmem:[#allocation86_spill] sm:$0xff] %v7756_v39  ;;  %9871 = vst [vmem:[#allocation17_spill] sm:$0xff] %v7758_v47 }
 0x3c1   : >> { %3131 = vrot.lane.b32.xlu1 %v3122_v58, %s5384_s16  ;;  %3133 = vrot.lane.b32.xlu0 %v3123_v37, %s5384_s16  ;;  %v3148_v58 = vmul.f32 %v3146_v3, %v7734_v61  ;;  %v3149_v37 = vmul.f32 %v3146_v3, %v7732_v53 }
 0x3c3   : >> { %v7764_v40 = vpop.permute.xlu1 %2683  ;;  %v7766_v54 = vpop.permute.xlu0 %2685 }
 0x3c4   : >> { %9872 = vst [vmem:[#allocation12_spill] sm:$0xff] %v7764_v40  ;;  %9873 = vst [vmem:[#allocation18_spill] sm:$0xff] %v7766_v54  ;;  %v3198_v40 = vstv %s5155_s11  ;;  %s5166_s11 = sld [smem:[#allocation3 + $0x8f]] }
 0x3c5   : >> { %3135 = vrot.lane.b32.xlu1 %v3124_v17, %s5384_s16  ;;  %3155 = vrot.lane.b32.xlu0 %v3147_v6, %s5384_s16  ;;  %v3150_v17 = vmul.f32 %v3146_v3, %v7744_v34  ;;  %v3173_v6 = vmul.f32 %v3172_v24, %v7722_v38 }
 0x3c7   : >> { %v7772_v47 = vpop.permute.xlu1 %2687  ;;  %v7774_v39 = vpop.permute.xlu0 %2707 }
 0x3c8   : >> { %9874 = vst [vmem:[#allocation83_spill] sm:$0xff] %v7772_v47  ;;  %9875 = vst [vmem:[#allocation84_spill] sm:$0xff] %v7774_v39 }
 0x3c9   : >> { %3157 = vrot.lane.b32.xlu1 %v3148_v58, %s5384_s16  ;;  %3159 = vrot.lane.b32.xlu0 %v3149_v37, %s5384_s16  ;;  %v3174_v58 = vmul.f32 %v3172_v24, %v7734_v61  ;;  %v3175_v37 = vmul.f32 %v3172_v24, %v7732_v53 }
 0x3cb   : >> { %v7780_v15 = vpop.permute.xlu1 %2709  ;;  %v7782_v54 = vpop.permute.xlu0 %2711 }
 0x3cc   : >> { %9876 = vst [vmem:[#allocation24_spill] sm:$0xff] %v7780_v15  ;;  %9877 = vst [vmem:[#allocation73_spill] sm:$0xff] %v7782_v54  ;;  %v3224_v15 = vstv %s5156_s13  ;;  %s5167_s13 = sld [smem:[#allocation3 + $0x90]] }
 0x3cd   : >> { %3161 = vrot.lane.b32.xlu1 %v3150_v17, %s5384_s16  ;;  %3181 = vrot.lane.b32.xlu0 %v3173_v6, %s5384_s16  ;;  %v3176_v17 = vmul.f32 %v3172_v24, %v7744_v34  ;;  %v3199_v6 = vmul.f32 %v3198_v40, %v7722_v38 }
 0x3cf   : >> { %v7788_v39 = vpop.permute.xlu1 %2713  ;;  %v7790_v47 = vpop.permute.xlu0 %2733 }
 0x3d0   : >> { %9878 = vst [vmem:[#allocation61_spill] sm:$0xff] %v7788_v39  ;;  %9879 = vst [vmem:[#allocation67_spill] sm:$0xff] %v7790_v47 }
 0x3d1   : >> { %3183 = vrot.lane.b32.xlu1 %v3174_v58, %s5384_s16  ;;  %3185 = vrot.lane.b32.xlu0 %v3175_v37, %s5384_s16  ;;  %v3200_v58 = vmul.f32 %v3198_v40, %v7734_v61  ;;  %v3201_v37 = vmul.f32 %v3198_v40, %v7732_v53 }
 0x3d3   : >> { %v7796_v3 = vpop.permute.xlu1 %2735  ;;  %v7798_v54 = vpop.permute.xlu0 %2737 }
 0x3d4   : >> { %9880 = vst [vmem:[#allocation62_spill] sm:$0xff] %v7796_v3  ;;  %9881 = vst [vmem:[#allocation68_spill] sm:$0xff] %v7798_v54 }
 0x3d5   : >> { %3187 = vrot.lane.b32.xlu1 %v3176_v17, %s5384_s16  ;;  %3207 = vrot.lane.b32.xlu0 %v3199_v6, %s5384_s16  ;;  %v3202_v17 = vmul.f32 %v3198_v40, %v7744_v34  ;;  %v3225_v6 = vmul.f32 %v3224_v15, %v7722_v38  ;;  %v2199_v40 = vadd.f32 %v7434_v35, %v7060_v14 }
 0x3d6   : >> { %v2200_v14 = vadd.f32 %v7444_v46, %v7081_v60  ;;  %v2201_v35 = vadd.f32 %v7446_v5, %v7083_v9  ;;  %v2202_v9 = vadd.f32 %v7452_v52, %v7105_v51 }
 0x3d7   : >> { %v7804_v47 = vpop.permute.xlu1 %2739  ;;  %v7806_v39 = vpop.permute.xlu0 %2759 }
 0x3d8   : >> { %9882 = vst [vmem:[#allocation54_spill] sm:$0xff] %v7804_v47  ;;  %9883 = vst [vmem:[#allocation55_spill] sm:$0xff] %v7806_v39 }
 0x3d9   : >> { %3209 = vrot.lane.b32.xlu1 %v3200_v58, %s5384_s16  ;;  %3211 = vrot.lane.b32.xlu0 %v3201_v37, %s5384_s16  ;;  %v3226_v58 = vmul.f32 %v3224_v15, %v7734_v61  ;;  %v3227_v37 = vmul.f32 %v3224_v15, %v7732_v53 }
 0x3db   : >> { %v7812_v24 = vpop.permute.xlu1 %2761  ;;  %v7814_v54 = vpop.permute.xlu0 %2763 }
 0x3dc   : >> { %9884 = vst [vmem:[#allocation74_spill] sm:$0xff] %v7812_v24  ;;  %9885 = vst [vmem:[#allocation48_spill] sm:$0xff] %v7814_v54  ;;  %v3250_v24 = vstv %s5157_s14  ;;  %v2407_v54 = vadd.f32 %v7568_v4, %v2199_v40  ;;  %v3276_v40 = vstv %s5158_s17  ;;  %s5168_s14 = sld [smem:[#allocation3 + $0x91]]  ;;  %s5170_s17 = sld [smem:[#allocation3 + $0x93]] }
 0x3dd   : >> { %3213 = vrot.lane.b32.xlu1 %v3202_v17, %s5384_s16  ;;  %3233 = vrot.lane.b32.xlu0 %v3225_v6, %s5384_s16  ;;  %v3252_v4 = vmul.f32 %v3250_v24, %v7734_v61  ;;  %v3254_v52 = vmul.f32 %v3250_v24, %v7744_v34 }
 0x3df   : >> { %v7820_v39 = vpop.permute.xlu1 %2765  ;;  %v7822_v47 = vpop.permute.xlu0 %2785 }
 0x3e0   : >> { %9886 = vst [vmem:[#allocation36_spill] sm:$0xff] %v7820_v39  ;;  %9887 = vst [vmem:[#allocation42_spill] sm:$0xff] %v7822_v47  ;;  %v3228_v47 = vmul.f32 %v3224_v15, %v7744_v34  ;;  %v3251_v39 = vmul.f32 %v3250_v24, %v7722_v38 }
 0x3e1   : >> { %3235 = vrot.lane.b32.xlu1 %v3226_v58, %s5384_s16  ;;  %3237 = vrot.lane.b32.xlu0 %v3227_v37, %s5384_s16  ;;  %v3014_v58 = vstv %s5143_s15  ;;  %v2615_v37 = vadd.f32 %v7702_v20, %v2407_v54  ;;  %v7857_v54 = vstv %s5144_s18  ;;  %v2225_v20 = vadd.f32 %v7454_v32, %v7107_v33  ;;  %s5169_s15 = sld [smem:[#allocation3 + $0x92]]  ;;  %s5171_s18 = sld [smem:[#allocation3 + $0x94]] }
 0x3e2   : >> { %v3015_v60 = vmul.f32 %v3014_v58, %v7722_v38 }
 0x3e3   : >> { %v7830_v17 = vpop.permute.xlu1 %2787  ;;  %v7832_v6 = vpop.permute.xlu0 %2789  ;;  %v2433_v33 = vadd.f32 %v7590_v30, %v2225_v20  ;;  %v2228_v20 = vadd.f32 %v7468_v8, %v7158_v55 }
 0x3e4   : >> { %9888 = vst [vmem:[#allocation31_spill] sm:$0xff] %v7830_v17  ;;  %9889 = vst [vmem:[#allocation87_spill] sm:$0xff] %v7832_v6  ;;  %v2409_v17 = vadd.f32 %v7580_v56, %v2201_v35  ;;  %v3017_v35 = vmul.f32 %v3014_v58, %v7732_v53 }
 0x3e5   : >> { %3239 = vrot.lane.b32.xlu1 %v3228_v47, %s5384_s16  ;;  %3259 = vrot.lane.b32.xlu0 %v3251_v39, %s5384_s16  ;;  %v3253_v47 = vmul.f32 %v3250_v24, %v7732_v53  ;;  %v2408_v39 = vadd.f32 %v7578_v36, %v2200_v14  ;;  %v3016_v14 = vmul.f32 %v3014_v58, %v7734_v61  ;;  %v7880_v24 = vstv %s7839_s19  ;;  %s5172_s19 = sld [smem:[#allocation3 + $0x95]] }
 0x3e6   : >> { %v2617_v5 = vadd.f32 %v7710_v25, %v2409_v17  ;;  %v2226_v25 = vadd.f32 %v7460_v7, %v7131_v42  ;;  %v2641_v30 = vadd.f32 %v7718_v13, %v2433_v33 }
 0x3e7   : >> { %v7846_v15 = vpop.permute.xlu1 %2791  ;;  %v2812_v6 = vpop.permute.xlu0 %2811  ;;  %v2616_v46 = vadd.f32 %v7708_v62, %v2408_v39  ;;  %v3025_v39 = vmul.f32 %v7857_v54, %v7722_v38 }
 0x3e8   : >> { %v2823_v3 = vadd.f32 %v2812_v6, %v2615_v37  ;;  %v3277_v6 = vmul.f32 %v3276_v40, %v7722_v38  ;;  %v2410_v37 = vadd.f32 %v7588_v49, %v2202_v9 }
 0x3e9   : >> { %3261 = vrot.lane.b32.xlu1 %v3252_v4, %s5384_s16  ;;  %3263 = vrot.lane.b32.xlu0 %v3253_v47, %s5384_s16  ;;  %v3018_v47 = vmul.f32 %v3014_v58, %v7744_v34  ;;  %v7904_v58 = vstv %s7859_s20  ;;  %s5173_s20 = sld [smem:[#allocation3 + $0x96]] }
 0x3ea   : >> { %v7865_v36 = vadd.f32 %v3015_v60, %v2823_v3  ;;  %v2227_v3 = vadd.f32 %v7462_v16, %v7133_v26  ;;  %v2618_v49 = vadd.f32 %v7716_v43, %v2410_v37  ;;  %v3278_v26 = vmul.f32 %v3276_v40, %v7734_v61 }
 0x3eb   : >> { %v2814_v56 = vpop.permute.xlu1 %2813  ;;  %v2816_v51 = vpop.permute.xlu0 %2815  ;;  %v3279_v16 = vmul.f32 %v3276_v40, %v7732_v53  ;;  %v2434_v43 = vadd.f32 %v7596_v23, %v2226_v25  ;;  %v7930_v37 = vstv %s7882_s22  ;;  %s5174_s22 = sld [smem:[#allocation3 + $0x97]] }
 0x3ec   : >> { %v2824_v32 = vadd.f32 %v2814_v56, %v2616_v46  ;;  %v2825_v62 = vadd.f32 %v2816_v51, %v2617_v5  ;;  %v2435_v13 = vadd.f32 %v7598_v45, %v2227_v3  ;;  %v2251_v46 = vadd.f32 %v7470_v59, %v7160_v27 }
 0x3ed   : >> { %3265 = vrot.lane.b32.xlu1 %v3254_v52, %s5384_s16  ;;  %3285 = vrot.lane.b32.xlu0 %v3277_v6, %s5384_s16  ;;  %v2642_v23 = vadd.f32 %v7726_v48, %v2434_v43  ;;  %v3280_v27 = vmul.f32 %v3276_v40, %v7744_v34  ;;  %v3303_v59 = vmul.f32 %v7880_v24, %v7722_v38 }
 0x3ee   : >> { %v7886_v17 = vadd.f32 %v3016_v14, %v2824_v32  ;;  %v7888_v4 = vadd.f32 %v3017_v35, %v2825_v62  ;;  %v2643_v45 = vadd.f32 %v7728_v19, %v2435_v13  ;;  %v3026_v51 = vmul.f32 %v7857_v54, %v7734_v61 }
 0x3ef   : >> { %v2818_v42 = vpop.permute.xlu1 %2817  ;;  %v2838_v7 = vpop.permute.xlu0 %2837  ;;  %v3027_v48 = vmul.f32 %v7857_v54, %v7732_v53  ;;  %v2436_v19 = vadd.f32 %v7604_v44, %v2228_v20  ;;  %v2459_v52 = vadd.f32 %v7606_v29, %v2251_v46  ;;  %v2252_v35 = vadd.f32 %v7476_v31, %v7185_v57  ;;  %v9893_v46 = vld [vmem:[#allocation43_spill] sm:$0xff] }
 0x3f0   : >> { %v2826_v60 = vadd.f32 %v2818_v42, %v2618_v49  ;;  %v2849_v9 = vadd.f32 %v2838_v7, %v2641_v30  ;;  %v2253_v40 = vadd.f32 %v7478_v10, %v7187_v41  ;;  %v3304_v41 = vmul.f32 %v7880_v24, %v7734_v61 }
 0x3f1   : >> { %3287 = vrot.lane.b32.xlu1 %v3278_v26, %s5384_s16  ;;  %3289 = vrot.lane.b32.xlu0 %v3279_v16, %s5384_s16  ;;  %v2644_v44 = vadd.f32 %v7738_v63, %v2436_v19  ;;  %v2667_v29 = vadd.f32 %v7740_v50, %v2459_v52  ;;  %v3305_v10 = vmul.f32 %v7880_v24, %v7732_v53 }
 0x3f2   : >> { %v7910_v5 = vadd.f32 %v3018_v47, %v2826_v60  ;;  %v7912_v56 = vadd.f32 %v3025_v39, %v2849_v9  ;;  %v3028_v62 = vmul.f32 %v7857_v54, %v7744_v34  ;;  %v3035_v63 = vmul.f32 %v7904_v58, %v7722_v38  ;;  %v9890_v47 = vld [vmem:[#allocation79_spill] sm:$0xff]  ;;  %v9891_v60 = vld [vmem:[#allocation56_spill] sm:$0xff] }
 0x3f3   : >> { %v2840_v55 = vpop.permute.xlu1 %2839  ;;  %v2842_v8 = vpop.permute.xlu0 %2841  ;;  %v2460_v50 = vadd.f32 %v7612_v21, %v2252_v35  ;;  %v2461_v25 = vadd.f32 %v7614_v11, %v2253_v40  ;;  %v2254_v30 = vadd.f32 %v7484_v28, %v7212_v1  ;;  %v2277_v42 = vadd.f32 %v7486_v0, %v7214_v2  ;;  %v9892_v9 = vld [vmem:[#allocation63_spill] sm:$0xff]  ;;  %v9897_v40 = vld [vmem:[#allocation80_spill] sm:$0xff] }
 0x3f4   : >> { %v2850_v6 = vadd.f32 %v2840_v55, %v2642_v23  ;;  %v2851_v14 = vadd.f32 %v2842_v8, %v2643_v45  ;;  %v7957_v54 = vstv %s7906_s23  ;;  %v3306_v2 = vmul.f32 %v7880_v24, %v7744_v34  ;;  %v9894_v24 = vld [vmem:[#allocation9_spill] sm:$0xff]  ;;  %v9895_v55 = vld [vmem:[#allocation86_spill] sm:$0xff]  ;;  %s5175_s23 = sld [smem:[#allocation3 + $0x98]] }
 0x3f5   : >> { %3291 = vrot.lane.b32.xlu1 %v3280_v27, %s5384_s16  ;;  %3311 = vrot.lane.b32.xlu0 %v3303_v59, %s5385_s25  ;;  %v2668_v21 = vadd.f32 %v7748_v12, %v2460_v50  ;;  %v2669_v11 = vadd.f32 %v7750_v22, %v2461_v25  ;;  %v3329_v0 = vmul.f32 %v7930_v37, %v7722_v38  ;;  %v7984_v45 = vstv %s7932_s24  ;;  %v9896_v8 = vld [vmem:[#allocation17_spill] sm:$0xff]  ;;  %v9902_v25 = vld [vmem:[#allocation50_spill] sm:$0xff]  ;;  %s5176_s24 = sld [smem:[#allocation3 + $0x99]] }
 0x3f6   : >> { %v7936_v33 = vadd.f32 %v3026_v51, %v2850_v6  ;;  %v7938_v32 = vadd.f32 %v3027_v48, %v2851_v14  ;;  %v3036_v16 = vmul.f32 %v7904_v58, %v7734_v61  ;;  %v3037_v12 = vmul.f32 %v7904_v58, %v7732_v53  ;;  %v9901_v50 = vld [vmem:[#allocation37_spill] sm:$0xff] }
 0x3f7   : >> { %v2844_v57 = vpop.permute.xlu1 %2843  ;;  %v2864_v31 = vpop.permute.xlu0 %2863  ;;  %v2462_v22 = vadd.f32 %v7620_v18, %v2254_v30  ;;  %v2485_v39 = vadd.f32 %v9890_v47, %v2277_v42  ;;  %v2278_v20 = vadd.f32 %v9892_v9, %v9891_v60  ;;  %v2279_v23 = vadd.f32 %v9894_v24, %v9893_v46  ;;  %v9904_v42 = vld [vmem:[#allocation18_spill] sm:$0xff]  ;;  %v9905_v47 = vld [vmem:[#allocation71_spill] sm:$0xff] }
 0x3f8   : >> { %v2852_v3 = vadd.f32 %v2844_v57, %v2644_v44  ;;  %v2875_v49 = vadd.f32 %v2864_v31, %v2667_v29  ;;  %v3330_v52 = vmul.f32 %v7930_v37, %v7734_v61  ;;  %v3331_v6 = vmul.f32 %v7930_v37, %v7732_v53  ;;  %v9898_v29 = vld [vmem:[#allocation77_spill] sm:$0xff]  ;;  %v9908_v46 = vld [vmem:[#allocation51_spill] sm:$0xff] }
 0x3f9   : >> { %3313 = vrot.lane.b32.xlu1 %v3304_v41, %s5385_s25  ;;  %3315 = vrot.lane.b32.xlu0 %v3305_v10, %s5385_s25  ;;  %v2670_v18 = vadd.f32 %v9895_v55, %v2462_v22  ;;  %v2693_v27 = vadd.f32 %v9896_v8, %v2485_v39  ;;  %v3038_v14 = vmul.f32 %v7904_v58, %v7744_v34  ;;  %v9899_v10 = vld [vmem:[#allocation57_spill] sm:$0xff]  ;;  %v8011_v58 = vstv %s7959_s26  ;;  %v9911_v8 = vld [vmem:[#allocation83_spill] sm:$0xff]  ;;  %s5177_s26 = sld [smem:[#allocation3 + $0x9a]] }
 0x3fa   : >> { %v7963_v7 = vadd.f32 %v3028_v62, %v2852_v3  ;;  %v7965_v26 = vadd.f32 %v3035_v63, %v2875_v49  ;;  %v3045_v35 = vmul.f32 %v7957_v54, %v7722_v38  ;;  %v2486_v44 = vadd.f32 %v9897_v40, %v2278_v20  ;;  %v9900_v62 = vld [vmem:[#allocation64_spill] sm:$0xff]  ;;  %v9907_v20 = vld [vmem:[#allocation58_spill] sm:$0xff] }
 0x3fb   : >> { %v2866_v1 = vpop.permute.xlu1 %2865  ;;  %v2868_v28 = vpop.permute.xlu0 %2867  ;;  %v2487_v57 = vadd.f32 %v9898_v29, %v2279_v23  ;;  %v2280_v63 = vadd.f32 %v9900_v62, %v9899_v10  ;;  %v2303_v3 = vadd.f32 %v9902_v25, %v9901_v50  ;;  %v9903_v49 = vld [vmem:[#allocation12_spill] sm:$0xff]  ;;  %v3047_v22 = vmul.f32 %v7957_v54, %v7732_v53  ;;  %v9909_v23 = vld [vmem:[#allocation13_spill] sm:$0xff]  ;;  %v9916_v10 = vld [vmem:[#allocation35_spill] sm:$0xff] }
 0x3fc   : >> { %v2876_v43 = vadd.f32 %v2866_v1, %v2668_v21  ;;  %v2877_v13 = vadd.f32 %v2868_v28, %v2669_v11  ;;  %v2694_v30 = vadd.f32 %v9903_v49, %v2486_v44  ;;  %v2304_v24 = vadd.f32 %v9908_v46, %v9907_v20  ;;  %v9917_v25 = vld [vmem:[#allocation25_spill] sm:$0xff]  ;;  %v9925_v20 = vld [vmem:[#allocation66_spill] sm:$0xff] }
 0x3fd   : >> { %3317 = vrot.lane.b32.xlu1 %v3306_v2, %s5385_s25  ;;  %3337 = vrot.lane.b32.xlu0 %v3329_v0, %s5385_s25  ;;  %v2695_v21 = vadd.f32 %v9904_v42, %v2487_v57  ;;  %v3332_v0 = vmul.f32 %v7930_v37, %v7744_v34  ;;  %v2488_v39 = vadd.f32 %v9905_v47, %v2280_v63  ;;  %v9910_v37 = vld [vmem:[#allocation44_spill] sm:$0xff]  ;;  %v9920_v42 = vld [vmem:[#allocation82_spill] sm:$0xff] }
 0x3fe   : >> { %v7990_v59 = vadd.f32 %v3036_v16, %v2876_v43  ;;  %v7992_v51 = vadd.f32 %v3037_v12, %v2877_v13  ;;  %v3355_v16 = vmul.f32 %v7984_v45, %v7722_v38  ;;  %v3046_v12 = vmul.f32 %v7957_v54, %v7734_v61  ;;  %v9906_v43 = vld [vmem:[#allocation34_spill] sm:$0xff] }
 0x3ff   : >> { %v2870_v48 = vpop.permute.xlu1 %2869  ;;  %v2890_v19 = vpop.permute.xlu0 %2889  ;;  %v2511_v13 = vadd.f32 %v9906_v43, %v2303_v3  ;;  %v2305_v55 = vadd.f32 %v9910_v37, %v9909_v23  ;;  %v3356_v40 = vmul.f32 %v7984_v45, %v7734_v61  ;;  %v3357_v44 = vmul.f32 %v7984_v45, %v7732_v53  ;;  %v9918_v3 = vld [vmem:[#allocation45_spill] sm:$0xff] }
 0x400   : >> { %v2878_v31 = vadd.f32 %v2870_v48, %v2670_v18  ;;  %v2901_v41 = vadd.f32 %v2890_v19, %v2693_v27  ;;  %v8038_v18 = vstv %s7986_s27  ;;  %v2696_v27 = vadd.f32 %v9911_v8, %v2488_v39  ;;  %v9912_v48 = vld [vmem:[#allocation84_spill] sm:$0xff]  ;;  %v9927_v8 = vld [vmem:[#allocation19_spill] sm:$0xff]  ;;  %s5178_s27 = sld [smem:[#allocation3 + $0x9b]] }
 0x401   : >> { %3339 = vrot.lane.b32.xlu1 %v3330_v52, %s5385_s25  ;;  %3341 = vrot.lane.b32.xlu0 %v3331_v6, %s5385_s25  ;;  %v2719_v19 = vadd.f32 %v9912_v48, %v2511_v13  ;;  %v3048_v29 = vmul.f32 %v7957_v54, %v7744_v34  ;;  %v3055_v57 = vmul.f32 %v8011_v58, %v7722_v38  ;;  %v8065_v54 = vstv %s8013_s28  ;;  %s5179_s28 = sld [smem:[#allocation3 + $0x9c]] }
 0x402   : >> { %v8017_v11 = vadd.f32 %v3038_v14, %v2878_v31  ;;  %v8019_v1 = vadd.f32 %v3045_v35, %v2901_v41  ;;  %v9915_v31 = vld [vmem:[#allocation65_spill] sm:$0xff]  ;;  %v2513_v62 = vadd.f32 %v9916_v10, %v2305_v55  ;;  %v2306_v49 = vadd.f32 %v9918_v3, %v9917_v25 }
 0x403   : >> { %v2892_v28 = vpop.permute.xlu1 %2891  ;;  %v2894_v2 = vpop.permute.xlu0 %2893  ;;  %v2512_v41 = vadd.f32 %v9915_v31, %v2304_v24  ;;  %v3358_v43 = vmul.f32 %v7984_v45, %v7744_v34  ;;  %v3381_v13 = vmul.f32 %v8038_v18, %v7722_v38  ;;  %v9926_v24 = vld [vmem:[#allocation52_spill] sm:$0xff]  ;;  %v9930_v45 = vld [vmem:[#allocation10_spill] sm:$0xff]  ;;  %v3058_v25 = vmul.f32 %v8011_v58, %v7744_v34 }
 0x404   : >> { %v2902_v60 = vadd.f32 %v2892_v28, %v2694_v30  ;;  %v2903_v9 = vadd.f32 %v2894_v2, %v2695_v21  ;;  %v9919_v30 = vld [vmem:[#allocation26_spill] sm:$0xff]  ;;  %v9921_v28 = vld [vmem:[#allocation24_spill] sm:$0xff]  ;;  %v2514_v46 = vadd.f32 %v9925_v20, %v2306_v49  ;;  %v3065_v3 = vmul.f32 %v8065_v54, %v7722_v38  ;;  %v9935_v49 = vld [vmem:[#allocation53_spill] sm:$0xff] }
 0x405   : >> { %3343 = vrot.lane.b32.xlu1 %v3332_v0, %s5385_s25  ;;  %3363 = vrot.lane.b32.xlu0 %v3355_v16, %s5385_s25  ;;  %v2329_v21 = vadd.f32 %v9920_v42, %v9919_v30  ;;  %v2720_v2 = vadd.f32 %v9921_v28, %v2512_v41  ;;  %v9922_v0 = vld [vmem:[#allocation73_spill] sm:$0xff]  ;;  %v9936_v42 = vld [vmem:[#allocation72_spill] sm:$0xff] }
 0x406   : >> { %v8044_v52 = vadd.f32 %v3046_v12, %v2902_v60  ;;  %v8046_v6 = vadd.f32 %v3047_v22, %v2903_v9  ;;  %v2721_v16 = vadd.f32 %v9922_v0, %v2513_v62  ;;  %v3056_v60 = vmul.f32 %v8011_v58, %v7734_v61  ;;  %v9937_v0 = vld [vmem:[#allocation32_spill] sm:$0xff] }
 0x407   : >> { %v2896_v14 = vpop.permute.xlu1 %2895  ;;  %v2916_v35 = vpop.permute.xlu0 %2915  ;;  %v3057_v9 = vmul.f32 %v8011_v58, %v7732_v53  ;;  %v2537_v23 = vadd.f32 %v9926_v24, %v2329_v21  ;;  %v8119_v58 = vstv %s8067_s30  ;;  %v9942_v20 = vld [vmem:[#allocation68_spill] sm:$0xff]  ;;  %s5181_s30 = sld [smem:[#allocation3 + $0x9e]] }
 0x408   : >> { %9913 = vst [vmem:[#allocation49_spill] sm:$0xff] %v8044_v52  ;;  %9914 = vst [vmem:[#allocation79_spill] sm:$0xff] %v8046_v6  ;;  %v2904_v63 = vadd.f32 %v2896_v14, %v2696_v27  ;;  %v2927_v50 = vadd.f32 %v2916_v35, %v2719_v19  ;;  %v9928_v27 = vld [vmem:[#allocation38_spill] sm:$0xff]  ;;  %v9929_v19 = vld [vmem:[#allocation20_spill] sm:$0xff]  ;;  %v8092_v35 = vstv %s8040_s29  ;;  %s5180_s29 = sld [smem:[#allocation3 + $0x9d]] }
 0x409   : >> { %3365 = vrot.lane.b32.xlu1 %v3356_v40, %s5385_s25  ;;  %3367 = vrot.lane.b32.xlu0 %v3357_v44, %s5385_s25  ;;  %v2330_v48 = vadd.f32 %v9928_v27, %v9927_v8  ;;  %v2331_v14 = vadd.f32 %v9930_v45, %v9929_v19  ;;  %v9931_v40 = vld [vmem:[#allocation61_spill] sm:$0xff]  ;;  %v3384_v8 = vmul.f32 %v8038_v18, %v7744_v34  ;;  %v9945_v45 = vld [vmem:[#allocation46_spill] sm:$0xff] }
 0x40a   : >> { %v8071_v12 = vadd.f32 %v3048_v29, %v2904_v63  ;;  %v8073_v22 = vadd.f32 %v3055_v57, %v2927_v50  ;;  %v2722_v44 = vadd.f32 %v9931_v40, %v2514_v46  ;;  %v9932_v29 = vld [vmem:[#allocation67_spill] sm:$0xff]  ;;  %v3382_v63 = vmul.f32 %v8038_v18, %v7734_v61  ;;  %v9946_v40 = vld [vmem:[#allocation85_spill] sm:$0xff] }
 0x40b   : >> { %v2918_v47 = vpop.permute.xlu1 %2917  ;;  %v2920_v39 = vpop.permute.xlu0 %2919  ;;  %v2745_v57 = vadd.f32 %v9932_v29, %v2537_v23  ;;  %v3383_v50 = vmul.f32 %v8038_v18, %v7732_v53  ;;  %v2538_v30 = vadd.f32 %v9935_v49, %v2330_v48  ;;  %v2539_v21 = vadd.f32 %v9936_v42, %v2331_v14  ;;  %v9950_v18 = vld [vmem:[#allocation21_spill] sm:$0xff]  ;;  %v9951_v49 = vld [vmem:[#allocation54_spill] sm:$0xff]  ;;  %v9952_v42 = vld [vmem:[#allocation55_spill] sm:$0xff] }
 0x40c   : >> { %9923 = vst [vmem:[#allocation56_spill] sm:$0xff] %v8071_v12  ;;  %9924 = vst [vmem:[#allocation63_spill] sm:$0xff] %v8073_v22  ;;  %v2928_v37 = vadd.f32 %v2918_v47, %v2720_v2  ;;  %v2929_v55 = vadd.f32 %v2920_v39, %v2721_v16  ;;  %v9938_v16 = vld [vmem:[#allocation39_spill] sm:$0xff]  ;;  %v9939_v39 = vld [vmem:[#allocation14_spill] sm:$0xff]  ;;  %v3407_v27 = vmul.f32 %v8092_v35, %v7722_v38 }
 0x40d   : >> { %3369 = vrot.lane.b32.xlu1 %v3358_v43, %s5385_s25  ;;  %3389 = vrot.lane.b32.xlu0 %v3381_v13, %s5385_s25  ;;  %v2332_v47 = vadd.f32 %v9938_v16, %v9937_v0  ;;  %v9940_v43 = vld [vmem:[#allocation27_spill] sm:$0xff]  ;;  %v2747_v46 = vadd.f32 %v9942_v20, %v2539_v21  ;;  %v3066_v48 = vmul.f32 %v8065_v54, %v7734_v61 }
 0x40e   : >> { %v8098_v31 = vadd.f32 %v3056_v60, %v2928_v37  ;;  %v8100_v41 = vadd.f32 %v3057_v9, %v2929_v55  ;;  %v2355_v13 = vadd.f32 %v9940_v43, %v9939_v39  ;;  %v9941_v60 = vld [vmem:[#allocation62_spill] sm:$0xff]  ;;  %v3067_v19 = vmul.f32 %v8065_v54, %v7732_v53  ;;  %v9956_v20 = vld [vmem:[#allocation11_spill] sm:$0xff] }
 0x40f   : >> { %v2922_v10 = vpop.permute.xlu1 %2921  ;;  %v2942_v62 = vpop.permute.xlu0 %2941  ;;  %v2746_v9 = vadd.f32 %v9941_v60, %v2538_v30  ;;  %v2540_v14 = vadd.f32 %v9945_v45, %v2332_v47  ;;  %v3408_v47 = vmul.f32 %v8092_v35, %v7734_v61  ;;  %v3409_v39 = vmul.f32 %v8092_v35, %v7732_v53  ;;  %v9955_v60 = vld [vmem:[#allocation40_spill] sm:$0xff]  ;;  %v9960_v45 = vld [vmem:[#allocation59_spill] sm:$0xff] }
 0x410   : >> { %9933 = vst [vmem:[#allocation43_spill] sm:$0xff] %v8098_v31  ;;  %9934 = vst [vmem:[#allocation9_spill] sm:$0xff] %v8100_v41  ;;  %v2930_v28 = vadd.f32 %v2922_v10, %v2722_v44  ;;  %v2953_v2 = vadd.f32 %v2942_v62, %v2745_v57  ;;  %v2563_v44 = vadd.f32 %v9946_v40, %v2355_v13  ;;  %v9947_v10 = vld [vmem:[#allocation33_spill] sm:$0xff]  ;;  %v9948_v62 = vld [vmem:[#allocation28_spill] sm:$0xff]  ;;  %v3796_v41 = vstv %s5178_s27  ;;  %s8736_s27 = sld [smem:[#allocation3 + $0xb2]] }
 0x411   : >> { %3391 = vrot.lane.b32.xlu1 %v3382_v63, %s5385_s25  ;;  %3393 = vrot.lane.b32.xlu0 %v3383_v50, %s5385_s25  ;;  %v2356_v63 = vadd.f32 %v9948_v62, %v9947_v10  ;;  %v9949_v50 = vld [vmem:[#allocation78_spill] sm:$0xff]  ;;  %v2748_v30 = vadd.f32 %v9951_v49, %v2540_v14  ;;  %v3068_v43 = vmul.f32 %v8065_v54, %v7744_v34  ;;  %v8173_v54 = vstv %s8121_s6  ;;  %s5191_s6 = sld [smem:[#allocation3 + $0xa8]] }
 0x412   : >> { %v8125_v24 = vadd.f32 %v3058_v25, %v2930_v28  ;;  %v8127_v23 = vadd.f32 %v3065_v3, %v2953_v2  ;;  %v2357_v25 = vadd.f32 %v9950_v18, %v9949_v50  ;;  %v8146_v3 = vstv %s8094_s4  ;;  %v9961_v40 = vld [vmem:[#allocation74_spill] sm:$0xff]  ;;  %s5182_s4 = sld [smem:[#allocation3 + $0x9f]] }
 0x413   : >> { %v2944_v37 = vpop.permute.xlu1 %2943  ;;  %v2946_v55 = vpop.permute.xlu0 %2945  ;;  %v2771_v21 = vadd.f32 %v9952_v42, %v2563_v44  ;;  %v3075_v13 = vmul.f32 %v8119_v58, %v7722_v38  ;;  %v3410_v18 = vmul.f32 %v8092_v35, %v7744_v34  ;;  %v3076_v49 = vmul.f32 %v8119_v58, %v7734_v61  ;;  %v9965_v42 = vld [vmem:[#allocation41_spill] sm:$0xff]  ;;  %v9970_v35 = vld [vmem:[#allocation60_spill] sm:$0xff] }
 0x414   : >> { %9943 = vst [vmem:[#allocation86_spill] sm:$0xff] %v8125_v24  ;;  %9944 = vst [vmem:[#allocation17_spill] sm:$0xff] %v8127_v23  ;;  %v2954_v29 = vadd.f32 %v2944_v37, %v2746_v9  ;;  %v2955_v57 = vadd.f32 %v2946_v55, %v2747_v46  ;;  %v2564_v9 = vadd.f32 %v9955_v60, %v2356_v63  ;;  %v3770_v23 = vstv %s5177_s26  ;;  %s8717_s26 = sld [smem:[#allocation3 + $0xa3]] }
 0x415   : >> { %3395 = vrot.lane.b32.xlu1 %v3384_v8, %s5385_s25  ;;  %3415 = vrot.lane.b32.xlu0 %v3407_v27, %s5385_s25  ;;  %v2565_v46 = vadd.f32 %v9956_v20, %v2357_v25  ;;  %v9957_v8 = vld [vmem:[#allocation75_spill] sm:$0xff]  ;;  %v9958_v27 = vld [vmem:[#allocation22_spill] sm:$0xff]  ;;  %v3433_v25 = vmul.f32 %v8146_v3, %v7722_v38 }
 0x416   : >> { %v8152_v28 = vadd.f32 %v3066_v48, %v2954_v29  ;;  %v8154_v2 = vadd.f32 %v3067_v19, %v2955_v57  ;;  %v2358_v48 = vadd.f32 %v9958_v27, %v9957_v8  ;;  %v9959_v19 = vld [vmem:[#allocation76_spill] sm:$0xff]  ;;  %v2772_v44 = vadd.f32 %v9961_v40, %v2564_v9  ;;  %v9969_v9 = vld [vmem:[#allocation70_spill] sm:$0xff] }
 0x417   : >> { %v2948_v0 = vpop.permute.xlu1 %2947  ;;  %v2968_v16 = vpop.permute.xlu0 %2967  ;;  %v2381_v14 = vadd.f32 %v9960_v45, %v9959_v19  ;;  %v9962_v29 = vld [vmem:[#allocation48_spill] sm:$0xff]  ;;  %v2383_v20 = vadd.f32 %v9970_v35, %v9969_v9  ;;  %v9972_v8 = vld [vmem:[#allocation42_spill] sm:$0xff]  ;;  %v3434_v40 = vmul.f32 %v8146_v3, %v7734_v61  ;;  %v3436_v35 = vmul.f32 %v8146_v3, %v7744_v34 }
 0x418   : >> { %9953 = vst [vmem:[#allocation80_spill] sm:$0xff] %v8152_v28  ;;  %9954 = vst [vmem:[#allocation77_spill] sm:$0xff] %v8154_v2  ;;  %v2956_v37 = vadd.f32 %v2948_v0, %v2748_v30  ;;  %v2979_v55 = vadd.f32 %v2968_v16, %v2771_v21  ;;  %v2773_v57 = vadd.f32 %v9962_v29, %v2565_v46  ;;  %v9966_v0 = vld [vmem:[#allocation29_spill] sm:$0xff]  ;;  %v3458_v46 = vstv %s8148_s7  ;;  %s5192_s7 = sld [smem:[#allocation3 + $0xa9]] }
 0x419   : >> { %3417 = vrot.lane.b32.xlu1 %v3408_v47, %s5385_s25  ;;  %3419 = vrot.lane.b32.xlu0 %v3409_v39, %s5385_s25  ;;  %v3077_v30 = vmul.f32 %v8119_v58, %v7732_v53  ;;  %v2566_v21 = vadd.f32 %v9965_v42, %v2358_v48  ;;  %v2589_v16 = vadd.f32 %v9966_v0, %v2381_v14  ;;  %v9977_v42 = vld [vmem:[#allocation81_spill] sm:$0xff]  ;;  %v3744_v2 = vstv %s5176_s24  ;;  %s8686_s24 = sld [smem:[#allocation3 + $0xb1]] }
 0x41a   : >> { %v8177_v10 = vadd.f32 %v3068_v43, %v2956_v37  ;;  %v8179_v62 = vadd.f32 %v3075_v13, %v2979_v55  ;;  %v9967_v43 = vld [vmem:[#allocation69_spill] sm:$0xff]  ;;  %v9968_v13 = vld [vmem:[#allocation15_spill] sm:$0xff]  ;;  %v9971_v37 = vld [vmem:[#allocation36_spill] sm:$0xff]  ;;  %v3078_v29 = vmul.f32 %v8119_v58, %v7744_v34  ;;  %v4010_v22 = vstv %s5191_s6  ;;  %s8862_s6 = sld [smem:[#allocation3 + $0xb5]] }
 0x41b   : >> { %v2970_v63 = vpop.permute.xlu1 %2969  ;;  %v2972_v50 = vpop.permute.xlu0 %2971  ;;  %v2382_v60 = vadd.f32 %v9968_v13, %v9967_v43  ;;  %v2774_v55 = vadd.f32 %v9971_v37, %v2566_v21  ;;  %v2797_v27 = vadd.f32 %v9972_v8, %v2589_v16  ;;  %v9978_v21 = vld [vmem:[#allocation16_spill] sm:$0xff]  ;;  %v9979_v16 = vld [vmem:[#allocation31_spill] sm:$0xff]  ;;  %v3086_v37 = vmul.f32 %v8173_v54, %v7734_v61 }
 0x41c   : >> { %9963 = vst [vmem:[#allocation57_spill] sm:$0xff] %v8177_v10  ;;  %9964 = vst [vmem:[#allocation64_spill] sm:$0xff] %v8179_v62  ;;  %v2980_v47 = vadd.f32 %v2970_v63, %v2772_v44  ;;  %v2981_v39 = vadd.f32 %v2972_v50, %v2773_v57  ;;  %v3435_v44 = vmul.f32 %v8146_v3, %v7732_v53  ;;  %v9975_v63 = vld [vmem:[#allocation30_spill] sm:$0xff]  ;;  %v9980_v58 = vld [vmem:[#allocation87_spill] sm:$0xff]  ;;  %v3718_v62 = vstv %s5175_s23  ;;  %s8675_s23 = sld [smem:[#allocation3 + $0xa2]] }
 0x41d   : >> { %3421 = vrot.lane.b32.xlu1 %v3410_v18, %s5385_s25  ;;  %3441 = vrot.lane.b32.xlu0 %v3433_v25, %s5385_s25  ;;  %v3085_v57 = vmul.f32 %v8173_v54, %v7722_v38  ;;  %v2590_v50 = vadd.f32 %v9975_v63, %v2382_v60  ;;  %v9976_v18 = vld [vmem:[#allocation47_spill] sm:$0xff]  ;;  %v2384_v0 = vadd.f32 %v9978_v21, %v9977_v42 }
 0x41e   : >> { %v8200_v48 = vadd.f32 %v3076_v49, %v2980_v47  ;;  %v8202_v19 = vadd.f32 %v3077_v30, %v2981_v39  ;;  %v2591_v25 = vadd.f32 %v9976_v18, %v2383_v20  ;;  %v3459_v20 = vmul.f32 %v3458_v46, %v7722_v38 }
 0x41f   : >> { %v2974_v45 = vpop.permute.xlu1 %2973  ;;  %v2994_v14 = vpop.permute.xlu0 %2993  ;;  %v2798_v47 = vadd.f32 %v9979_v16, %v2590_v50  ;;  %v3460_v63 = vmul.f32 %v3458_v46, %v7734_v61  ;;  %v3461_v50 = vmul.f32 %v3458_v46, %v7732_v53  ;;  %v3462_v21 = vmul.f32 %v3458_v46, %v7744_v34 }
 0x420   : >> { %9973 = vst [vmem:[#allocation37_spill] sm:$0xff] %v8200_v48  ;;  %9974 = vst [vmem:[#allocation50_spill] sm:$0xff] %v8202_v19  ;;  %v2982_v49 = vadd.f32 %v2974_v45, %v2774_v55  ;;  %v3005_v30 = vadd.f32 %v2994_v14, %v2797_v27  ;;  %v2799_v39 = vadd.f32 %v9980_v58, %v2591_v25  ;;  %v9983_v55 = vld [vmem:[#allocation23_spill] sm:$0xff]  ;;  %v3484_v25 = vstv %s5166_s11  ;;  %s5193_s11 = sld [smem:[#allocation3 + $0xaa]] }
 0x421   : >> { %3443 = vrot.lane.b32.xlu1 %v3434_v40, %s5385_s25  ;;  %3445 = vrot.lane.b32.xlu0 %v3435_v44, %s5385_s25  ;;  %v2592_v8 = vadd.f32 %v9983_v55, %v2384_v0  ;;  %v3087_v14 = vmul.f32 %v8173_v54, %v7732_v53  ;;  %v3485_v0 = vmul.f32 %v3484_v25, %v7722_v38 }
 0x422   : >> { %v8220_v43 = vadd.f32 %v3078_v29, %v2982_v49  ;;  %v8222_v13 = vadd.f32 %v3085_v57, %v3005_v30  ;;  %v3088_v49 = vmul.f32 %v8173_v54, %v7744_v34  ;;  %v3487_v58 = vmul.f32 %v3484_v25, %v7732_v53 }
 0x423   : >> { %v2996_v60 = vpop.permute.xlu1 %2995  ;;  %v2998_v9 = vpop.permute.xlu0 %2997  ;;  %v2800_v40 = vadd.f32 %v7846_v15, %v2592_v8 }
 0x424   : >> { %9981 = vst [vmem:[#allocation12_spill] sm:$0xff] %v8220_v43  ;;  %9982 = vst [vmem:[#allocation18_spill] sm:$0xff] %v8222_v13  ;;  %v3006_v27 = vadd.f32 %v2996_v60, %v2798_v47  ;;  %v3007_v45 = vadd.f32 %v2998_v9, %v2799_v39  ;;  %v3486_v47 = vmul.f32 %v3484_v25, %v7734_v61  ;;  %v3510_v39 = vstv %s5167_s13  ;;  %s5194_s13 = sld [smem:[#allocation3 + $0xab]] }
 0x425   : >> { %3447 = vrot.lane.b32.xlu1 %v3436_v35, %s5385_s25  ;;  %3467 = vrot.lane.b32.xlu0 %v3459_v20, %s5385_s25  ;;  %v3488_v9 = vmul.f32 %v3484_v25, %v7744_v34  ;;  %v3511_v35 = vmul.f32 %v3510_v39, %v7722_v38  ;;  %v3512_v55 = vmul.f32 %v3510_v39, %v7734_v61  ;;  %v3640_v13 = vstv %s5172_s19  ;;  %s5198_s19 = sld [smem:[#allocation3 + $0xaf]] }
 0x426   : >> { %v8235_v44 = vadd.f32 %v3086_v37, %v3006_v27  ;;  %v8237_v3 = vadd.f32 %v3087_v14, %v3007_v45  ;;  %v3513_v8 = vmul.f32 %v3510_v39, %v7732_v53  ;;  %v3536_v27 = vstv %s5168_s14  ;;  %s5195_s14 = sld [smem:[#allocation3 + $0xac]] }
 0x427   : >> { %v3000_v29 = vpop.permute.xlu1 %2999  ;;  %v8239_v57 = vpop.permute.xlu0 %3103  ;;  %v3539_v25 = vmul.f32 %v3536_v27, %v7732_v53 }
 0x428   : >> { %9984 = vst [vmem:[#allocation71_spill] sm:$0xff] %v8235_v44  ;;  %9985 = vst [vmem:[#allocation34_spill] sm:$0xff] %v8237_v3  ;;  %v3008_v18 = vadd.f32 %v3000_v29, %v2800_v40  ;;  %v3514_v40 = vmul.f32 %v3510_v39, %v7744_v34  ;;  %v3537_v29 = vmul.f32 %v3536_v27, %v7722_v38 }
 0x429   : >> { %3469 = vrot.lane.b32.xlu1 %v3460_v63, %s5385_s25  ;;  %3471 = vrot.lane.b32.xlu0 %v3461_v50, %s5385_s25 }
 0x42a   : >> { %v8247_v15 = vadd.f32 %v3088_v49, %v3008_v18  ;;  %v3538_v18 = vmul.f32 %v3536_v27, %v7734_v61  ;;  %v3562_v49 = vstv %s5169_s15  ;;  %s5196_s15 = sld [smem:[#allocation3 + $0xad]] }
 0x42b   : >> { %v8249_v30 = vpop.permute.xlu1 %3105  ;;  %v8251_v42 = vpop.permute.xlu0 %3107 }
 0x42c   : >> { %9986 = vst [vmem:[#allocation58_spill] sm:$0xff] %v8247_v15 }
 0x42d   : >> { %3473 = vrot.lane.b32.xlu1 %v3462_v21, %s5385_s25  ;;  %3493 = vrot.lane.b32.xlu0 %v3485_v0, %s5385_s25 }
 0x42f   : >> { %v8257_v16 = vpop.permute.xlu1 %3109  ;;  %v8259_v54 = vpop.permute.xlu0 %3129 }
 0x431   : >> { %3495 = vrot.lane.b32.xlu1 %v3486_v47, %s5385_s25  ;;  %3497 = vrot.lane.b32.xlu0 %v3487_v58, %s5385_s25  ;;  %v3540_v47 = vmul.f32 %v3536_v27, %v7744_v34  ;;  %v3563_v58 = vmul.f32 %v3562_v49, %v7722_v38 }
 0x433   : >> { %v8265_v46 = vpop.permute.xlu1 %3131  ;;  %v8267_v60 = vpop.permute.xlu0 %3133 }
 0x435   : >> { %3499 = vrot.lane.b32.xlu1 %v3488_v9, %s5385_s25  ;;  %3519 = vrot.lane.b32.xlu0 %v3511_v35, %s5386_s10  ;;  %v3564_v35 = vmul.f32 %v3562_v49, %v7734_v61 }
 0x437   : >> { %v8273_v20 = vpop.permute.xlu1 %3135  ;;  %v8275_v37 = vpop.permute.xlu0 %3155 }
 0x439   : >> { %3521 = vrot.lane.b32.xlu1 %v3512_v55, %s5386_s10  ;;  %3523 = vrot.lane.b32.xlu0 %v3513_v8, %s5386_s10  ;;  %v3565_v55 = vmul.f32 %v3562_v49, %v7732_v53  ;;  %v3588_v8 = vstv %s5170_s17  ;;  %s5197_s17 = sld [smem:[#allocation3 + $0xae]] }
 0x43b   : >> { %v8281_v45 = vpop.permute.xlu1 %3157  ;;  %v8283_v14 = vpop.permute.xlu0 %3159 }
 0x43d   : >> { %3525 = vrot.lane.b32.xlu1 %v3514_v40, %s5386_s10  ;;  %3545 = vrot.lane.b32.xlu0 %v3537_v29, %s5386_s10  ;;  %v3566_v29 = vmul.f32 %v3562_v49, %v7744_v34 }
 0x43f   : >> { %v8289_v63 = vpop.permute.xlu1 %3161  ;;  %v8291_v50 = vpop.permute.xlu0 %3181 }
 0x441   : >> { %3547 = vrot.lane.b32.xlu1 %v3538_v18, %s5386_s10  ;;  %3549 = vrot.lane.b32.xlu0 %v3539_v25, %s5386_s10  ;;  %v3589_v18 = vmul.f32 %v3588_v8, %v7722_v38 }
 0x443   : >> { %v8297_v21 = vpop.permute.xlu1 %3183  ;;  %v8299_v0 = vpop.permute.xlu0 %3185 }
 0x444   : >> { %9987 = vst [vmem:[#allocation51_spill] sm:$0xff] %v8297_v21  ;;  %9988 = vst [vmem:[#allocation13_spill] sm:$0xff] %v8299_v0  ;;  %v4062_v21 = vstv %s5193_s11  ;;  %s8904_s11 = sld [smem:[#allocation3 + $0xb6]] }
 0x445   : >> { %3551 = vrot.lane.b32.xlu1 %v3540_v47, %s5386_s10  ;;  %3571 = vrot.lane.b32.xlu0 %v3563_v58, %s5386_s10  ;;  %v3590_v58 = vmul.f32 %v3588_v8, %v7734_v61 }
 0x447   : >> { %v8305_v39 = vpop.permute.xlu1 %3187  ;;  %v8307_v9 = vpop.permute.xlu0 %3207 }
 0x448   : >> { %9989 = vst [vmem:[#allocation44_spill] sm:$0xff] %v8305_v39  ;;  %9990 = vst [vmem:[#allocation83_spill] sm:$0xff] %v8307_v9  ;;  %v8527_v9 = vld [vmem:[#allocation2 + $0x4] sm:$0xff]  ;;  %v8537_v39 = vld [vmem:[#allocation2 + $0x14] sm:$0xff] }
 0x449   : >> { %3573 = vrot.lane.b32.xlu1 %v3564_v35, %s5386_s10  ;;  %3575 = vrot.lane.b32.xlu0 %v3565_v55, %s5386_s10  ;;  %v3591_v35 = vmul.f32 %v3588_v8, %v7732_v53  ;;  %v3614_v55 = vstv %s5171_s18  ;;  %v4013_v12 = vmul.f32 %v4010_v22, %v8537_v39  ;;  %s5183_s18 = sld [smem:[#allocation3 + $0xa0]] }
 0x44b   : >> { %v8313_v27 = vpop.permute.xlu1 %3209  ;;  %v8315_v40 = vpop.permute.xlu0 %3211 }
 0x44c   : >> { %9991 = vst [vmem:[#allocation84_spill] sm:$0xff] %v8313_v27  ;;  %9992 = vst [vmem:[#allocation65_spill] sm:$0xff] %v8315_v40 }
 0x44d   : >> { %3577 = vrot.lane.b32.xlu1 %v3566_v29, %s5386_s10  ;;  %3597 = vrot.lane.b32.xlu0 %v3589_v18, %s5386_s10  ;;  %v3592_v29 = vmul.f32 %v3588_v8, %v7744_v34  ;;  %v3615_v18 = vmul.f32 %v3614_v55, %v7722_v38 }
 0x44f   : >> { %v8321_v25 = vpop.permute.xlu1 %3213  ;;  %v8323_v47 = vpop.permute.xlu0 %3233 }
 0x450   : >> { %9993 = vst [vmem:[#allocation35_spill] sm:$0xff] %v8321_v25  ;;  %9994 = vst [vmem:[#allocation25_spill] sm:$0xff] %v8323_v47 }
 0x451   : >> { %3599 = vrot.lane.b32.xlu1 %v3590_v58, %s5386_s10  ;;  %3601 = vrot.lane.b32.xlu0 %v3591_v35, %s5386_s10  ;;  %v3616_v58 = vmul.f32 %v3614_v55, %v7734_v61  ;;  %v3617_v35 = vmul.f32 %v3614_v55, %v7732_v53 }
 0x453   : >> { %v8329_v49 = vpop.permute.xlu1 %3235  ;;  %v8331_v15 = vpop.permute.xlu0 %3237 }
 0x454   : >> { %9995 = vst [vmem:[#allocation45_spill] sm:$0xff] %v8329_v49  ;;  %9996 = vst [vmem:[#allocation26_spill] sm:$0xff] %v8331_v15 }
 0x455   : >> { %3603 = vrot.lane.b32.xlu1 %v3592_v29, %s5386_s10  ;;  %3623 = vrot.lane.b32.xlu0 %v3615_v18, %s5386_s10  ;;  %v3618_v29 = vmul.f32 %v3614_v55, %v7744_v34  ;;  %v8350_v18 = vld [vmem:[#allocation2 + $0x3] sm:$0xff] }
 0x456   : >> { %v3641_v43 = vmul.f32 %v8350_v18, %v3640_v13 }
 0x457   : >> { %v8337_v3 = vpop.permute.xlu1 %3239  ;;  %v8339_v44 = vpop.permute.xlu0 %3259 }
 0x458   : >> { %9997 = vst [vmem:[#allocation82_spill] sm:$0xff] %v8337_v3  ;;  %9998 = vst [vmem:[#allocation24_spill] sm:$0xff] %v8339_v44 }
 0x459   : >> { %3625 = vrot.lane.b32.xlu1 %v3616_v58, %s5386_s10  ;;  %3627 = vrot.lane.b32.xlu0 %v3617_v35, %s5386_s10  ;;  %v3642_v58 = vmul.f32 %v3640_v13, %v7734_v61  ;;  %v3643_v35 = vmul.f32 %v3640_v13, %v7732_v53 }
 0x45b   : >> { %v8345_v8 = vpop.permute.xlu1 %3261  ;;  %v8347_v38 = vpop.permute.xlu0 %3263 }
 0x45c   : >> { %9999 = vst [vmem:[#allocation73_spill] sm:$0xff] %v8345_v8  ;;  %10000 = vst [vmem:[#allocation66_spill] sm:$0xff] %v8347_v38  ;;  %v3666_v8 = vstv %s5173_s20  ;;  %s8641_s20 = sld [smem:[#allocation3 + $0xa1]] }
 0x45d   : >> { %3629 = vrot.lane.b32.xlu1 %v3618_v29, %s5386_s10  ;;  %3649 = vrot.lane.b32.xlu0 %v3641_v43, %s5386_s10  ;;  %v3644_v43 = vmul.f32 %v3640_v13, %v7744_v34  ;;  %v3667_v29 = vmul.f32 %v8350_v18, %v3666_v8 }
 0x45f   : >> { %v8355_v19 = vpop.permute.xlu1 %3265  ;;  %v8357_v48 = vpop.permute.xlu0 %3285 }
 0x460   : >> { %10001 = vst [vmem:[#allocation52_spill] sm:$0xff] %v8355_v19  ;;  %10002 = vst [vmem:[#allocation19_spill] sm:$0xff] %v8357_v48  ;;  %v8375_v48 = vld [vmem:[#allocation2 + $0xb] sm:$0xff] }
 0x461   : >> { %3651 = vrot.lane.b32.xlu1 %v3642_v58, %s5386_s10  ;;  %3653 = vrot.lane.b32.xlu0 %v3643_v35, %s5386_s10  ;;  %v3668_v58 = vmul.f32 %v8375_v48, %v3666_v8  ;;  %v8378_v35 = vld [vmem:[#allocation2 + $0x13] sm:$0xff] }
 0x463   : >> { %v8363_v55 = vpop.permute.xlu1 %3287  ;;  %v8365_v38 = vpop.permute.xlu0 %3289 }
 0x464   : >> { %10003 = vst [vmem:[#allocation38_spill] sm:$0xff] %v8363_v55  ;;  %10004 = vst [vmem:[#allocation20_spill] sm:$0xff] %v8365_v38  ;;  %v3669_v38 = vmul.f32 %v8378_v35, %v3666_v8  ;;  %v3692_v55 = vstv %s5174_s22  ;;  %s8655_s22 = sld [smem:[#allocation3 + $0xb0]] }
 0x465   : >> { %3655 = vrot.lane.b32.xlu1 %v3644_v43, %s5386_s10  ;;  %3675 = vrot.lane.b32.xlu0 %v3667_v29, %s5386_s10  ;;  %v8387_v43 = vld [vmem:[#allocation2 + $0x1b] sm:$0xf] }
 0x466   : >> { %v3670_v29 = vmul.f32 %v8387_v43, %v3666_v8 }
 0x467   : >> { %v8371_v61 = vpop.permute.xlu1 %3291  ;;  %v8373_v53 = vpop.permute.xlu0 %3311 }
 0x468   : >> { %10005 = vst [vmem:[#allocation10_spill] sm:$0xff] %v8371_v61  ;;  %v3693_v61 = vmul.f32 %v8350_v18, %v3692_v55 }
 0x469   : >> { %3677 = vrot.lane.b32.xlu1 %v3668_v58, %s5386_s10  ;;  %3679 = vrot.lane.b32.xlu0 %v3669_v38, %s5386_s10  ;;  %v3694_v38 = vmul.f32 %v8375_v48, %v3692_v55  ;;  %v3695_v58 = vmul.f32 %v8378_v35, %v3692_v55 }
 0x46b   : >> { %v8383_v34 = vpop.permute.xlu1 %3313  ;;  %v8385_v13 = vpop.permute.xlu0 %3315 }
 0x46d   : >> { %3681 = vrot.lane.b32.xlu1 %v3670_v29, %s5386_s10  ;;  %3701 = vrot.lane.b32.xlu0 %v3693_v61, %s5386_s10  ;;  %v3696_v61 = vmul.f32 %v8387_v43, %v3692_v55  ;;  %v3719_v29 = vmul.f32 %v8350_v18, %v3718_v62 }
 0x46f   : >> { %v8393_v19 = vpop.permute.xlu1 %3317  ;;  %v8395_v44 = vpop.permute.xlu0 %3337 }
 0x471   : >> { %3703 = vrot.lane.b32.xlu1 %v3694_v38, %s5386_s10  ;;  %3705 = vrot.lane.b32.xlu0 %v3695_v58, %s5386_s10  ;;  %v3720_v38 = vmul.f32 %v8375_v48, %v3718_v62  ;;  %v3721_v58 = vmul.f32 %v8378_v35, %v3718_v62 }
 0x473   : >> { %v8401_v8 = vpop.permute.xlu1 %3339  ;;  %v8403_v3 = vpop.permute.xlu0 %3341 }
 0x475   : >> { %3707 = vrot.lane.b32.xlu1 %v3696_v61, %s5386_s10  ;;  %3727 = vrot.lane.b32.xlu0 %v3719_v29, %s5387_s21  ;;  %v3722_v61 = vmul.f32 %v8387_v43, %v3718_v62  ;;  %v3745_v29 = vmul.f32 %v8350_v18, %v3744_v2 }
 0x477   : >> { %v8409_v10 = vpop.permute.xlu1 %3343  ;;  %v8411_v15 = vpop.permute.xlu0 %3363 }
 0x479   : >> { %3729 = vrot.lane.b32.xlu1 %v3720_v38, %s5387_s21  ;;  %3731 = vrot.lane.b32.xlu0 %v3721_v58, %s5387_s21  ;;  %v3746_v38 = vmul.f32 %v8375_v48, %v3744_v2  ;;  %v3747_v58 = vmul.f32 %v8378_v35, %v3744_v2 }
 0x47b   : >> { %v8417_v55 = vpop.permute.xlu1 %3365  ;;  %v8419_v49 = vpop.permute.xlu0 %3367 }
 0x47d   : >> { %3733 = vrot.lane.b32.xlu1 %v3722_v61, %s5387_s21  ;;  %3753 = vrot.lane.b32.xlu0 %v3745_v29, %s5387_s21  ;;  %v3748_v61 = vmul.f32 %v8387_v43, %v3744_v2  ;;  %v3771_v29 = vmul.f32 %v8350_v18, %v3770_v23 }
 0x47f   : >> { %v8425_v28 = vpop.permute.xlu1 %3369  ;;  %v8427_v47 = vpop.permute.xlu0 %3389 }
 0x480   : >> { %10006 = vst [vmem:[#allocation61_spill] sm:$0xff] %v8427_v47  ;;  %v4088_v47 = vstv %s5194_s13  ;;  %s5206_s13 = sld [smem:[#allocation3 + $0xb7]] }
 0x481   : >> { %3755 = vrot.lane.b32.xlu1 %v3746_v38, %s5387_s21  ;;  %3757 = vrot.lane.b32.xlu0 %v3747_v58, %s5387_s21  ;;  %v3772_v38 = vmul.f32 %v8375_v48, %v3770_v23  ;;  %v3773_v58 = vmul.f32 %v8378_v35, %v3770_v23 }
 0x483   : >> { %v8433_v62 = vpop.permute.xlu1 %3391  ;;  %v8435_v25 = vpop.permute.xlu0 %3393 }
 0x484   : >> { %10007 = vst [vmem:[#allocation67_spill] sm:$0xff] %v8433_v62  ;;  %10008 = vst [vmem:[#allocation53_spill] sm:$0xff] %v8435_v25  ;;  %v8549_v25 = vld [vmem:[#allocation2 + $0x1c] sm:$0xf] }
 0x485   : >> { %3759 = vrot.lane.b32.xlu1 %v3748_v61, %s5387_s21  ;;  %3779 = vrot.lane.b32.xlu0 %v3771_v29, %s5387_s21  ;;  %v3774_v61 = vmul.f32 %v8387_v43, %v3770_v23  ;;  %v3797_v29 = vmul.f32 %v8350_v18, %v3796_v41 }
 0x487   : >> { %v8441_v24 = vpop.permute.xlu1 %3395  ;;  %v8443_v40 = vpop.permute.xlu0 %3415 }
 0x488   : >> { %10009 = vst [vmem:[#allocation72_spill] sm:$0xff] %v8441_v24  ;;  %10010 = vst [vmem:[#allocation32_spill] sm:$0xff] %v8443_v40  ;;  %v3822_v24 = vstv %s5179_s28  ;;  %s8770_s28 = sld [smem:[#allocation3 + $0xb3]] }
 0x489   : >> { %3781 = vrot.lane.b32.xlu1 %v3772_v38, %s5387_s21  ;;  %3783 = vrot.lane.b32.xlu0 %v3773_v58, %s5387_s21  ;;  %v3798_v38 = vmul.f32 %v8375_v48, %v3796_v41  ;;  %v3799_v58 = vmul.f32 %v8378_v35, %v3796_v41 }
 0x48b   : >> { %v8449_v2 = vpop.permute.xlu1 %3417  ;;  %v8451_v27 = vpop.permute.xlu0 %3419 }
 0x48c   : >> { %10011 = vst [vmem:[#allocation39_spill] sm:$0xff] %v8449_v2  ;;  %10012 = vst [vmem:[#allocation14_spill] sm:$0xff] %v8451_v27  ;;  %v3848_v2 = vstv %s5180_s29  ;;  %s8801_s29 = sld [smem:[#allocation3 + $0xa5]] }
 0x48d   : >> { %3785 = vrot.lane.b32.xlu1 %v3774_v61, %s5387_s21  ;;  %3805 = vrot.lane.b32.xlu0 %v3797_v29, %s5387_s21  ;;  %v3800_v61 = vmul.f32 %v8387_v43, %v3796_v41  ;;  %v3823_v29 = vmul.f32 %v8350_v18, %v3822_v24 }
 0x48f   : >> { %v8457_v31 = vpop.permute.xlu1 %3421  ;;  %v8459_v40 = vpop.permute.xlu0 %3441 }
 0x490   : >> { %10013 = vst [vmem:[#allocation27_spill] sm:$0xff] %v8457_v31  ;;  %10014 = vst [vmem:[#allocation62_spill] sm:$0xff] %v8459_v40 }
 0x491   : >> { %3807 = vrot.lane.b32.xlu1 %v3798_v38, %s5387_s21  ;;  %3809 = vrot.lane.b32.xlu0 %v3799_v58, %s5387_s21  ;;  %v3824_v38 = vmul.f32 %v8375_v48, %v3822_v24  ;;  %v3825_v58 = vmul.f32 %v8378_v35, %v3822_v24 }
 0x493   : >> { %v8465_v23 = vpop.permute.xlu1 %3443  ;;  %v8467_v27 = vpop.permute.xlu0 %3445 }
 0x494   : >> { %10015 = vst [vmem:[#allocation68_spill] sm:$0xff] %v8465_v23  ;;  %10016 = vst [vmem:[#allocation46_spill] sm:$0xff] %v8467_v27  ;;  %v3874_v23 = vstv %s5181_s30  ;;  %s8812_s30 = sld [smem:[#allocation3 + $0xb4]] }
 0x495   : >> { %3811 = vrot.lane.b32.xlu1 %v3800_v61, %s5387_s21  ;;  %3831 = vrot.lane.b32.xlu0 %v3823_v29, %s5387_s21  ;;  %v3826_v61 = vmul.f32 %v8387_v43, %v3822_v24  ;;  %v3849_v29 = vmul.f32 %v8350_v18, %v3848_v2 }
 0x497   : >> { %v8473_v40 = vpop.permute.xlu1 %3447  ;;  %v8475_v31 = vpop.permute.xlu0 %3467 }
 0x498   : >> { %10017 = vst [vmem:[#allocation85_spill] sm:$0xff] %v8473_v40  ;;  %10018 = vst [vmem:[#allocation33_spill] sm:$0xff] %v8475_v31 }
 0x499   : >> { %3833 = vrot.lane.b32.xlu1 %v3824_v38, %s5387_s21  ;;  %3835 = vrot.lane.b32.xlu0 %v3825_v58, %s5387_s21  ;;  %v3850_v38 = vmul.f32 %v8375_v48, %v3848_v2  ;;  %v3851_v58 = vmul.f32 %v8378_v35, %v3848_v2 }
 0x49b   : >> { %v8481_v41 = vpop.permute.xlu1 %3469  ;;  %v8483_v27 = vpop.permute.xlu0 %3471 }
 0x49c   : >> { %10019 = vst [vmem:[#allocation28_spill] sm:$0xff] %v8481_v41  ;;  %10020 = vst [vmem:[#allocation78_spill] sm:$0xff] %v8483_v27  ;;  %v3900_v41 = vstv %s5182_s4  ;;  %s8843_s4 = sld [smem:[#allocation3 + $0xa6]] }
 0x49d   : >> { %3837 = vrot.lane.b32.xlu1 %v3826_v61, %s5387_s21  ;;  %3857 = vrot.lane.b32.xlu0 %v3849_v29, %s5387_s21  ;;  %v3852_v61 = vmul.f32 %v8387_v43, %v3848_v2  ;;  %v3875_v29 = vmul.f32 %v8350_v18, %v3874_v23 }
 0x49f   : >> { %v8489_v31 = vpop.permute.xlu1 %3473  ;;  %v8491_v40 = vpop.permute.xlu0 %3493 }
 0x4a0   : >> { %10021 = vst [vmem:[#allocation21_spill] sm:$0xff] %v8489_v31  ;;  %10022 = vst [vmem:[#allocation54_spill] sm:$0xff] %v8491_v40 }
 0x4a1   : >> { %3859 = vrot.lane.b32.xlu1 %v3850_v38, %s5387_s21  ;;  %3861 = vrot.lane.b32.xlu0 %v3851_v58, %s5387_s21  ;;  %v3876_v38 = vmul.f32 %v8375_v48, %v3874_v23  ;;  %v3877_v58 = vmul.f32 %v8378_v35, %v3874_v23 }
 0x4a3   : >> { %v8497_v24 = vpop.permute.xlu1 %3495  ;;  %v8499_v27 = vpop.permute.xlu0 %3497 }
 0x4a4   : >> { %10023 = vst [vmem:[#allocation55_spill] sm:$0xff] %v8497_v24  ;;  %10024 = vst [vmem:[#allocation40_spill] sm:$0xff] %v8499_v27 }
 0x4a5   : >> { %3863 = vrot.lane.b32.xlu1 %v3852_v61, %s5387_s21  ;;  %3883 = vrot.lane.b32.xlu0 %v3875_v29, %s5387_s21  ;;  %v3878_v61 = vmul.f32 %v8387_v43, %v3874_v23  ;;  %v3901_v29 = vmul.f32 %v8350_v18, %v3900_v41 }
 0x4a7   : >> { %v8505_v40 = vpop.permute.xlu1 %3499  ;;  %v8507_v31 = vpop.permute.xlu0 %3519 }
 0x4a8   : >> { %10025 = vst [vmem:[#allocation11_spill] sm:$0xff] %v8505_v40 }
 0x4a9   : >> { %3885 = vrot.lane.b32.xlu1 %v3876_v38, %s5387_s21  ;;  %3887 = vrot.lane.b32.xlu0 %v3877_v58, %s5387_s21  ;;  %v3902_v38 = vmul.f32 %v8375_v48, %v3900_v41  ;;  %v3903_v58 = vmul.f32 %v8378_v35, %v3900_v41  ;;  %v8539_v48 = vld [vmem:[#allocation2 + $0xc] sm:$0xff] }
 0x4ab   : >> { %v8513_v2 = vpop.permute.xlu1 %3521  ;;  %v8515_v27 = vpop.permute.xlu0 %3523 }
 0x4ad   : >> { %3889 = vrot.lane.b32.xlu1 %v3878_v61, %s5387_s21  ;;  %3909 = vrot.lane.b32.xlu0 %v3901_v29, %s5387_s21  ;;  %v3904_v61 = vmul.f32 %v8387_v43, %v3900_v41  ;;  %v4011_v29 = vmul.f32 %v4010_v22, %v8527_v9  ;;  %v4036_v43 = vstv %s5192_s7  ;;  %s8885_s7 = sld [smem:[#allocation3 + $0xa7]] }
 0x4ae   : >> { %v4037_v62 = vmul.f32 %v4036_v43, %v8527_v9 }
 0x4af   : >> { %v8521_v40 = vpop.permute.xlu1 %3525  ;;  %v8523_v24 = vpop.permute.xlu0 %3545 }
 0x4b1   : >> { %3911 = vrot.lane.b32.xlu1 %v3902_v38, %s5387_s21  ;;  %3913 = vrot.lane.b32.xlu0 %v3903_v58, %s5387_s21  ;;  %v4012_v58 = vmul.f32 %v4010_v22, %v8539_v48 }
 0x4b3   : >> { %v8531_v18 = vpop.permute.xlu1 %3547  ;;  %v8533_v23 = vpop.permute.xlu0 %3549 }
 0x4b5   : >> { %3915 = vrot.lane.b32.xlu1 %v3904_v61, %s5387_s21  ;;  %4019 = vrot.lane.b32.xlu0 %v4011_v29, %s5384_s16  ;;  %v4014_v29 = vmul.f32 %v4010_v22, %v8549_v25 }
 0x4b7   : >> { %v8543_v35 = vpop.permute.xlu1 %3551  ;;  %v8545_v38 = vpop.permute.xlu0 %3571 }
 0x4b9   : >> { %4021 = vrot.lane.b32.xlu1 %v4012_v58, %s5384_s16  ;;  %4023 = vrot.lane.b32.xlu0 %v4013_v12, %s5384_s16  ;;  %v4038_v58 = vmul.f32 %v4036_v43, %v8539_v48  ;;  %v4039_v12 = vmul.f32 %v4036_v43, %v8537_v39 }
 0x4bb   : >> { %v8553_v41 = vpop.permute.xlu1 %3573  ;;  %v8555_v61 = vpop.permute.xlu0 %3575 }
 0x4bd   : >> { %4025 = vrot.lane.b32.xlu1 %v4014_v29, %s5384_s16  ;;  %4045 = vrot.lane.b32.xlu0 %v4037_v62, %s5384_s16  ;;  %v4040_v62 = vmul.f32 %v4036_v43, %v8549_v25  ;;  %v4063_v29 = vmul.f32 %v4062_v21, %v8527_v9 }
 0x4bf   : >> { %v8561_v0 = vpop.permute.xlu1 %3577  ;;  %v8563_v6 = vpop.permute.xlu0 %3597 }
 0x4c0   : >> { %10026 = vst [vmem:[#allocation75_spill] sm:$0xff] %v8561_v0  ;;  %10027 = vst [vmem:[#allocation22_spill] sm:$0xff] %v8563_v6 }
 0x4c1   : >> { %4047 = vrot.lane.b32.xlu1 %v4038_v58, %s5384_s16  ;;  %4049 = vrot.lane.b32.xlu0 %v4039_v12, %s5384_s16  ;;  %v4064_v58 = vmul.f32 %v4062_v21, %v8539_v48  ;;  %v4065_v12 = vmul.f32 %v4062_v21, %v8537_v39 }
 0x4c3   : >> { %v8569_v22 = vpop.permute.xlu1 %3599  ;;  %v8571_v52 = vpop.permute.xlu0 %3601 }
 0x4c4   : >> { %10028 = vst [vmem:[#allocation76_spill] sm:$0xff] %v8569_v22  ;;  %10029 = vst [vmem:[#allocation59_spill] sm:$0xff] %v8571_v52  ;;  %v4114_v22 = vstv %s5195_s14  ;;  %s5207_s14 = sld [smem:[#allocation3 + $0xb8]] }
 0x4c5   : >> { %4051 = vrot.lane.b32.xlu1 %v4040_v62, %s5384_s16  ;;  %4071 = vrot.lane.b32.xlu0 %v4063_v29, %s5384_s16  ;;  %v4066_v62 = vmul.f32 %v4062_v21, %v8549_v25  ;;  %v4089_v29 = vmul.f32 %v4088_v47, %v8527_v9 }
 0x4c7   : >> { %v8577_v6 = vpop.permute.xlu1 %3603  ;;  %v8579_v0 = vpop.permute.xlu0 %3623 }
 0x4c8   : >> { %10030 = vst [vmem:[#allocation74_spill] sm:$0xff] %v8577_v6  ;;  %10031 = vst [vmem:[#allocation48_spill] sm:$0xff] %v8579_v0 }
 0x4c9   : >> { %4073 = vrot.lane.b32.xlu1 %v4064_v58, %s5384_s16  ;;  %4075 = vrot.lane.b32.xlu0 %v4065_v12, %s5384_s16  ;;  %v4090_v58 = vmul.f32 %v4088_v47, %v8539_v48  ;;  %v4091_v12 = vmul.f32 %v4088_v47, %v8537_v39 }
 0x4cb   : >> { %v8585_v43 = vpop.permute.xlu1 %3625  ;;  %v8587_v52 = vpop.permute.xlu0 %3627 }
 0x4cc   : >> { %10032 = vst [vmem:[#allocation41_spill] sm:$0xff] %v8585_v43  ;;  %10033 = vst [vmem:[#allocation29_spill] sm:$0xff] %v8587_v52  ;;  %v4140_v43 = vstv %s5196_s15  ;;  %s5208_s15 = sld [smem:[#allocation3 + $0xb9]] }
 0x4cd   : >> { %4077 = vrot.lane.b32.xlu1 %v4066_v62, %s5384_s16  ;;  %4097 = vrot.lane.b32.xlu0 %v4089_v29, %s5384_s16  ;;  %v4092_v62 = vmul.f32 %v4088_v47, %v8549_v25  ;;  %v4115_v29 = vmul.f32 %v4114_v22, %v8527_v9 }
 0x4cf   : >> { %v8593_v0 = vpop.permute.xlu1 %3629  ;;  %v8595_v6 = vpop.permute.xlu0 %3649 }
 0x4d0   : >> { %10034 = vst [vmem:[#allocation69_spill] sm:$0xff] %v8593_v0  ;;  %10035 = vst [vmem:[#allocation15_spill] sm:$0xff] %v8595_v6 }
 0x4d1   : >> { %4099 = vrot.lane.b32.xlu1 %v4090_v58, %s5384_s16  ;;  %4101 = vrot.lane.b32.xlu0 %v4091_v12, %s5384_s16  ;;  %v4116_v58 = vmul.f32 %v4114_v22, %v8539_v48  ;;  %v4117_v12 = vmul.f32 %v4114_v22, %v8537_v39 }
 0x4d3   : >> { %v8601_v21 = vpop.permute.xlu1 %3651  ;;  %v8603_v52 = vpop.permute.xlu0 %3653 }
 0x4d4   : >> { %10036 = vst [vmem:[#allocation70_spill] sm:$0xff] %v8603_v52 }
 0x4d5   : >> { %4103 = vrot.lane.b32.xlu1 %v4092_v62, %s5384_s16  ;;  %4123 = vrot.lane.b32.xlu0 %v4115_v29, %s5384_s16  ;;  %v4118_v62 = vmul.f32 %v4114_v22, %v8549_v25  ;;  %v4141_v29 = vmul.f32 %v4140_v43, %v8527_v9  ;;  %v3115_v22 = vadd.f32 %v8239_v57, %v7865_v36 }
 0x4d6   : >> { %v3116_v36 = vadd.f32 %v8249_v30, %v7886_v17  ;;  %v3117_v57 = vadd.f32 %v8251_v42, %v7888_v4  ;;  %v3141_v30 = vadd.f32 %v8259_v54, %v7912_v56 }
 0x4d7   : >> { %v8609_v6 = vpop.permute.xlu1 %3655  ;;  %v8611_v0 = vpop.permute.xlu0 %3675 }
 0x4d8   : >> { %10037 = vst [vmem:[#allocation60_spill] sm:$0xff] %v8609_v6  ;;  %10038 = vst [vmem:[#allocation36_spill] sm:$0xff] %v8611_v0  ;;  %v3349_v56 = vadd.f32 %v8395_v44, %v3141_v30  ;;  %v3144_v30 = vadd.f32 %v8273_v20, %v7963_v7 }
 0x4d9   : >> { %4125 = vrot.lane.b32.xlu1 %v4116_v58, %s5384_s16  ;;  %4127 = vrot.lane.b32.xlu0 %v4117_v12, %s5384_s16  ;;  %v4142_v58 = vmul.f32 %v4140_v43, %v8539_v48  ;;  %v4143_v12 = vmul.f32 %v4140_v43, %v8537_v39 }
 0x4da   : >> { %v3557_v44 = vadd.f32 %v8523_v24, %v3349_v56  ;;  %v4244_v56 = vstv %s8686_s24  ;;  %s5216_s24 = sld [smem:[#allocation3 + $0xc1]] }
 0x4db   : >> { %v8617_v47 = vpop.permute.xlu1 %3677  ;;  %v8619_v52 = vpop.permute.xlu0 %3679 }
 0x4dc   : >> { %10039 = vst [vmem:[#allocation42_spill] sm:$0xff] %v8617_v47  ;;  %10040 = vst [vmem:[#allocation30_spill] sm:$0xff] %v8619_v52  ;;  %v4166_v47 = vstv %s5197_s17  ;;  %v3323_v52 = vadd.f32 %v8373_v53, %v3115_v22  ;;  %v4192_v22 = vstv %s5198_s19  ;;  %s5209_s17 = sld [smem:[#allocation3 + $0xba]]  ;;  %s5212_s19 = sld [smem:[#allocation3 + $0xbd]] }
 0x4dd   : >> { %4129 = vrot.lane.b32.xlu1 %v4118_v62, %s5384_s16  ;;  %4149 = vrot.lane.b32.xlu0 %v4141_v29, %s5384_s16  ;;  %v4169_v53 = vmul.f32 %v4166_v47, %v8537_v39 }
 0x4df   : >> { %v8625_v0 = vpop.permute.xlu1 %3681  ;;  %v8627_v6 = vpop.permute.xlu0 %3701 }
 0x4e0   : >> { %10041 = vst [vmem:[#allocation47_spill] sm:$0xff] %v8625_v0  ;;  %10042 = vst [vmem:[#allocation81_spill] sm:$0xff] %v8627_v6  ;;  %v4144_v0 = vmul.f32 %v4140_v43, %v8549_v25  ;;  %v4167_v6 = vmul.f32 %v4166_v47, %v8527_v9 }
 0x4e1   : >> { %4151 = vrot.lane.b32.xlu1 %v4142_v58, %s5384_s16  ;;  %4153 = vrot.lane.b32.xlu0 %v4143_v12, %s5384_s16  ;;  %v3930_v58 = vstv %s5183_s18  ;;  %v3531_v12 = vadd.f32 %v8507_v31, %v3323_v52  ;;  %v3118_v52 = vadd.f32 %v8257_v16, %v7910_v5  ;;  %v4170_v31 = vmul.f32 %v4166_v47, %v8549_v25  ;;  %s5211_s18 = sld [smem:[#allocation3 + $0xbc]] }
 0x4e2   : >> { %v3931_v4 = vmul.f32 %v3930_v58, %v8527_v9  ;;  %v3932_v5 = vmul.f32 %v3930_v58, %v8539_v48  ;;  %v3933_v16 = vmul.f32 %v3930_v58, %v8537_v39 }
 0x4e3   : >> { %v8635_v62 = vpop.permute.xlu1 %3703  ;;  %v8637_v29 = vpop.permute.xlu0 %3705 }
 0x4e4   : >> { %10043 = vst [vmem:[#allocation16_spill] sm:$0xff] %v8635_v62  ;;  %10044 = vst [vmem:[#allocation31_spill] sm:$0xff] %v8637_v29  ;;  %v4168_v62 = vmul.f32 %v4166_v47, %v8539_v48  ;;  %v3326_v47 = vadd.f32 %v8393_v19, %v3118_v52 }
 0x4e5   : >> { %4155 = vrot.lane.b32.xlu1 %v4144_v0, %s5384_s16  ;;  %4175 = vrot.lane.b32.xlu0 %v4167_v6, %s5384_s16  ;;  %v3324_v6 = vadd.f32 %v8383_v34, %v3116_v36  ;;  %v3325_v0 = vadd.f32 %v8385_v13, %v3117_v57  ;;  %v4193_v57 = vmul.f32 %v4192_v22, %v8527_v9 }
 0x4e6   : >> { %v3534_v19 = vadd.f32 %v8521_v40, %v3326_v47  ;;  %v3169_v47 = vadd.f32 %v8283_v14, %v7992_v51 }
 0x4e7   : >> { %v8651_v43 = vpop.permute.xlu1 %3707  ;;  %v3728_v29 = vpop.permute.xlu0 %3727  ;;  %v3532_v42 = vadd.f32 %v8513_v2, %v3324_v6  ;;  %v3533_v34 = vadd.f32 %v8515_v27, %v3325_v0  ;;  %v3142_v2 = vadd.f32 %v8265_v46, %v7936_v33 }
 0x4e8   : >> { %v3739_v17 = vadd.f32 %v3728_v29, %v3531_v12  ;;  %v3143_v12 = vadd.f32 %v8267_v60, %v7938_v32  ;;  %v4195_v32 = vmul.f32 %v4192_v22, %v8537_v39  ;;  %v4218_v60 = vstv %s8655_s22  ;;  %s5214_s22 = sld [smem:[#allocation3 + $0xbf]] }
 0x4e9   : >> { %4177 = vrot.lane.b32.xlu1 %v4168_v62, %s5384_s16  ;;  %4179 = vrot.lane.b32.xlu0 %v4169_v53, %s5384_s16  ;;  %v3940_v62 = vstv %s8641_s20  ;;  %v4194_v53 = vmul.f32 %v4192_v22, %v8539_v48  ;;  %v3350_v52 = vadd.f32 %v8401_v8, %v3142_v2  ;;  %v4219_v20 = vmul.f32 %v4218_v60, %v8527_v9  ;;  %s5213_s20 = sld [smem:[#allocation3 + $0xbe]] }
 0x4ea   : >> { %v8669_v13 = vadd.f32 %v3931_v4, %v3739_v17  ;;  %v3934_v17 = vmul.f32 %v3930_v58, %v8549_v25  ;;  %v3941_v4 = vmul.f32 %v3940_v62, %v8527_v9  ;;  %v4196_v58 = vmul.f32 %v4192_v22, %v8549_v25 }
 0x4eb   : >> { %v3730_v29 = vpop.permute.xlu1 %3729  ;;  %v3732_v36 = vpop.permute.xlu0 %3731  ;;  %v3944_v51 = vmul.f32 %v3940_v62, %v8549_v25 }
 0x4ec   : >> { %v3740_v54 = vadd.f32 %v3730_v29, %v3532_v42  ;;  %v3741_v27 = vadd.f32 %v3732_v36, %v3533_v34  ;;  %v3167_v42 = vadd.f32 %v8275_v37, %v7965_v26  ;;  %v3558_v34 = vadd.f32 %v8531_v18, %v3350_v52 }
 0x4ed   : >> { %4181 = vrot.lane.b32.xlu1 %v4170_v31, %s5384_s16  ;;  %4201 = vrot.lane.b32.xlu0 %v4193_v57, %s5384_s16  ;;  %v3351_v31 = vadd.f32 %v8403_v3, %v3143_v12  ;;  %v3942_v26 = vmul.f32 %v3940_v62, %v8539_v48  ;;  %v3943_v37 = vmul.f32 %v3940_v62, %v8537_v39  ;;  %v3950_v57 = vstv %s8675_s23  ;;  %s5215_s23 = sld [smem:[#allocation3 + $0xc0]] }
 0x4ee   : >> { %v8690_v6 = vadd.f32 %v3932_v5, %v3740_v54  ;;  %v8692_v0 = vadd.f32 %v3933_v16, %v3741_v27  ;;  %v3352_v18 = vadd.f32 %v8409_v10, %v3144_v30  ;;  %v3168_v16 = vadd.f32 %v8281_v45, %v7990_v59 }
 0x4ef   : >> { %v3734_v33 = vpop.permute.xlu1 %3733  ;;  %v3754_v46 = vpop.permute.xlu0 %3753  ;;  %v3559_v8 = vadd.f32 %v8533_v23, %v3351_v31  ;;  %v3375_v23 = vadd.f32 %v8411_v15, %v3167_v42  ;;  %v4220_v59 = vmul.f32 %v4218_v60, %v8539_v48  ;;  %v4221_v45 = vmul.f32 %v4218_v60, %v8537_v39  ;;  %v10048_v42 = vld [vmem:[#allocation79_spill] sm:$0xff] }
 0x4f0   : >> { %v3742_v40 = vadd.f32 %v3734_v33, %v3534_v19  ;;  %v3765_v24 = vadd.f32 %v3754_v46, %v3557_v44  ;;  %v3560_v54 = vadd.f32 %v8543_v35, %v3352_v18  ;;  %v3951_v14 = vmul.f32 %v3950_v57, %v8527_v9 }
 0x4f1   : >> { %4203 = vrot.lane.b32.xlu1 %v4194_v53, %s5384_s16  ;;  %4205 = vrot.lane.b32.xlu0 %v4195_v32, %s5384_s16  ;;  %v3583_v27 = vadd.f32 %v8545_v38, %v3375_v23  ;;  %v3376_v35 = vadd.f32 %v8417_v55, %v3168_v16  ;;  %v3377_v38 = vadd.f32 %v8419_v49, %v3169_v47 }
 0x4f2   : >> { %v8709_v3 = vadd.f32 %v3934_v17, %v3742_v40  ;;  %v8711_v29 = vadd.f32 %v3941_v4, %v3765_v24  ;;  %v3170_v44 = vadd.f32 %v8289_v63, %v8017_v11  ;;  %v3193_v33 = vadd.f32 %v8291_v50, %v8019_v1  ;;  %v10046_v40 = vld [vmem:[#allocation49_spill] sm:$0xff]  ;;  %v10047_v24 = vld [vmem:[#allocation51_spill] sm:$0xff] }
 0x4f3   : >> { %v3756_v36 = vpop.permute.xlu1 %3755  ;;  %v3758_v7 = vpop.permute.xlu0 %3757  ;;  %v4222_v62 = vmul.f32 %v4218_v60, %v8549_v25  ;;  %v3584_v46 = vadd.f32 %v8553_v41, %v3376_v35  ;;  %v3585_v55 = vadd.f32 %v8555_v61, %v3377_v38  ;;  %v4245_v11 = vmul.f32 %v4244_v56, %v8527_v9  ;;  %v10045_v41 = vld [vmem:[#allocation61_spill] sm:$0xff]  ;;  %v10056_v38 = vld [vmem:[#allocation63_spill] sm:$0xff] }
 0x4f4   : >> { %v3766_v22 = vadd.f32 %v3756_v36, %v3558_v34  ;;  %v3767_v5 = vadd.f32 %v3758_v7, %v3559_v8  ;;  %v3952_v1 = vmul.f32 %v3950_v57, %v8539_v48  ;;  %v3953_v63 = vmul.f32 %v3950_v57, %v8537_v39  ;;  %v10051_v7 = vld [vmem:[#allocation22_spill] sm:$0xff] }
 0x4f5   : >> { %4207 = vrot.lane.b32.xlu1 %v4196_v58, %s5384_s16  ;;  %4227 = vrot.lane.b32.xlu0 %v4219_v20, %s5385_s25  ;;  %v3960_v50 = vstv %s8717_s26  ;;  %s8759_s16 = sld [smem:[#allocation3 + $0xa4]]  ;;  %v3378_v60 = vadd.f32 %v8425_v28, %v3170_v44  ;;  %v3401_v52 = vadd.f32 %v10045_v41, %v3193_v33  ;;  %v3194_v30 = vadd.f32 %v10047_v24, %v10046_v40  ;;  %v10049_v58 = vld [vmem:[#allocation13_spill] sm:$0xff]  ;;  %v10050_v28 = vld [vmem:[#allocation75_spill] sm:$0xff]  ;;  %v10058_v44 = vld [vmem:[#allocation76_spill] sm:$0xff]  ;;  %s5218_s26 = sld [smem:[#allocation3 + $0xc3]] }
 0x4f6   : >> { %v8730_v10 = vadd.f32 %v3942_v26, %v3766_v22  ;;  %v8732_v15 = vadd.f32 %v3943_v37, %v3767_v5  ;;  %v3195_v34 = vadd.f32 %v10049_v58, %v10048_v42  ;;  %v4246_v8 = vmul.f32 %v4244_v56, %v8539_v48  ;;  %v10063_v42 = vld [vmem:[#allocation84_spill] sm:$0xff] }
 0x4f7   : >> { %v3760_v2 = vpop.permute.xlu1 %3759  ;;  %v3780_v12 = vpop.permute.xlu0 %3779  ;;  %v3586_v36 = vadd.f32 %v10050_v28, %v3378_v60  ;;  %v3609_v20 = vadd.f32 %v10051_v7, %v3401_v52  ;;  %v4247_v22 = vmul.f32 %v4244_v56, %v8537_v39  ;;  %v4270_v5 = vstv %s8736_s27  ;;  %v10066_v7 = vld [vmem:[#allocation74_spill] sm:$0xff]  ;;  %s5219_s27 = sld [smem:[#allocation3 + $0xc4]] }
 0x4f8   : >> { %v3768_v53 = vadd.f32 %v3760_v2, %v3560_v54  ;;  %v3791_v19 = vadd.f32 %v3780_v12, %v3583_v27  ;;  %v3954_v16 = vmul.f32 %v3950_v57, %v8549_v25  ;;  %v3961_v47 = vmul.f32 %v3960_v50, %v8527_v9  ;;  %v10052_v54 = vld [vmem:[#allocation67_spill] sm:$0xff]  ;;  %v10053_v2 = vld [vmem:[#allocation53_spill] sm:$0xff] }
 0x4f9   : >> { %4229 = vrot.lane.b32.xlu1 %v4220_v59, %s5385_s25  ;;  %4231 = vrot.lane.b32.xlu0 %v4221_v45, %s5385_s25  ;;  %v3402_v27 = vadd.f32 %v10052_v54, %v3194_v30  ;;  %v3403_v12 = vadd.f32 %v10053_v2, %v3195_v34  ;;  %v4248_v57 = vmul.f32 %v4244_v56, %v8549_v25  ;;  %v10060_v56 = vld [vmem:[#allocation72_spill] sm:$0xff]  ;;  %v10062_v30 = vld [vmem:[#allocation43_spill] sm:$0xff]  ;;  %v10064_v34 = vld [vmem:[#allocation9_spill] sm:$0xff] }
 0x4fa   : >> { %v8751_v49 = vadd.f32 %v3944_v51, %v3768_v53  ;;  %v8753_v32 = vadd.f32 %v3951_v14, %v3791_v19  ;;  %v10054_v51 = vld [vmem:[#allocation56_spill] sm:$0xff]  ;;  %v10057_v53 = vld [vmem:[#allocation83_spill] sm:$0xff]  ;;  %v3963_v60 = vmul.f32 %v3960_v50, %v8537_v39  ;;  %v3220_v58 = vadd.f32 %v10063_v42, %v10062_v30 }
 0x4fb   : >> { %v3782_v17 = vpop.permute.xlu1 %3781  ;;  %v3784_v4 = vpop.permute.xlu0 %3783  ;;  %v10055_v14 = vld [vmem:[#allocation44_spill] sm:$0xff]  ;;  %v3219_v19 = vadd.f32 %v10057_v53, %v10056_v38  ;;  %v3610_v33 = vadd.f32 %v10058_v44, %v3402_v27  ;;  %v3970_v41 = vstv %s8759_s16  ;;  %v4272_v27 = vmul.f32 %v4270_v5, %v8539_v48  ;;  %s5220_s16 = sld [smem:[#allocation3 + $0xc5]] }
 0x4fc   : >> { %v3792_v61 = vadd.f32 %v3782_v17, %v3584_v46  ;;  %v3793_v31 = vadd.f32 %v3784_v4, %v3585_v55  ;;  %v3196_v35 = vadd.f32 %v10055_v14, %v10054_v51  ;;  %v4273_v2 = vmul.f32 %v4270_v5, %v8537_v39  ;;  %v10069_v14 = vld [vmem:[#allocation14_spill] sm:$0xff] }
 0x4fd   : >> { %4233 = vrot.lane.b32.xlu1 %v4222_v62, %s5385_s25  ;;  %4253 = vrot.lane.b32.xlu0 %v4245_v11, %s5385_s25  ;;  %v10059_v62 = vld [vmem:[#allocation59_spill] sm:$0xff]  ;;  %v3980_v30 = vstv %s8801_s29  ;;  %s5222_s29 = sld [smem:[#allocation3 + $0xc7]] }
 0x4fe   : >> { %v8774_v26 = vadd.f32 %v3952_v1, %v3792_v61  ;;  %v8776_v37 = vadd.f32 %v3953_v63, %v3793_v31  ;;  %v3611_v46 = vadd.f32 %v10059_v62, %v3403_v12  ;;  %v4271_v1 = vmul.f32 %v4270_v5, %v8527_v9  ;;  %v10061_v61 = vld [vmem:[#allocation32_spill] sm:$0xff]  ;;  %v10073_v62 = vld [vmem:[#allocation25_spill] sm:$0xff] }
 0x4ff   : >> { %v3786_v18 = vpop.permute.xlu1 %3785  ;;  %v3806_v23 = vpop.permute.xlu0 %3805  ;;  %v3962_v63 = vmul.f32 %v3960_v50, %v8539_v48  ;;  %v3404_v52 = vadd.f32 %v10060_v56, %v3196_v35  ;;  %v3427_v31 = vadd.f32 %v10061_v61, %v3219_v19  ;;  %v3964_v12 = vmul.f32 %v3960_v50, %v8549_v25  ;;  %v10070_v19 = vld [vmem:[#allocation86_spill] sm:$0xff] }
 0x500   : >> { %v3794_v59 = vadd.f32 %v3786_v18, %v3586_v36  ;;  %v3817_v45 = vadd.f32 %v3806_v23, %v3609_v20  ;;  %v4296_v36 = vstv %s8770_s28  ;;  %v10067_v18 = vld [vmem:[#allocation48_spill] sm:$0xff]  ;;  %v4274_v50 = vmul.f32 %v4270_v5, %v8549_v25  ;;  %v10076_v5 = vld [vmem:[#allocation27_spill] sm:$0xff]  ;;  %s5221_s28 = sld [smem:[#allocation3 + $0xc6]] }
 0x501   : >> { %4255 = vrot.lane.b32.xlu1 %v4246_v8, %s5385_s25  ;;  %4257 = vrot.lane.b32.xlu0 %v4247_v22, %s5385_s25  ;;  %v10065_v8 = vld [vmem:[#allocation65_spill] sm:$0xff]  ;;  %v3612_v20 = vadd.f32 %v10066_v7, %v3404_v52  ;;  %v3635_v23 = vadd.f32 %v10067_v18, %v3427_v31  ;;  %v4297_v31 = vmul.f32 %v4296_v36, %v8527_v9  ;;  %v10078_v7 = vld [vmem:[#allocation80_spill] sm:$0xff] }
 0x502   : >> { %v8793_v55 = vadd.f32 %v3954_v16, %v3794_v59  ;;  %v8795_v17 = vadd.f32 %v3961_v47, %v3817_v45  ;;  %v3221_v28 = vadd.f32 %v10065_v8, %v10064_v34  ;;  %v3971_v59 = vmul.f32 %v3970_v41, %v8527_v9  ;;  %v10068_v45 = vld [vmem:[#allocation39_spill] sm:$0xff] }
 0x503   : >> { %v3808_v4 = vpop.permute.xlu1 %3807  ;;  %v3810_v11 = vpop.permute.xlu0 %3809  ;;  %v3428_v51 = vadd.f32 %v10068_v45, %v3220_v58  ;;  %v10077_v58 = vld [vmem:[#allocation62_spill] sm:$0xff] }
 0x504   : >> { %v3818_v40 = vadd.f32 %v3808_v4, %v3610_v33  ;;  %v3819_v24 = vadd.f32 %v3810_v11, %v3611_v46  ;;  %v3429_v35 = vadd.f32 %v10069_v14, %v3221_v28  ;;  %v10072_v33 = vld [vmem:[#allocation17_spill] sm:$0xff] }
 0x505   : >> { %4259 = vrot.lane.b32.xlu1 %v4248_v57, %s5385_s25  ;;  %4279 = vrot.lane.b32.xlu0 %v4271_v1, %s5385_s25  ;;  %v10071_v57 = vld [vmem:[#allocation35_spill] sm:$0xff]  ;;  %v3245_v46 = vadd.f32 %v10073_v62, %v10072_v33  ;;  %v10074_v4 = vld [vmem:[#allocation41_spill] sm:$0xff]  ;;  %v10084_v33 = vld [vmem:[#allocation68_spill] sm:$0xff] }
 0x506   : >> { %v8816_v22 = vadd.f32 %v3962_v63, %v3818_v40  ;;  %v8818_v16 = vadd.f32 %v3963_v60, %v3819_v24  ;;  %v3222_v44 = vadd.f32 %v10071_v57, %v10070_v19  ;;  %v3636_v11 = vadd.f32 %v10074_v4, %v3428_v51  ;;  %v10075_v1 = vld [vmem:[#allocation29_spill] sm:$0xff] }
 0x507   : >> { %v3812_v47 = vpop.permute.xlu1 %3811  ;;  %v3832_v54 = vpop.permute.xlu0 %3831  ;;  %v3637_v63 = vadd.f32 %v10075_v1, %v3429_v35  ;;  %v3972_v40 = vmul.f32 %v3970_v41, %v8539_v48  ;;  %v3973_v24 = vmul.f32 %v3970_v41, %v8537_v39  ;;  %v3453_v34 = vadd.f32 %v10077_v58, %v3245_v46  ;;  %v10085_v46 = vld [vmem:[#allocation46_spill] sm:$0xff]  ;;  %v10086_v1 = vld [vmem:[#allocation57_spill] sm:$0xff] }
 0x508   : >> { %v3820_v38 = vadd.f32 %v3812_v47, %v3612_v20  ;;  %v3843_v53 = vadd.f32 %v3832_v54, %v3635_v23  ;;  %v3430_v42 = vadd.f32 %v10076_v5, %v3222_v44  ;;  %v10079_v20 = vld [vmem:[#allocation45_spill] sm:$0xff]  ;;  %v10081_v47 = vld [vmem:[#allocation26_spill] sm:$0xff]  ;;  %v4299_v19 = vmul.f32 %v4296_v36, %v8537_v39 }
 0x509   : >> { %4281 = vrot.lane.b32.xlu1 %v4272_v27, %s5385_s25  ;;  %4283 = vrot.lane.b32.xlu0 %v4273_v2, %s5385_s25  ;;  %v3246_v18 = vadd.f32 %v10079_v20, %v10078_v7  ;;  %v10080_v23 = vld [vmem:[#allocation77_spill] sm:$0xff]  ;;  %v4322_v27 = vstv %s8812_s30  ;;  %v3974_v57 = vmul.f32 %v3970_v41, %v8549_v25  ;;  %v3981_v44 = vmul.f32 %v3980_v30, %v8527_v9  ;;  %v10090_v5 = vld [vmem:[#allocation70_spill] sm:$0xff] }
 0x50a   : >> { %v8835_v60 = vadd.f32 %v3964_v12, %v3820_v38  ;;  %v8837_v56 = vadd.f32 %v3971_v59, %v3843_v53  ;;  %v3247_v54 = vadd.f32 %v10081_v47, %v10080_v23  ;;  %v10082_v2 = vld [vmem:[#allocation69_spill] sm:$0xff]  ;;  %v10083_v59 = vld [vmem:[#allocation15_spill] sm:$0xff]  ;;  %v4298_v53 = vmul.f32 %v4296_v36, %v8539_v48 }
 0x50b   : >> { %v3834_v52 = vpop.permute.xlu1 %3833  ;;  %v3836_v61 = vpop.permute.xlu0 %3835  ;;  %v3638_v12 = vadd.f32 %v10082_v2, %v3430_v42  ;;  %v3661_v45 = vadd.f32 %v10083_v59, %v3453_v34  ;;  %v3454_v62 = vadd.f32 %v10084_v33, %v3246_v18  ;;  %v4300_v41 = vmul.f32 %v4296_v36, %v8549_v25  ;;  %v10091_v36 = vld [vmem:[#allocation85_spill] sm:$0xff] }
 0x50c   : >> { %v3844_v8 = vadd.f32 %v3834_v52, %v3636_v11  ;;  %v3845_v28 = vadd.f32 %v3836_v61, %v3637_v63  ;;  %v10087_v63 = vld [vmem:[#allocation82_spill] sm:$0xff]  ;;  %v10088_v61 = vld [vmem:[#allocation64_spill] sm:$0xff]  ;;  %v4323_v7 = vmul.f32 %v4322_v27, %v8527_v9  ;;  %v3982_v20 = vmul.f32 %v3980_v30, %v8539_v48  ;;  %v10093_v59 = vld [vmem:[#allocation37_spill] sm:$0xff] }
 0x50d   : >> { %4285 = vrot.lane.b32.xlu1 %v4274_v50, %s5385_s25  ;;  %4305 = vrot.lane.b32.xlu0 %v4297_v31, %s5385_s25  ;;  %v3455_v50 = vadd.f32 %v10085_v46, %v3247_v54  ;;  %v3248_v52 = vadd.f32 %v10087_v63, %v10086_v1  ;;  %v10089_v31 = vld [vmem:[#allocation24_spill] sm:$0xff]  ;;  %v3983_v18 = vmul.f32 %v3980_v30, %v8537_v39  ;;  %v3990_v23 = vstv %s8843_s4 }
 0x50e   : >> { %v8856_v51 = vadd.f32 %v3972_v40, %v3844_v8  ;;  %v8858_v14 = vadd.f32 %v3973_v24, %v3845_v28  ;;  %v3271_v40 = vadd.f32 %v10089_v31, %v10088_v61  ;;  %v3662_v24 = vadd.f32 %v8601_v21, %v3454_v62  ;;  %v10092_v21 = vld [vmem:[#allocation33_spill] sm:$0xff]  ;;  %v10098_v62 = vld [vmem:[#allocation36_spill] sm:$0xff] }
 0x50f   : >> { %v3838_v35 = vpop.permute.xlu1 %3837  ;;  %v3858_v38 = vpop.permute.xlu0 %3857  ;;  %v3663_v42 = vadd.f32 %v10090_v5, %v3455_v50  ;;  %v3456_v47 = vadd.f32 %v10091_v36, %v3248_v52  ;;  %v4325_v63 = vmul.f32 %v4322_v27, %v8537_v39  ;;  %v4348_v52 = vstv %s8862_s6  ;;  %v10104_v36 = vld [vmem:[#allocation19_spill] sm:$0xff] }
 0x510   : >> { %v3846_v4 = vadd.f32 %v3838_v35, %v3638_v12  ;;  %v3869_v11 = vadd.f32 %v3858_v38, %v3661_v45  ;;  %v3479_v54 = vadd.f32 %v10092_v21, %v3271_v40  ;;  %v10094_v45 = vld [vmem:[#allocation73_spill] sm:$0xff]  ;;  %v10095_v38 = vld [vmem:[#allocation50_spill] sm:$0xff]  ;;  %v3984_v61 = vmul.f32 %v3980_v30, %v8549_v25  ;;  %v10099_v40 = vld [vmem:[#allocation28_spill] sm:$0xff] }
 0x511   : >> { %4307 = vrot.lane.b32.xlu1 %v4298_v53, %s5385_s25  ;;  %4309 = vrot.lane.b32.xlu0 %v4299_v19, %s5385_s25  ;;  %v3272_v35 = vadd.f32 %v10094_v45, %v10093_v59  ;;  %v10096_v53 = vld [vmem:[#allocation66_spill] sm:$0xff]  ;;  %v3991_v31 = vmul.f32 %v3990_v23, %v8527_v9  ;;  %v4326_v30 = vmul.f32 %v4322_v27, %v8549_v25 }
 0x512   : >> { %v8877_v58 = vadd.f32 %v3974_v57, %v3846_v4  ;;  %v8879_v34 = vadd.f32 %v3981_v44, %v3869_v11  ;;  %v3273_v19 = vadd.f32 %v10096_v53, %v10095_v38  ;;  %v4324_v57 = vmul.f32 %v4322_v27, %v8539_v48  ;;  %v10097_v44 = vld [vmem:[#allocation60_spill] sm:$0xff]  ;;  %v10105_v21 = vld [vmem:[#allocation42_spill] sm:$0xff] }
 0x513   : >> { %v3860_v8 = vpop.permute.xlu1 %3859  ;;  %v3862_v28 = vpop.permute.xlu0 %3861  ;;  %v3664_v33 = vadd.f32 %v10097_v44, %v3456_v47  ;;  %v3687_v46 = vadd.f32 %v10098_v62, %v3479_v54  ;;  %v4349_v53 = vmul.f32 %v4348_v52, %v8527_v9  ;;  %v4000_v44 = vstv %s8885_s7  ;;  %v10109_v27 = vld [vmem:[#allocation54_spill] sm:$0xff] }
 0x514   : >> { %v3870_v2 = vadd.f32 %v3860_v8, %v3662_v24  ;;  %v3871_v12 = vadd.f32 %v3862_v28, %v3663_v42  ;;  %v10100_v24 = vld [vmem:[#allocation78_spill] sm:$0xff]  ;;  %v10101_v28 = vld [vmem:[#allocation12_spill] sm:$0xff] }
 0x515   : >> { %4311 = vrot.lane.b32.xlu1 %v4300_v41, %s5385_s25  ;;  %4331 = vrot.lane.b32.xlu0 %v4323_v7, %s5385_s25  ;;  %v3480_v41 = vadd.f32 %v10099_v40, %v3272_v35  ;;  %v3481_v5 = vadd.f32 %v10100_v24, %v3273_v19  ;;  %v10102_v7 = vld [vmem:[#allocation52_spill] sm:$0xff]  ;;  %v3992_v19 = vmul.f32 %v3990_v23, %v8539_v48  ;;  %v10112_v40 = vld [vmem:[#allocation34_spill] sm:$0xff] }
 0x516   : >> { %v8898_v50 = vadd.f32 %v3982_v20, %v3870_v2  ;;  %v8900_v4 = vadd.f32 %v3983_v18, %v3871_v12  ;;  %v3274_v20 = vadd.f32 %v10102_v7, %v10101_v28  ;;  %v10103_v18 = vld [vmem:[#allocation18_spill] sm:$0xff]  ;;  %v10115_v28 = vld [vmem:[#allocation81_spill] sm:$0xff] }
 0x517   : >> { %v3864_v11 = vpop.permute.xlu1 %3863  ;;  %v3884_v1 = vpop.permute.xlu0 %3883  ;;  %v3297_v47 = vadd.f32 %v10104_v36, %v10103_v18  ;;  %v3688_v54 = vadd.f32 %v10105_v21, %v3480_v41  ;;  %v10106_v2 = vld [vmem:[#allocation30_spill] sm:$0xff]  ;;  %v10113_v41 = vld [vmem:[#allocation20_spill] sm:$0xff]  ;;  %v4351_v21 = vmul.f32 %v4348_v52, %v8537_v39 }
 0x518   : >> { %v3872_v42 = vadd.f32 %v3864_v11, %v3664_v33  ;;  %v3895_v8 = vadd.f32 %v3884_v1, %v3687_v46  ;;  %v3689_v12 = vadd.f32 %v10106_v2, %v3481_v5  ;;  %v10108_v33 = vld [vmem:[#allocation21_spill] sm:$0xff]  ;;  %v3299_v24 = vadd.f32 %v10113_v41, %v10112_v40 }
 0x519   : >> { %4333 = vrot.lane.b32.xlu1 %v4324_v57, %s5385_s25  ;;  %4335 = vrot.lane.b32.xlu0 %v4325_v63, %s5385_s25  ;;  %v3993_v57 = vmul.f32 %v3990_v23, %v8537_v39  ;;  %v3482_v62 = vadd.f32 %v10108_v33, %v3274_v20  ;;  %v3505_v46 = vadd.f32 %v10109_v27, %v3297_v47  ;;  %v10110_v63 = vld [vmem:[#allocation71_spill] sm:$0xff]  ;;  %v10121_v27 = vld [vmem:[#allocation10_spill] sm:$0xff] }
 0x51a   : >> { %v8919_v59 = vadd.f32 %v3984_v61, %v3872_v42  ;;  %v8921_v45 = vadd.f32 %v3991_v31, %v3895_v8  ;;  %v10111_v61 = vld [vmem:[#allocation38_spill] sm:$0xff]  ;;  %v4350_v5 = vmul.f32 %v4348_v52, %v8539_v48  ;;  %v10114_v42 = vld [vmem:[#allocation47_spill] sm:$0xff]  ;;  %v3994_v2 = vmul.f32 %v3990_v23, %v8549_v25 }
 0x51b   : >> { %v3886_v35 = vpop.permute.xlu1 %3885  ;;  %v3888_v38 = vpop.permute.xlu0 %3887  ;;  %v3298_v31 = vadd.f32 %v10111_v61, %v10110_v63  ;;  %v3690_v8 = vadd.f32 %v10114_v42, %v3482_v62  ;;  %v3713_v7 = vadd.f32 %v10115_v28, %v3505_v46  ;;  %v10122_v46 = vld [vmem:[#allocation16_spill] sm:$0xff]  ;;  %v4352_v41 = vmul.f32 %v4348_v52, %v8549_v25 }
 0x51c   : >> { %10107 = vst [vmem:[#allocation87_spill] sm:$0xff] %v8921_v45  ;;  %v3896_v11 = vadd.f32 %v3886_v35, %v3688_v54  ;;  %v3897_v1 = vadd.f32 %v3888_v38, %v3689_v12  ;;  %v4374_v54 = vstv %s8904_s11  ;;  %v10118_v12 = vld [vmem:[#allocation55_spill] sm:$0xff]  ;;  %v10119_v38 = vld [vmem:[#allocation40_spill] sm:$0xff]  ;;  %v4002_v42 = vmul.f32 %v4000_v44, %v8539_v48 }
 0x51d   : >> { %4337 = vrot.lane.b32.xlu1 %v4326_v30, %s5385_s25  ;;  %4357 = vrot.lane.b32.xlu0 %v4349_v53, %s5385_s25  ;;  %v4001_v30 = vmul.f32 %v4000_v44, %v8527_v9  ;;  %v3506_v35 = vadd.f32 %v10118_v12, %v3298_v31  ;;  %v3507_v53 = vadd.f32 %v10119_v38, %v3299_v24 }
 0x51e   : >> { %v8938_v20 = vadd.f32 %v3992_v19, %v3896_v11  ;;  %v8940_v18 = vadd.f32 %v3993_v57, %v3897_v1  ;;  %v10120_v19 = vld [vmem:[#allocation58_spill] sm:$0xff]  ;;  %v10123_v1 = vld [vmem:[#allocation31_spill] sm:$0xff]  ;;  %v4375_v24 = vmul.f32 %v4374_v54, %v8527_v9  ;;  %v4376_v12 = vmul.f32 %v4374_v54, %v8539_v48 }
 0x51f   : >> { %v3890_v36 = vpop.permute.xlu1 %3889  ;;  %v3910_v47 = vpop.permute.xlu0 %3909  ;;  %v3300_v57 = vadd.f32 %v10121_v27, %v10120_v19  ;;  %v3714_v11 = vadd.f32 %v10122_v46, %v3506_v35  ;;  %v3715_v23 = vadd.f32 %v10123_v1, %v3507_v53  ;;  %v4377_v35 = vmul.f32 %v4374_v54, %v8537_v39 }
 0x520   : >> { %10116 = vst [vmem:[#allocation23_spill] sm:$0xff] %v8938_v20  ;;  %10117 = vst [vmem:[#allocation61_spill] sm:$0xff] %v8940_v18  ;;  %v3898_v33 = vadd.f32 %v3890_v36, %v3690_v8  ;;  %v3921_v62 = vadd.f32 %v3910_v47, %v3713_v7  ;;  %v10126_v8 = vld [vmem:[#allocation11_spill] sm:$0xff]  ;;  %v4003_v36 = vmul.f32 %v4000_v44, %v8537_v39  ;;  %v4400_v53 = vstv %s5206_s13 }
 0x521   : >> { %4359 = vrot.lane.b32.xlu1 %v4350_v5, %s5385_s25  ;;  %4361 = vrot.lane.b32.xlu0 %v4351_v21, %s5385_s25  ;;  %v3508_v5 = vadd.f32 %v10126_v8, %v3300_v57  ;;  %v4378_v27 = vmul.f32 %v4374_v54, %v8549_v25  ;;  %v4401_v57 = vmul.f32 %v4400_v53, %v8527_v9  ;;  %v4556_v18 = vstv %s5212_s19 }
 0x522   : >> { %v8954_v63 = vadd.f32 %v3994_v2, %v3898_v33  ;;  %v8956_v61 = vadd.f32 %v4001_v30, %v3921_v62  ;;  %v4004_v33 = vmul.f32 %v4000_v44, %v8549_v25  ;;  %v4403_v1 = vmul.f32 %v4400_v53, %v8537_v39 }
 0x523   : >> { %v3912_v31 = vpop.permute.xlu1 %3911  ;;  %v3914_v40 = vpop.permute.xlu0 %3913  ;;  %v3716_v47 = vadd.f32 %v8651_v43, %v3508_v5 }
 0x524   : >> { %10124 = vst [vmem:[#allocation49_spill] sm:$0xff] %v8954_v63  ;;  %10125 = vst [vmem:[#allocation51_spill] sm:$0xff] %v8956_v61  ;;  %v3922_v28 = vadd.f32 %v3912_v31, %v3714_v11  ;;  %v3923_v7 = vadd.f32 %v3914_v40, %v3715_v23  ;;  %v4402_v11 = vmul.f32 %v4400_v53, %v8539_v48  ;;  %v4426_v23 = vstv %s5207_s14 }
 0x525   : >> { %4363 = vrot.lane.b32.xlu1 %v4352_v41, %s5385_s25  ;;  %4383 = vrot.lane.b32.xlu0 %v4375_v24, %s5385_s25  ;;  %v4404_v40 = vmul.f32 %v4400_v53, %v8549_v25  ;;  %v4427_v41 = vmul.f32 %v4426_v23, %v8527_v9  ;;  %v4428_v8 = vmul.f32 %v4426_v23, %v8539_v48 }
 0x526   : >> { %v8966_v21 = vadd.f32 %v4002_v42, %v3922_v28  ;;  %v8968_v2 = vadd.f32 %v4003_v36, %v3923_v7  ;;  %v4429_v5 = vmul.f32 %v4426_v23, %v8537_v39  ;;  %v4452_v28 = vstv %s5208_s15 }
 0x527   : >> { %v3916_v52 = vpop.permute.xlu1 %3915  ;;  %v8970_v30 = vpop.permute.xlu0 %4019  ;;  %v4455_v53 = vmul.f32 %v4452_v28, %v8537_v39 }
 0x528   : >> { %10127 = vst [vmem:[#allocation79_spill] sm:$0xff] %v8966_v21  ;;  %v3924_v38 = vadd.f32 %v3916_v52, %v3716_v47  ;;  %v4430_v47 = vmul.f32 %v4426_v23, %v8549_v25  ;;  %v4453_v52 = vmul.f32 %v4452_v28, %v8527_v9 }
 0x529   : >> { %4385 = vrot.lane.b32.xlu1 %v4376_v12, %s5385_s25  ;;  %4387 = vrot.lane.b32.xlu0 %v4377_v35, %s5385_s25 }
 0x52a   : >> { %v8977_v43 = vadd.f32 %v4004_v33, %v3924_v38  ;;  %v4454_v38 = vmul.f32 %v4452_v28, %v8539_v48  ;;  %v4478_v33 = vstv %s5209_s17 }
 0x52b   : >> { %v8979_v62 = vpop.permute.xlu1 %4021  ;;  %v8981_v19 = vpop.permute.xlu0 %4023 }
 0x52d   : >> { %4389 = vrot.lane.b32.xlu1 %v4378_v27, %s5385_s25  ;;  %4409 = vrot.lane.b32.xlu0 %v4401_v57, %s5385_s25 }
 0x52f   : >> { %v8987_v46 = vpop.permute.xlu1 %4025  ;;  %v8989_v44 = vpop.permute.xlu0 %4045 }
 0x531   : >> { %4411 = vrot.lane.b32.xlu1 %v4402_v11, %s5385_s25  ;;  %4413 = vrot.lane.b32.xlu0 %v4403_v1, %s5385_s25  ;;  %v4456_v11 = vmul.f32 %v4452_v28, %v8549_v25  ;;  %v4479_v1 = vmul.f32 %v4478_v33, %v8527_v9 }
 0x533   : >> { %v8995_v54 = vpop.permute.xlu1 %4047  ;;  %v8997_v31 = vpop.permute.xlu0 %4049 }
 0x535   : >> { %4415 = vrot.lane.b32.xlu1 %v4404_v40, %s5385_s25  ;;  %4435 = vrot.lane.b32.xlu0 %v4427_v41, %s5386_s10  ;;  %s5210_s25 = sld [smem:[#allocation3 + $0xbb]]  ;;  %v4480_v41 = vmul.f32 %v4478_v33, %v8539_v48 }
 0x537   : >> { %v9003_v24 = vpop.permute.xlu1 %4051  ;;  %v9005_v42 = vpop.permute.xlu0 %4071 }
 0x539   : >> { %4437 = vrot.lane.b32.xlu1 %v4428_v8, %s5386_s10  ;;  %4439 = vrot.lane.b32.xlu0 %v4429_v5, %s5386_s10  ;;  %v4481_v8 = vmul.f32 %v4478_v33, %v8537_v39 }
 0x53b   : >> { %v9011_v7 = vpop.permute.xlu1 %4073  ;;  %v9013_v36 = vpop.permute.xlu0 %4075  ;;  %v4504_v5 = vstv %s5210_s25 }
 0x53d   : >> { %4441 = vrot.lane.b32.xlu1 %v4430_v47, %s5386_s10  ;;  %4461 = vrot.lane.b32.xlu0 %v4453_v52, %s5386_s10  ;;  %v4482_v52 = vmul.f32 %v4478_v33, %v8549_v25 }
 0x53f   : >> { %v9019_v12 = vpop.permute.xlu1 %4077  ;;  %v9021_v35 = vpop.permute.xlu0 %4097 }
 0x541   : >> { %4463 = vrot.lane.b32.xlu1 %v4454_v38, %s5386_s10  ;;  %4465 = vrot.lane.b32.xlu0 %v4455_v53, %s5386_s10  ;;  %v4505_v38 = vmul.f32 %v4504_v5, %v8527_v9 }
 0x543   : >> { %v9027_v27 = vpop.permute.xlu1 %4099  ;;  %v9029_v57 = vpop.permute.xlu0 %4101 }
 0x545   : >> { %4467 = vrot.lane.b32.xlu1 %v4456_v11, %s5386_s10  ;;  %4487 = vrot.lane.b32.xlu0 %v4479_v1, %s5386_s10  ;;  %v4506_v1 = vmul.f32 %v4504_v5, %v8539_v48 }
 0x547   : >> { %v9035_v23 = vpop.permute.xlu1 %4103  ;;  %v9037_v40 = vpop.permute.xlu0 %4123 }
 0x549   : >> { %4489 = vrot.lane.b32.xlu1 %v4480_v41, %s5386_s10  ;;  %4491 = vrot.lane.b32.xlu0 %v4481_v8, %s5386_s10  ;;  %v4507_v41 = vmul.f32 %v4504_v5, %v8537_v39  ;;  %v4530_v8 = vstv %s5211_s18 }
 0x54b   : >> { %v9043_v28 = vpop.permute.xlu1 %4125  ;;  %v9045_v47 = vpop.permute.xlu0 %4127 }
 0x54d   : >> { %4493 = vrot.lane.b32.xlu1 %v4482_v52, %s5386_s10  ;;  %4513 = vrot.lane.b32.xlu0 %v4505_v38, %s5386_s10  ;;  %v4508_v52 = vmul.f32 %v4504_v5, %v8549_v25  ;;  %v4531_v38 = vmul.f32 %v4530_v8, %v8527_v9 }
 0x54f   : >> { %v9051_v53 = vpop.permute.xlu1 %4129  ;;  %v9053_v11 = vpop.permute.xlu0 %4149 }
 0x551   : >> { %4515 = vrot.lane.b32.xlu1 %v4506_v1, %s5386_s10  ;;  %4517 = vrot.lane.b32.xlu0 %v4507_v41, %s5386_s10  ;;  %v4532_v1 = vmul.f32 %v4530_v8, %v8539_v48  ;;  %v4533_v41 = vmul.f32 %v4530_v8, %v8537_v39 }
 0x553   : >> { %v9059_v33 = vpop.permute.xlu1 %4151  ;;  %v9061_v21 = vpop.permute.xlu0 %4153 }
 0x555   : >> { %4519 = vrot.lane.b32.xlu1 %v4508_v52, %s5386_s10  ;;  %4539 = vrot.lane.b32.xlu0 %v4531_v38, %s5386_s10  ;;  %v4534_v52 = vmul.f32 %v4530_v8, %v8549_v25  ;;  %v9080_v38 = vld [vmem:[#allocation2 + $0x4] sm:$0xff] }
 0x556   : >> { %v4557_v20 = vmul.f32 %v9080_v38, %v4556_v18 }
 0x557   : >> { %v9067_v61 = vpop.permute.xlu1 %4155  ;;  %v9069_v63 = vpop.permute.xlu0 %4175 }
 0x558   : >> { %10128 = vst [vmem:[#allocation13_spill] sm:$0xff] %v9069_v63 }
 0x559   : >> { %4541 = vrot.lane.b32.xlu1 %v4532_v1, %s5386_s10  ;;  %4543 = vrot.lane.b32.xlu0 %v4533_v41, %s5386_s10  ;;  %v4558_v1 = vmul.f32 %v4556_v18, %v8539_v48  ;;  %v4559_v41 = vmul.f32 %v4556_v18, %v8537_v39  ;;  %v4031_v39 = vadd.f32 %v8970_v30, %v8669_v13 }
 0x55a   : >> { %v4032_v13 = vadd.f32 %v8979_v62, %v8690_v6  ;;  %v4033_v30 = vadd.f32 %v8981_v19, %v8692_v0  ;;  %v4034_v6 = vadd.f32 %v8987_v46, %v8709_v3  ;;  %v4057_v0 = vadd.f32 %v8989_v44, %v8711_v29 }
 0x55b   : >> { %v9075_v5 = vpop.permute.xlu1 %4177  ;;  %v9077_v9 = vpop.permute.xlu0 %4179  ;;  %v4058_v3 = vadd.f32 %v8995_v54, %v8730_v10  ;;  %v4059_v29 = vadd.f32 %v8997_v31, %v8732_v15  ;;  %v4060_v10 = vadd.f32 %v9003_v24, %v8751_v49  ;;  %v4083_v15 = vadd.f32 %v9005_v42, %v8753_v32 }
 0x55c   : >> { %10129 = vst [vmem:[#allocation75_spill] sm:$0xff] %v9075_v5  ;;  %10130 = vst [vmem:[#allocation22_spill] sm:$0xff] %v9077_v9  ;;  %v4582_v5 = vstv %s5213_s20  ;;  %v4084_v49 = vadd.f32 %v9011_v7, %v8774_v26  ;;  %v4085_v32 = vadd.f32 %v9013_v36, %v8776_v37  ;;  %v4086_v26 = vadd.f32 %v9019_v12, %v8793_v55 }
 0x55d   : >> { %4545 = vrot.lane.b32.xlu1 %v4534_v52, %s5386_s10  ;;  %4565 = vrot.lane.b32.xlu0 %v4557_v20, %s5386_s10  ;;  %v4560_v52 = vmul.f32 %v4556_v18, %v8549_v25  ;;  %v4583_v20 = vmul.f32 %v9080_v38, %v4582_v5  ;;  %v4109_v37 = vadd.f32 %v9021_v35, %v8795_v17 }
 0x55e   : >> { %v4110_v55 = vadd.f32 %v9027_v27, %v8816_v22  ;;  %v4111_v17 = vadd.f32 %v9029_v57, %v8818_v16  ;;  %v4112_v22 = vadd.f32 %v9035_v23, %v8835_v60  ;;  %v4135_v16 = vadd.f32 %v9037_v40, %v8837_v56 }
 0x55f   : >> { %v9085_v63 = vpop.permute.xlu1 %4181  ;;  %v9087_v45 = vpop.permute.xlu0 %4201  ;;  %v4136_v60 = vadd.f32 %v9043_v28, %v8856_v51  ;;  %v4137_v56 = vadd.f32 %v9045_v47, %v8858_v14  ;;  %v4138_v51 = vadd.f32 %v9051_v53, %v8877_v58  ;;  %v4161_v14 = vadd.f32 %v9053_v11, %v8879_v34 }
 0x560   : >> { %10131 = vst [vmem:[#allocation67_spill] sm:$0xff] %v9085_v63  ;;  %10132 = vst [vmem:[#allocation53_spill] sm:$0xff] %v9087_v45  ;;  %v9107_v45 = vld [vmem:[#allocation2 + $0x14] sm:$0xff]  ;;  %v4162_v58 = vadd.f32 %v9059_v33, %v8898_v50  ;;  %v4163_v34 = vadd.f32 %v9061_v21, %v8900_v4  ;;  %v4164_v50 = vadd.f32 %v9067_v61, %v8919_v59 }
 0x561   : >> { %4567 = vrot.lane.b32.xlu1 %v4558_v1, %s5386_s10  ;;  %4569 = vrot.lane.b32.xlu0 %v4559_v41, %s5386_s10  ;;  %v9104_v41 = vld [vmem:[#allocation2 + $0xc] sm:$0xff]  ;;  %v4585_v25 = vmul.f32 %v9107_v45, %v4582_v5 }
 0x562   : >> { %v10135_v33 = vld [vmem:[#allocation87_spill] sm:$0xff] }
 0x563   : >> { %v9093_v8 = vpop.permute.xlu1 %4203  ;;  %v4206_v9 = vpop.permute.xlu0 %4205  ;;  %v10137_v59 = vld [vmem:[#allocation23_spill] sm:$0xff] }
 0x564   : >> { %10133 = vst [vmem:[#allocation56_spill] sm:$0xff] %v9093_v8  ;;  %v9098_v63 = vadd.f32 %v4206_v9, %v8968_v2  ;;  %v4584_v8 = vmul.f32 %v9104_v41, %v4582_v5  ;;  %v4608_v9 = vstv %s5214_s22  ;;  %v10138_v61 = vld [vmem:[#allocation75_spill] sm:$0xff] }
 0x565   : >> { %4571 = vrot.lane.b32.xlu1 %v4560_v52, %s5386_s10  ;;  %4591 = vrot.lane.b32.xlu0 %v4583_v20, %s5386_s10 }
 0x566   : >> { %10134 = vst [vmem:[#allocation44_spill] sm:$0xff] %v9098_v63  ;;  %v9121_v63 = vld [vmem:[#allocation2 + $0x1c] sm:$0xf] }
 0x567   : >> { %v4208_v48 = vpop.permute.xlu1 %4207  ;;  %v4228_v1 = vpop.permute.xlu0 %4227 }
 0x568   : >> { %v9111_v18 = vadd.f32 %v4208_v48, %v8977_v43  ;;  %v9113_v2 = vadd.f32 %v4228_v1, %v4031_v39  ;;  %v4586_v43 = vmul.f32 %v9121_v63, %v4582_v5  ;;  %v4609_v39 = vmul.f32 %v9080_v38, %v4608_v9 }
 0x569   : >> { %4593 = vrot.lane.b32.xlu1 %v4584_v8, %s5386_s10  ;;  %4595 = vrot.lane.b32.xlu0 %v4585_v25, %s5386_s10  ;;  %v4610_v5 = vmul.f32 %v9104_v41, %v4608_v9  ;;  %v4611_v8 = vmul.f32 %v9107_v45, %v4608_v9 }
 0x56b   : >> { %v4230_v52 = vpop.permute.xlu1 %4229  ;;  %v4232_v20 = vpop.permute.xlu0 %4231 }
 0x56c   : >> { %v9125_v48 = vadd.f32 %v4230_v52, %v4032_v13  ;;  %v9127_v1 = vadd.f32 %v4232_v20, %v4033_v30  ;;  %v4634_v30 = vstv %s5215_s23  ;;  %v4612_v52 = vmul.f32 %v9121_v63, %v4608_v9 }
 0x56d   : >> { %4597 = vrot.lane.b32.xlu1 %v4586_v43, %s5386_s10  ;;  %4617 = vrot.lane.b32.xlu0 %v4609_v39, %s5386_s10  ;;  %v4635_v20 = vmul.f32 %v9080_v38, %v4634_v30  ;;  %v4636_v9 = vmul.f32 %v9104_v41, %v4634_v30 }
 0x56f   : >> { %v4234_v62 = vpop.permute.xlu1 %4233  ;;  %v4254_v19 = vpop.permute.xlu0 %4253 }
 0x570   : >> { %v9137_v25 = vadd.f32 %v4234_v62, %v4034_v6  ;;  %v9139_v13 = vadd.f32 %v4254_v19, %v4057_v0  ;;  %v4637_v6 = vmul.f32 %v9107_v45, %v4634_v30  ;;  %v4660_v19 = vstv %s5216_s24 }
 0x571   : >> { %4619 = vrot.lane.b32.xlu1 %v4610_v5, %s5386_s10  ;;  %4621 = vrot.lane.b32.xlu0 %v4611_v8, %s5386_s10  ;;  %v4638_v5 = vmul.f32 %v9121_v63, %v4634_v30  ;;  %v4661_v8 = vmul.f32 %v9080_v38, %v4660_v19  ;;  %v4662_v30 = vmul.f32 %v9104_v41, %v4660_v19 }
 0x573   : >> { %v4256_v46 = vpop.permute.xlu1 %4255  ;;  %v4258_v44 = vpop.permute.xlu0 %4257 }
 0x574   : >> { %v9149_v43 = vadd.f32 %v4256_v46, %v4058_v3  ;;  %v9151_v39 = vadd.f32 %v4258_v44, %v4059_v29  ;;  %v4663_v46 = vmul.f32 %v9107_v45, %v4660_v19 }
 0x575   : >> { %4623 = vrot.lane.b32.xlu1 %v4612_v52, %s5386_s10  ;;  %4643 = vrot.lane.b32.xlu0 %v4635_v20, %s5387_s21  ;;  %s5217_s10 = sld [smem:[#allocation3 + $0xc2]] }
 0x577   : >> { %v4260_v54 = vpop.permute.xlu1 %4259  ;;  %v4280_v31 = vpop.permute.xlu0 %4279 }
 0x578   : >> { %v9161_v0 = vadd.f32 %v4260_v54, %v4060_v10  ;;  %v9163_v62 = vadd.f32 %v4280_v31, %v4083_v15  ;;  %v4664_v10 = vmul.f32 %v9121_v63, %v4660_v19 }
 0x579   : >> { %4645 = vrot.lane.b32.xlu1 %v4636_v9, %s5387_s21  ;;  %4647 = vrot.lane.b32.xlu0 %v4637_v6, %s5387_s21 }
 0x57b   : >> { %v4282_v24 = vpop.permute.xlu1 %4281  ;;  %v4284_v42 = vpop.permute.xlu0 %4283  ;;  %v4686_v20 = vstv %s5217_s10 }
 0x57c   : >> { %v9173_v3 = vadd.f32 %v4282_v24, %v4084_v49  ;;  %v9175_v29 = vadd.f32 %v4284_v42, %v4085_v32  ;;  %v4687_v15 = vmul.f32 %v9080_v38, %v4686_v20  ;;  %v4688_v9 = vmul.f32 %v9104_v41, %v4686_v20 }
 0x57d   : >> { %4649 = vrot.lane.b32.xlu1 %v4638_v5, %s5387_s21  ;;  %4669 = vrot.lane.b32.xlu0 %v4661_v8, %s5387_s21  ;;  %v4689_v6 = vmul.f32 %v9107_v45, %v4686_v20  ;;  %v4712_v32 = vstv %s5218_s26  ;;  %v4690_v24 = vmul.f32 %v9121_v63, %v4686_v20 }
 0x57e   : >> { %v4713_v42 = vmul.f32 %v9080_v38, %v4712_v32 }
 0x57f   : >> { %v4286_v7 = vpop.permute.xlu1 %4285  ;;  %v4306_v36 = vpop.permute.xlu0 %4305 }
 0x580   : >> { %v9185_v44 = vadd.f32 %v4286_v7, %v4086_v26  ;;  %v9187_v52 = vadd.f32 %v4306_v36, %v4109_v37  ;;  %v4714_v26 = vmul.f32 %v9104_v41, %v4712_v32  ;;  %v4715_v37 = vmul.f32 %v9107_v45, %v4712_v32 }
 0x581   : >> { %4671 = vrot.lane.b32.xlu1 %v4662_v30, %s5387_s21  ;;  %4673 = vrot.lane.b32.xlu0 %v4663_v46, %s5387_s21  ;;  %v4738_v30 = vstv %s5219_s27  ;;  %v4716_v46 = vmul.f32 %v9121_v63, %v4712_v32 }
 0x582   : >> { %v4739_v20 = vmul.f32 %v9080_v38, %v4738_v30 }
 0x583   : >> { %v4308_v12 = vpop.permute.xlu1 %4307  ;;  %v4310_v35 = vpop.permute.xlu0 %4309 }
 0x584   : >> { %v9197_v54 = vadd.f32 %v4308_v12, %v4110_v55  ;;  %v9199_v31 = vadd.f32 %v4310_v35, %v4111_v17  ;;  %v10136_v12 = vld [vmem:[#allocation13_spill] sm:$0xff] }
 0x585   : >> { %4675 = vrot.lane.b32.xlu1 %v4664_v10, %s5387_s21  ;;  %4695 = vrot.lane.b32.xlu0 %v4687_v15, %s5387_s21  ;;  %v4187_v4 = vadd.f32 %v10136_v12, %v10135_v33  ;;  %v4740_v10 = vmul.f32 %v9104_v41, %v4738_v30  ;;  %v4741_v15 = vmul.f32 %v9107_v45, %v4738_v30  ;;  %v10147_v33 = vld [vmem:[#allocation56_spill] sm:$0xff] }
 0x587   : >> { %v4312_v27 = vpop.permute.xlu1 %4311  ;;  %v4332_v57 = vpop.permute.xlu0 %4331 }
 0x588   : >> { %v9209_v19 = vadd.f32 %v4312_v27, %v4112_v22  ;;  %v9211_v49 = vadd.f32 %v4332_v57, %v4135_v16  ;;  %v4764_v27 = vstv %s5220_s16  ;;  %v4188_v57 = vadd.f32 %v10138_v61, %v10137_v59  ;;  %v10149_v59 = vld [vmem:[#allocation44_spill] sm:$0xff] }
 0x589   : >> { %4697 = vrot.lane.b32.xlu1 %v4688_v9, %s5387_s21  ;;  %4699 = vrot.lane.b32.xlu0 %v4689_v6, %s5387_s21  ;;  %v10139_v9 = vld [vmem:[#allocation61_spill] sm:$0xff]  ;;  %v10140_v6 = vld [vmem:[#allocation22_spill] sm:$0xff] }
 0x58a   : >> { %v4189_v32 = vadd.f32 %v10140_v6, %v10139_v9 }
 0x58b   : >> { %v4334_v23 = vpop.permute.xlu1 %4333  ;;  %v4336_v40 = vpop.permute.xlu0 %4335 }
 0x58c   : >> { %v9221_v5 = vadd.f32 %v4334_v23, %v4136_v60  ;;  %v9223_v8 = vadd.f32 %v4336_v40, %v4137_v56  ;;  %v4742_v23 = vmul.f32 %v9121_v63, %v4738_v30  ;;  %v4765_v40 = vmul.f32 %v9080_v38, %v4764_v27 }
 0x58d   : >> { %4701 = vrot.lane.b32.xlu1 %v4690_v24, %s5387_s21  ;;  %4721 = vrot.lane.b32.xlu0 %v4713_v42, %s5387_s21  ;;  %v4766_v30 = vmul.f32 %v9104_v41, %v4764_v27 }
 0x58f   : >> { %v4338_v28 = vpop.permute.xlu1 %4337  ;;  %v4358_v47 = vpop.permute.xlu0 %4357 }
 0x590   : >> { %v9233_v7 = vadd.f32 %v4338_v28, %v4138_v51  ;;  %v9235_v36 = vadd.f32 %v4358_v47, %v4161_v14  ;;  %v10141_v51 = vld [vmem:[#allocation49_spill] sm:$0xff]  ;;  %v10142_v14 = vld [vmem:[#allocation67_spill] sm:$0xff] }
 0x591   : >> { %4723 = vrot.lane.b32.xlu1 %v4714_v26, %s5387_s21  ;;  %4725 = vrot.lane.b32.xlu0 %v4715_v37, %s5387_s21  ;;  %v4190_v28 = vadd.f32 %v10142_v14, %v10141_v51  ;;  %v10143_v47 = vld [vmem:[#allocation51_spill] sm:$0xff]  ;;  %v10144_v26 = vld [vmem:[#allocation53_spill] sm:$0xff] }
 0x592   : >> { %v4213_v37 = vadd.f32 %v10144_v26, %v10143_v47 }
 0x593   : >> { %v4360_v53 = vpop.permute.xlu1 %4359  ;;  %v4362_v11 = vpop.permute.xlu0 %4361 }
 0x594   : >> { %v9245_v55 = vadd.f32 %v4360_v53, %v4162_v58  ;;  %v9247_v17 = vadd.f32 %v4362_v11, %v4163_v34  ;;  %v4767_v53 = vmul.f32 %v9107_v45, %v4764_v27 }
 0x595   : >> { %4727 = vrot.lane.b32.xlu1 %v4716_v46, %s5387_s21  ;;  %4747 = vrot.lane.b32.xlu0 %v4739_v20, %s5387_s21  ;;  %v4790_v20 = vstv %s5221_s28 }
 0x596   : >> { %v4792_v6 = vmul.f32 %v9104_v41, %v4790_v20 }
 0x597   : >> { %v4364_v21 = vpop.permute.xlu1 %4363  ;;  %v4384_v35 = vpop.permute.xlu0 %4383 }
 0x598   : >> { %v9257_v22 = vadd.f32 %v4364_v21, %v4164_v50  ;;  %v9259_v16 = vadd.f32 %v4384_v35, %v4187_v4  ;;  %v10146_v50 = vld [vmem:[#allocation79_spill] sm:$0xff]  ;;  %v4768_v35 = vmul.f32 %v9121_v63, %v4764_v27  ;;  %v4816_v27 = vstv %s5222_s29 }
 0x599   : >> { %4749 = vrot.lane.b32.xlu1 %v4740_v10, %s5387_s21  ;;  %4751 = vrot.lane.b32.xlu0 %v4741_v15, %s5387_s21  ;;  %v4214_v12 = vadd.f32 %v10147_v33, %v10146_v50  ;;  %v4791_v10 = vmul.f32 %v9080_v38, %v4790_v20  ;;  %v4817_v51 = vmul.f32 %v9080_v38, %v4816_v27 }
 0x59a   : >> { %v4819_v47 = vmul.f32 %v9107_v45, %v4816_v27 }
 0x59b   : >> { %v4386_v60 = vpop.permute.xlu1 %4385  ;;  %v4388_v56 = vpop.permute.xlu0 %4387 }
 0x59c   : >> { %v9269_v24 = vadd.f32 %v4386_v60, %v4188_v57  ;;  %v9271_v42 = vadd.f32 %v4388_v56, %v4189_v32  ;;  %v4793_v32 = vmul.f32 %v9107_v45, %v4790_v20 }
 0x59d   : >> { %4753 = vrot.lane.b32.xlu1 %v4742_v23, %s5387_s21  ;;  %4773 = vrot.lane.b32.xlu0 %v4765_v40, %s5387_s21  ;;  %v4794_v40 = vmul.f32 %v9121_v63, %v4790_v20 }
 0x59f   : >> { %v4390_v58 = vpop.permute.xlu1 %4389  ;;  %v4410_v34 = vpop.permute.xlu0 %4409 }
 0x5a0   : >> { %v9281_v11 = vadd.f32 %v4390_v58, %v4190_v28  ;;  %v9283_v46 = vadd.f32 %v4410_v34, %v4213_v37  ;;  %v4820_v58 = vmul.f32 %v9121_v63, %v4816_v27 }
 0x5a1   : >> { %4775 = vrot.lane.b32.xlu1 %v4766_v30, %s5387_s21  ;;  %4777 = vrot.lane.b32.xlu0 %v4767_v53, %s5387_s21 }
 0x5a2   : >> { %10145 = vst [vmem:[#allocation63_spill] sm:$0xff] %v9283_v46 }
 0x5a3   : >> { %v4412_v4 = vpop.permute.xlu1 %4411  ;;  %v4414_v21 = vpop.permute.xlu0 %4413 }
 0x5a4   : >> { %v9291_v15 = vadd.f32 %v4412_v4, %v4214_v12  ;;  %v9294_v61 = vadd.f32 %v4414_v21, %v10149_v59 }
 0x5a5   : >> { %4779 = vrot.lane.b32.xlu1 %v4768_v35, %s5387_s21  ;;  %4799 = vrot.lane.b32.xlu0 %v4791_v10, %s5387_s21 }
 0x5a6   : >> { %10148 = vst [vmem:[#allocation83_spill] sm:$0xff] %v9291_v15  ;;  %10150 = vst [vmem:[#allocation76_spill] sm:$0xff] %v9294_v61 }
 0x5a7   : >> { %v4416_v57 = vpop.permute.xlu1 %4415  ;;  %v4436_v9 = vpop.permute.xlu0 %4435 }
 0x5a8   : >> { %v9301_v60 = vadd.f32 %v4416_v57, %v9111_v18  ;;  %v4818_v18 = vmul.f32 %v9104_v41, %v4816_v27 }
 0x5a9   : >> { %4801 = vrot.lane.b32.xlu1 %v4792_v6, %s5387_s21  ;;  %4803 = vrot.lane.b32.xlu0 %v4793_v32, %s5387_s21 }
 0x5aa   : >> { %10151 = vst [vmem:[#allocation59_spill] sm:$0xff] %v9301_v60 }
 0x5ab   : >> { %v4438_v56 = vpop.permute.xlu1 %4437  ;;  %v4440_v23 = vpop.permute.xlu0 %4439 }
 0x5ac   : >> { %v4448_v46 = vadd.f32 %v4438_v56, %v9125_v48 }
 0x5ad   : >> { %4805 = vrot.lane.b32.xlu1 %v4794_v40, %s5387_s21  ;;  %4825 = vrot.lane.b32.xlu0 %v4817_v51, %s5387_s21 }
 0x5af   : >> { %v4442_v14 = vpop.permute.xlu1 %4441  ;;  %v4462_v28 = vpop.permute.xlu0 %4461 }
 0x5b1   : >> { %4827 = vrot.lane.b32.xlu1 %v4818_v18, %s5387_s21  ;;  %4829 = vrot.lane.b32.xlu0 %v4819_v47, %s5387_s21 }
 0x5b3   : >> { %v4464_v26 = vpop.permute.xlu1 %4463  ;;  %v4466_v37 = vpop.permute.xlu0 %4465 }
 0x5b4   : >> { %v4474_v56 = vadd.f32 %v4464_v26, %v9149_v43 }
 0x5b5   : >> { %4831 = vrot.lane.b32.xlu1 %v4820_v58, %s5387_s21  ;;  %s5223_s21 = sshll.u32 %s5378_s9, 8  ;;  %v4447_v58 = vadd.f32 %v4436_v9, %v9113_v2  ;;  %s216_s9 = sadd.s32 1, %s5378_s9  }
 0x5b6   : >> { %s9360_s30 = scalar_lea.vmem %s5466_s8, %s5223_s21  ;;  %p213_p3 = scmp.ge.s32.totalorder %s216_s9, 2  }
 0x5b7   : >> { %v4468_v38 = vpop.permute.xlu1 %4467  ;;  %v4488_v34 = vpop.permute.xlu0 %4487 }
 0x5bb   : >> { %v4490_v30 = vpop.permute.xlu1 %4489  ;;  %v4492_v53 = vpop.permute.xlu0 %4491 }
 0x5bf   : >> { %v9315_v20 = vpop.permute.xlu1 %4493  ;;  %v9317_v50 = vpop.permute.xlu0 %4513 }
 0x5c3   : >> { %v9319_v41 = vpop.permute.xlu1 %4515  ;;  %v9321_v45 = vpop.permute.xlu0 %4517 }
 0x5c7   : >> { %v9323_v33 = vpop.permute.xlu1 %4519  ;;  %v9325_v12 = vpop.permute.xlu0 %4539 }
 0x5cb   : >> { %v9327_v63 = vpop.permute.xlu1 %4541  ;;  %v9329_v4 = vpop.permute.xlu0 %4543 }
 0x5cf   : >> { %v9331_v21 = vpop.permute.xlu1 %4545  ;;  %v9333_v35 = vpop.permute.xlu0 %4565 }
 0x5d3   : >> { %v9335_v10 = vpop.permute.xlu1 %4567  ;;  %v9337_v59 = vpop.permute.xlu0 %4569 }
 0x5d7   : >> { %v9339_v57 = vpop.permute.xlu1 %4571  ;;  %v9341_v6 = vpop.permute.xlu0 %4591 }
 0x5db   : >> { %v9343_v32 = vpop.permute.xlu1 %4593  ;;  %v9345_v27 = vpop.permute.xlu0 %4595 }
 0x5df   : >> { %v9347_v40 = vpop.permute.xlu1 %4597  ;;  %v9349_v51 = vpop.permute.xlu0 %4617 }
 0x5e0   : >> { %10152 = vst [vmem:[#allocation72_spill] sm:$0xff] %v9347_v40  ;;  %10153 = vst [vmem:[#allocation32_spill] sm:$0xff] %v9349_v51  ;;  %v4449_v51 = vadd.f32 %v4440_v23, %v9127_v1  ;;  %v4473_v40 = vadd.f32 %v4462_v28, %v9139_v13  ;;  %v4499_v28 = vadd.f32 %v4488_v34, %v9163_v62 }
 0x5e3   : >> { %v9351_v18 = vpop.permute.xlu1 %4619  ;;  %v9353_v47 = vpop.permute.xlu0 %4621 }
 0x5e4   : >> { %10154 = vst [vmem:[#allocation43_spill] sm:$0xff] %v9351_v18  ;;  %10155 = vst [vmem:[#allocation84_spill] sm:$0xff] %v9353_v47  ;;  %v4450_v18 = vadd.f32 %v4442_v14, %v9137_v25  ;;  %v4476_v14 = vadd.f32 %v4468_v38, %v9161_v0 }
 0x5e7   : >> { %v9357_v60 = vpop.permute.xlu1 %4623  ;;  %v4644_v61 = vpop.permute.xlu0 %4643 }
 0x5e8   : >> { %10156 = vst [vmem:[#allocation9_spill] sm:$0xff] %v9357_v60  ;;  %v4655_v15 = vadd.f32 %v4644_v61, %v4447_v58  ;;  %v4526_v58 = vadd.f32 %v9319_v41, %v9197_v54 }
 0x5ea   : >> { %4844 = vst.msk [vmem:[%s9360_s30] sm:$0xff] %vm4843_vm3, %v4655_v15 }
 0x5eb   : >> { %v4646_v47 = vpop.permute.xlu1 %4645  ;;  %v4648_v2 = vpop.permute.xlu0 %4647 }
 0x5ec   : >> { %v4656_v9 = vadd.f32 %v4646_v47, %v4448_v46  ;;  %v4657_v60 = vadd.f32 %v4648_v2, %v4449_v51  ;;  %v4475_v46 = vadd.f32 %v4466_v37, %v9151_v39  ;;  %v4501_v51 = vadd.f32 %v4492_v53, %v9175_v29 }
 0x5ed   : >> { %v4525_v47 = vadd.f32 %v9317_v50, %v9187_v52  ;;  %v4527_v2 = vadd.f32 %v9321_v45, %v9199_v31 }
 0x5ee   : >> { %4845 = vst.msk [vmem:[%s9360_s30 + $0x8] sm:$0xff] %vm4843_vm3, %v4656_v9  ;;  %4846 = vst.msk [vmem:[%s9360_s30 + $0x10] sm:$0xff] %vm4843_vm3, %v4657_v60  ;;  %v4528_v9 = vadd.f32 %v9323_v33, %v9209_v19 }
 0x5ef   : >> { %v4650_v48 = vpop.permute.xlu1 %4649  ;;  %v4670_v1 = vpop.permute.xlu0 %4669 }
 0x5f0   : >> { %v4658_v15 = vadd.f32 %v4650_v48, %v4450_v18  ;;  %v4681_v61 = vadd.f32 %v4670_v1, %v4473_v40  ;;  %v4500_v40 = vadd.f32 %v4490_v30, %v9173_v3  ;;  %v4502_v18 = vadd.f32 %v9315_v20, %v9185_v44 }
 0x5f1   : >> { %v4551_v48 = vadd.f32 %v9325_v12, %v9211_v49  ;;  %v4552_v1 = vadd.f32 %v9327_v63, %v9221_v5 }
 0x5f2   : >> { %4848 = vst.msk [vmem:[%s9360_s30 + $0x18] sm:$0xf] %vm4847_vm4, %v4658_v15  ;;  %v4553_v15 = vadd.f32 %v9329_v4, %v9223_v8 }
 0x5f3   : >> { %5225 = vst.msk [vmem:[%s9360_s30 + $0x20] sm:$0xff] %vm4843_vm3, %v4681_v61  ;;  %v4672_v25 = vpop.permute.xlu1 %4671  ;;  %v4674_v13 = vpop.permute.xlu0 %4673  ;;  %v4554_v61 = vadd.f32 %v9331_v21, %v9233_v7 }
 0x5f4   : >> { %v4682_v60 = vadd.f32 %v4672_v25, %v4474_v56  ;;  %v4683_v23 = vadd.f32 %v4674_v13, %v4475_v46  ;;  %v4577_v56 = vadd.f32 %v9333_v35, %v9235_v36  ;;  %v4578_v46 = vadd.f32 %v9335_v10, %v9245_v55 }
 0x5f5   : >> { %v4579_v25 = vadd.f32 %v9337_v59, %v9247_v17  ;;  %v4580_v13 = vadd.f32 %v9339_v57, %v9257_v22 }
 0x5f6   : >> { %5226 = vst.msk [vmem:[%s9360_s30 + $0x28] sm:$0xff] %vm4843_vm3, %v4682_v60  ;;  %5227 = vst.msk [vmem:[%s9360_s30 + $0x30] sm:$0xff] %vm4843_vm3, %v4683_v23  ;;  %v4603_v60 = vadd.f32 %v9341_v6, %v9259_v16  ;;  %v4604_v23 = vadd.f32 %v9343_v32, %v9269_v24 }
 0x5f7   : >> { %v4676_v43 = vpop.permute.xlu1 %4675  ;;  %v4696_v39 = vpop.permute.xlu0 %4695 }
 0x5f8   : >> { %v4684_v26 = vadd.f32 %v4676_v43, %v4476_v14  ;;  %v4707_v37 = vadd.f32 %v4696_v39, %v4499_v28  ;;  %v4605_v14 = vadd.f32 %v9345_v27, %v9271_v42  ;;  %v10157_v28 = vld [vmem:[#allocation72_spill] sm:$0xff]  ;;  %v10158_v39 = vld [vmem:[#allocation63_spill] sm:$0xff] }
 0x5f9   : >> { %v4606_v43 = vadd.f32 %v10157_v28, %v9281_v11 }
 0x5fa   : >> { %5228 = vst.msk [vmem:[%s9360_s30 + $0x38] sm:$0xf] %vm4847_vm4, %v4684_v26  ;;  %v10159_v26 = vld [vmem:[#allocation32_spill] sm:$0xff] }
 0x5fb   : >> { %5230 = vst.msk [vmem:[%s9360_s30 + $0x40] sm:$0xff] %vm4843_vm3, %v4707_v37  ;;  %v4698_v0 = vpop.permute.xlu1 %4697  ;;  %v4700_v62 = vpop.permute.xlu0 %4699  ;;  %v4629_v37 = vadd.f32 %v10159_v26, %v10158_v39 }
 0x5fc   : >> { %v4708_v38 = vadd.f32 %v4698_v0, %v4500_v40  ;;  %v4709_v34 = vadd.f32 %v4700_v62, %v4501_v51  ;;  %v10160_v40 = vld [vmem:[#allocation83_spill] sm:$0xff]  ;;  %v10162_v62 = vld [vmem:[#allocation76_spill] sm:$0xff] }
 0x5fd   : >> { %v10161_v51 = vld [vmem:[#allocation43_spill] sm:$0xff] }
 0x5fe   : >> { %5231 = vst.msk [vmem:[%s9360_s30 + $0x48] sm:$0xff] %vm4843_vm3, %v4708_v38  ;;  %5232 = vst.msk [vmem:[%s9360_s30 + $0x50] sm:$0xff] %vm4843_vm3, %v4709_v34  ;;  %v4630_v0 = vadd.f32 %v10161_v51, %v10160_v40  ;;  %v10163_v38 = vld [vmem:[#allocation84_spill] sm:$0xff] }
 0x5ff   : >> { %v4702_v3 = vpop.permute.xlu1 %4701  ;;  %v4722_v29 = vpop.permute.xlu0 %4721  ;;  %v4631_v11 = vadd.f32 %v10163_v38, %v10162_v62 }
 0x600   : >> { %v4710_v30 = vadd.f32 %v4702_v3, %v4502_v18  ;;  %v4733_v53 = vadd.f32 %v4722_v29, %v4525_v47  ;;  %v10164_v29 = vld [vmem:[#allocation59_spill] sm:$0xff] }
 0x602   : >> { %5233 = vst.msk [vmem:[%s9360_s30 + $0x58] sm:$0xf] %vm4847_vm4, %v4710_v30  ;;  %v10165_v30 = vld [vmem:[#allocation9_spill] sm:$0xff] }
 0x603   : >> { %5235 = vst.msk [vmem:[%s9360_s30 + $0x60] sm:$0xff] %vm4843_vm3, %v4733_v53  ;;  %v4724_v44 = vpop.permute.xlu1 %4723  ;;  %v4726_v52 = vpop.permute.xlu0 %4725  ;;  %v4632_v53 = vadd.f32 %v10165_v30, %v10164_v29 }
 0x604   : >> { %v4734_v20 = vadd.f32 %v4724_v44, %v4526_v58  ;;  %v4735_v50 = vadd.f32 %v4726_v52, %v4527_v2 }
 0x606   : >> { %5236 = vst.msk [vmem:[%s9360_s30 + $0x68] sm:$0xff] %vm4843_vm3, %v4734_v20  ;;  %5237 = vst.msk [vmem:[%s9360_s30 + $0x70] sm:$0xff] %vm4843_vm3, %v4735_v50 }
 0x607   : >> { %v4728_v54 = vpop.permute.xlu1 %4727  ;;  %v4748_v31 = vpop.permute.xlu0 %4747 }
 0x608   : >> { %v4736_v41 = vadd.f32 %v4728_v54, %v4528_v9  ;;  %v4759_v45 = vadd.f32 %v4748_v31, %v4551_v48 }
 0x60a   : >> { %5238 = vst.msk [vmem:[%s9360_s30 + $0x78] sm:$0xf] %vm4847_vm4, %v4736_v41 }
 0x60b   : >> { %5240 = vst.msk [vmem:[%s9360_s30 + $0x80] sm:$0xff] %vm4843_vm3, %v4759_v45  ;;  %v4750_v19 = vpop.permute.xlu1 %4749  ;;  %v4752_v49 = vpop.permute.xlu0 %4751 }
 0x60c   : >> { %v4760_v33 = vadd.f32 %v4750_v19, %v4552_v1  ;;  %v4761_v12 = vadd.f32 %v4752_v49, %v4553_v15 }
 0x60e   : >> { %5241 = vst.msk [vmem:[%s9360_s30 + $0x88] sm:$0xff] %vm4843_vm3, %v4760_v33  ;;  %5242 = vst.msk [vmem:[%s9360_s30 + $0x90] sm:$0xff] %vm4843_vm3, %v4761_v12 }
 0x60f   : >> { %v4754_v5 = vpop.permute.xlu1 %4753  ;;  %v4774_v8 = vpop.permute.xlu0 %4773 }
 0x610   : >> { %v4762_v63 = vadd.f32 %v4754_v5, %v4554_v61  ;;  %v4785_v4 = vadd.f32 %v4774_v8, %v4577_v56 }
 0x612   : >> { %5243 = vst.msk [vmem:[%s9360_s30 + $0x98] sm:$0xf] %vm4847_vm4, %v4762_v63 }
 0x613   : >> { %5245 = vst.msk [vmem:[%s9360_s30 + $0xa0] sm:$0xff] %vm4843_vm3, %v4785_v4  ;;  %v4776_v7 = vpop.permute.xlu1 %4775  ;;  %v4778_v36 = vpop.permute.xlu0 %4777 }
 0x614   : >> { %v4786_v21 = vadd.f32 %v4776_v7, %v4578_v46  ;;  %v4787_v35 = vadd.f32 %v4778_v36, %v4579_v25 }
 0x616   : >> { %5246 = vst.msk [vmem:[%s9360_s30 + $0xa8] sm:$0xff] %vm4843_vm3, %v4786_v21  ;;  %5247 = vst.msk [vmem:[%s9360_s30 + $0xb0] sm:$0xff] %vm4843_vm3, %v4787_v35 }
 0x617   : >> { %v4780_v55 = vpop.permute.xlu1 %4779  ;;  %v4800_v17 = vpop.permute.xlu0 %4799 }
 0x618   : >> { %v4788_v10 = vadd.f32 %v4780_v55, %v4580_v13  ;;  %v4811_v59 = vadd.f32 %v4800_v17, %v4603_v60 }
 0x61a   : >> { %5248 = vst.msk [vmem:[%s9360_s30 + $0xb8] sm:$0xf] %vm4847_vm4, %v4788_v10 }
 0x61b   : >> { %5250 = vst.msk [vmem:[%s9360_s30 + $0xc0] sm:$0xff] %vm4843_vm3, %v4811_v59  ;;  %v4802_v22 = vpop.permute.xlu1 %4801  ;;  %v4804_v16 = vpop.permute.xlu0 %4803 }
 0x61c   : >> { %v4812_v57 = vadd.f32 %v4802_v22, %v4604_v23  ;;  %v4813_v6 = vadd.f32 %v4804_v16, %v4605_v14 }
 0x61e   : >> { %5251 = vst.msk [vmem:[%s9360_s30 + $0xc8] sm:$0xff] %vm4843_vm3, %v4812_v57  ;;  %5252 = vst.msk [vmem:[%s9360_s30 + $0xd0] sm:$0xff] %vm4843_vm3, %v4813_v6 }
 0x61f   : >> { %v4806_v24 = vpop.permute.xlu1 %4805  ;;  %v4826_v42 = vpop.permute.xlu0 %4825 }
 0x620   : >> { %v4814_v32 = vadd.f32 %v4806_v24, %v4606_v43  ;;  %v4837_v27 = vadd.f32 %v4826_v42, %v4629_v37 }
 0x622   : >> { %5253 = vst.msk [vmem:[%s9360_s30 + $0xd8] sm:$0xf] %vm4847_vm4, %v4814_v32 }
 0x623   : >> { %5255 = vst.msk [vmem:[%s9360_s30 + $0xe0] sm:$0xff] %vm4843_vm3, %v4837_v27  ;;  %v4828_v34 = vpop.permute.xlu1 %4827  ;;  %v4830_v18 = vpop.permute.xlu0 %4829 }
 0x624   : >> { %v4838_v47 = vadd.f32 %v4828_v34, %v4630_v0  ;;  %v4839_v3 = vadd.f32 %v4830_v18, %v4631_v11  ;;  %215 = sbr.rel (!%p213_p3) target bundleno = 52 (0x34), region = 87 }
 0x626   : >> { %5256 = vst.msk [vmem:[%s9360_s30 + $0xe8] sm:$0xff] %vm4843_vm3, %v4838_v47  ;;  %5257 = vst.msk [vmem:[%s9360_s30 + $0xf0] sm:$0xff] %vm4843_vm3, %v4839_v3 }
 0x627   : >> { %v4832_v58 = vpop.permute.xlu1 %4831 }
 0x628   : >> { %v4840_v2 = vadd.f32 %v4832_v58, %v4632_v53 }
 0x62a   : >> { %5258 = vst.msk [vmem:[%s9360_s30 + $0xf8] sm:$0xf] %vm4847_vm4, %v4840_v2 }
 0x62b PF: > { %s15_s12 = sadd.s32 1, %s5374_s12  }
 0x62c   : > { %p12_p5 = scmp.ge.s32.totalorder %s15_s12, 4  }
 0x62e   :  { %14 = sbr.rel (!%p12_p5) target bundleno = 2 (0x2), region = 98 }
 0x635   :  { %4915 = vsyncpa [#allocation4], 1 }
 0x636   :  { %4917 = vsyncpa [#allocation4 + $0x1], 1 }
 0x637   :  { %4918 = vsyncpa [#allocation6], 1 }

</bundles_post_ra>
